<compile_context>
chip_gen: v7x
topology: tpu7x:2x2x1
jax: 0.10.0
libtpu: 0.0.40
codegen_flags: <defaults>
</compile_context>

<pallas_src>
import numpy as np
import jax
import jax.numpy as jnp
from jax.experimental import pallas as pl
from jax.experimental.pallas import tpu as pltpu

EPS = 1e-5
KK = 5                        # Conv3d kernel size
PAD = KK // 2                 # padding = 2
VMEM_SPEC = pl.BlockSpec(memory_space=pltpu.MemorySpace.VMEM)


def _round_up(x, m):
    return ((x + m - 1) // m) * m


def _tap_blocks(wc):
    """Lane-block layout of the im2col slab for one conv layer.

    Returns (kblk, blocks): kblk is the 128-aligned lane width of one K block and
    blocks is a list of (kh, [(kd, lane_offset), ...]) entries, one per K block.
    When two taps fit in 128 lanes (layer 0: W*E = 64), two kd taps that share the
    same kh are packed per block so every slab store is a full-128-lane write and
    both halves come from the same per-kh staging buffer."""
    if 2 * wc <= 128:
        kblk = 128
        blocks = []
        for kh in range(KK):
            for kd0 in range(0, KK, 2):
                taps = [(kd0, 0)]
                if kd0 + 1 < KK:
                    taps.append((kd0 + 1, wc))
                blocks.append((kh, taps))
    else:
        kblk = _round_up(wc, 128)
        blocks = [(kh, [(kd, 0)]) for kh in range(KK) for kd in range(KK)]
    return kblk, blocks


def _banded_conv_weight(w5, sl, layout):
    """Repack a (5,5,5,Ci,Co) conv weight into a banded block-Toeplitz matrix B (bf16)
    so that slab @ B == Conv3d(k=5, p=2) over lane-dense (rows, W*Ci) activation slabs:
    the kw axis is folded into the band, and the (kd, kh) taps follow the slab lane
    layout in `layout`.  Rows not covered by a tap (K-alignment pad) stay zero."""
    kblk, blocks = layout
    w5 = np.asarray(w5, np.float32)
    ci, co = int(w5.shape[3]), int(w5.shape[4])
    B = np.zeros((kblk * len(blocks), sl * co), np.float32)
    for b, (kh, taps) in enumerate(blocks):
        for kd, off in taps:
            for w in range(sl):
                for kw in range(KK):
                    w_in = w + kw - PAD
                    if 0 <= w_in < sl:
                        r0 = b * kblk + off + w_in * ci
                        B[r0:r0 + ci, w * co:(w + 1) * co] = w5[kd, kh, kw]
    return jnp.asarray(B, jnp.bfloat16)


# ---------------------------------------------------------------------------
# Fused kernel
# ---------------------------------------------------------------------------
def _make_fused_kernel(n, sl, emb_dim, hidden, num_layers, layout_in, layout_hid):
    rows = n * sl * sl                 # one activation row per (n, d, h)
    total = rows * sl                  # BN sample count: N*D*H*W
    inv_total = 1.0 / float(total)
    wc_in = sl * emb_dim               # lane width of the embedded input activation
    wc_hid = sl * hidden               # lane width of hidden activations
    slp = sl + 2 * PAD

    def kernel(*refs):
        ids_rep_ref, bpat_ref, embk_ref, cavg_ref = refs[:4]
        layer_refs = refs[4:4 + 4 * num_layers]
        woutk_ref = refs[4 + 4 * num_layers]
        boutb_ref = refs[5 + 4 * num_layers]
        out_ref = refs[6 + 4 * num_layers]
        (zp_in_ref, zp_hid_ref, stage_in_ref, stage_hid_ref,
         slab_ref) = refs[7 + 4 * num_layers:]

        # Zero only the (D, H) halo strips of the padded activations: their interiors
        # are fully overwritten every layer, and the im2col slab never exposes an
        # unwritten lane to the MXU, so no full-buffer zero fills are needed.
        def zero_halo(zp_ref, wc):
            zp_ref[:, :PAD, :, :] = jnp.zeros((n, PAD, slp, wc), jnp.float32)
            zp_ref[:, PAD + sl:, :, :] = jnp.zeros((n, PAD, slp, wc), jnp.float32)
            zp_ref[:, PAD:PAD + sl, :PAD, :] = jnp.zeros((n, sl, PAD, wc), jnp.float32)
            zp_ref[:, PAD:PAD + sl, PAD + sl:, :] = jnp.zeros((n, sl, PAD, wc),
                                                              jnp.float32)

        zero_halo(zp_in_ref, wc_in)
        if num_layers > 1:
            zero_halo(zp_hid_ref, wc_hid)

        # Hoisted once (not re-materialized inside the per-layer Python loops).
        ones8 = jnp.ones((8, rows), jnp.float32)   # MXU row-reducer, native M=8 tile

        # Embedding index_select as a one-hot matmul against kron(I_W, emb): lands
        # directly in the lane-dense (rows, W*E) layout, no extra launch / HBM trip.
        onehot = (ids_rep_ref[...] == bpat_ref[...]).astype(jnp.bfloat16)
        z = jnp.dot(onehot, embk_ref[...], preferred_element_type=jnp.float32)
        zp_in_ref[:, PAD:PAD + sl, PAD:PAD + sl, :] = z.reshape(n, sl, sl, wc_in)

        def conv_bn_relu(zp_ref, stage_ref, wc, layout,
                         bw_ref, bias_ref, gam_ref, bet_ref):
            kblk, blocks = layout
            k_tot = kblk * len(blocks)
            # im2col slab build: ONE sublane-shifted staging copy per kh plane
            # (5 per layer instead of 25 misaligned 4-D window gathers); the per-tap
            # reads are then cheap slab-granular kd slices of the staging scratch and
            # every slab store is a full, 128-aligned bf16 write.
            for kh in range(KK):
                stage_ref[...] = zp_ref[:, :, kh:kh + sl, :]
                for b, (bkh, taps) in enumerate(blocks):
                    if bkh != kh:
                        continue
                    parts, width = [], 0
                    for kd, off in taps:
                        v = stage_ref[:, kd:kd + sl, :, :].reshape(rows, wc)
                        parts.append(v.astype(jnp.bfloat16))
                        width = off + wc
                    if width < kblk:   # K-alignment pad lanes: written, never NaN
                        parts.append(jnp.zeros((rows, kblk - width), jnp.bfloat16))
                    val = parts[0] if len(parts) == 1 else jnp.concatenate(parts,
                                                                           axis=-1)
                    slab_ref[:, b * kblk:(b + 1) * kblk] = val
            # Conv3d as a single large-K bf16 matmul (kw axis folded into the band).
            acc = jnp.dot(slab_ref[:, :k_tot], bw_ref[...],
                          preferred_element_type=jnp.float32) + bias_ref[...]
            # BatchNorm3d, training-mode batch stats: row reduction rides the idle MXU
            # and var = E[x^2] - mean^2 so acc is swept only once for statistics.
            s1 = jnp.dot(jnp.dot(ones8, acc, preferred_element_type=jnp.float32),
                         cavg_ref[...], preferred_element_type=jnp.float32)[0:1, :]
            s2 = jnp.dot(jnp.dot(ones8, acc * acc, preferred_element_type=jnp.float32),
                         cavg_ref[...], preferred_element_type=jnp.float32)[0:1, :]
            mean = s1 * inv_total
            var = jnp.maximum(s2 * inv_total - mean * mean, 0.0)
            scale = gam_ref[...] * jax.lax.rsqrt(var + EPS)
            shift = bet_ref[...] - mean * scale
            return jnp.maximum(acc * scale + shift, 0.0)        # (rows, W*hidden) f32

        y = None
        for layer in range(num_layers):
            bw_ref, bias_ref, gam_ref, bet_ref = layer_refs[4 * layer:4 * layer + 4]
            if layer == 0:
                y = conv_bn_relu(zp_in_ref, stage_in_ref, wc_in, layout_in,
                                 bw_ref, bias_ref, gam_ref, bet_ref)
            else:
                zp_hid_ref[:, PAD:PAD + sl, PAD:PAD + sl, :] = (
                    y.reshape(n, sl, sl, wc_hid))
                y = conv_bn_relu(zp_hid_ref, stage_hid_ref, wc_hid, layout_hid,
                                 bw_ref, bias_ref, gam_ref, bet_ref)

        # Final Linear(hidden, out): y @ kron(I_W, W_out); output lanes are padded to
        # a multiple of 128 so the HBM writeback is a dense, unmasked store.
        out_ref[...] = (jnp.dot(y.astype(jnp.bfloat16), woutk_ref[...],
                                preferred_element_type=jnp.float32) + boutb_ref[...])

    return kernel


# ---------------------------------------------------------------------------
# Glue: tiny host-side parameter / id repacking (no activation-sized HBM traffic)
# ---------------------------------------------------------------------------
def context_embedding_forward(params, context, opts):
    sl = opts["context_side_length"]
    n = int(context.shape[0])
    if context.shape[1:] != (sl, sl, sl):
        raise Exception("Size of context should be Nx{sl}x{sl}x{sl}".format(sl=sl))

    emb = np.asarray(params["embedding"], np.float32)            # (NB, E)
    nb, emb_dim = emb.shape
    hidden = int(params["layers"][0][0].shape[-1])
    out_dim = int(params["out_w"].shape[1])
    num_layers = len(params["layers"])
    rows = n * sl * sl
    wc_in, wc_hid = sl * emb_dim, sl * hidden
    out_pad = _round_up(sl * out_dim, 128)
    slp = sl + 2 * PAD
    layout_in = _tap_blocks(wc_in)
    layout_hid = _tap_blocks(wc_hid)

    ids2d = context.reshape(rows, sl).astype(jnp.int32)          # rows=(n,d,h), cols=w
    ids_rep = jnp.repeat(ids2d, nb, axis=1)                      # (rows, W*NB)
    bpat = jnp.asarray(np.tile(np.arange(nb, dtype=np.int32), sl))[None, :]
    embk = jnp.asarray(np.kron(np.eye(sl, dtype=np.float32), emb), jnp.bfloat16)
    cavg = jnp.asarray(np.tile(np.eye(hidden, dtype=np.float32), (sl, sl)))  # f32

    layer_inputs = []
    for li, (w5, b, gamma, beta) in enumerate(params["layers"]):
        layout = layout_in if li == 0 else layout_hid
        layer_inputs += [
            _banded_conv_weight(w5, sl, layout),
            jnp.asarray(np.tile(np.asarray(b, np.float32), sl))[None, :],
            jnp.asarray(np.tile(np.asarray(gamma, np.float32), sl))[None, :],
            jnp.asarray(np.tile(np.asarray(beta, np.float32), sl))[None, :],
        ]

    woutk = np.zeros((wc_hid, out_pad), np.float32)
    woutk[:, :sl * out_dim] = np.kron(np.eye(sl, dtype=np.float32),
                                      np.asarray(params["out_w"], np.float32))
    boutb = np.zeros((1, out_pad), np.float32)
    boutb[0, :sl * out_dim] = np.tile(np.asarray(params["out_b"], np.float32), sl)

    inputs = ([ids_rep, bpat, embk, cavg] + layer_inputs
              + [jnp.asarray(woutk, jnp.bfloat16), jnp.asarray(boutb)])

    kernel = _make_fused_kernel(n, sl, emb_dim, hidden, num_layers,
                                layout_in, layout_hid)
    k_max = max(layout_in[0] * len(layout_in[1]),
                layout_hid[0] * len(layout_hid[1]))
    out2d = pl.pallas_call(
        kernel,
        out_shape=jax.ShapeDtypeStruct((rows, out_pad), jnp.float32),
        in_specs=[VMEM_SPEC] * len(inputs),
        out_specs=VMEM_SPEC,
        scratch_shapes=[
            pltpu.VMEM((n, slp, slp, wc_in), jnp.float32),    # halo-padded layer-0 act
            pltpu.VMEM((n, slp, slp, wc_hid), jnp.float32),   # halo-padded hidden act
            pltpu.VMEM((n, slp, sl, wc_in), jnp.float32),     # per-kh staging (layer 0)
            pltpu.VMEM((n, slp, sl, wc_hid), jnp.float32),    # per-kh staging (hidden)
            pltpu.VMEM((rows, k_max), jnp.bfloat16),          # shared bf16 im2col slab
        ],
        # Actual footprint is ~4 MB; 32 MiB is explicit headroom that also fits the
        # scoped-VMEM defaults of every generation (v5e 16 MiB default would be tight).
        compiler_params=pltpu.CompilerParams(vmem_limit_bytes=32 * 1024 * 1024),
    )(*inputs)
    return out2d[:, :sl * out_dim].reshape(n, sl, sl, sl, out_dim)


# ---------------------------------------------------------------------------
# Synthetic params + pure-JAX reference (self-check only)
# ---------------------------------------------------------------------------
def init_params(key, opts, num_blocks):
    emb_dim = opts["blockid_embedding_dim"]
    out_dim = opts["output_embedding_dim"]
    num_layers = opts["num_layers"]
    hidden = opts["hidden_dim"]

    keys = jax.random.split(key, 4 * num_layers + 3)
    params = {
        "embedding": jax.random.normal(keys[0], (num_blocks, emb_dim), jnp.float32),
        "layers": [],
    }
    cin = emb_dim
    for i in range(num_layers):
        kw = keys[1 + 4 * i: 5 + 4 * i]
        w = jax.random.normal(kw[0], (KK, KK, KK, cin, hidden), jnp.float32) * 0.05
        b = jax.random.normal(kw[1], (hidden,), jnp.float32) * 0.05
        # PyTorch BN init is gamma=1, beta=0; perturbed here (synthetic params) so the
        # affine path is actually exercised by the self-check.
        gamma = 1.0 + 0.1 * jax.random.normal(kw[2], (hidden,), jnp.float32)
        beta = 0.1 * jax.random.normal(kw[3], (hidden,), jnp.float32)
        params["layers"].append((w, b, gamma, beta))
        cin = hidden
    params["out_w"] = jax.random.normal(keys[-2], (hidden, out_dim), jnp.float32) * 0.05
    params["out_b"] = 0.05 * jax.random.normal(keys[-1], (out_dim,), jnp.float32)
    return params


def reference_forward(params, context, opts):
    """Plain-JAX/XLA reference with identical semantics (numerical self-check)."""
    sl = opts["context_side_length"]
    n = context.shape[0]
    emb = params["embedding"]
    z = emb[context.reshape(-1)].reshape(n, sl, sl, sl, emb.shape[1])
    for (w5, b, gamma, beta) in params["layers"]:
        y = jax.lax.conv_general_dilated(
            z, w5, window_strides=(1, 1, 1), padding=[(PAD, PAD)] * 3,
            dimension_numbers=("NDHWC", "DHWIO", "NDHWC"),
            precision=jax.lax.Precision.HIGHEST) + b
        mean = jnp.mean(y, axis=(0, 1, 2, 3), keepdims=True)
        var = jnp.mean(jnp.square(y - mean), axis=(0, 1, 2, 3), keepdims=True)
        z = jnp.maximum((y - mean) * jax.lax.rsqrt(var + EPS) * gamma + beta, 0.0)
    return jnp.einsum("ndhwc,co->ndhwo", z, params["out_w"],
                      precision=jax.lax.Precision.HIGHEST) + params["out_b"]


# ---------------------------------------------------------------------------
if __name__ == "__main__":
    opts = {
        "blockid_embedding_dim": 8,
        "output_embedding_dim": 8,
        "num_layers": 2,
        "hidden_dim": 16,
        "context_side_length": 8,
        "cont_use_direction": False,
        "cont_use_xyz_from_viewer_look": False,
    }
    num_blocks = 20
    batch = 2
    sl = opts["context_side_length"]

    key = jax.random.PRNGKey(0)
    k_param, k_ctx = jax.random.split(key)
    params = init_params(k_param, opts, num_blocks)
    context = jax.random.randint(k_ctx, (batch, sl, sl, sl), 0, num_blocks,
                                 dtype=jnp.int32)

    out = context_embedding_forward(params, context, opts)
    out = jax.block_until_ready(out)
    assert out.shape == (batch, sl, sl, sl, opts["output_embedding_dim"])
    assert out.dtype == jnp.float32

    ref = jax.block_until_ready(reference_forward(params, context, opts))
    max_err = float(jnp.max(jnp.abs(out - ref)))
    assert max_err < 5e-2, "mismatch vs pure-JAX reference: %g" % max_err
    print("KERNEL_OK")
</pallas_src>

<mosaic_0001>
module attributes {stable_mosaic.version = 11 : i64} {
  func.func @kernel(%arg0: memref<128x160xi32, #tpu.memory_space<vmem>>, %arg1: memref<1x160xi32, #tpu.memory_space<vmem>>, %arg2: memref<160x64xbf16, #tpu.memory_space<vmem>>, %arg3: memref<128x128xf32, #tpu.memory_space<vmem>>, %arg4: memref<1920x128xbf16, #tpu.memory_space<vmem>>, %arg5: memref<1x128xf32, #tpu.memory_space<vmem>>, %arg6: memref<1x128xf32, #tpu.memory_space<vmem>>, %arg7: memref<1x128xf32, #tpu.memory_space<vmem>>, %arg8: memref<3200x128xbf16, #tpu.memory_space<vmem>>, %arg9: memref<1x128xf32, #tpu.memory_space<vmem>>, %arg10: memref<1x128xf32, #tpu.memory_space<vmem>>, %arg11: memref<1x128xf32, #tpu.memory_space<vmem>>, %arg12: memref<128x128xbf16, #tpu.memory_space<vmem>>, %arg13: memref<1x128xf32, #tpu.memory_space<vmem>>, %arg14: memref<128x128xf32, #tpu.memory_space<vmem>>, %arg15: memref<2x12x12x64xf32, #tpu.memory_space<vmem>>, %arg16: memref<2x12x12x128xf32, #tpu.memory_space<vmem>>, %arg17: memref<2x12x8x64xf32, #tpu.memory_space<vmem>>, %arg18: memref<2x12x8x128xf32, #tpu.memory_space<vmem>>, %arg19: memref<128x3200xbf16, #tpu.memory_space<vmem>>) attributes {dimension_semantics = [], scalar_prefetch = 0 : i64, scratch_operands = 5 : i64, tpu.core_type = #tpu.core_type<tc>} {
    %cst = arith.constant 0.000000e+00 : f32
    %0 = vector.broadcast %cst : f32 to vector<2x2x12x64xf32>
    %c0 = arith.constant 0 : index
    %c0_0 = arith.constant 0 : index
    %c0_1 = arith.constant 0 : index
    %c0_2 = arith.constant 0 : index
    %1 = vector.load %arg15[%c0, %c0_0, %c0_1, %c0_2] : memref<2x12x12x64xf32, #tpu.memory_space<vmem>>, vector<2x2x12x64xf32>
    tpu.vector_store %arg15[%c0, %c0_0, %c0_1, %c0_2], %0 {strides = array<i32>} : memref<2x12x12x64xf32, #tpu.memory_space<vmem>>, vector<2x2x12x64xf32>,
    %cst_3 = arith.constant 0.000000e+00 : f32
    %2 = vector.broadcast %cst_3 : f32 to vector<2x2x12x64xf32>
    %c0_4 = arith.constant 0 : index
    %c10 = arith.constant 10 : index
    %c0_5 = arith.constant 0 : index
    %c0_6 = arith.constant 0 : index
    %3 = vector.load %arg15[%c0_4, %c10, %c0_5, %c0_6] : memref<2x12x12x64xf32, #tpu.memory_space<vmem>>, vector<2x2x12x64xf32>
    tpu.vector_store %arg15[%c0_4, %c10, %c0_5, %c0_6], %2 {strides = array<i32>} : memref<2x12x12x64xf32, #tpu.memory_space<vmem>>, vector<2x2x12x64xf32>,
    %cst_7 = arith.constant 0.000000e+00 : f32
    %4 = vector.broadcast %cst_7 : f32 to vector<2x8x2x64xf32>
    %c0_8 = arith.constant 0 : index
    %c2 = arith.constant 2 : index
    %c0_9 = arith.constant 0 : index
    %c0_10 = arith.constant 0 : index
    %5 = vector.load %arg15[%c0_8, %c2, %c0_9, %c0_10] : memref<2x12x12x64xf32, #tpu.memory_space<vmem>>, vector<2x8x2x64xf32>
    tpu.vector_store %arg15[%c0_8, %c2, %c0_9, %c0_10], %4 {strides = array<i32>} : memref<2x12x12x64xf32, #tpu.memory_space<vmem>>, vector<2x8x2x64xf32>,
    %cst_11 = arith.constant 0.000000e+00 : f32
    %6 = vector.broadcast %cst_11 : f32 to vector<2x8x2x64xf32>
    %c0_12 = arith.constant 0 : index
    %c2_13 = arith.constant 2 : index
    %c10_14 = arith.constant 10 : index
    %c0_15 = arith.constant 0 : index
    %7 = vector.load %arg15[%c0_12, %c2_13, %c10_14, %c0_15] : memref<2x12x12x64xf32, #tpu.memory_space<vmem>>, vector<2x8x2x64xf32>
    tpu.vector_store %arg15[%c0_12, %c2_13, %c10_14, %c0_15], %6 {strides = array<i32>} : memref<2x12x12x64xf32, #tpu.memory_space<vmem>>, vector<2x8x2x64xf32>,
    %cst_16 = arith.constant 0.000000e+00 : f32
    %8 = vector.broadcast %cst_16 : f32 to vector<2x2x12x128xf32>
    %c0_17 = arith.constant 0 : index
    %c0_18 = arith.constant 0 : index
    %c0_19 = arith.constant 0 : index
    %c0_20 = arith.constant 0 : index
    %9 = vector.load %arg16[%c0_17, %c0_18, %c0_19, %c0_20] : memref<2x12x12x128xf32, #tpu.memory_space<vmem>>, vector<2x2x12x128xf32>
    tpu.vector_store %arg16[%c0_17, %c0_18, %c0_19, %c0_20], %8 {strides = array<i32>} : memref<2x12x12x128xf32, #tpu.memory_space<vmem>>, vector<2x2x12x128xf32>,
    %cst_21 = arith.constant 0.000000e+00 : f32
    %10 = vector.broadcast %cst_21 : f32 to vector<2x2x12x128xf32>
    %c0_22 = arith.constant 0 : index
    %c10_23 = arith.constant 10 : index
    %c0_24 = arith.constant 0 : index
    %c0_25 = arith.constant 0 : index
    %11 = vector.load %arg16[%c0_22, %c10_23, %c0_24, %c0_25] : memref<2x12x12x128xf32, #tpu.memory_space<vmem>>, vector<2x2x12x128xf32>
    tpu.vector_store %arg16[%c0_22, %c10_23, %c0_24, %c0_25], %10 {strides = array<i32>} : memref<2x12x12x128xf32, #tpu.memory_space<vmem>>, vector<2x2x12x128xf32>,
    %cst_26 = arith.constant 0.000000e+00 : f32
    %12 = vector.broadcast %cst_26 : f32 to vector<2x8x2x128xf32>
    %c0_27 = arith.constant 0 : index
    %c2_28 = arith.constant 2 : index
    %c0_29 = arith.constant 0 : index
    %c0_30 = arith.constant 0 : index
    %13 = vector.load %arg16[%c0_27, %c2_28, %c0_29, %c0_30] : memref<2x12x12x128xf32, #tpu.memory_space<vmem>>, vector<2x8x2x128xf32>
    tpu.vector_store %arg16[%c0_27, %c2_28, %c0_29, %c0_30], %12 {strides = array<i32>} : memref<2x12x12x128xf32, #tpu.memory_space<vmem>>, vector<2x8x2x128xf32>,
    %cst_31 = arith.constant 0.000000e+00 : f32
    %14 = vector.broadcast %cst_31 : f32 to vector<2x8x2x128xf32>
    %c0_32 = arith.constant 0 : index
    %c2_33 = arith.constant 2 : index
    %c10_34 = arith.constant 10 : index
    %c0_35 = arith.constant 0 : index
    %15 = vector.load %arg16[%c0_32, %c2_33, %c10_34, %c0_35] : memref<2x12x12x128xf32, #tpu.memory_space<vmem>>, vector<2x8x2x128xf32>
    tpu.vector_store %arg16[%c0_32, %c2_33, %c10_34, %c0_35], %14 {strides = array<i32>} : memref<2x12x12x128xf32, #tpu.memory_space<vmem>>, vector<2x8x2x128xf32>,
    %cst_36 = arith.constant 1.000000e+00 : f32
    %16 = vector.broadcast %cst_36 : f32 to vector<8x128xf32>
    %c0_37 = arith.constant 0 : index
    %c0_38 = arith.constant 0 : index
    %17 = vector.load %arg0[%c0_37, %c0_38] : memref<128x160xi32, #tpu.memory_space<vmem>>, vector<128x160xi32>
    %c0_39 = arith.constant 0 : index
    %c0_40 = arith.constant 0 : index
    %18 = vector.load %arg1[%c0_39, %c0_40] : memref<1x160xi32, #tpu.memory_space<vmem>>, vector<1x160xi32>
    %19 = vector.broadcast %18 : vector<1x160xi32> to vector<128x160xi32>
    %20 = arith.cmpi eq, %17, %19 : vector<128x160xi32>
    %21 = arith.extui %20 : vector<128x160xi1> to vector<128x160xi32>
    %22 = arith.sitofp %21 : vector<128x160xi32> to vector<128x160xf32>
    %23 = arith.truncf %22 : vector<128x160xf32> to vector<128x160xbf16>
    %c0_41 = arith.constant 0 : index
    %c0_42 = arith.constant 0 : index
    %24 = vector.load %arg2[%c0_41, %c0_42] : memref<160x64xbf16, #tpu.memory_space<vmem>>, vector<160x64xbf16>
    %cst_43 = arith.constant dense<0.000000e+00> : vector<128x64xf32>
    %25 = tpu.matmul %23, %24, %cst_43 {dimension_numbers = #tpu.dot_dimension_numbers<[1], [0], [0], [1], [0, 0, 1, 1], [], []>} : vector<128x160xbf16>, vector<160x64xbf16>, vector<128x64xf32> -> vector<128x64xf32>
    %26 = vector.shape_cast %25 : vector<128x64xf32> to vector<2x8x8x64xf32>
    %c0_44 = arith.constant 0 : index
    %c2_45 = arith.constant 2 : index
    %c2_46 = arith.constant 2 : index
    %c0_47 = arith.constant 0 : index
    %27 = vector.load %arg15[%c0_44, %c2_45, %c2_46, %c0_47] : memref<2x12x12x64xf32, #tpu.memory_space<vmem>>, vector<2x8x8x64xf32>
    tpu.vector_store %arg15[%c0_44, %c2_45, %c2_46, %c0_47], %26 {strides = array<i32>} : memref<2x12x12x64xf32, #tpu.memory_space<vmem>>, vector<2x8x8x64xf32>,
    %c0_48 = arith.constant 0 : index
    %c0_49 = arith.constant 0 : index
    %c0_50 = arith.constant 0 : index
    %c0_51 = arith.constant 0 : index
    %28 = vector.load %arg15[%c0_48, %c0_49, %c0_50, %c0_51] : memref<2x12x12x64xf32, #tpu.memory_space<vmem>>, vector<2x12x8x64xf32>
    %c0_52 = arith.constant 0 : index
    %c0_53 = arith.constant 0 : index
    %c0_54 = arith.constant 0 : index
    %c0_55 = arith.constant 0 : index
    %29 = vector.load %arg17[%c0_52, %c0_53, %c0_54, %c0_55] : memref<2x12x8x64xf32, #tpu.memory_space<vmem>>, vector<2x12x8x64xf32>
    tpu.vector_store %arg17[%c0_52, %c0_53, %c0_54, %c0_55], %28 {strides = array<i32>} : memref<2x12x8x64xf32, #tpu.memory_space<vmem>>, vector<2x12x8x64xf32>,
    %c0_56 = arith.constant 0 : index
    %c0_57 = arith.constant 0 : index
    %c0_58 = arith.constant 0 : index
    %c0_59 = arith.constant 0 : index
    %30 = vector.load %arg17[%c0_56, %c0_57, %c0_58, %c0_59] : memref<2x12x8x64xf32, #tpu.memory_space<vmem>>, vector<2x8x8x64xf32>
    %31 = vector.shape_cast %30 : vector<2x8x8x64xf32> to vector<128x64xf32>
    %32 = arith.truncf %31 : vector<128x64xf32> to vector<128x64xbf16>
    %c0_60 = arith.constant 0 : index
    %c1 = arith.constant 1 : index
    %c0_61 = arith.constant 0 : index
    %c0_62 = arith.constant 0 : index
    %33 = vector.load %arg17[%c0_60, %c1, %c0_61, %c0_62] : memref<2x12x8x64xf32, #tpu.memory_space<vmem>>, vector<2x8x8x64xf32>
    %34 = vector.shape_cast %33 : vector<2x8x8x64xf32> to vector<128x64xf32>
    %35 = arith.truncf %34 : vector<128x64xf32> to vector<128x64xbf16>
    %36 = tpu.concatenate %32, %35 in 1 : vector<128x64xbf16>, vector<128x64xbf16> -> vector<128x128xbf16>
    %c0_63 = arith.constant 0 : index
    %c0_64 = arith.constant 0 : index
    %37 = vector.load %arg19[%c0_63, %c0_64] : memref<128x3200xbf16, #tpu.memory_space<vmem>>, vector<128x128xbf16>
    tpu.vector_store %arg19[%c0_63, %c0_64], %36 {strides = array<i32>} : memref<128x3200xbf16, #tpu.memory_space<vmem>>, vector<128x128xbf16>,
    %c0_65 = arith.constant 0 : index
    %c2_66 = arith.constant 2 : index
    %c0_67 = arith.constant 0 : index
    %c0_68 = arith.constant 0 : index
    %38 = vector.load %arg17[%c0_65, %c2_66, %c0_67, %c0_68] : memref<2x12x8x64xf32, #tpu.memory_space<vmem>>, vector<2x8x8x64xf32>
    %39 = vector.shape_cast %38 : vector<2x8x8x64xf32> to vector<128x64xf32>
    %40 = arith.truncf %39 : vector<128x64xf32> to vector<128x64xbf16>
    %c0_69 = arith.constant 0 : index
    %c3 = arith.constant 3 : index
    %c0_70 = arith.constant 0 : index
    %c0_71 = arith.constant 0 : index
    %41 = vector.load %arg17[%c0_69, %c3, %c0_70, %c0_71] : memref<2x12x8x64xf32, #tpu.memory_space<vmem>>, vector<2x8x8x64xf32>
    %42 = vector.shape_cast %41 : vector<2x8x8x64xf32> to vector<128x64xf32>
    %43 = arith.truncf %42 : vector<128x64xf32> to vector<128x64xbf16>
    %44 = tpu.concatenate %40, %43 in 1 : vector<128x64xbf16>, vector<128x64xbf16> -> vector<128x128xbf16>
    %c0_72 = arith.constant 0 : index
    %c128 = arith.constant 128 : index
    %45 = vector.load %arg19[%c0_72, %c128] : memref<128x3200xbf16, #tpu.memory_space<vmem>>, vector<128x128xbf16>
    tpu.vector_store %arg19[%c0_72, %c128], %44 {strides = array<i32>} : memref<128x3200xbf16, #tpu.memory_space<vmem>>, vector<128x128xbf16>,
    %c0_73 = arith.constant 0 : index
    %c4 = arith.constant 4 : index
    %c0_74 = arith.constant 0 : index
    %c0_75 = arith.constant 0 : index
    %46 = vector.load %arg17[%c0_73, %c4, %c0_74, %c0_75] : memref<2x12x8x64xf32, #tpu.memory_space<vmem>>, vector<2x8x8x64xf32>
    %47 = vector.shape_cast %46 : vector<2x8x8x64xf32> to vector<128x64xf32>
    %48 = arith.truncf %47 : vector<128x64xf32> to vector<128x64xbf16>
    %cst_76 = arith.constant 0.000000e+00 : bf16
    %49 = vector.broadcast %cst_76 : bf16 to vector<128x64xbf16>
    %50 = tpu.concatenate %48, %49 in 1 : vector<128x64xbf16>, vector<128x64xbf16> -> vector<128x128xbf16>
    %c0_77 = arith.constant 0 : index
    %c256 = arith.constant 256 : index
    %51 = vector.load %arg19[%c0_77, %c256] : memref<128x3200xbf16, #tpu.memory_space<vmem>>, vector<128x128xbf16>
    tpu.vector_store %arg19[%c0_77, %c256], %50 {strides = array<i32>} : memref<128x3200xbf16, #tpu.memory_space<vmem>>, vector<128x128xbf16>,
    %c0_78 = arith.constant 0 : index
    %c0_79 = arith.constant 0 : index
    %c1_80 = arith.constant 1 : index
    %c0_81 = arith.constant 0 : index
    %52 = vector.load %arg15[%c0_78, %c0_79, %c1_80, %c0_81] : memref<2x12x12x64xf32, #tpu.memory_space<vmem>>, vector<2x12x8x64xf32>
    %c0_82 = arith.constant 0 : index
    %c0_83 = arith.constant 0 : index
    %c0_84 = arith.constant 0 : index
    %c0_85 = arith.constant 0 : index
    %53 = vector.load %arg17[%c0_82, %c0_83, %c0_84, %c0_85] : memref<2x12x8x64xf32, #tpu.memory_space<vmem>>, vector<2x12x8x64xf32>
    tpu.vector_store %arg17[%c0_82, %c0_83, %c0_84, %c0_85], %52 {strides = array<i32>} : memref<2x12x8x64xf32, #tpu.memory_space<vmem>>, vector<2x12x8x64xf32>,
    %c0_86 = arith.constant 0 : index
    %c0_87 = arith.constant 0 : index
    %c0_88 = arith.constant 0 : index
    %c0_89 = arith.constant 0 : index
    %54 = vector.load %arg17[%c0_86, %c0_87, %c0_88, %c0_89] : memref<2x12x8x64xf32, #tpu.memory_space<vmem>>, vector<2x8x8x64xf32>
    %55 = vector.shape_cast %54 : vector<2x8x8x64xf32> to vector<128x64xf32>
    %56 = arith.truncf %55 : vector<128x64xf32> to vector<128x64xbf16>
    %c0_90 = arith.constant 0 : index
    %c1_91 = arith.constant 1 : index
    %c0_92 = arith.constant 0 : index
    %c0_93 = arith.constant 0 : index
    %57 = vector.load %arg17[%c0_90, %c1_91, %c0_92, %c0_93] : memref<2x12x8x64xf32, #tpu.memory_space<vmem>>, vector<2x8x8x64xf32>
    %58 = vector.shape_cast %57 : vector<2x8x8x64xf32> to vector<128x64xf32>
    %59 = arith.truncf %58 : vector<128x64xf32> to vector<128x64xbf16>
    %60 = tpu.concatenate %56, %59 in 1 : vector<128x64xbf16>, vector<128x64xbf16> -> vector<128x128xbf16>
    %c0_94 = arith.constant 0 : index
    %c384 = arith.constant 384 : index
    %61 = vector.load %arg19[%c0_94, %c384] : memref<128x3200xbf16, #tpu.memory_space<vmem>>, vector<128x128xbf16>
    tpu.vector_store %arg19[%c0_94, %c384], %60 {strides = array<i32>} : memref<128x3200xbf16, #tpu.memory_space<vmem>>, vector<128x128xbf16>,
    %c0_95 = arith.constant 0 : index
    %c2_96 = arith.constant 2 : index
    %c0_97 = arith.constant 0 : index
    %c0_98 = arith.constant 0 : index
    %62 = vector.load %arg17[%c0_95, %c2_96, %c0_97, %c0_98] : memref<2x12x8x64xf32, #tpu.memory_space<vmem>>, vector<2x8x8x64xf32>
    %63 = vector.shape_cast %62 : vector<2x8x8x64xf32> to vector<128x64xf32>
    %64 = arith.truncf %63 : vector<128x64xf32> to vector<128x64xbf16>
    %c0_99 = arith.constant 0 : index
    %c3_100 = arith.constant 3 : index
    %c0_101 = arith.constant 0 : index
    %c0_102 = arith.constant 0 : index
    %65 = vector.load %arg17[%c0_99, %c3_100, %c0_101, %c0_102] : memref<2x12x8x64xf32, #tpu.memory_space<vmem>>, vector<2x8x8x64xf32>
    %66 = vector.shape_cast %65 : vector<2x8x8x64xf32> to vector<128x64xf32>
    %67 = arith.truncf %66 : vector<128x64xf32> to vector<128x64xbf16>
    %68 = tpu.concatenate %64, %67 in 1 : vector<128x64xbf16>, vector<128x64xbf16> -> vector<128x128xbf16>
    %c0_103 = arith.constant 0 : index
    %c512 = arith.constant 512 : index
    %69 = vector.load %arg19[%c0_103, %c512] : memref<128x3200xbf16, #tpu.memory_space<vmem>>, vector<128x128xbf16>
    tpu.vector_store %arg19[%c0_103, %c512], %68 {strides = array<i32>} : memref<128x3200xbf16, #tpu.memory_space<vmem>>, vector<128x128xbf16>,
    %c0_104 = arith.constant 0 : index
    %c4_105 = arith.constant 4 : index
    %c0_106 = arith.constant 0 : index
    %c0_107 = arith.constant 0 : index
    %70 = vector.load %arg17[%c0_104, %c4_105, %c0_106, %c0_107] : memref<2x12x8x64xf32, #tpu.memory_space<vmem>>, vector<2x8x8x64xf32>
    %71 = vector.shape_cast %70 : vector<2x8x8x64xf32> to vector<128x64xf32>
    %72 = arith.truncf %71 : vector<128x64xf32> to vector<128x64xbf16>
    %cst_108 = arith.constant 0.000000e+00 : bf16
    %73 = vector.broadcast %cst_108 : bf16 to vector<128x64xbf16>
    %74 = tpu.concatenate %72, %73 in 1 : vector<128x64xbf16>, vector<128x64xbf16> -> vector<128x128xbf16>
    %c0_109 = arith.constant 0 : index
    %c640 = arith.constant 640 : index
    %75 = vector.load %arg19[%c0_109, %c640] : memref<128x3200xbf16, #tpu.memory_space<vmem>>, vector<128x128xbf16>
    tpu.vector_store %arg19[%c0_109, %c640], %74 {strides = array<i32>} : memref<128x3200xbf16, #tpu.memory_space<vmem>>, vector<128x128xbf16>,
    %c0_110 = arith.constant 0 : index
    %c0_111 = arith.constant 0 : index
    %c2_112 = arith.constant 2 : index
    %c0_113 = arith.constant 0 : index
    %76 = vector.load %arg15[%c0_110, %c0_111, %c2_112, %c0_113] : memref<2x12x12x64xf32, #tpu.memory_space<vmem>>, vector<2x12x8x64xf32>
    %c0_114 = arith.constant 0 : index
    %c0_115 = arith.constant 0 : index
    %c0_116 = arith.constant 0 : index
    %c0_117 = arith.constant 0 : index
    %77 = vector.load %arg17[%c0_114, %c0_115, %c0_116, %c0_117] : memref<2x12x8x64xf32, #tpu.memory_space<vmem>>, vector<2x12x8x64xf32>
    tpu.vector_store %arg17[%c0_114, %c0_115, %c0_116, %c0_117], %76 {strides = array<i32>} : memref<2x12x8x64xf32, #tpu.memory_space<vmem>>, vector<2x12x8x64xf32>,
    %c0_118 = arith.constant 0 : index
    %c0_119 = arith.constant 0 : index
    %c0_120 = arith.constant 0 : index
    %c0_121 = arith.constant 0 : index
    %78 = vector.load %arg17[%c0_118, %c0_119, %c0_120, %c0_121] : memref<2x12x8x64xf32, #tpu.memory_space<vmem>>, vector<2x8x8x64xf32>
    %79 = vector.shape_cast %78 : vector<2x8x8x64xf32> to vector<128x64xf32>
    %80 = arith.truncf %79 : vector<128x64xf32> to vector<128x64xbf16>
    %c0_122 = arith.constant 0 : index
    %c1_123 = arith.constant 1 : index
    %c0_124 = arith.constant 0 : index
    %c0_125 = arith.constant 0 : index
    %81 = vector.load %arg17[%c0_122, %c1_123, %c0_124, %c0_125] : memref<2x12x8x64xf32, #tpu.memory_space<vmem>>, vector<2x8x8x64xf32>
    %82 = vector.shape_cast %81 : vector<2x8x8x64xf32> to vector<128x64xf32>
    %83 = arith.truncf %82 : vector<128x64xf32> to vector<128x64xbf16>
    %84 = tpu.concatenate %80, %83 in 1 : vector<128x64xbf16>, vector<128x64xbf16> -> vector<128x128xbf16>
    %c0_126 = arith.constant 0 : index
    %c768 = arith.constant 768 : index
    %85 = vector.load %arg19[%c0_126, %c768] : memref<128x3200xbf16, #tpu.memory_space<vmem>>, vector<128x128xbf16>
    tpu.vector_store %arg19[%c0_126, %c768], %84 {strides = array<i32>} : memref<128x3200xbf16, #tpu.memory_space<vmem>>, vector<128x128xbf16>,
    %c0_127 = arith.constant 0 : index
    %c2_128 = arith.constant 2 : index
    %c0_129 = arith.constant 0 : index
    %c0_130 = arith.constant 0 : index
    %86 = vector.load %arg17[%c0_127, %c2_128, %c0_129, %c0_130] : memref<2x12x8x64xf32, #tpu.memory_space<vmem>>, vector<2x8x8x64xf32>
    %87 = vector.shape_cast %86 : vector<2x8x8x64xf32> to vector<128x64xf32>
    %88 = arith.truncf %87 : vector<128x64xf32> to vector<128x64xbf16>
    %c0_131 = arith.constant 0 : index
    %c3_132 = arith.constant 3 : index
    %c0_133 = arith.constant 0 : index
    %c0_134 = arith.constant 0 : index
    %89 = vector.load %arg17[%c0_131, %c3_132, %c0_133, %c0_134] : memref<2x12x8x64xf32, #tpu.memory_space<vmem>>, vector<2x8x8x64xf32>
    %90 = vector.shape_cast %89 : vector<2x8x8x64xf32> to vector<128x64xf32>
    %91 = arith.truncf %90 : vector<128x64xf32> to vector<128x64xbf16>
    %92 = tpu.concatenate %88, %91 in 1 : vector<128x64xbf16>, vector<128x64xbf16> -> vector<128x128xbf16>
    %c0_135 = arith.constant 0 : index
    %c896 = arith.constant 896 : index
    %93 = vector.load %arg19[%c0_135, %c896] : memref<128x3200xbf16, #tpu.memory_space<vmem>>, vector<128x128xbf16>
    tpu.vector_store %arg19[%c0_135, %c896], %92 {strides = array<i32>} : memref<128x3200xbf16, #tpu.memory_space<vmem>>, vector<128x128xbf16>,
    %c0_136 = arith.constant 0 : index
    %c4_137 = arith.constant 4 : index
    %c0_138 = arith.constant 0 : index
    %c0_139 = arith.constant 0 : index
    %94 = vector.load %arg17[%c0_136, %c4_137, %c0_138, %c0_139] : memref<2x12x8x64xf32, #tpu.memory_space<vmem>>, vector<2x8x8x64xf32>
    %95 = vector.shape_cast %94 : vector<2x8x8x64xf32> to vector<128x64xf32>
    %96 = arith.truncf %95 : vector<128x64xf32> to vector<128x64xbf16>
    %cst_140 = arith.constant 0.000000e+00 : bf16
    %97 = vector.broadcast %cst_140 : bf16 to vector<128x64xbf16>
    %98 = tpu.concatenate %96, %97 in 1 : vector<128x64xbf16>, vector<128x64xbf16> -> vector<128x128xbf16>
    %c0_141 = arith.constant 0 : index
    %c1024 = arith.constant 1024 : index
    %99 = vector.load %arg19[%c0_141, %c1024] : memref<128x3200xbf16, #tpu.memory_space<vmem>>, vector<128x128xbf16>
    tpu.vector_store %arg19[%c0_141, %c1024], %98 {strides = array<i32>} : memref<128x3200xbf16, #tpu.memory_space<vmem>>, vector<128x128xbf16>,
    %c0_142 = arith.constant 0 : index
    %c0_143 = arith.constant 0 : index
    %c3_144 = arith.constant 3 : index
    %c0_145 = arith.constant 0 : index
    %100 = vector.load %arg15[%c0_142, %c0_143, %c3_144, %c0_145] : memref<2x12x12x64xf32, #tpu.memory_space<vmem>>, vector<2x12x8x64xf32>
    %c0_146 = arith.constant 0 : index
    %c0_147 = arith.constant 0 : index
    %c0_148 = arith.constant 0 : index
    %c0_149 = arith.constant 0 : index
    %101 = vector.load %arg17[%c0_146, %c0_147, %c0_148, %c0_149] : memref<2x12x8x64xf32, #tpu.memory_space<vmem>>, vector<2x12x8x64xf32>
    tpu.vector_store %arg17[%c0_146, %c0_147, %c0_148, %c0_149], %100 {strides = array<i32>} : memref<2x12x8x64xf32, #tpu.memory_space<vmem>>, vector<2x12x8x64xf32>,
    %c0_150 = arith.constant 0 : index
    %c0_151 = arith.constant 0 : index
    %c0_152 = arith.constant 0 : index
    %c0_153 = arith.constant 0 : index
    %102 = vector.load %arg17[%c0_150, %c0_151, %c0_152, %c0_153] : memref<2x12x8x64xf32, #tpu.memory_space<vmem>>, vector<2x8x8x64xf32>
    %103 = vector.shape_cast %102 : vector<2x8x8x64xf32> to vector<128x64xf32>
    %104 = arith.truncf %103 : vector<128x64xf32> to vector<128x64xbf16>
    %c0_154 = arith.constant 0 : index
    %c1_155 = arith.constant 1 : index
    %c0_156 = arith.constant 0 : index
    %c0_157 = arith.constant 0 : index
    %105 = vector.load %arg17[%c0_154, %c1_155, %c0_156, %c0_157] : memref<2x12x8x64xf32, #tpu.memory_space<vmem>>, vector<2x8x8x64xf32>
    %106 = vector.shape_cast %105 : vector<2x8x8x64xf32> to vector<128x64xf32>
    %107 = arith.truncf %106 : vector<128x64xf32> to vector<128x64xbf16>
    %108 = tpu.concatenate %104, %107 in 1 : vector<128x64xbf16>, vector<128x64xbf16> -> vector<128x128xbf16>
    %c0_158 = arith.constant 0 : index
    %c1152 = arith.constant 1152 : index
    %109 = vector.load %arg19[%c0_158, %c1152] : memref<128x3200xbf16, #tpu.memory_space<vmem>>, vector<128x128xbf16>
    tpu.vector_store %arg19[%c0_158, %c1152], %108 {strides = array<i32>} : memref<128x3200xbf16, #tpu.memory_space<vmem>>, vector<128x128xbf16>,
    %c0_159 = arith.constant 0 : index
    %c2_160 = arith.constant 2 : index
    %c0_161 = arith.constant 0 : index
    %c0_162 = arith.constant 0 : index
    %110 = vector.load %arg17[%c0_159, %c2_160, %c0_161, %c0_162] : memref<2x12x8x64xf32, #tpu.memory_space<vmem>>, vector<2x8x8x64xf32>
    %111 = vector.shape_cast %110 : vector<2x8x8x64xf32> to vector<128x64xf32>
    %112 = arith.truncf %111 : vector<128x64xf32> to vector<128x64xbf16>
    %c0_163 = arith.constant 0 : index
    %c3_164 = arith.constant 3 : index
    %c0_165 = arith.constant 0 : index
    %c0_166 = arith.constant 0 : index
    %113 = vector.load %arg17[%c0_163, %c3_164, %c0_165, %c0_166] : memref<2x12x8x64xf32, #tpu.memory_space<vmem>>, vector<2x8x8x64xf32>
    %114 = vector.shape_cast %113 : vector<2x8x8x64xf32> to vector<128x64xf32>
    %115 = arith.truncf %114 : vector<128x64xf32> to vector<128x64xbf16>
    %116 = tpu.concatenate %112, %115 in 1 : vector<128x64xbf16>, vector<128x64xbf16> -> vector<128x128xbf16>
    %c0_167 = arith.constant 0 : index
    %c1280 = arith.constant 1280 : index
    %117 = vector.load %arg19[%c0_167, %c1280] : memref<128x3200xbf16, #tpu.memory_space<vmem>>, vector<128x128xbf16>
    tpu.vector_store %arg19[%c0_167, %c1280], %116 {strides = array<i32>} : memref<128x3200xbf16, #tpu.memory_space<vmem>>, vector<128x128xbf16>,
    %c0_168 = arith.constant 0 : index
    %c4_169 = arith.constant 4 : index
    %c0_170 = arith.constant 0 : index
    %c0_171 = arith.constant 0 : index
    %118 = vector.load %arg17[%c0_168, %c4_169, %c0_170, %c0_171] : memref<2x12x8x64xf32, #tpu.memory_space<vmem>>, vector<2x8x8x64xf32>
    %119 = vector.shape_cast %118 : vector<2x8x8x64xf32> to vector<128x64xf32>
    %120 = arith.truncf %119 : vector<128x64xf32> to vector<128x64xbf16>
    %cst_172 = arith.constant 0.000000e+00 : bf16
    %121 = vector.broadcast %cst_172 : bf16 to vector<128x64xbf16>
    %122 = tpu.concatenate %120, %121 in 1 : vector<128x64xbf16>, vector<128x64xbf16> -> vector<128x128xbf16>
    %c0_173 = arith.constant 0 : index
    %c1408 = arith.constant 1408 : index
    %123 = vector.load %arg19[%c0_173, %c1408] : memref<128x3200xbf16, #tpu.memory_space<vmem>>, vector<128x128xbf16>
    tpu.vector_store %arg19[%c0_173, %c1408], %122 {strides = array<i32>} : memref<128x3200xbf16, #tpu.memory_space<vmem>>, vector<128x128xbf16>,
    %c0_174 = arith.constant 0 : index
    %c0_175 = arith.constant 0 : index
    %c4_176 = arith.constant 4 : index
    %c0_177 = arith.constant 0 : index
    %124 = vector.load %arg15[%c0_174, %c0_175, %c4_176, %c0_177] : memref<2x12x12x64xf32, #tpu.memory_space<vmem>>, vector<2x12x8x64xf32>
    %c0_178 = arith.constant 0 : index
    %c0_179 = arith.constant 0 : index
    %c0_180 = arith.constant 0 : index
    %c0_181 = arith.constant 0 : index
    %125 = vector.load %arg17[%c0_178, %c0_179, %c0_180, %c0_181] : memref<2x12x8x64xf32, #tpu.memory_space<vmem>>, vector<2x12x8x64xf32>
    tpu.vector_store %arg17[%c0_178, %c0_179, %c0_180, %c0_181], %124 {strides = array<i32>} : memref<2x12x8x64xf32, #tpu.memory_space<vmem>>, vector<2x12x8x64xf32>,
    %c0_182 = arith.constant 0 : index
    %c0_183 = arith.constant 0 : index
    %c0_184 = arith.constant 0 : index
    %c0_185 = arith.constant 0 : index
    %126 = vector.load %arg17[%c0_182, %c0_183, %c0_184, %c0_185] : memref<2x12x8x64xf32, #tpu.memory_space<vmem>>, vector<2x8x8x64xf32>
    %127 = vector.shape_cast %126 : vector<2x8x8x64xf32> to vector<128x64xf32>
    %128 = arith.truncf %127 : vector<128x64xf32> to vector<128x64xbf16>
    %c0_186 = arith.constant 0 : index
    %c1_187 = arith.constant 1 : index
    %c0_188 = arith.constant 0 : index
    %c0_189 = arith.constant 0 : index
    %129 = vector.load %arg17[%c0_186, %c1_187, %c0_188, %c0_189] : memref<2x12x8x64xf32, #tpu.memory_space<vmem>>, vector<2x8x8x64xf32>
    %130 = vector.shape_cast %129 : vector<2x8x8x64xf32> to vector<128x64xf32>
    %131 = arith.truncf %130 : vector<128x64xf32> to vector<128x64xbf16>
    %132 = tpu.concatenate %128, %131 in 1 : vector<128x64xbf16>, vector<128x64xbf16> -> vector<128x128xbf16>
    %c0_190 = arith.constant 0 : index
    %c1536 = arith.constant 1536 : index
    %133 = vector.load %arg19[%c0_190, %c1536] : memref<128x3200xbf16, #tpu.memory_space<vmem>>, vector<128x128xbf16>
    tpu.vector_store %arg19[%c0_190, %c1536], %132 {strides = array<i32>} : memref<128x3200xbf16, #tpu.memory_space<vmem>>, vector<128x128xbf16>,
    %c0_191 = arith.constant 0 : index
    %c2_192 = arith.constant 2 : index
    %c0_193 = arith.constant 0 : index
    %c0_194 = arith.constant 0 : index
    %134 = vector.load %arg17[%c0_191, %c2_192, %c0_193, %c0_194] : memref<2x12x8x64xf32, #tpu.memory_space<vmem>>, vector<2x8x8x64xf32>
    %135 = vector.shape_cast %134 : vector<2x8x8x64xf32> to vector<128x64xf32>
    %136 = arith.truncf %135 : vector<128x64xf32> to vector<128x64xbf16>
    %c0_195 = arith.constant 0 : index
    %c3_196 = arith.constant 3 : index
    %c0_197 = arith.constant 0 : index
    %c0_198 = arith.constant 0 : index
    %137 = vector.load %arg17[%c0_195, %c3_196, %c0_197, %c0_198] : memref<2x12x8x64xf32, #tpu.memory_space<vmem>>, vector<2x8x8x64xf32>
    %138 = vector.shape_cast %137 : vector<2x8x8x64xf32> to vector<128x64xf32>
    %139 = arith.truncf %138 : vector<128x64xf32> to vector<128x64xbf16>
    %140 = tpu.concatenate %136, %139 in 1 : vector<128x64xbf16>, vector<128x64xbf16> -> vector<128x128xbf16>
    %c0_199 = arith.constant 0 : index
    %c1664 = arith.constant 1664 : index
    %141 = vector.load %arg19[%c0_199, %c1664] : memref<128x3200xbf16, #tpu.memory_space<vmem>>, vector<128x128xbf16>
    tpu.vector_store %arg19[%c0_199, %c1664], %140 {strides = array<i32>} : memref<128x3200xbf16, #tpu.memory_space<vmem>>, vector<128x128xbf16>,
    %c0_200 = arith.constant 0 : index
    %c4_201 = arith.constant 4 : index
    %c0_202 = arith.constant 0 : index
    %c0_203 = arith.constant 0 : index
    %142 = vector.load %arg17[%c0_200, %c4_201, %c0_202, %c0_203] : memref<2x12x8x64xf32, #tpu.memory_space<vmem>>, vector<2x8x8x64xf32>
    %143 = vector.shape_cast %142 : vector<2x8x8x64xf32> to vector<128x64xf32>
    %144 = arith.truncf %143 : vector<128x64xf32> to vector<128x64xbf16>
    %cst_204 = arith.constant 0.000000e+00 : bf16
    %145 = vector.broadcast %cst_204 : bf16 to vector<128x64xbf16>
    %146 = tpu.concatenate %144, %145 in 1 : vector<128x64xbf16>, vector<128x64xbf16> -> vector<128x128xbf16>
    %c0_205 = arith.constant 0 : index
    %c1792 = arith.constant 1792 : index
    %147 = vector.load %arg19[%c0_205, %c1792] : memref<128x3200xbf16, #tpu.memory_space<vmem>>, vector<128x128xbf16>
    tpu.vector_store %arg19[%c0_205, %c1792], %146 {strides = array<i32>} : memref<128x3200xbf16, #tpu.memory_space<vmem>>, vector<128x128xbf16>,
    %c0_206 = arith.constant 0 : index
    %c0_207 = arith.constant 0 : index
    %148 = vector.load %arg19[%c0_206, %c0_207] : memref<128x3200xbf16, #tpu.memory_space<vmem>>, vector<128x1920xbf16>
    %c0_208 = arith.constant 0 : index
    %c0_209 = arith.constant 0 : index
    %149 = vector.load %arg4[%c0_208, %c0_209] : memref<1920x128xbf16, #tpu.memory_space<vmem>>, vector<1920x128xbf16>
    %cst_210 = arith.constant dense<0.000000e+00> : vector<128x128xf32>
    %150 = tpu.matmul %148, %149, %cst_210 {dimension_numbers = #tpu.dot_dimension_numbers<[1], [0], [0], [1], [0, 0, 1, 1], [], []>} : vector<128x1920xbf16>, vector<1920x128xbf16>, vector<128x128xf32> -> vector<128x128xf32>
    %c0_211 = arith.constant 0 : index
    %c0_212 = arith.constant 0 : index
    %151 = vector.load %arg5[%c0_211, %c0_212] : memref<1x128xf32, #tpu.memory_space<vmem>>, vector<1x128xf32>
    %152 = vector.broadcast %151 : vector<1x128xf32> to vector<128x128xf32>
    %153 = arith.addf %150, %152 : vector<128x128xf32>
    %cst_213 = arith.constant dense<0.000000e+00> : vector<8x128xf32>
    %154 = tpu.matmul %16, %153, %cst_213 {dimension_numbers = #tpu.dot_dimension_numbers<[1], [0], [0], [1], [0, 0, 1, 1], [], []>} : vector<8x128xf32>, vector<128x128xf32>, vector<8x128xf32> -> vector<8x128xf32>
    %c0_214 = arith.constant 0 : index
    %c0_215 = arith.constant 0 : index
    %155 = vector.load %arg3[%c0_214, %c0_215] : memref<128x128xf32, #tpu.memory_space<vmem>>, vector<128x128xf32>
    %cst_216 = arith.constant dense<0.000000e+00> : vector<8x128xf32>
    %156 = tpu.matmul %154, %155, %cst_216 {dimension_numbers = #tpu.dot_dimension_numbers<[1], [0], [0], [1], [0, 0, 1, 1], [], []>} : vector<8x128xf32>, vector<128x128xf32>, vector<8x128xf32> -> vector<8x128xf32>
    %157 = vector.extract_strided_slice %156 {offsets = [0, 0], sizes = [1, 128], strides = [1, 1]} : vector<8x128xf32> to vector<1x128xf32>
    %158 = arith.mulf %153, %153 : vector<128x128xf32>
    %cst_217 = arith.constant dense<0.000000e+00> : vector<8x128xf32>
    %159 = tpu.matmul %16, %158, %cst_217 {dimension_numbers = #tpu.dot_dimension_numbers<[1], [0], [0], [1], [0, 0, 1, 1], [], []>} : vector<8x128xf32>, vector<128x128xf32>, vector<8x128xf32> -> vector<8x128xf32>
    %c0_218 = arith.constant 0 : index
    %c0_219 = arith.constant 0 : index
    %160 = vector.load %arg3[%c0_218, %c0_219] : memref<128x128xf32, #tpu.memory_space<vmem>>, vector<128x128xf32>
    %cst_220 = arith.constant dense<0.000000e+00> : vector<8x128xf32>
    %161 = tpu.matmul %159, %160, %cst_220 {dimension_numbers = #tpu.dot_dimension_numbers<[1], [0], [0], [1], [0, 0, 1, 1], [], []>} : vector<8x128xf32>, vector<128x128xf32>, vector<8x128xf32> -> vector<8x128xf32>
    %162 = vector.extract_strided_slice %161 {offsets = [0, 0], sizes = [1, 128], strides = [1, 1]} : vector<8x128xf32> to vector<1x128xf32>
    %cst_221 = arith.constant 9.765625E-4 : f32
    %163 = vector.broadcast %cst_221 : f32 to vector<1x128xf32>
    %164 = arith.mulf %157, %163 : vector<1x128xf32>
    %cst_222 = arith.constant 9.765625E-4 : f32
    %165 = vector.broadcast %cst_222 : f32 to vector<1x128xf32>
    %166 = arith.mulf %162, %165 : vector<1x128xf32>
    %167 = arith.mulf %164, %164 : vector<1x128xf32>
    %168 = arith.subf %166, %167 : vector<1x128xf32>
    %cst_223 = arith.constant 0.000000e+00 : f32
    %169 = vector.broadcast %cst_223 : f32 to vector<1x128xf32>
    %170 = arith.maximumf %168, %169 : vector<1x128xf32>
    %c0_224 = arith.constant 0 : index
    %c0_225 = arith.constant 0 : index
    %171 = vector.load %arg6[%c0_224, %c0_225] : memref<1x128xf32, #tpu.memory_space<vmem>>, vector<1x128xf32>
    %cst_226 = arith.constant 9.99999974E-6 : f32
    %172 = vector.broadcast %cst_226 : f32 to vector<1x128xf32>
    %173 = arith.addf %170, %172 : vector<1x128xf32>
    %174 = math.rsqrt %173 : vector<1x128xf32>
    %175 = arith.mulf %171, %174 : vector<1x128xf32>
    %c0_227 = arith.constant 0 : index
    %c0_228 = arith.constant 0 : index
    %176 = vector.load %arg7[%c0_227, %c0_228] : memref<1x128xf32, #tpu.memory_space<vmem>>, vector<1x128xf32>
    %177 = arith.mulf %164, %175 : vector<1x128xf32>
    %178 = arith.subf %176, %177 : vector<1x128xf32>
    %179 = vector.broadcast %175 : vector<1x128xf32> to vector<128x128xf32>
    %180 = arith.mulf %153, %179 : vector<128x128xf32>
    %181 = vector.broadcast %178 : vector<1x128xf32> to vector<128x128xf32>
    %182 = arith.addf %180, %181 : vector<128x128xf32>
    %cst_229 = arith.constant 0.000000e+00 : f32
    %183 = vector.broadcast %cst_229 : f32 to vector<128x128xf32>
    %184 = arith.maximumf %182, %183 : vector<128x128xf32>
    %185 = vector.shape_cast %184 : vector<128x128xf32> to vector<2x8x8x128xf32>
    %c0_230 = arith.constant 0 : index
    %c2_231 = arith.constant 2 : index
    %c2_232 = arith.constant 2 : index
    %c0_233 = arith.constant 0 : index
    %186 = vector.load %arg16[%c0_230, %c2_231, %c2_232, %c0_233] : memref<2x12x12x128xf32, #tpu.memory_space<vmem>>, vector<2x8x8x128xf32>
    tpu.vector_store %arg16[%c0_230, %c2_231, %c2_232, %c0_233], %185 {strides = array<i32>} : memref<2x12x12x128xf32, #tpu.memory_space<vmem>>, vector<2x8x8x128xf32>,
    %c0_234 = arith.constant 0 : index
    %c0_235 = arith.constant 0 : index
    %c0_236 = arith.constant 0 : index
    %c0_237 = arith.constant 0 : index
    %187 = vector.load %arg16[%c0_234, %c0_235, %c0_236, %c0_237] : memref<2x12x12x128xf32, #tpu.memory_space<vmem>>, vector<2x12x8x128xf32>
    %c0_238 = arith.constant 0 : index
    %c0_239 = arith.constant 0 : index
    %c0_240 = arith.constant 0 : index
    %c0_241 = arith.constant 0 : index
    %188 = vector.load %arg18[%c0_238, %c0_239, %c0_240, %c0_241] : memref<2x12x8x128xf32, #tpu.memory_space<vmem>>, vector<2x12x8x128xf32>
    tpu.vector_store %arg18[%c0_238, %c0_239, %c0_240, %c0_241], %187 {strides = array<i32>} : memref<2x12x8x128xf32, #tpu.memory_space<vmem>>, vector<2x12x8x128xf32>,
    %c0_242 = arith.constant 0 : index
    %c0_243 = arith.constant 0 : index
    %c0_244 = arith.constant 0 : index
    %c0_245 = arith.constant 0 : index
    %189 = vector.load %arg18[%c0_242, %c0_243, %c0_244, %c0_245] : memref<2x12x8x128xf32, #tpu.memory_space<vmem>>, vector<2x8x8x128xf32>
    %190 = vector.shape_cast %189 : vector<2x8x8x128xf32> to vector<128x128xf32>
    %191 = arith.truncf %190 : vector<128x128xf32> to vector<128x128xbf16>
    %c0_246 = arith.constant 0 : index
    %c0_247 = arith.constant 0 : index
    %192 = vector.load %arg19[%c0_246, %c0_247] : memref<128x3200xbf16, #tpu.memory_space<vmem>>, vector<128x128xbf16>
    tpu.vector_store %arg19[%c0_246, %c0_247], %191 {strides = array<i32>} : memref<128x3200xbf16, #tpu.memory_space<vmem>>, vector<128x128xbf16>,
    %c0_248 = arith.constant 0 : index
    %c1_249 = arith.constant 1 : index
    %c0_250 = arith.constant 0 : index
    %c0_251 = arith.constant 0 : index
    %193 = vector.load %arg18[%c0_248, %c1_249, %c0_250, %c0_251] : memref<2x12x8x128xf32, #tpu.memory_space<vmem>>, vector<2x8x8x128xf32>
    %194 = vector.shape_cast %193 : vector<2x8x8x128xf32> to vector<128x128xf32>
    %195 = arith.truncf %194 : vector<128x128xf32> to vector<128x128xbf16>
    %c0_252 = arith.constant 0 : index
    %c128_253 = arith.constant 128 : index
    %196 = vector.load %arg19[%c0_252, %c128_253] : memref<128x3200xbf16, #tpu.memory_space<vmem>>, vector<128x128xbf16>
    tpu.vector_store %arg19[%c0_252, %c128_253], %195 {strides = array<i32>} : memref<128x3200xbf16, #tpu.memory_space<vmem>>, vector<128x128xbf16>,
    %c0_254 = arith.constant 0 : index
    %c2_255 = arith.constant 2 : index
    %c0_256 = arith.constant 0 : index
    %c0_257 = arith.constant 0 : index
    %197 = vector.load %arg18[%c0_254, %c2_255, %c0_256, %c0_257] : memref<2x12x8x128xf32, #tpu.memory_space<vmem>>, vector<2x8x8x128xf32>
    %198 = vector.shape_cast %197 : vector<2x8x8x128xf32> to vector<128x128xf32>
    %199 = arith.truncf %198 : vector<128x128xf32> to vector<128x128xbf16>
    %c0_258 = arith.constant 0 : index
    %c256_259 = arith.constant 256 : index
    %200 = vector.load %arg19[%c0_258, %c256_259] : memref<128x3200xbf16, #tpu.memory_space<vmem>>, vector<128x128xbf16>
    tpu.vector_store %arg19[%c0_258, %c256_259], %199 {strides = array<i32>} : memref<128x3200xbf16, #tpu.memory_space<vmem>>, vector<128x128xbf16>,
    %c0_260 = arith.constant 0 : index
    %c3_261 = arith.constant 3 : index
    %c0_262 = arith.constant 0 : index
    %c0_263 = arith.constant 0 : index
    %201 = vector.load %arg18[%c0_260, %c3_261, %c0_262, %c0_263] : memref<2x12x8x128xf32, #tpu.memory_space<vmem>>, vector<2x8x8x128xf32>
    %202 = vector.shape_cast %201 : vector<2x8x8x128xf32> to vector<128x128xf32>
    %203 = arith.truncf %202 : vector<128x128xf32> to vector<128x128xbf16>
    %c0_264 = arith.constant 0 : index
    %c384_265 = arith.constant 384 : index
    %204 = vector.load %arg19[%c0_264, %c384_265] : memref<128x3200xbf16, #tpu.memory_space<vmem>>, vector<128x128xbf16>
    tpu.vector_store %arg19[%c0_264, %c384_265], %203 {strides = array<i32>} : memref<128x3200xbf16, #tpu.memory_space<vmem>>, vector<128x128xbf16>,
    %c0_266 = arith.constant 0 : index
    %c4_267 = arith.constant 4 : index
    %c0_268 = arith.constant 0 : index
    %c0_269 = arith.constant 0 : index
    %205 = vector.load %arg18[%c0_266, %c4_267, %c0_268, %c0_269] : memref<2x12x8x128xf32, #tpu.memory_space<vmem>>, vector<2x8x8x128xf32>
    %206 = vector.shape_cast %205 : vector<2x8x8x128xf32> to vector<128x128xf32>
    %207 = arith.truncf %206 : vector<128x128xf32> to vector<128x128xbf16>
    %c0_270 = arith.constant 0 : index
    %c512_271 = arith.constant 512 : index
    %208 = vector.load %arg19[%c0_270, %c512_271] : memref<128x3200xbf16, #tpu.memory_space<vmem>>, vector<128x128xbf16>
    tpu.vector_store %arg19[%c0_270, %c512_271], %207 {strides = array<i32>} : memref<128x3200xbf16, #tpu.memory_space<vmem>>, vector<128x128xbf16>,
    %c0_272 = arith.constant 0 : index
    %c0_273 = arith.constant 0 : index
    %c1_274 = arith.constant 1 : index
    %c0_275 = arith.constant 0 : index
    %209 = vector.load %arg16[%c0_272, %c0_273, %c1_274, %c0_275] : memref<2x12x12x128xf32, #tpu.memory_space<vmem>>, vector<2x12x8x128xf32>
    %c0_276 = arith.constant 0 : index
    %c0_277 = arith.constant 0 : index
    %c0_278 = arith.constant 0 : index
    %c0_279 = arith.constant 0 : index
    %210 = vector.load %arg18[%c0_276, %c0_277, %c0_278, %c0_279] : memref<2x12x8x128xf32, #tpu.memory_space<vmem>>, vector<2x12x8x128xf32>
    tpu.vector_store %arg18[%c0_276, %c0_277, %c0_278, %c0_279], %209 {strides = array<i32>} : memref<2x12x8x128xf32, #tpu.memory_space<vmem>>, vector<2x12x8x128xf32>,
    %c0_280 = arith.constant 0 : index
    %c0_281 = arith.constant 0 : index
    %c0_282 = arith.constant 0 : index
    %c0_283 = arith.constant 0 : index
    %211 = vector.load %arg18[%c0_280, %c0_281, %c0_282, %c0_283] : memref<2x12x8x128xf32, #tpu.memory_space<vmem>>, vector<2x8x8x128xf32>
    %212 = vector.shape_cast %211 : vector<2x8x8x128xf32> to vector<128x128xf32>
    %213 = arith.truncf %212 : vector<128x128xf32> to vector<128x128xbf16>
    %c0_284 = arith.constant 0 : index
    %c640_285 = arith.constant 640 : index
    %214 = vector.load %arg19[%c0_284, %c640_285] : memref<128x3200xbf16, #tpu.memory_space<vmem>>, vector<128x128xbf16>
    tpu.vector_store %arg19[%c0_284, %c640_285], %213 {strides = array<i32>} : memref<128x3200xbf16, #tpu.memory_space<vmem>>, vector<128x128xbf16>,
    %c0_286 = arith.constant 0 : index
    %c1_287 = arith.constant 1 : index
    %c0_288 = arith.constant 0 : index
    %c0_289 = arith.constant 0 : index
    %215 = vector.load %arg18[%c0_286, %c1_287, %c0_288, %c0_289] : memref<2x12x8x128xf32, #tpu.memory_space<vmem>>, vector<2x8x8x128xf32>
    %216 = vector.shape_cast %215 : vector<2x8x8x128xf32> to vector<128x128xf32>
    %217 = arith.truncf %216 : vector<128x128xf32> to vector<128x128xbf16>
    %c0_290 = arith.constant 0 : index
    %c768_291 = arith.constant 768 : index
    %218 = vector.load %arg19[%c0_290, %c768_291] : memref<128x3200xbf16, #tpu.memory_space<vmem>>, vector<128x128xbf16>
    tpu.vector_store %arg19[%c0_290, %c768_291], %217 {strides = array<i32>} : memref<128x3200xbf16, #tpu.memory_space<vmem>>, vector<128x128xbf16>,
    %c0_292 = arith.constant 0 : index
    %c2_293 = arith.constant 2 : index
    %c0_294 = arith.constant 0 : index
    %c0_295 = arith.constant 0 : index
    %219 = vector.load %arg18[%c0_292, %c2_293, %c0_294, %c0_295] : memref<2x12x8x128xf32, #tpu.memory_space<vmem>>, vector<2x8x8x128xf32>
    %220 = vector.shape_cast %219 : vector<2x8x8x128xf32> to vector<128x128xf32>
    %221 = arith.truncf %220 : vector<128x128xf32> to vector<128x128xbf16>
    %c0_296 = arith.constant 0 : index
    %c896_297 = arith.constant 896 : index
    %222 = vector.load %arg19[%c0_296, %c896_297] : memref<128x3200xbf16, #tpu.memory_space<vmem>>, vector<128x128xbf16>
    tpu.vector_store %arg19[%c0_296, %c896_297], %221 {strides = array<i32>} : memref<128x3200xbf16, #tpu.memory_space<vmem>>, vector<128x128xbf16>,
    %c0_298 = arith.constant 0 : index
    %c3_299 = arith.constant 3 : index
    %c0_300 = arith.constant 0 : index
    %c0_301 = arith.constant 0 : index
    %223 = vector.load %arg18[%c0_298, %c3_299, %c0_300, %c0_301] : memref<2x12x8x128xf32, #tpu.memory_space<vmem>>, vector<2x8x8x128xf32>
    %224 = vector.shape_cast %223 : vector<2x8x8x128xf32> to vector<128x128xf32>
    %225 = arith.truncf %224 : vector<128x128xf32> to vector<128x128xbf16>
    %c0_302 = arith.constant 0 : index
    %c1024_303 = arith.constant 1024 : index
    %226 = vector.load %arg19[%c0_302, %c1024_303] : memref<128x3200xbf16, #tpu.memory_space<vmem>>, vector<128x128xbf16>
    tpu.vector_store %arg19[%c0_302, %c1024_303], %225 {strides = array<i32>} : memref<128x3200xbf16, #tpu.memory_space<vmem>>, vector<128x128xbf16>,
    %c0_304 = arith.constant 0 : index
    %c4_305 = arith.constant 4 : index
    %c0_306 = arith.constant 0 : index
    %c0_307 = arith.constant 0 : index
    %227 = vector.load %arg18[%c0_304, %c4_305, %c0_306, %c0_307] : memref<2x12x8x128xf32, #tpu.memory_space<vmem>>, vector<2x8x8x128xf32>
    %228 = vector.shape_cast %227 : vector<2x8x8x128xf32> to vector<128x128xf32>
    %229 = arith.truncf %228 : vector<128x128xf32> to vector<128x128xbf16>
    %c0_308 = arith.constant 0 : index
    %c1152_309 = arith.constant 1152 : index
    %230 = vector.load %arg19[%c0_308, %c1152_309] : memref<128x3200xbf16, #tpu.memory_space<vmem>>, vector<128x128xbf16>
    tpu.vector_store %arg19[%c0_308, %c1152_309], %229 {strides = array<i32>} : memref<128x3200xbf16, #tpu.memory_space<vmem>>, vector<128x128xbf16>,
    %c0_310 = arith.constant 0 : index
    %c0_311 = arith.constant 0 : index
    %c2_312 = arith.constant 2 : index
    %c0_313 = arith.constant 0 : index
    %231 = vector.load %arg16[%c0_310, %c0_311, %c2_312, %c0_313] : memref<2x12x12x128xf32, #tpu.memory_space<vmem>>, vector<2x12x8x128xf32>
    %c0_314 = arith.constant 0 : index
    %c0_315 = arith.constant 0 : index
    %c0_316 = arith.constant 0 : index
    %c0_317 = arith.constant 0 : index
    %232 = vector.load %arg18[%c0_314, %c0_315, %c0_316, %c0_317] : memref<2x12x8x128xf32, #tpu.memory_space<vmem>>, vector<2x12x8x128xf32>
    tpu.vector_store %arg18[%c0_314, %c0_315, %c0_316, %c0_317], %231 {strides = array<i32>} : memref<2x12x8x128xf32, #tpu.memory_space<vmem>>, vector<2x12x8x128xf32>,
    %c0_318 = arith.constant 0 : index
    %c0_319 = arith.constant 0 : index
    %c0_320 = arith.constant 0 : index
    %c0_321 = arith.constant 0 : index
    %233 = vector.load %arg18[%c0_318, %c0_319, %c0_320, %c0_321] : memref<2x12x8x128xf32, #tpu.memory_space<vmem>>, vector<2x8x8x128xf32>
    %234 = vector.shape_cast %233 : vector<2x8x8x128xf32> to vector<128x128xf32>
    %235 = arith.truncf %234 : vector<128x128xf32> to vector<128x128xbf16>
    %c0_322 = arith.constant 0 : index
    %c1280_323 = arith.constant 1280 : index
    %236 = vector.load %arg19[%c0_322, %c1280_323] : memref<128x3200xbf16, #tpu.memory_space<vmem>>, vector<128x128xbf16>
    tpu.vector_store %arg19[%c0_322, %c1280_323], %235 {strides = array<i32>} : memref<128x3200xbf16, #tpu.memory_space<vmem>>, vector<128x128xbf16>,
    %c0_324 = arith.constant 0 : index
    %c1_325 = arith.constant 1 : index
    %c0_326 = arith.constant 0 : index
    %c0_327 = arith.constant 0 : index
    %237 = vector.load %arg18[%c0_324, %c1_325, %c0_326, %c0_327] : memref<2x12x8x128xf32, #tpu.memory_space<vmem>>, vector<2x8x8x128xf32>
    %238 = vector.shape_cast %237 : vector<2x8x8x128xf32> to vector<128x128xf32>
    %239 = arith.truncf %238 : vector<128x128xf32> to vector<128x128xbf16>
    %c0_328 = arith.constant 0 : index
    %c1408_329 = arith.constant 1408 : index
    %240 = vector.load %arg19[%c0_328, %c1408_329] : memref<128x3200xbf16, #tpu.memory_space<vmem>>, vector<128x128xbf16>
    tpu.vector_store %arg19[%c0_328, %c1408_329], %239 {strides = array<i32>} : memref<128x3200xbf16, #tpu.memory_space<vmem>>, vector<128x128xbf16>,
    %c0_330 = arith.constant 0 : index
    %c2_331 = arith.constant 2 : index
    %c0_332 = arith.constant 0 : index
    %c0_333 = arith.constant 0 : index
    %241 = vector.load %arg18[%c0_330, %c2_331, %c0_332, %c0_333] : memref<2x12x8x128xf32, #tpu.memory_space<vmem>>, vector<2x8x8x128xf32>
    %242 = vector.shape_cast %241 : vector<2x8x8x128xf32> to vector<128x128xf32>
    %243 = arith.truncf %242 : vector<128x128xf32> to vector<128x128xbf16>
    %c0_334 = arith.constant 0 : index
    %c1536_335 = arith.constant 1536 : index
    %244 = vector.load %arg19[%c0_334, %c1536_335] : memref<128x3200xbf16, #tpu.memory_space<vmem>>, vector<128x128xbf16>
    tpu.vector_store %arg19[%c0_334, %c1536_335], %243 {strides = array<i32>} : memref<128x3200xbf16, #tpu.memory_space<vmem>>, vector<128x128xbf16>,
    %c0_336 = arith.constant 0 : index
    %c3_337 = arith.constant 3 : index
    %c0_338 = arith.constant 0 : index
    %c0_339 = arith.constant 0 : index
    %245 = vector.load %arg18[%c0_336, %c3_337, %c0_338, %c0_339] : memref<2x12x8x128xf32, #tpu.memory_space<vmem>>, vector<2x8x8x128xf32>
    %246 = vector.shape_cast %245 : vector<2x8x8x128xf32> to vector<128x128xf32>
    %247 = arith.truncf %246 : vector<128x128xf32> to vector<128x128xbf16>
    %c0_340 = arith.constant 0 : index
    %c1664_341 = arith.constant 1664 : index
    %248 = vector.load %arg19[%c0_340, %c1664_341] : memref<128x3200xbf16, #tpu.memory_space<vmem>>, vector<128x128xbf16>
    tpu.vector_store %arg19[%c0_340, %c1664_341], %247 {strides = array<i32>} : memref<128x3200xbf16, #tpu.memory_space<vmem>>, vector<128x128xbf16>,
    %c0_342 = arith.constant 0 : index
    %c4_343 = arith.constant 4 : index
    %c0_344 = arith.constant 0 : index
    %c0_345 = arith.constant 0 : index
    %249 = vector.load %arg18[%c0_342, %c4_343, %c0_344, %c0_345] : memref<2x12x8x128xf32, #tpu.memory_space<vmem>>, vector<2x8x8x128xf32>
    %250 = vector.shape_cast %249 : vector<2x8x8x128xf32> to vector<128x128xf32>
    %251 = arith.truncf %250 : vector<128x128xf32> to vector<128x128xbf16>
    %c0_346 = arith.constant 0 : index
    %c1792_347 = arith.constant 1792 : index
    %252 = vector.load %arg19[%c0_346, %c1792_347] : memref<128x3200xbf16, #tpu.memory_space<vmem>>, vector<128x128xbf16>
    tpu.vector_store %arg19[%c0_346, %c1792_347], %251 {strides = array<i32>} : memref<128x3200xbf16, #tpu.memory_space<vmem>>, vector<128x128xbf16>,
    %c0_348 = arith.constant 0 : index
    %c0_349 = arith.constant 0 : index
    %c3_350 = arith.constant 3 : index
    %c0_351 = arith.constant 0 : index
    %253 = vector.load %arg16[%c0_348, %c0_349, %c3_350, %c0_351] : memref<2x12x12x128xf32, #tpu.memory_space<vmem>>, vector<2x12x8x128xf32>
    %c0_352 = arith.constant 0 : index
    %c0_353 = arith.constant 0 : index
    %c0_354 = arith.constant 0 : index
    %c0_355 = arith.constant 0 : index
    %254 = vector.load %arg18[%c0_352, %c0_353, %c0_354, %c0_355] : memref<2x12x8x128xf32, #tpu.memory_space<vmem>>, vector<2x12x8x128xf32>
    tpu.vector_store %arg18[%c0_352, %c0_353, %c0_354, %c0_355], %253 {strides = array<i32>} : memref<2x12x8x128xf32, #tpu.memory_space<vmem>>, vector<2x12x8x128xf32>,
    %c0_356 = arith.constant 0 : index
    %c0_357 = arith.constant 0 : index
    %c0_358 = arith.constant 0 : index
    %c0_359 = arith.constant 0 : index
    %255 = vector.load %arg18[%c0_356, %c0_357, %c0_358, %c0_359] : memref<2x12x8x128xf32, #tpu.memory_space<vmem>>, vector<2x8x8x128xf32>
    %256 = vector.shape_cast %255 : vector<2x8x8x128xf32> to vector<128x128xf32>
    %257 = arith.truncf %256 : vector<128x128xf32> to vector<128x128xbf16>
    %c0_360 = arith.constant 0 : index
    %c1920 = arith.constant 1920 : index
    %258 = vector.load %arg19[%c0_360, %c1920] : memref<128x3200xbf16, #tpu.memory_space<vmem>>, vector<128x128xbf16>
    tpu.vector_store %arg19[%c0_360, %c1920], %257 {strides = array<i32>} : memref<128x3200xbf16, #tpu.memory_space<vmem>>, vector<128x128xbf16>,
    %c0_361 = arith.constant 0 : index
    %c1_362 = arith.constant 1 : index
    %c0_363 = arith.constant 0 : index
    %c0_364 = arith.constant 0 : index
    %259 = vector.load %arg18[%c0_361, %c1_362, %c0_363, %c0_364] : memref<2x12x8x128xf32, #tpu.memory_space<vmem>>, vector<2x8x8x128xf32>
    %260 = vector.shape_cast %259 : vector<2x8x8x128xf32> to vector<128x128xf32>
    %261 = arith.truncf %260 : vector<128x128xf32> to vector<128x128xbf16>
    %c0_365 = arith.constant 0 : index
    %c2048 = arith.constant 2048 : index
    %262 = vector.load %arg19[%c0_365, %c2048] : memref<128x3200xbf16, #tpu.memory_space<vmem>>, vector<128x128xbf16>
    tpu.vector_store %arg19[%c0_365, %c2048], %261 {strides = array<i32>} : memref<128x3200xbf16, #tpu.memory_space<vmem>>, vector<128x128xbf16>,
    %c0_366 = arith.constant 0 : index
    %c2_367 = arith.constant 2 : index
    %c0_368 = arith.constant 0 : index
    %c0_369 = arith.constant 0 : index
    %263 = vector.load %arg18[%c0_366, %c2_367, %c0_368, %c0_369] : memref<2x12x8x128xf32, #tpu.memory_space<vmem>>, vector<2x8x8x128xf32>
    %264 = vector.shape_cast %263 : vector<2x8x8x128xf32> to vector<128x128xf32>
    %265 = arith.truncf %264 : vector<128x128xf32> to vector<128x128xbf16>
    %c0_370 = arith.constant 0 : index
    %c2176 = arith.constant 2176 : index
    %266 = vector.load %arg19[%c0_370, %c2176] : memref<128x3200xbf16, #tpu.memory_space<vmem>>, vector<128x128xbf16>
    tpu.vector_store %arg19[%c0_370, %c2176], %265 {strides = array<i32>} : memref<128x3200xbf16, #tpu.memory_space<vmem>>, vector<128x128xbf16>,
    %c0_371 = arith.constant 0 : index
    %c3_372 = arith.constant 3 : index
    %c0_373 = arith.constant 0 : index
    %c0_374 = arith.constant 0 : index
    %267 = vector.load %arg18[%c0_371, %c3_372, %c0_373, %c0_374] : memref<2x12x8x128xf32, #tpu.memory_space<vmem>>, vector<2x8x8x128xf32>
    %268 = vector.shape_cast %267 : vector<2x8x8x128xf32> to vector<128x128xf32>
    %269 = arith.truncf %268 : vector<128x128xf32> to vector<128x128xbf16>
    %c0_375 = arith.constant 0 : index
    %c2304 = arith.constant 2304 : index
    %270 = vector.load %arg19[%c0_375, %c2304] : memref<128x3200xbf16, #tpu.memory_space<vmem>>, vector<128x128xbf16>
    tpu.vector_store %arg19[%c0_375, %c2304], %269 {strides = array<i32>} : memref<128x3200xbf16, #tpu.memory_space<vmem>>, vector<128x128xbf16>,
    %c0_376 = arith.constant 0 : index
    %c4_377 = arith.constant 4 : index
    %c0_378 = arith.constant 0 : index
    %c0_379 = arith.constant 0 : index
    %271 = vector.load %arg18[%c0_376, %c4_377, %c0_378, %c0_379] : memref<2x12x8x128xf32, #tpu.memory_space<vmem>>, vector<2x8x8x128xf32>
    %272 = vector.shape_cast %271 : vector<2x8x8x128xf32> to vector<128x128xf32>
    %273 = arith.truncf %272 : vector<128x128xf32> to vector<128x128xbf16>
    %c0_380 = arith.constant 0 : index
    %c2432 = arith.constant 2432 : index
    %274 = vector.load %arg19[%c0_380, %c2432] : memref<128x3200xbf16, #tpu.memory_space<vmem>>, vector<128x128xbf16>
    tpu.vector_store %arg19[%c0_380, %c2432], %273 {strides = array<i32>} : memref<128x3200xbf16, #tpu.memory_space<vmem>>, vector<128x128xbf16>,
    %c0_381 = arith.constant 0 : index
    %c0_382 = arith.constant 0 : index
    %c4_383 = arith.constant 4 : index
    %c0_384 = arith.constant 0 : index
    %275 = vector.load %arg16[%c0_381, %c0_382, %c4_383, %c0_384] : memref<2x12x12x128xf32, #tpu.memory_space<vmem>>, vector<2x12x8x128xf32>
    %c0_385 = arith.constant 0 : index
    %c0_386 = arith.constant 0 : index
    %c0_387 = arith.constant 0 : index
    %c0_388 = arith.constant 0 : index
    %276 = vector.load %arg18[%c0_385, %c0_386, %c0_387, %c0_388] : memref<2x12x8x128xf32, #tpu.memory_space<vmem>>, vector<2x12x8x128xf32>
    tpu.vector_store %arg18[%c0_385, %c0_386, %c0_387, %c0_388], %275 {strides = array<i32>} : memref<2x12x8x128xf32, #tpu.memory_space<vmem>>, vector<2x12x8x128xf32>,
    %c0_389 = arith.constant 0 : index
    %c0_390 = arith.constant 0 : index
    %c0_391 = arith.constant 0 : index
    %c0_392 = arith.constant 0 : index
    %277 = vector.load %arg18[%c0_389, %c0_390, %c0_391, %c0_392] : memref<2x12x8x128xf32, #tpu.memory_space<vmem>>, vector<2x8x8x128xf32>
    %278 = vector.shape_cast %277 : vector<2x8x8x128xf32> to vector<128x128xf32>
    %279 = arith.truncf %278 : vector<128x128xf32> to vector<128x128xbf16>
    %c0_393 = arith.constant 0 : index
    %c2560 = arith.constant 2560 : index
    %280 = vector.load %arg19[%c0_393, %c2560] : memref<128x3200xbf16, #tpu.memory_space<vmem>>, vector<128x128xbf16>
    tpu.vector_store %arg19[%c0_393, %c2560], %279 {strides = array<i32>} : memref<128x3200xbf16, #tpu.memory_space<vmem>>, vector<128x128xbf16>,
    %c0_394 = arith.constant 0 : index
    %c1_395 = arith.constant 1 : index
    %c0_396 = arith.constant 0 : index
    %c0_397 = arith.constant 0 : index
    %281 = vector.load %arg18[%c0_394, %c1_395, %c0_396, %c0_397] : memref<2x12x8x128xf32, #tpu.memory_space<vmem>>, vector<2x8x8x128xf32>
    %282 = vector.shape_cast %281 : vector<2x8x8x128xf32> to vector<128x128xf32>
    %283 = arith.truncf %282 : vector<128x128xf32> to vector<128x128xbf16>
    %c0_398 = arith.constant 0 : index
    %c2688 = arith.constant 2688 : index
    %284 = vector.load %arg19[%c0_398, %c2688] : memref<128x3200xbf16, #tpu.memory_space<vmem>>, vector<128x128xbf16>
    tpu.vector_store %arg19[%c0_398, %c2688], %283 {strides = array<i32>} : memref<128x3200xbf16, #tpu.memory_space<vmem>>, vector<128x128xbf16>,
    %c0_399 = arith.constant 0 : index
    %c2_400 = arith.constant 2 : index
    %c0_401 = arith.constant 0 : index
    %c0_402 = arith.constant 0 : index
    %285 = vector.load %arg18[%c0_399, %c2_400, %c0_401, %c0_402] : memref<2x12x8x128xf32, #tpu.memory_space<vmem>>, vector<2x8x8x128xf32>
    %286 = vector.shape_cast %285 : vector<2x8x8x128xf32> to vector<128x128xf32>
    %287 = arith.truncf %286 : vector<128x128xf32> to vector<128x128xbf16>
    %c0_403 = arith.constant 0 : index
    %c2816 = arith.constant 2816 : index
    %288 = vector.load %arg19[%c0_403, %c2816] : memref<128x3200xbf16, #tpu.memory_space<vmem>>, vector<128x128xbf16>
    tpu.vector_store %arg19[%c0_403, %c2816], %287 {strides = array<i32>} : memref<128x3200xbf16, #tpu.memory_space<vmem>>, vector<128x128xbf16>,
    %c0_404 = arith.constant 0 : index
    %c3_405 = arith.constant 3 : index
    %c0_406 = arith.constant 0 : index
    %c0_407 = arith.constant 0 : index
    %289 = vector.load %arg18[%c0_404, %c3_405, %c0_406, %c0_407] : memref<2x12x8x128xf32, #tpu.memory_space<vmem>>, vector<2x8x8x128xf32>
    %290 = vector.shape_cast %289 : vector<2x8x8x128xf32> to vector<128x128xf32>
    %291 = arith.truncf %290 : vector<128x128xf32> to vector<128x128xbf16>
    %c0_408 = arith.constant 0 : index
    %c2944 = arith.constant 2944 : index
    %292 = vector.load %arg19[%c0_408, %c2944] : memref<128x3200xbf16, #tpu.memory_space<vmem>>, vector<128x128xbf16>
    tpu.vector_store %arg19[%c0_408, %c2944], %291 {strides = array<i32>} : memref<128x3200xbf16, #tpu.memory_space<vmem>>, vector<128x128xbf16>,
    %c0_409 = arith.constant 0 : index
    %c4_410 = arith.constant 4 : index
    %c0_411 = arith.constant 0 : index
    %c0_412 = arith.constant 0 : index
    %293 = vector.load %arg18[%c0_409, %c4_410, %c0_411, %c0_412] : memref<2x12x8x128xf32, #tpu.memory_space<vmem>>, vector<2x8x8x128xf32>
    %294 = vector.shape_cast %293 : vector<2x8x8x128xf32> to vector<128x128xf32>
    %295 = arith.truncf %294 : vector<128x128xf32> to vector<128x128xbf16>
    %c0_413 = arith.constant 0 : index
    %c3072 = arith.constant 3072 : index
    %296 = vector.load %arg19[%c0_413, %c3072] : memref<128x3200xbf16, #tpu.memory_space<vmem>>, vector<128x128xbf16>
    tpu.vector_store %arg19[%c0_413, %c3072], %295 {strides = array<i32>} : memref<128x3200xbf16, #tpu.memory_space<vmem>>, vector<128x128xbf16>,
    %c0_414 = arith.constant 0 : index
    %c0_415 = arith.constant 0 : index
    %297 = vector.load %arg19[%c0_414, %c0_415] : memref<128x3200xbf16, #tpu.memory_space<vmem>>, vector<128x3200xbf16>
    %c0_416 = arith.constant 0 : index
    %c0_417 = arith.constant 0 : index
    %298 = vector.load %arg8[%c0_416, %c0_417] : memref<3200x128xbf16, #tpu.memory_space<vmem>>, vector<3200x128xbf16>
    %cst_418 = arith.constant dense<0.000000e+00> : vector<128x128xf32>
    %299 = tpu.matmul %297, %298, %cst_418 {dimension_numbers = #tpu.dot_dimension_numbers<[1], [0], [0], [1], [0, 0, 1, 1], [], []>} : vector<128x3200xbf16>, vector<3200x128xbf16>, vector<128x128xf32> -> vector<128x128xf32>
    %c0_419 = arith.constant 0 : index
    %c0_420 = arith.constant 0 : index
    %300 = vector.load %arg9[%c0_419, %c0_420] : memref<1x128xf32, #tpu.memory_space<vmem>>, vector<1x128xf32>
    %301 = vector.broadcast %300 : vector<1x128xf32> to vector<128x128xf32>
    %302 = arith.addf %299, %301 : vector<128x128xf32>
    %cst_421 = arith.constant dense<0.000000e+00> : vector<8x128xf32>
    %303 = tpu.matmul %16, %302, %cst_421 {dimension_numbers = #tpu.dot_dimension_numbers<[1], [0], [0], [1], [0, 0, 1, 1], [], []>} : vector<8x128xf32>, vector<128x128xf32>, vector<8x128xf32> -> vector<8x128xf32>
    %c0_422 = arith.constant 0 : index
    %c0_423 = arith.constant 0 : index
    %304 = vector.load %arg3[%c0_422, %c0_423] : memref<128x128xf32, #tpu.memory_space<vmem>>, vector<128x128xf32>
    %cst_424 = arith.constant dense<0.000000e+00> : vector<8x128xf32>
    %305 = tpu.matmul %303, %304, %cst_424 {dimension_numbers = #tpu.dot_dimension_numbers<[1], [0], [0], [1], [0, 0, 1, 1], [], []>} : vector<8x128xf32>, vector<128x128xf32>, vector<8x128xf32> -> vector<8x128xf32>
    %306 = vector.extract_strided_slice %305 {offsets = [0, 0], sizes = [1, 128], strides = [1, 1]} : vector<8x128xf32> to vector<1x128xf32>
    %307 = arith.mulf %302, %302 : vector<128x128xf32>
    %cst_425 = arith.constant dense<0.000000e+00> : vector<8x128xf32>
    %308 = tpu.matmul %16, %307, %cst_425 {dimension_numbers = #tpu.dot_dimension_numbers<[1], [0], [0], [1], [0, 0, 1, 1], [], []>} : vector<8x128xf32>, vector<128x128xf32>, vector<8x128xf32> -> vector<8x128xf32>
    %c0_426 = arith.constant 0 : index
    %c0_427 = arith.constant 0 : index
    %309 = vector.load %arg3[%c0_426, %c0_427] : memref<128x128xf32, #tpu.memory_space<vmem>>, vector<128x128xf32>
    %cst_428 = arith.constant dense<0.000000e+00> : vector<8x128xf32>
    %310 = tpu.matmul %308, %309, %cst_428 {dimension_numbers = #tpu.dot_dimension_numbers<[1], [0], [0], [1], [0, 0, 1, 1], [], []>} : vector<8x128xf32>, vector<128x128xf32>, vector<8x128xf32> -> vector<8x128xf32>
    %311 = vector.extract_strided_slice %310 {offsets = [0, 0], sizes = [1, 128], strides = [1, 1]} : vector<8x128xf32> to vector<1x128xf32>
    %cst_429 = arith.constant 9.765625E-4 : f32
    %312 = vector.broadcast %cst_429 : f32 to vector<1x128xf32>
    %313 = arith.mulf %306, %312 : vector<1x128xf32>
    %cst_430 = arith.constant 9.765625E-4 : f32
    %314 = vector.broadcast %cst_430 : f32 to vector<1x128xf32>
    %315 = arith.mulf %311, %314 : vector<1x128xf32>
    %316 = arith.mulf %313, %313 : vector<1x128xf32>
    %317 = arith.subf %315, %316 : vector<1x128xf32>
    %cst_431 = arith.constant 0.000000e+00 : f32
    %318 = vector.broadcast %cst_431 : f32 to vector<1x128xf32>
    %319 = arith.maximumf %317, %318 : vector<1x128xf32>
    %c0_432 = arith.constant 0 : index
    %c0_433 = arith.constant 0 : index
    %320 = vector.load %arg10[%c0_432, %c0_433] : memref<1x128xf32, #tpu.memory_space<vmem>>, vector<1x128xf32>
    %cst_434 = arith.constant 9.99999974E-6 : f32
    %321 = vector.broadcast %cst_434 : f32 to vector<1x128xf32>
    %322 = arith.addf %319, %321 : vector<1x128xf32>
    %323 = math.rsqrt %322 : vector<1x128xf32>
    %324 = arith.mulf %320, %323 : vector<1x128xf32>
    %c0_435 = arith.constant 0 : index
    %c0_436 = arith.constant 0 : index
    %325 = vector.load %arg11[%c0_435, %c0_436] : memref<1x128xf32, #tpu.memory_space<vmem>>, vector<1x128xf32>
    %326 = arith.mulf %313, %324 : vector<1x128xf32>
    %327 = arith.subf %325, %326 : vector<1x128xf32>
    %328 = vector.broadcast %324 : vector<1x128xf32> to vector<128x128xf32>
    %329 = arith.mulf %302, %328 : vector<128x128xf32>
    %330 = vector.broadcast %327 : vector<1x128xf32> to vector<128x128xf32>
    %331 = arith.addf %329, %330 : vector<128x128xf32>
    %cst_437 = arith.constant 0.000000e+00 : f32
    %332 = vector.broadcast %cst_437 : f32 to vector<128x128xf32>
    %333 = arith.maximumf %331, %332 : vector<128x128xf32>
    %334 = arith.truncf %333 : vector<128x128xf32> to vector<128x128xbf16>
    %c0_438 = arith.constant 0 : index
    %c0_439 = arith.constant 0 : index
    %335 = vector.load %arg12[%c0_438, %c0_439] : memref<128x128xbf16, #tpu.memory_space<vmem>>, vector<128x128xbf16>
    %cst_440 = arith.constant dense<0.000000e+00> : vector<128x128xf32>
    %336 = tpu.matmul %334, %335, %cst_440 {dimension_numbers = #tpu.dot_dimension_numbers<[1], [0], [0], [1], [0, 0, 1, 1], [], []>} : vector<128x128xbf16>, vector<128x128xbf16>, vector<128x128xf32> -> vector<128x128xf32>
    %c0_441 = arith.constant 0 : index
    %c0_442 = arith.constant 0 : index
    %337 = vector.load %arg13[%c0_441, %c0_442] : memref<1x128xf32, #tpu.memory_space<vmem>>, vector<1x128xf32>
    %338 = vector.broadcast %337 : vector<1x128xf32> to vector<128x128xf32>
    %339 = arith.addf %336, %338 : vector<128x128xf32>
    %c0_443 = arith.constant 0 : index
    %c0_444 = arith.constant 0 : index
    %340 = vector.load %arg14[%c0_443, %c0_444] : memref<128x128xf32, #tpu.memory_space<vmem>>, vector<128x128xf32>
    tpu.vector_store %arg14[%c0_443, %c0_444], %339 {strides = array<i32>} : memref<128x128xf32, #tpu.memory_space<vmem>>, vector<128x128xf32>,
    return
  }
}

</mosaic_0001>

<bundles_post_ra>
// kernel: tpu_custom_call.1
= control target key start
LH: loop header
LB: loop body
LE: loop exit
PB: predicated region body
PF: predicated region fallthrough
CT: control target
= control target key end

     0   :  { %19 = vsyncpa [#allocation8], 0  ;;  %s14552_s0 = inlined_call_operand.vmem [shape: s32[128,160], index: 0, kind: input, shape index: {}]   ;;  %s14553_s1 = inlined_call_operand.vmem [shape: s32[1,160], index: 1, kind: input, shape index: {}]   ;;  %s14554_s2 = inlined_call_operand.vmem [shape: bf16[160,64], index: 2, kind: input, shape index: {}]   ;;  %s14555_s3 = inlined_call_operand.vmem [shape: f32[128,128], index: 3, kind: input, shape index: {}]   ;;  %s14556_s4 = inlined_call_operand.hbm [shape: bf16[1920,128], index: 4, kind: input, shape index: {}]   ;;  %s14557_s5 = inlined_call_operand.vmem [shape: f32[1,128], index: 5, kind: input, shape index: {}]   ;;  %s14558_s6 = inlined_call_operand.vmem [shape: f32[1,128], index: 6, kind: input, shape index: {}]   ;;  %s14559_s7 = inlined_call_operand.vmem [shape: f32[1,128], index: 7, kind: input, shape index: {}]   ;;  %s14560_s8 = inlined_call_operand.hbm [shape: bf16[3200,128], index: 8, kind: input, shape index: {}]   ;;  %s14561_s9 = inlined_call_operand.vmem [shape: f32[1,128], index: 9, kind: input, shape index: {}]   ;;  %s14562_s10 = inlined_call_operand.vmem [shape: f32[1,128], index: 10, kind: input, shape index: {}]   ;;  %s14563_s11 = inlined_call_operand.vmem [shape: f32[1,128], index: 11, kind: input, shape index: {}]   ;;  %s14564_s12 = inlined_call_operand.vmem [shape: bf16[128,128], index: 12, kind: input, shape index: {}]   ;;  %s14565_s13 = inlined_call_operand.vmem [shape: f32[1,128], index: 13, kind: input, shape index: {}]   ;;  %s14566_s14 = inlined_call_operand.hbm [shape: f32[128,128], index: 14, kind: output, shape index: {}]  }
   0x1   :  { %20 = vsyncpa [#allocation11], 0 }
   0x2   :  { %21 = vsyncpa [#allocation9], 0  ;;  %s12019_s29 = smov [#allocation7]   ;;  %s11947_s17 = scalar_lea.hbm %s14556_s4, 15360 }
   0x3   :  { %s35_s30 = sshll.u32 %s12019_s29, 4  ;;  %p11948_p0 = scmp.ne.s32.totalorder %s14556_s4, %s11947_s17  ;;  %s36_s30 = int_to_ptr.vmem [resolvable:$true] %s35_s30 }
   0x4   :  { %p11951_p1 = scmp.lt.u32.totalorder %s11947_s17, %s14556_s4 }
   0x6   :  { %p11953_p2 = pnand %p11951_p1, %p11948_p0 }
   0x8   :  { %11956 = shalt.err (!%p11953_p2)
}
   0x9   :  { %s11957_s22 = scalar_lea.vmem %s36_s30, 15360  ;;  %p11962_p4 = scmp.lt.s32.totalorder %s36_s30, %s36_s30 }
   0xa   :  { %p11958_p3 = scmp.ne.s32.totalorder %s36_s30, %s11957_s22  ;;  %p11963_p5 = scmp.lt.s32.totalorder %s11957_s22, %s11957_s22 }
   0xc   :  { %p11964_p6 = por %p11963_p5, %p11962_p4 }
   0xe   :  { %p11965_p7 = pnand %p11964_p6, %p11958_p3 }
  0x10   :  { %11968 = shalt.err (!%p11965_p7)
}
  0x11   :  { %s12020_s23 = smov 64   ;;  %s12021_s24 = smov 4  }
  0x12   :  { %41 = dma.hbm_to_vmem [thread:$0]  %s14556_s4, 15360, %s36_s30, [#allocation8], %s12020_s23, %s12020_s23, %s12021_s24  }
  0x13   :  { %s12022_s27 = smov [#allocation10]   ;;  %s11969_s16 = scalar_lea.hbm %s14560_s8, 25600 }
  0x14   :  { %s53_s28 = sshll.u32 %s12022_s27, 4  ;;  %p11970_p8 = scmp.ne.s32.totalorder %s14560_s8, %s11969_s16  ;;  %s54_s28 = int_to_ptr.vmem [resolvable:$true] %s53_s28 }
  0x15   :  { %p11973_p9 = scmp.lt.u32.totalorder %s11969_s16, %s14560_s8 }
  0x17   :  { %p11975_p10 = pnand %p11973_p9, %p11970_p8 }
  0x19   :  { %11978 = shalt.err (!%p11975_p10)
}
  0x1a   :  { %s11979_s21 = scalar_lea.vmem %s54_s28, 25600  ;;  %p11984_p12 = scmp.lt.s32.totalorder %s54_s28, %s54_s28 }
  0x1b   :  { %p11980_p11 = scmp.ne.s32.totalorder %s54_s28, %s11979_s21  ;;  %p11985_p13 = scmp.lt.s32.totalorder %s11979_s21, %s11979_s21 }
  0x1d   :  { %p11986_p0 = por %p11985_p13, %p11984_p12 }
  0x1f   :  { %p11987_p1 = pnand %p11986_p0, %p11980_p11 }
  0x21   :  { %11990 = shalt.err (!%p11987_p1)
}
  0x22   :  { %59 = dma.hbm_to_vmem [thread:$0]  %s14560_s8, 25600, %s54_s28, [#allocation11], %s12020_s23, %s12020_s23, %s12021_s24  }
  0x23   :  { %12013 = dma.done.wait [#allocation8], 15360  }
  0x24   :  { %12014 = vsyncadd [#allocation8], 4294951936 }
  0x25   :  { %12015 = dma.done.wait [#allocation11], 25600  }
  0x26   :  { %12016 = vsyncadd [#allocation11], 4294941696  ;;  %v12023_v0 = vmov 0   ;;  %v12024_v1 = vmov 0.0   ;;  %vm77_vm0 = vcmask 523264   ;;  %vm97_vm1 = vcmask 517120  }
  0x27   :  { %438 = vmatprep.subr.bf16.mxu0 %v12023_v0  ;;  %130 = vst [vmem:[#allocation3] sm:$0xff] %v12024_v1  ;;  %131 = vst [vmem:[#allocation3 + $0x8] sm:$0xf] %v12024_v1  ;;  %v213_v2 = vlaneseq  ;;  %v11599_v3 = vld [vmem:[%s14554_s2] sm:$0xff]   ;;  %v11600_v4 = vld [vmem:[%s14554_s2 + $0x8] sm:$0xff]   ;;  %vm413_vm4 = vcmask 261120  }
  0x28   :  { %132 = vst [vmem:[#allocation3 + $0x10] sm:$0xff] %v12024_v1  ;;  %133 = vst [vmem:[#allocation3 + $0x18] sm:$0xf] %v12024_v1  ;;  %439 = vmatpush1.bf16.msra.mxu0 %v11599_v3  ;;  %v11601_v6 = vld [vmem:[%s14554_s2 + $0x10] sm:$0xff]   ;;  %v11602_v8 = vld [vmem:[%s14554_s2 + $0x18] sm:$0xff]  }
  0x29   :  { %134 = vst [vmem:[#allocation3 + $0xc0] sm:$0xff] %v12024_v1  ;;  %135 = vst [vmem:[#allocation3 + $0xc8] sm:$0xf] %v12024_v1  ;;  %440 = vmatprep.subr.bf16.mxu0 %v12023_v0  ;;  %v214_v5 = vshrl.u32 %v213_v2, 7  ;;  %v181_v9 = vld [vmem:[%s14552_s0 + $0x8] sm:$0xff]  ;;  %v183_v10 = vld [vmem:[%s14552_s0 + $0x18] sm:$0xff] }
  0x2a   :  { %136 = vst [vmem:[#allocation3 + $0xd0] sm:$0xff] %v12024_v1  ;;  %137 = vst [vmem:[#allocation3 + $0xd8] sm:$0xf] %v12024_v1  ;;  %v212_v11 = vld [vmem:[%s14553_s1] sm:$0x3]  ;;  %v185_v16 = vld [vmem:[%s14552_s0 + $0x28] sm:$0xff] }
  0x2b   :  { %139 = vst [vmem:[#allocation3 + $0xa0] sm:$0xff] %v12024_v1  ;;  %140 = vst [vmem:[#allocation3 + $0xa8] sm:$0xf] %v12024_v1  ;;  %v219_v7 = vsub.s32 1, %v214_v5  ;;  %v11603_v13 = vld [vmem:[%s14554_s2 + $0x20] sm:$0xff]   ;;  %v187_v17 = vld [vmem:[%s14552_s0 + $0x38] sm:$0xff] }
  0x2c   :  { %141 = vst [vmem:[#allocation3 + $0xb0] sm:$0xff] %v12024_v1  ;;  %142 = vst [vmem:[#allocation3 + $0xb8] sm:$0xf] %v12024_v1  ;;  %441 = vmatpush1.bf16.msra.mxu0 %v11600_v4  ;;  %v189_v19 = vld [vmem:[%s14552_s0 + $0x48] sm:$0xff]  ;;  %v191_v20 = vld [vmem:[%s14552_s0 + $0x58] sm:$0xff]  ;;  %v12331_v26 = vsub.s32 0, %v214_v5 }
  0x2d   :  { %143 = vst [vmem:[#allocation3 + $0x160] sm:$0xff] %v12024_v1  ;;  %144 = vst [vmem:[#allocation3 + $0x168] sm:$0xf] %v12024_v1  ;;  %442 = vmatprep.subr.bf16.mxu0 %v12023_v0  ;;  %v12288_v12 = vrot.slane %v212_v11, %v219_v7  ;;  %v193_v21 = vld [vmem:[%s14552_s0 + $0x68] sm:$0xff]  ;;  %v195_v22 = vld [vmem:[%s14552_s0 + $0x78] sm:$0xff] }
  0x2e   :  { %145 = vst [vmem:[#allocation3 + $0x170] sm:$0xff] %v12024_v1  ;;  %146 = vst [vmem:[#allocation3 + $0x178] sm:$0xf] %v12024_v1  ;;  %v11604_v23 = vld [vmem:[%s14554_s2 + $0x28] sm:$0xff]   ;;  %v199_v25 = vld [vmem:[%s14552_s0 + $0x98] sm:$0xff]  ;;  %v12378_v42 = vrot.slane %v212_v11, %v12331_v26 }
  0x2f   :  { %148 = vst [vmem:[#allocation3 + $0x20] sm:$0x3] %v12024_v1  ;;  %149 = vst [vmem:[#allocation3 + $0x30] sm:$0x3] %v12024_v1  ;;  %vm222_vm2 = vcmp.eq.s32.totalorder %v181_v9, %v12288_v12  ;;  %vm224_vm3 = vcmp.eq.s32.totalorder %v183_v10, %v12288_v12  ;;  %vm226_vm5 = vcmp.eq.s32.totalorder %v185_v16, %v12288_v12  ;;  %v197_v24 = vld [vmem:[%s14552_s0 + $0x88] sm:$0xff]  ;;  %v203_v28 = vld [vmem:[%s14552_s0 + $0xb8] sm:$0xff] }
  0x30   :  { %150 = vst [vmem:[#allocation3 + $0x40] sm:$0x3] %v12024_v1  ;;  %151 = vst [vmem:[#allocation3 + $0x50] sm:$0x3] %v12024_v1  ;;  %443 = vmatpush1.bf16.msra.mxu0 %v11601_v6  ;;  %v9166_v14 = vsel %vm222_vm2, 1.0, %v12024_v1  ;;  %v9168_v15 = vsel %vm224_vm3, 1.0, %v12024_v1  ;;  %vm228_vm6 = vcmp.eq.s32.totalorder %v187_v17, %v12288_v12  ;;  %vm230_vm7 = vcmp.eq.s32.totalorder %v189_v19, %v12288_v12 }
  0x31   :  { %152 = vst [vmem:[#allocation3 + $0x60] sm:$0x3] %v12024_v1  ;;  %153 = vst [vmem:[#allocation3 + $0x70] sm:$0x3] %v12024_v1  ;;  %444 = vmatprep.subr.bf16.mxu0 %v12023_v0  ;;  %v318_v18 = vpack.c.bf16 %v9168_v15, %v9166_v14  ;;  %vm232_vm8 = vcmp.eq.s32.totalorder %v191_v20, %v12288_v12  ;;  %vm234_vm9 = vcmp.eq.s32.totalorder %v193_v21, %v12288_v12  ;;  %v201_v27 = vld [vmem:[%s14552_s0 + $0xa8] sm:$0xff]  ;;  %v207_v32 = vld [vmem:[%s14552_s0 + $0xd8] sm:$0xff] }
  0x32   :  { %154 = vst [vmem:[#allocation3 + $0x80] sm:$0x3] %v12024_v1  ;;  %155 = vst [vmem:[#allocation3 + $0x90] sm:$0x3] %v12024_v1  ;;  %vm236_vm10 = vcmp.eq.s32.totalorder %v195_v22, %v12288_v12  ;;  %v9170_v29 = vsel %vm226_vm5, 1.0, %v12024_v1  ;;  %v9172_v30 = vsel %vm228_vm6, 1.0, %v12024_v1  ;;  %vm238_vm11 = vcmp.eq.s32.totalorder %v197_v24, %v12288_v12 }
  0x33   :  { %156 = vst [vmem:[#allocation3 + $0xe0] sm:$0x3] %v12024_v1  ;;  %157 = vst [vmem:[#allocation3 + $0xf0] sm:$0x3] %v12024_v1  ;;  %9207 = vmatprep.mubr.msk.bf16.mxu0 %vm413_vm4, %v318_v18  ;;  %v205_v31 = vld [vmem:[%s14552_s0 + $0xc8] sm:$0xff]  ;;  %v11605_v33 = vld [vmem:[%s14554_s2 + $0x30] sm:$0xff]   ;;  %vm240_vm12 = vcmp.eq.s32.totalorder %v199_v25, %v12288_v12  ;;  %vm242_vm13 = vcmp.eq.s32.totalorder %v201_v27, %v12288_v12  ;;  %vm244_vm14 = vcmp.eq.s32.totalorder %v203_v28, %v12288_v12 }
  0x34   :  { %158 = vst [vmem:[#allocation3 + $0x100] sm:$0x3] %v12024_v1  ;;  %159 = vst [vmem:[#allocation3 + $0x110] sm:$0x3] %v12024_v1  ;;  %445 = vmatpush1.bf16.msra.mxu0 %v11602_v8  ;;  %v9174_v34 = vsel %vm230_vm7, 1.0, %v12024_v1  ;;  %v9176_v35 = vsel %vm232_vm8, 1.0, %v12024_v1  ;;  %vm246_vm15 = vcmp.eq.s32.totalorder %v205_v31, %v12288_v12  ;;  %v320_v56 = vpack.c.bf16 %v9172_v30, %v9170_v29 }
  0x35   :  { %160 = vst [vmem:[#allocation3 + $0x120] sm:$0x3] %v12024_v1  ;;  %161 = vst [vmem:[#allocation3 + $0x130] sm:$0x3] %v12024_v1  ;;  %446 = vmatprep.subr.bf16.mxu0 %v12023_v0  ;;  %v180_v36 = vld [vmem:[%s14552_s0] sm:$0xff]  ;;  %v182_v37 = vld [vmem:[%s14552_s0 + $0x10] sm:$0xff]  ;;  %v322_v60 = vpack.c.bf16 %v9176_v35, %v9174_v34 }
  0x36   :  { %162 = vst [vmem:[#allocation3 + $0x140] sm:$0x3] %v12024_v1  ;;  %163 = vst [vmem:[#allocation3 + $0x150] sm:$0x3] %v12024_v1  ;;  %v9178_v38 = vsel %vm234_vm9, 1.0, %v12024_v1  ;;  %v9180_v39 = vsel %vm236_vm10, 1.0, %v12024_v1  ;;  %vm221_vm5 = vcmp.eq.s32.totalorder %v180_v36, %v12378_v42  ;;  %vm223_vm6 = vcmp.eq.s32.totalorder %v182_v37, %v12378_v42 }
  0x37   :  { %164 = vst [vmem:[#allocation3 + $0x2a] sm:$0x3] %v12024_v1  ;;  %165 = vst [vmem:[#allocation3 + $0x3a] sm:$0x3] %v12024_v1  ;;  %v209_v40 = vld [vmem:[%s14552_s0 + $0xe8] sm:$0xff]  ;;  %v211_v41 = vld [vmem:[%s14552_s0 + $0xf8] sm:$0xff]  ;;  %v324_v63 = vpack.c.bf16 %v9180_v39, %v9178_v38 }
  0x38   :  { %166 = vst [vmem:[#allocation3 + $0x4a] sm:$0x3] %v12024_v1  ;;  %167 = vst [vmem:[#allocation3 + $0x5a] sm:$0x3] %v12024_v1  ;;  %447 = vmatpush1.bf16.msra.mxu0 %v11603_v13  ;;  %v11606_v43 = vld [vmem:[%s14554_s2 + $0x38] sm:$0xff]   ;;  %v9182_v44 = vsel %vm238_vm11, 1.0, %v12024_v1  ;;  %vm250_vm2 = vcmp.eq.s32.totalorder %v209_v40, %v12288_v12  ;;  %vm252_vm3 = vcmp.eq.s32.totalorder %v211_v41, %v12288_v12 }
  0x39   :  { %168 = vst [vmem:[#allocation3 + $0x6a] sm:$0x3] %v12024_v1  ;;  %169 = vst [vmem:[#allocation3 + $0x7a] sm:$0x3] %v12024_v1  ;;  %448 = vmatprep.subr.bf16.mxu0 %v12023_v0  ;;  %v9184_v45 = vsel %vm240_vm12, 1.0, %v12024_v1  ;;  %v12392_v46 = vsel %vm242_vm13, 1.0, %v12024_v1 }
  0x3a   :  { %170 = vst [vmem:[#allocation3 + $0x8a] sm:$0x3] %v12024_v1  ;;  %171 = vst [vmem:[#allocation3 + $0x9a] sm:$0x3] %v12024_v1  ;;  %v9188_v47 = vsel %vm244_vm14, 1.0, %v12024_v1  ;;  %v12398_v48 = vsel %vm246_vm15, 1.0, %v12024_v1  ;;  %v326_v2 = vpack.c.bf16 %v9184_v45, %v9182_v44 }
  0x3b   :  { %172 = vst [vmem:[#allocation3 + $0xea] sm:$0x3] %v12024_v1  ;;  %173 = vst [vmem:[#allocation3 + $0xfa] sm:$0x3] %v12024_v1  ;;  %v12407_v50 = vsel %vm250_vm2, 1.0, %v12024_v1  ;;  %v12410_v51 = vsel %vm252_vm3, 1.0, %v12024_v1  ;;  %v328_v5 = vpack.c.bf16 %v9188_v47, %v12392_v46 }
  0x3c   :  { %174 = vst [vmem:[#allocation3 + $0x10a] sm:$0x3] %v12024_v1  ;;  %175 = vst [vmem:[#allocation3 + $0x11a] sm:$0x3] %v12024_v1  ;;  %449 = vmatpush1.bf16.msra.mxu0 %v11604_v23  ;;  %v11607_v52 = vld [vmem:[%s14554_s2 + $0x40] sm:$0xff]   ;;  %v186_v54 = vld [vmem:[%s14552_s0 + $0x30] sm:$0xff]  ;;  %v332_v11 = vpack.c.bf16 %v12410_v51, %v12407_v50 }
  0x3d   :  { %176 = vst [vmem:[#allocation3 + $0x12a] sm:$0x3] %v12024_v1  ;;  %177 = vst [vmem:[#allocation3 + $0x13a] sm:$0x3] %v12024_v1  ;;  %450 = vmatprep.subr.bf16.mxu0 %v12023_v0  ;;  %v184_v53 = vld [vmem:[%s14552_s0 + $0x20] sm:$0xff]  ;;  %v11608_v55 = vld [vmem:[%s14554_s2 + $0x48] sm:$0xff]   ;;  %vm227_vm9 = vcmp.eq.s32.totalorder %v186_v54, %v12378_v42 }
  0x3e   :  { %178 = vst [vmem:[#allocation3 + $0x14a] sm:$0x3] %v12024_v1  ;;  %179 = vst [vmem:[#allocation3 + $0x15a] sm:$0x3] %v12024_v1  ;;  %vm225_vm8 = vcmp.eq.s32.totalorder %v184_v53, %v12378_v42  ;;  %v188_v57 = vld [vmem:[%s14552_s0 + $0x40] sm:$0xff]  ;;  %v190_v58 = vld [vmem:[%s14552_s0 + $0x50] sm:$0xff] }
  0x3f   :  { %98 = vst.msk [vmem:[#allocation2 + $0x20] sm:$0x3] %vm97_vm1, %v12024_v1  ;;  %99 = vst.msk [vmem:[#allocation2 + $0x30] sm:$0x3] %vm97_vm1, %v12024_v1  ;;  %v12025_v59 = vmov 1.0|1.0   ;;  %vm229_vm11 = vcmp.eq.s32.totalorder %v188_v57, %v12378_v42  ;;  %vm231_vm12 = vcmp.eq.s32.totalorder %v190_v58, %v12378_v42 }
  0x40   :  { %78 = vst.msk [vmem:[#allocation2] sm:$0xff] %vm77_vm0, %v12024_v1  ;;  %81 = vst.msk [vmem:[#allocation2 + $0x10] sm:$0xff] %vm77_vm0, %v12024_v1  ;;  %451 = vmatpush1.bf16.msra.mxu0 %v11605_v33  ;;  %v192_v61 = vld [vmem:[%s14552_s0 + $0x60] sm:$0xff]  ;;  %v194_v62 = vld [vmem:[%s14552_s0 + $0x70] sm:$0xff] }
  0x41   :  { %83 = vst.msk [vmem:[#allocation2 + $0xc0] sm:$0xff] %vm77_vm0, %v12024_v1  ;;  %85 = vst.msk [vmem:[#allocation2 + $0xd0] sm:$0xff] %vm77_vm0, %v12024_v1  ;;  %452 = vmatprep.subr.bf16.mxu0 %v12023_v0  ;;  %vm233_vm14 = vcmp.eq.s32.totalorder %v192_v61, %v12378_v42  ;;  %vm235_vm15 = vcmp.eq.s32.totalorder %v194_v62, %v12378_v42  ;;  %v200_v3 = vld [vmem:[%s14552_s0 + $0xa0] sm:$0xff]  ;;  %v202_v4 = vld [vmem:[%s14552_s0 + $0xb0] sm:$0xff] }
  0x42   :  { %88 = vst.msk [vmem:[#allocation2 + $0xa0] sm:$0xff] %vm77_vm0, %v12024_v1  ;;  %90 = vst.msk [vmem:[#allocation2 + $0xb0] sm:$0xff] %vm77_vm0, %v12024_v1  ;;  %v204_v6 = vld [vmem:[%s14552_s0 + $0xc0] sm:$0xff]  ;;  %v206_v7 = vld [vmem:[%s14552_s0 + $0xd0] sm:$0xff] }
  0x43   :  { %92 = vst.msk [vmem:[#allocation2 + $0x160] sm:$0xff] %vm77_vm0, %v12024_v1  ;;  %94 = vst.msk [vmem:[#allocation2 + $0x170] sm:$0xff] %vm77_vm0, %v12024_v1  ;;  %v208_v9 = vld [vmem:[%s14552_s0 + $0xe0] sm:$0xff]  ;;  %v210_v10 = vld [vmem:[%s14552_s0 + $0xf0] sm:$0xff] }
  0x44   :  { %100 = vst.msk [vmem:[#allocation2 + $0x40] sm:$0x3] %vm97_vm1, %v12024_v1  ;;  %101 = vst.msk [vmem:[#allocation2 + $0x50] sm:$0x3] %vm97_vm1, %v12024_v1  ;;  %453 = vmatpush1.bf16.msra.mxu0 %v11606_v43  ;;  %v11941_v13 = vld [vmem:[#allocation3] sm:$0xff] }
  0x45   :  { %102 = vst.msk [vmem:[#allocation2 + $0x60] sm:$0x3] %vm97_vm1, %v12024_v1  ;;  %103 = vst.msk [vmem:[#allocation2 + $0x70] sm:$0x3] %vm97_vm1, %v12024_v1  ;;  %454 = vmatprep.subr.bf16.mxu0 %v12023_v0 }
  0x46   :  { %104 = vst.msk [vmem:[#allocation2 + $0x80] sm:$0x3] %vm97_vm1, %v12024_v1  ;;  %105 = vst.msk [vmem:[#allocation2 + $0x90] sm:$0x3] %vm97_vm1, %v12024_v1 }
  0x47   :  { %106 = vst.msk [vmem:[#allocation2 + $0xe0] sm:$0x3] %vm97_vm1, %v12024_v1  ;;  %107 = vst.msk [vmem:[#allocation2 + $0xf0] sm:$0x3] %vm97_vm1, %v12024_v1 }
  0x48   :  { %108 = vst.msk [vmem:[#allocation2 + $0x100] sm:$0x3] %vm97_vm1, %v12024_v1  ;;  %109 = vst.msk [vmem:[#allocation2 + $0x110] sm:$0x3] %vm97_vm1, %v12024_v1  ;;  %455 = vmatpush1.bf16.msra.mxu0 %v11607_v52  ;;  %v564_v21 = vld [vmem:[#allocation2 + $0xd0] sm:$0xff] }
  0x49   :  { %110 = vst.msk [vmem:[#allocation2 + $0x120] sm:$0x3] %vm97_vm1, %v12024_v1  ;;  %111 = vst.msk [vmem:[#allocation2 + $0x130] sm:$0x3] %vm97_vm1, %v12024_v1  ;;  %456 = vmatprep.subr.bf16.mxu0 %v12023_v0  ;;  %v196_v0 = vld [vmem:[%s14552_s0 + $0x80] sm:$0xff] }
  0x4a   :  { %112 = vst.msk [vmem:[#allocation2 + $0x140] sm:$0x3] %vm97_vm1, %v12024_v1  ;;  %113 = vst.msk [vmem:[#allocation2 + $0x150] sm:$0x3] %vm97_vm1, %v12024_v1  ;;  %vm237_vm2 = vcmp.eq.s32.totalorder %v196_v0, %v12378_v42  ;;  %v561_v20 = vld [vmem:[#allocation2 + $0xa0] sm:$0xff] }
  0x4b   :  { %114 = vst.msk [vmem:[#allocation2 + $0x2a] sm:$0x3] %vm97_vm1, %v12024_v1  ;;  %115 = vst.msk [vmem:[#allocation2 + $0x3a] sm:$0x3] %vm97_vm1, %v12024_v1  ;;  %v573_v35 = vld [vmem:[#allocation2 + $0x160] sm:$0xff] }
  0x4c   :  { %116 = vst.msk [vmem:[#allocation2 + $0x4a] sm:$0x3] %vm97_vm1, %v12024_v1  ;;  %117 = vst.msk [vmem:[#allocation2 + $0x5a] sm:$0x3] %vm97_vm1, %v12024_v1  ;;  %457 = vmatpush1.bf16.msra.mxu0 %v11608_v55 }
  0x4d   :  { %118 = vst.msk [vmem:[#allocation2 + $0x6a] sm:$0x3] %vm97_vm1, %v12024_v1  ;;  %119 = vst.msk [vmem:[#allocation2 + $0x7a] sm:$0x3] %vm97_vm1, %v12024_v1 }
  0x4e   :  { %120 = vst.msk [vmem:[#allocation2 + $0x8a] sm:$0x3] %vm97_vm1, %v12024_v1  ;;  %121 = vst.msk [vmem:[#allocation2 + $0x9a] sm:$0x3] %vm97_vm1, %v12024_v1 }
  0x4f   :  { %122 = vst.msk [vmem:[#allocation2 + $0xea] sm:$0x3] %vm97_vm1, %v12024_v1  ;;  %123 = vst.msk [vmem:[#allocation2 + $0xfa] sm:$0x3] %vm97_vm1, %v12024_v1 }
  0x50   :  { %124 = vst.msk [vmem:[#allocation2 + $0x10a] sm:$0x3] %vm97_vm1, %v12024_v1  ;;  %125 = vst.msk [vmem:[#allocation2 + $0x11a] sm:$0x3] %vm97_vm1, %v12024_v1 }
  0x51   :  { %126 = vst.msk [vmem:[#allocation2 + $0x12a] sm:$0x3] %vm97_vm1, %v12024_v1  ;;  %127 = vst.msk [vmem:[#allocation2 + $0x13a] sm:$0x3] %vm97_vm1, %v12024_v1 }
  0x52   :  { %128 = vst.msk [vmem:[#allocation2 + $0x14a] sm:$0x3] %vm97_vm1, %v12024_v1  ;;  %129 = vst.msk [vmem:[#allocation2 + $0x15a] sm:$0x3] %vm97_vm1, %v12024_v1  ;;  %vm248_vm1 = vcmp.eq.s32.totalorder %v207_v32, %v12288_v12  ;;  %v552_v12 = vld [vmem:[#allocation2 + $0x10] sm:$0xff] }
  0x53   :  { %14601 = vst [vmem:[#allocation16_spill] sm:$0xff] %v12331_v26  ;;  %v12401_v49 = vsel %vm248_vm1, 1.0, %v12024_v1  ;;  %vm9208_vm7 = vmpackc.low %vm223_vm6, %vm221_vm5  ;;  %v198_v1 = vld [vmem:[%s14552_s0 + $0x90] sm:$0xff]  ;;  %vm241_vm6 = vcmp.eq.s32.totalorder %v200_v3, %v12378_v42 }
  0x54   :  { %vm9211_vm10 = vmpackc.low %vm227_vm9, %vm225_vm8  ;;  %9209 = vmatmul.mubr.msk.bf16.vlgmr.msra.gmra.mrb[0].mxu0 %vm9208_vm7, %v12025_v59  ;;  %vm239_vm3 = vcmp.eq.s32.totalorder %v198_v1, %v12378_v42  ;;  %vm243_vm7 = vcmp.eq.s32.totalorder %v202_v4, %v12378_v42  ;;  %vm245_vm9 = vcmp.eq.s32.totalorder %v204_v6, %v12378_v42  ;;  %v330_v8 = vpack.c.bf16 %v12401_v49, %v12398_v48  ;;  %v11609_v6 = vld [vmem:[#allocation7 + $0x40] sm:$0xff]  }
  0x55   :  { %9210 = vmatprep.mubr.msk.bf16.mxu0 %vm413_vm4, %v320_v56  ;;  %vm9214_vm13 = vmpackc.low %vm231_vm12, %vm229_vm11  ;;  %vm249_vm12 = vcmp.eq.s32.totalorder %v208_v9, %v12378_v42  ;;  %576 = vst.msk [vmem:[#allocation4 + $0x8] sm:$0xff] %vm77_vm0, %v552_v12  ;;  %11570 = vmatprep.subr.bf16.mxu1 %v11609_v6 }
  0x56   :  { %vm9217_vm1 = vmpackc.low %vm235_vm15, %vm233_vm14  ;;  %vm79_vm15 = vcmask 519168   ;;  %585 = vst.msk [vmem:[#allocation4 + $0x50] sm:$0xff] %vm77_vm0, %v561_v20  ;;  %9602 = vmatprep.subr.bf16.mxu0 %v11609_v6 }
  0x57   :  { %vm9220_vm5 = vmpackc.low %vm239_vm3, %vm237_vm2  ;;  %86 = vst.msk [vmem:[#allocation2 + $0xd8] sm:$0xf] %vm79_vm15, %v11941_v13 }
  0x58   :  { %vm9223_vm8 = vmpackc.low %vm243_vm7, %vm241_vm6  ;;  %80 = vst.msk [vmem:[#allocation2 + $0x8] sm:$0xf] %vm79_vm15, %v11941_v13 }
  0x59   :  { %82 = vst.msk [vmem:[#allocation2 + $0x18] sm:$0xf] %vm79_vm15, %v11941_v13  ;;  %84 = vst.msk [vmem:[#allocation2 + $0xc8] sm:$0xf] %vm79_vm15, %v11941_v13 }
  0x5a   :  { %89 = vst.msk [vmem:[#allocation2 + $0xa8] sm:$0xf] %vm79_vm15, %v11941_v13  ;;  %91 = vst.msk [vmem:[#allocation2 + $0xb8] sm:$0xf] %vm79_vm15, %v11941_v13 }
  0x5b   :  { %93 = vst.msk [vmem:[#allocation2 + $0x168] sm:$0xf] %vm79_vm15, %v11941_v13  ;;  %95 = vst.msk [vmem:[#allocation2 + $0x178] sm:$0xf] %vm79_vm15, %v11941_v13 }
  0x5c   :  { %9212 = vmatmul.mubr.msk.bf16.gmra.mrb[4].mxu0 %vm9211_vm10, %v12025_v59  ;;  %vm247_vm10 = vcmp.eq.s32.totalorder %v206_v7, %v12378_v42  ;;  %v12489_v14 = vld [vmem:[#allocation4 + $0x8] sm:$0xff]  ;;  %588 = vst.msk [vmem:[#allocation4 + $0x68] sm:$0xff] %vm77_vm0, %v564_v21  ;;  %597 = vst.msk [vmem:[#allocation4 + $0xb0] sm:$0xff] %vm77_vm0, %v573_v35  ;;  %v11610_v7 = vld [vmem:[#allocation7] sm:$0xff]  }
  0x5d   :  { %9213 = vmatprep.mubr.msk.bf16.mxu0 %vm413_vm4, %v322_v60  ;;  %vm9226_vm11 = vmpackc.low %vm247_vm10, %vm245_vm9  ;;  %v12502_v24 = vld [vmem:[#allocation4 + $0x50] sm:$0xff]  ;;  %11578 = vmatpush3.bf16.msra.mxu1 %v11610_v7 }
  0x5e   :  { %v897_v28 = vld [vmem:[#allocation2 + $0xd1] sm:$0xff]  ;;  %9603 = vmatpush3.bf16.msra.mxu0 %v11610_v7 }
  0x5f   :  { %v1225_v32 = vld [vmem:[#allocation2 + $0xd2] sm:$0xff] }
  0x60   :  { %v885_v15 = vld [vmem:[#allocation2 + $0x11] sm:$0xff] }
  0x61   :  { %909 = vst.msk [vmem:[#allocation4 + $0x8] sm:$0xff] %vm77_vm0, %v885_v15  ;;  %v1213_v17 = vld [vmem:[#allocation2 + $0x12] sm:$0xff]  ;;  %v894_v25 = vld [vmem:[#allocation2 + $0xa1] sm:$0xff] }
  0x62   :  { %v1541_v19 = vld [vmem:[#allocation2 + $0x13] sm:$0xff]  ;;  %918 = vst.msk [vmem:[#allocation4 + $0x50] sm:$0xff] %vm77_vm0, %v894_v25  ;;  %v1222_v30 = vld [vmem:[#allocation2 + $0xa2] sm:$0xff] }
  0x63   :  { %v1869_v23 = vld [vmem:[#allocation2 + $0x14] sm:$0xff]  ;;  %v12506_v27 = vld [vmem:[#allocation4 + $0x68] sm:$0xff] }
  0x64   :  { %9215 = vmatmul.mubr.msk.bf16.gmra.mrb[8].mxu0 %vm9214_vm13, %v12025_v59  ;;  %vm251_vm13 = vcmp.eq.s32.totalorder %v210_v10, %v12378_v42  ;;  %14602 = vst [vmem:[#allocation17_spill] sm:$0xff] %v12506_v27  ;;  %921 = vst.msk [vmem:[#allocation4 + $0x68] sm:$0xff] %vm77_vm0, %v897_v28  ;;  %v1550_v34 = vld [vmem:[#allocation2 + $0xa3] sm:$0xff]  ;;  %v1553_v37 = vld [vmem:[#allocation2 + $0xd3] sm:$0xff] }
  0x65   :  { %9216 = vmatprep.mubr.msk.bf16.mxu0 %vm413_vm4, %v324_v63  ;;  %vm9229_vm14 = vmpackc.low %vm251_vm13, %vm249_vm12  ;;  %v1878_v39 = vld [vmem:[#allocation2 + $0xa4] sm:$0xff]  ;;  %v12525_v40 = vld [vmem:[#allocation4 + $0xb0] sm:$0xff] }
  0x66   :  { %14604 = vst [vmem:[#allocation19_spill] sm:$0xff] %v12525_v40  ;;  %v906_v41 = vld [vmem:[#allocation2 + $0x161] sm:$0xff]  ;;  %v1881_v43 = vld [vmem:[#allocation2 + $0xd4] sm:$0xff] }
  0x67   :  { %930 = vst.msk [vmem:[#allocation4 + $0xb0] sm:$0xff] %vm77_vm0, %v906_v41  ;;  %v1234_v45 = vld [vmem:[#allocation2 + $0x162] sm:$0xff]  ;;  %v11613_v35 = vld [vmem:[#allocation7 + $0x50] sm:$0xff]  }
  0x68   :  { %v12492_v16 = vld [vmem:[#allocation4 + $0x8] sm:$0xff]  ;;  %v11614_v41 = vld [vmem:[#allocation7 + $0x10] sm:$0xff]  }
  0x69   :  { %1237 = vst.msk [vmem:[#allocation4 + $0x8] sm:$0xff] %vm77_vm0, %v1213_v17  ;;  %v12509_v29 = vld [vmem:[#allocation4 + $0x50] sm:$0xff]  ;;  %v1562_v47 = vld [vmem:[#allocation2 + $0x163] sm:$0xff] }
  0x6a   :  { %1246 = vst.msk [vmem:[#allocation4 + $0x50] sm:$0xff] %vm77_vm0, %v1222_v30  ;;  %v1890_v49 = vld [vmem:[#allocation2 + $0x164] sm:$0xff] }
  0x6b   :  { %v12512_v31 = vld [vmem:[#allocation4 + $0x68] sm:$0xff] }
  0x6c   :  { %9218 = vmatmul.mubr.msk.bf16.gmra.mrb[12].mxu0 %vm9217_vm1, %v12025_v59  ;;  %1249 = vst.msk [vmem:[#allocation4 + $0x68] sm:$0xff] %vm77_vm0, %v1225_v32 }
  0x6d   :  { %9219 = vmatprep.mubr.msk.bf16.mxu0 %vm413_vm4, %v326_v2 }
  0x6e   :  { %v12531_v44 = vld [vmem:[#allocation4 + $0xb0] sm:$0xff] }
  0x6f   :  { %1258 = vst.msk [vmem:[#allocation4 + $0xb0] sm:$0xff] %vm77_vm0, %v1234_v45 }
  0x70   :  { %v12495_v18 = vld [vmem:[#allocation4 + $0x8] sm:$0xff] }
  0x71   :  { %1565 = vst.msk [vmem:[#allocation4 + $0x8] sm:$0xff] %vm77_vm0, %v1541_v19  ;;  %v12515_v33 = vld [vmem:[#allocation4 + $0x50] sm:$0xff] }
  0x72   :  { %1574 = vst.msk [vmem:[#allocation4 + $0x50] sm:$0xff] %vm77_vm0, %v1550_v34  ;;  %v11612_v34 = vld [vmem:[#allocation7 + $0x8] sm:$0xff]  }
  0x73   :  { %v12519_v36 = vld [vmem:[#allocation4 + $0x68] sm:$0xff] }
  0x74   :  { %9221 = vmatmul.mubr.msk.bf16.gmra.mrb[16].mxu0 %vm9220_vm5, %v12025_v59  ;;  %1577 = vst.msk [vmem:[#allocation4 + $0x68] sm:$0xff] %vm77_vm0, %v1553_v37 }
  0x75   :  { %9222 = vmatprep.mubr.msk.bf16.mxu0 %vm413_vm4, %v328_v5 }
  0x76   :  { %v12534_v46 = vld [vmem:[#allocation4 + $0xb0] sm:$0xff] }
  0x77   :  { %1586 = vst.msk [vmem:[#allocation4 + $0xb0] sm:$0xff] %vm77_vm0, %v1562_v47 }
  0x78   :  { %v12500_v22 = vld [vmem:[#allocation4 + $0x8] sm:$0xff] }
  0x79   :  { %1893 = vst.msk [vmem:[#allocation4 + $0x8] sm:$0xff] %vm77_vm0, %v1869_v23  ;;  %v12522_v38 = vld [vmem:[#allocation4 + $0x50] sm:$0xff] }
  0x7a   :  { %14603 = vst [vmem:[#allocation18_spill] sm:$0xff] %v12522_v38  ;;  %1902 = vst.msk [vmem:[#allocation4 + $0x50] sm:$0xff] %vm77_vm0, %v1878_v39 }
  0x7b   :  { %v12528_v42 = vld [vmem:[#allocation4 + $0x68] sm:$0xff] }
  0x7c   :  { %9224 = vmatmul.mubr.msk.bf16.gmra.mrb[20].mxu0 %vm9223_vm8, %v12025_v59  ;;  %1905 = vst.msk [vmem:[#allocation4 + $0x68] sm:$0xff] %vm77_vm0, %v1881_v43  ;;  %v11615_v43 = vld [vmem:[#allocation7 + $0x58] sm:$0xff]  }
  0x7d   :  { %9225 = vmatprep.mubr.msk.bf16.mxu0 %vm413_vm4, %v330_v8  ;;  %v11611_v8 = vld [vmem:[#allocation7 + $0x48] sm:$0xff]  }
  0x7e   :  { %v12537_v48 = vld [vmem:[#allocation4 + $0xb0] sm:$0xff]  ;;  %11571 = vmatprep.subr.bf16.mxu1 %v11611_v8  ;;  %9604 = vmatprep.subr.bf16.mxu0 %v11611_v8  ;;  %v11618_v8 = vld [vmem:[#allocation7 + $0x20] sm:$0xff]  }
  0x7f   :  { %14605 = vst [vmem:[#allocation20_spill] sm:$0xff] %v12537_v48  ;;  %1914 = vst.msk [vmem:[#allocation4 + $0xb0] sm:$0xff] %vm77_vm0, %v1890_v49  ;;  %11579 = vmatpush3.bf16.msra.mxu1 %v11612_v34  ;;  %9605 = vmatpush3.bf16.msra.mxu0 %v11612_v34 }
  0x80   :  { %11572 = vmatprep.subr.bf16.mxu1 %v11613_v35  ;;  %9606 = vmatprep.subr.bf16.mxu0 %v11613_v35 }
  0x83   :  { %11580 = vmatpush3.bf16.msra.mxu1 %v11614_v41  ;;  %9607 = vmatpush3.bf16.msra.mxu0 %v11614_v41 }
  0x84   :  { %9227 = vmatmul.mubr.msk.bf16.gmra.mrb[24].mxu0 %vm9226_vm11, %v12025_v59  ;;  %11573 = vmatprep.subr.bf16.mxu1 %v11615_v43 }
  0x85   :  { %9228 = vmatprep.mubr.msk.bf16.mxu0 %vm413_vm4, %v332_v11  ;;  %9608 = vmatprep.subr.bf16.mxu0 %v11615_v43 }
  0x8c   :  { %9230 = vmatmul.mubr.msk.bf16.gmra.mrb[28].mxu0 %vm9229_vm14, %v12025_v59 }
 0x127   :  { %v472_v50 = vpop.f32.mrb[0].mxu0 }
 0x128   :  { %535 = vst.msk [vmem:[#allocation2 + $0x22] sm:$0xff] %vm77_vm0, %v472_v50  ;;  %v474_v51 = vpop.f32.mrb[1].mxu0 }
 0x129   :  { %v475_v52 = vpop.f32.mrb[2].mxu0 }
 0x12a   :  { %536 = vst.msk [vmem:[#allocation2 + $0x32] sm:$0xff] %vm77_vm0, %v475_v52  ;;  %v477_v53 = vpop.f32.mrb[3].mxu0 }
 0x12f   :  { %v553_v54 = vld [vmem:[#allocation2 + $0x20] sm:$0xff]  ;;  %v480_v55 = vpop.f32.mrb[4].mxu0 }
 0x130   :  { %577 = vst.msk [vmem:[#allocation4 + $0x10] sm:$0xff] %vm77_vm0, %v553_v54  ;;  %537 = vst.msk [vmem:[#allocation2 + $0x42] sm:$0xff] %vm77_vm0, %v480_v55  ;;  %v482_v56 = vpop.f32.mrb[5].mxu0  ;;  %v886_v62 = vld [vmem:[#allocation2 + $0x21] sm:$0xff] }
 0x131   :  { %v554_v57 = vld [vmem:[#allocation2 + $0x30] sm:$0xff]  ;;  %v483_v58 = vpop.f32.mrb[6].mxu0  ;;  %v1214_v20 = vld [vmem:[#allocation2 + $0x22] sm:$0xff] }
 0x132   :  { %578 = vst.msk [vmem:[#allocation4 + $0x18] sm:$0xff] %vm77_vm0, %v554_v57  ;;  %538 = vst.msk [vmem:[#allocation2 + $0x52] sm:$0xff] %vm77_vm0, %v483_v58  ;;  %v485_v59 = vpop.f32.mrb[7].mxu0  ;;  %v887_v5 = vld [vmem:[#allocation2 + $0x31] sm:$0xff]  ;;  %v1542_v54 = vld [vmem:[#allocation2 + $0x23] sm:$0xff] }
 0x133   :  { %v1215_v28 = vld [vmem:[#allocation2 + $0x32] sm:$0xff]  ;;  %v1870_v34 = vld [vmem:[#allocation2 + $0x24] sm:$0xff] }
 0x137   :  { %v555_v60 = vld [vmem:[#allocation2 + $0x40] sm:$0xff]  ;;  %v488_v61 = vpop.f32.mrb[8].mxu0  ;;  %v12548_v0 = vld [vmem:[#allocation4 + $0x10] sm:$0xff] }
 0x138   :  { %579 = vst.msk [vmem:[#allocation4 + $0x20] sm:$0xff] %vm77_vm0, %v555_v60  ;;  %539 = vst.msk [vmem:[#allocation2 + $0x62] sm:$0xff] %vm77_vm0, %v488_v61  ;;  %v490_v63 = vpop.f32.mrb[9].mxu0  ;;  %v888_v12 = vld [vmem:[#allocation2 + $0x41] sm:$0xff] }
 0x139   :  { %v556_v1 = vld [vmem:[#allocation2 + $0x50] sm:$0xff]  ;;  %v491_v2 = vpop.f32.mrb[10].mxu0  ;;  %910 = vst.msk [vmem:[#allocation4 + $0x10] sm:$0xff] %vm77_vm0, %v886_v62  ;;  %v12553_v4 = vld [vmem:[#allocation4 + $0x18] sm:$0xff]  ;;  %v1216_v51 = vld [vmem:[#allocation2 + $0x42] sm:$0xff] }
 0x13a   :  { %580 = vst.msk [vmem:[#allocation4 + $0x28] sm:$0xff] %vm77_vm0, %v556_v1  ;;  %540 = vst.msk [vmem:[#allocation2 + $0x72] sm:$0xff] %vm77_vm0, %v491_v2  ;;  %v493_v3 = vpop.f32.mrb[11].mxu0  ;;  %v12558_v9 = vpack.c.bf16 %v12553_v4, %v12548_v0  ;;  %v889_v21 = vld [vmem:[#allocation2 + $0x51] sm:$0xff] }
 0x13b   :  { %911 = vst.msk [vmem:[#allocation4 + $0x18] sm:$0xff] %vm77_vm0, %v887_v5  ;;  %v1217_v59 = vld [vmem:[#allocation2 + $0x52] sm:$0xff]  ;;  %v11617_v5 = vld [vmem:[#allocation7 + $0x60] sm:$0xff]  }
 0x13c   :  { %14606 = vst [vmem:[#allocation21_spill] sm:$0xff] %v12558_v9  ;;  %v1543_v62 = vld [vmem:[#allocation2 + $0x33] sm:$0xff] }
 0x13d   :  { %v11616_v3 = vld [vmem:[#allocation7 + $0x18] sm:$0xff]  }
 0x13e   :  { %11581 = vmatpush3.bf16.msra.mxu1 %v11616_v3  ;;  %9609 = vmatpush3.bf16.msra.mxu0 %v11616_v3  ;;  %v11621_v3 = vld [vmem:[#allocation7 + $0x70] sm:$0xff]  }
 0x13f   :  { %v557_v10 = vld [vmem:[#allocation2 + $0x60] sm:$0xff]  ;;  %v496_v11 = vpop.f32.mrb[12].mxu0  ;;  %11574 = vmatprep.subr.bf16.mxu1 %v11617_v5  ;;  %9610 = vmatprep.subr.bf16.mxu0 %v11617_v5 }
 0x140   :  { %581 = vst.msk [vmem:[#allocation4 + $0x30] sm:$0xff] %vm77_vm0, %v557_v10  ;;  %541 = vst.msk [vmem:[#allocation2 + $0x82] sm:$0xff] %vm77_vm0, %v496_v11  ;;  %v498_v13 = vpop.f32.mrb[13].mxu0  ;;  %v12562_v15 = vld [vmem:[#allocation4 + $0x20] sm:$0xff]  ;;  %v12567_v25 = vld [vmem:[#allocation4 + $0x10] sm:$0xff] }
 0x141   :  { %v558_v17 = vld [vmem:[#allocation2 + $0x70] sm:$0xff]  ;;  %v499_v19 = vpop.f32.mrb[14].mxu0  ;;  %912 = vst.msk [vmem:[#allocation4 + $0x20] sm:$0xff] %vm77_vm0, %v888_v12  ;;  %1238 = vst.msk [vmem:[#allocation4 + $0x10] sm:$0xff] %vm77_vm0, %v1214_v20  ;;  %v12570_v30 = vld [vmem:[#allocation4 + $0x28] sm:$0xff] }
 0x142   :  { %582 = vst.msk [vmem:[#allocation4 + $0x38] sm:$0xff] %vm77_vm0, %v558_v17  ;;  %542 = vst.msk [vmem:[#allocation2 + $0x92] sm:$0xff] %vm77_vm0, %v499_v19  ;;  %v501_v23 = vpop.f32.mrb[15].mxu0  ;;  %v12572_v32 = vld [vmem:[#allocation4 + $0x18] sm:$0xff]  ;;  %v12578_v37 = vpack.c.bf16 %v12570_v30, %v12562_v15  ;;  %v890_v45 = vld [vmem:[#allocation2 + $0x61] sm:$0xff]  ;;  %11582 = vmatpush3.bf16.msra.mxu1 %v11618_v8  ;;  %9611 = vmatpush3.bf16.msra.mxu0 %v11618_v8 }
 0x143   :  { %913 = vst.msk [vmem:[#allocation4 + $0x28] sm:$0xff] %vm77_vm0, %v889_v21  ;;  %1239 = vst.msk [vmem:[#allocation4 + $0x18] sm:$0xff] %vm77_vm0, %v1215_v28  ;;  %v12582_v39 = vpack.c.bf16 %v12572_v32, %v12567_v25  ;;  %v891_v55 = vld [vmem:[#allocation2 + $0x71] sm:$0xff]  ;;  %v1544_v10 = vld [vmem:[#allocation2 + $0x43] sm:$0xff] }
 0x144   :  { %14607 = vst [vmem:[#allocation22_spill] sm:$0xff] %v12578_v37  ;;  %v11619_v11 = vld [vmem:[#allocation7 + $0x68] sm:$0xff]  }
 0x145   :  { %14608 = vst [vmem:[#allocation23_spill] sm:$0xff] %v12582_v39  ;;  %v1218_v20 = vld [vmem:[#allocation2 + $0x62] sm:$0xff]  ;;  %11575 = vmatprep.subr.bf16.mxu1 %v11619_v11  ;;  %9612 = vmatprep.subr.bf16.mxu0 %v11619_v11 }
 0x146   :  { %v563_v11 = vld [vmem:[#allocation2 + $0xc0] sm:$0xff] }
 0x147   :  { %v559_v47 = vld [vmem:[#allocation2 + $0x80] sm:$0xff]  ;;  %v504_v49 = vpop.f32.mrb[16].mxu0  ;;  %v12584_v50 = vld [vmem:[#allocation4 + $0x30] sm:$0xff]  ;;  %587 = vst.msk [vmem:[#allocation4 + $0x60] sm:$0xff] %vm77_vm0, %v563_v11 }
 0x148   :  { %583 = vst.msk [vmem:[#allocation4 + $0x40] sm:$0xff] %vm77_vm0, %v559_v47  ;;  %543 = vst.msk [vmem:[#allocation2 + $0xe2] sm:$0xff] %vm77_vm0, %v504_v49  ;;  %v506_v52 = vpop.f32.mrb[17].mxu0  ;;  %v12589_v53 = vld [vmem:[#allocation4 + $0x20] sm:$0xff]  ;;  %v12597_v61 = vld [vmem:[#allocation4 + $0x10] sm:$0xff] }
 0x149   :  { %914 = vst.msk [vmem:[#allocation4 + $0x30] sm:$0xff] %vm77_vm0, %v890_v45  ;;  %v507_v56 = vpop.f32.mrb[18].mxu0  ;;  %v12591_v57 = vld [vmem:[#allocation4 + $0x38] sm:$0xff]  ;;  %v560_v58 = vld [vmem:[#allocation2 + $0x90] sm:$0xff]  ;;  %1240 = vst.msk [vmem:[#allocation4 + $0x20] sm:$0xff] %vm77_vm0, %v1216_v51 }
 0x14a   :  { %544 = vst.msk [vmem:[#allocation2 + $0xf2] sm:$0xff] %vm77_vm0, %v507_v56  ;;  %v509_v60 = vpop.f32.mrb[19].mxu0  ;;  %915 = vst.msk [vmem:[#allocation4 + $0x38] sm:$0xff] %vm77_vm0, %v891_v55  ;;  %v12601_v63 = vpack.c.bf16 %v12591_v57, %v12584_v50  ;;  %v12603_v1 = vld [vmem:[#allocation4 + $0x28] sm:$0xff]  ;;  %v1396_v2 = vld [vmem:[#allocation4 + $0x18] sm:$0xff] }
 0x14b   :  { %584 = vst.msk [vmem:[#allocation4 + $0x48] sm:$0xff] %vm77_vm0, %v560_v58  ;;  %1566 = vst.msk [vmem:[#allocation4 + $0x10] sm:$0xff] %vm77_vm0, %v1542_v54  ;;  %v12610_v6 = vpack.c.bf16 %v12603_v1, %v12589_v53  ;;  %v12613_v7 = vpack.c.bf16 %v1396_v2, %v12597_v61  ;;  %v892_v19 = vld [vmem:[#allocation2 + $0x81] sm:$0xff]  ;;  %v893_v45 = vld [vmem:[#allocation2 + $0x91] sm:$0xff] }
 0x14c   :  { %14609 = vst [vmem:[#allocation24_spill] sm:$0xff] %v12601_v63  ;;  %1241 = vst.msk [vmem:[#allocation4 + $0x28] sm:$0xff] %vm77_vm0, %v1217_v59  ;;  %v1871_v49 = vld [vmem:[#allocation2 + $0x34] sm:$0xff] }
 0x14d   :  { %1567 = vst.msk [vmem:[#allocation4 + $0x18] sm:$0xff] %vm77_vm0, %v1543_v62  ;;  %14610 = vst [vmem:[#allocation25_spill] sm:$0xff] %v12610_v6  ;;  %v1219_v51 = vld [vmem:[#allocation2 + $0x72] sm:$0xff] }
 0x14e   :  { %14611 = vst [vmem:[#allocation26_spill] sm:$0xff] %v12613_v7  ;;  %v1545_v58 = vld [vmem:[#allocation2 + $0x53] sm:$0xff] }
 0x14f   :  { %v512_v12 = vpop.f32.mrb[20].mxu0  ;;  %v565_v13 = vld [vmem:[#allocation2 + $0xe0] sm:$0xff] }
 0x150   :  { %v12615_v17 = vld [vmem:[#allocation4 + $0x40] sm:$0xff]  ;;  %545 = vst.msk [vmem:[#allocation2 + $0x102] sm:$0xff] %vm77_vm0, %v512_v12  ;;  %v514_v21 = vpop.f32.mrb[21].mxu0  ;;  %589 = vst.msk [vmem:[#allocation4 + $0x70] sm:$0xff] %vm77_vm0, %v565_v13  ;;  %v12620_v23 = vld [vmem:[#allocation4 + $0x30] sm:$0xff] }
 0x151   :  { %916 = vst.msk [vmem:[#allocation4 + $0x40] sm:$0xff] %vm77_vm0, %v892_v19  ;;  %v1397_v28 = vld [vmem:[#allocation4 + $0x20] sm:$0xff]  ;;  %v515_v35 = vpop.f32.mrb[22].mxu0  ;;  %v566_v41 = vld [vmem:[#allocation2 + $0xf0] sm:$0xff]  ;;  %1242 = vst.msk [vmem:[#allocation4 + $0x30] sm:$0xff] %vm77_vm0, %v1218_v20 }
 0x152   :  { %v12622_v43 = vld [vmem:[#allocation4 + $0x48] sm:$0xff]  ;;  %v12625_v47 = vpack.c.bf16 %v1397_v28, %v1396_v2  ;;  %1568 = vst.msk [vmem:[#allocation4 + $0x20] sm:$0xff] %vm77_vm0, %v1544_v10  ;;  %546 = vst.msk [vmem:[#allocation2 + $0x112] sm:$0xff] %vm77_vm0, %v515_v35  ;;  %v517_v52 = vpop.f32.mrb[23].mxu0  ;;  %v12631_v54 = vld [vmem:[#allocation4 + $0x38] sm:$0xff] }
 0x153   :  { %590 = vst.msk [vmem:[#allocation4 + $0x78] sm:$0xff] %vm77_vm0, %v566_v41  ;;  %917 = vst.msk [vmem:[#allocation4 + $0x48] sm:$0xff] %vm77_vm0, %v893_v45  ;;  %v12633_v55 = vld [vmem:[#allocation4 + $0x10] sm:$0xff]  ;;  %v12637_v56 = vpack.c.bf16 %v12622_v43, %v12615_v17  ;;  %v1398_v59 = vld [vmem:[#allocation4 + $0x28] sm:$0xff]  ;;  %v12643_v62 = vpack.c.bf16 %v12631_v54, %v12620_v23 }
 0x154   :  { %1243 = vst.msk [vmem:[#allocation4 + $0x38] sm:$0xff] %vm77_vm0, %v1219_v51  ;;  %1894 = vst.msk [vmem:[#allocation4 + $0x10] sm:$0xff] %vm77_vm0, %v1870_v34  ;;  %v1614_v60 = vld [vmem:[#allocation4 + $0x18] sm:$0xff]  ;;  %v11620_v2 = vld [vmem:[#allocation7 + $0x28] sm:$0xff]   ;;  %v12647_v5 = vpack.c.bf16 %v1398_v59, %v1397_v28 }
 0x155   :  { %14612 = vst [vmem:[#allocation27_spill] sm:$0xff] %v12637_v56  ;;  %14613 = vst [vmem:[#allocation28_spill] sm:$0xff] %v12643_v62  ;;  %v12650_v8 = vpack.c.bf16 %v1614_v60, %v12633_v55  ;;  %11583 = vmatpush3.bf16.msra.mxu1 %v11620_v2  ;;  %v11622_v10 = vld [vmem:[#allocation7 + $0x30] sm:$0xff]   ;;  %9613 = vmatpush3.bf16.msra.mxu0 %v11620_v2  ;;  %v11623_v13 = vld [vmem:[#allocation7 + $0x78] sm:$0xff]  }
 0x156   :  { %1569 = vst.msk [vmem:[#allocation4 + $0x28] sm:$0xff] %vm77_vm0, %v1545_v58  ;;  %1895 = vst.msk [vmem:[#allocation4 + $0x18] sm:$0xff] %vm77_vm0, %v1871_v49  ;;  %11576 = vmatprep.subr.bf16.mxu1 %v11621_v3  ;;  %9614 = vmatprep.subr.bf16.mxu0 %v11621_v3  ;;  %v898_v28 = vld [vmem:[#allocation2 + $0xe1] sm:$0xff]  ;;  %v1221_v45 = vld [vmem:[#allocation2 + $0x92] sm:$0xff] }
 0x157   :  { %14614 = vst [vmem:[#allocation29_spill] sm:$0xff] %v12647_v5  ;;  %14615 = vst [vmem:[#allocation30_spill] sm:$0xff] %v12650_v8  ;;  %v520_v12 = vpop.f32.mrb[24].mxu0  ;;  %v567_v20 = vld [vmem:[#allocation2 + $0x100] sm:$0xff]  ;;  %v12654_v21 = vld [vmem:[#allocation4 + $0x70] sm:$0xff] }
 0x158   :  { %547 = vst.msk [vmem:[#allocation2 + $0x122] sm:$0xff] %vm77_vm0, %v520_v12  ;;  %v522_v19 = vpop.f32.mrb[25].mxu0  ;;  %v1546_v34 = vld [vmem:[#allocation2 + $0x63] sm:$0xff]  ;;  %591 = vst.msk [vmem:[#allocation4 + $0x80] sm:$0xff] %vm77_vm0, %v567_v20  ;;  %v1873_v51 = vld [vmem:[#allocation2 + $0x54] sm:$0xff] }
 0x159   :  { %v523_v35 = vpop.f32.mrb[26].mxu0  ;;  %922 = vst.msk [vmem:[#allocation4 + $0x70] sm:$0xff] %vm77_vm0, %v898_v28  ;;  %v1220_v41 = vld [vmem:[#allocation2 + $0x82] sm:$0xff]  ;;  %v1547_v52 = vld [vmem:[#allocation2 + $0x73] sm:$0xff]  ;;  %11584 = vmatpush3.bf16.msra.mxu1 %v11622_v10  ;;  %9615 = vmatpush3.bf16.msra.mxu0 %v11622_v10 }
 0x15a   :  { %v1872_v49 = vld [vmem:[#allocation2 + $0x44] sm:$0xff]  ;;  %548 = vst.msk [vmem:[#allocation2 + $0x132] sm:$0xff] %vm77_vm0, %v523_v35  ;;  %v525_v58 = vpop.f32.mrb[27].mxu0  ;;  %v746_v2 = vld [vmem:[#allocation4 + $0x78] sm:$0xff]  ;;  %v568_v3 = vld [vmem:[#allocation2 + $0x110] sm:$0xff]  ;;  %11577 = vmatprep.subr.bf16.mxu1 %v11623_v13  ;;  %9616 = vmatprep.subr.bf16.mxu0 %v11623_v13 }
 0x15b   :  { %v899_v11 = vld [vmem:[#allocation2 + $0xf1] sm:$0xff]  ;;  %592 = vst.msk [vmem:[#allocation4 + $0x88] sm:$0xff] %vm77_vm0, %v568_v3  ;;  %v12661_v12 = vld [vmem:[#allocation4 + $0x40] sm:$0xff]  ;;  %v12663_v19 = vld [vmem:[#allocation4 + $0x48] sm:$0xff]  ;;  %v12666_v28 = vpack.c.bf16 %v746_v2, %v12654_v21 }
 0x15c   :  { %923 = vst.msk [vmem:[#allocation4 + $0x78] sm:$0xff] %vm77_vm0, %v899_v11  ;;  %v1399_v20 = vld [vmem:[#allocation4 + $0x30] sm:$0xff]  ;;  %1244 = vst.msk [vmem:[#allocation4 + $0x40] sm:$0xff] %vm77_vm0, %v1220_v41  ;;  %v1400_v10 = vld [vmem:[#allocation4 + $0x38] sm:$0xff]  ;;  %v12675_v11 = vpack.c.bf16 %v12663_v19, %v12661_v12 }
 0x15d   :  { %14616 = vst [vmem:[#allocation31_spill] sm:$0xff] %v12666_v28  ;;  %1245 = vst.msk [vmem:[#allocation4 + $0x48] sm:$0xff] %vm77_vm0, %v1221_v45  ;;  %v12670_v35 = vpack.c.bf16 %v1399_v20, %v1398_v59  ;;  %v1615_v58 = vld [vmem:[#allocation4 + $0x20] sm:$0xff]  ;;  %v1616_v3 = vld [vmem:[#allocation4 + $0x28] sm:$0xff]  ;;  %v12682_v45 = vpack.c.bf16 %v1400_v10, %v1399_v20 }
 0x15e   :  { %1570 = vst.msk [vmem:[#allocation4 + $0x30] sm:$0xff] %vm77_vm0, %v1546_v34  ;;  %14617 = vst [vmem:[#allocation32_spill] sm:$0xff] %v12675_v11  ;;  %v12678_v26 = vpack.c.bf16 %v1615_v58, %v1614_v60  ;;  %v11624_v13 = vld [vmem:[#allocation7 + $0x38] sm:$0xff]   ;;  %v896_v59 = vld [vmem:[#allocation2 + $0xc1] sm:$0xff]  ;;  %v12684_v34 = vpack.c.bf16 %v1616_v3, %v1615_v58 }
 0x15f   :  { %1571 = vst.msk [vmem:[#allocation4 + $0x38] sm:$0xff] %vm77_vm0, %v1547_v52  ;;  %1896 = vst.msk [vmem:[#allocation4 + $0x20] sm:$0xff] %vm77_vm0, %v1872_v49  ;;  %v11625_v41 = vld [vmem:[#allocation7 + $0xc0] sm:$0xff]   ;;  %v528_v5 = vpop.f32.mrb[28].mxu0  ;;  %11585 = vmatpush3.bf16.msra.mxu1 %v11624_v13  ;;  %9617 = vmatpush3.bf16.msra.mxu0 %v11624_v13  ;;  %v901_v13 = vld [vmem:[#allocation2 + $0x111] sm:$0xff] }
 0x160   :  { %1897 = vst.msk [vmem:[#allocation4 + $0x28] sm:$0xff] %vm77_vm0, %v1873_v51  ;;  %14618 = vst [vmem:[#allocation33_spill] sm:$0xff] %v12682_v45  ;;  %v12686_v8 = vld [vmem:[#allocation4 + $0x60] sm:$0xff]  ;;  %v530_v49 = vpop.f32.mrb[29].mxu0  ;;  %9666 = vmatprep.subr.bf16.mxu1 %v11625_v41  ;;  %v1227_v41 = vld [vmem:[#allocation2 + $0xf2] sm:$0xff] }
 0x161   :  { %14619 = vst [vmem:[#allocation34_spill] sm:$0xff] %v12684_v34  ;;  %14620 = vst [vmem:[#allocation35_spill] sm:$0xff] %v12686_v8  ;;  %v900_v60 = vld [vmem:[#allocation2 + $0x101] sm:$0xff]  ;;  %v570_v7 = vld [vmem:[#allocation2 + $0x130] sm:$0xff]  ;;  %v531_v11 = vpop.f32.mrb[30].mxu0 }
 0x162   :  { %920 = vst.msk [vmem:[#allocation4 + $0x60] sm:$0xff] %vm77_vm0, %v896_v59  ;;  %549 = vst.msk [vmem:[#allocation2 + $0x142] sm:$0xff] %vm77_vm0, %v528_v5  ;;  %v747_v52 = vld [vmem:[#allocation4 + $0x80] sm:$0xff]  ;;  %v1875_v59 = vld [vmem:[#allocation2 + $0x74] sm:$0xff]  ;;  %v533_v5 = vpop.f32.mrb[31].mxu0 }
 0x163   :  { %v569_v51 = vld [vmem:[#allocation2 + $0x120] sm:$0xff]  ;;  %v12690_v20 = vpack.c.bf16 %v747_v52, %v746_v2  ;;  %924 = vst.msk [vmem:[#allocation4 + $0x80] sm:$0xff] %vm77_vm0, %v900_v60  ;;  %594 = vst.msk [vmem:[#allocation4 + $0x98] sm:$0xff] %vm77_vm0, %v570_v7  ;;  %v748_v49 = vld [vmem:[#allocation4 + $0x88] sm:$0xff] }
 0x164   :  { %593 = vst.msk [vmem:[#allocation4 + $0x90] sm:$0xff] %vm77_vm0, %v569_v51  ;;  %v1226_v58 = vld [vmem:[#allocation2 + $0xe2] sm:$0xff]  ;;  %550 = vst.msk [vmem:[#allocation2 + $0x152] sm:$0xff] %vm77_vm0, %v531_v11  ;;  %v1549_v62 = vld [vmem:[#allocation2 + $0x93] sm:$0xff]  ;;  %v12703_v6 = vpack.c.bf16 %v748_v49, %v747_v52  ;;  %v644_v52 = vpack.c.bf16 %v12654_v21, %v12506_v27 }
 0x165   :  { %v1548_v34 = vld [vmem:[#allocation2 + $0x83] sm:$0xff]  ;;  %778 = vrot.lane.b32.xlu0 %v12690_v20, %s12020_s23  ;;  %925 = vst.msk [vmem:[#allocation4 + $0x88] sm:$0xff] %vm77_vm0, %v901_v13  ;;  %v12699_v2 = vld [vmem:[#allocation4 + $0x70] sm:$0xff]  ;;  %v12701_v60 = vld [vmem:[#allocation4 + $0x78] sm:$0xff] }
 0x166   :  { %v1874_v45 = vld [vmem:[#allocation2 + $0x64] sm:$0xff]  ;;  %14621 = vst [vmem:[#allocation36_spill] sm:$0xff] %v12703_v6  ;;  %1250 = vst.msk [vmem:[#allocation4 + $0x70] sm:$0xff] %vm77_vm0, %v1226_v58  ;;  %v1617_v5 = vld [vmem:[#allocation4 + $0x30] sm:$0xff]  ;;  %v12714_v13 = vpack.c.bf16 %v12701_v60, %v12699_v2 }
 0x167   :  { %v1401_v51 = vld [vmem:[#allocation4 + $0x40] sm:$0xff]  ;;  %1251 = vst.msk [vmem:[#allocation4 + $0x78] sm:$0xff] %vm77_vm0, %v1227_v41  ;;  %v12709_v11 = vld [vmem:[#allocation4 + $0x48] sm:$0xff]  ;;  %v1618_v56 = vld [vmem:[#allocation4 + $0x38] sm:$0xff]  ;;  %v12719_v58 = vpack.c.bf16 %v1617_v5, %v1616_v3 }
 0x168   :  { %v12707_v7 = vpack.c.bf16 %v1401_v51, %v1400_v10  ;;  %1572 = vst.msk [vmem:[#allocation4 + $0x40] sm:$0xff] %vm77_vm0, %v1548_v34  ;;  %14622 = vst [vmem:[#allocation37_spill] sm:$0xff] %v12714_v13  ;;  %v12724_v10 = vpack.c.bf16 %v12709_v11, %v1401_v51  ;;  %v12726_v34 = vpack.c.bf16 %v1618_v56, %v1617_v5  ;;  %v1228_v41 = vld [vmem:[#allocation2 + $0x102] sm:$0xff]  ;;  %v903_v3 = vld [vmem:[#allocation2 + $0x131] sm:$0xff] }
 0x169   :  { %1573 = vst.msk [vmem:[#allocation4 + $0x48] sm:$0xff] %vm77_vm0, %v1549_v62  ;;  %1898 = vst.msk [vmem:[#allocation4 + $0x30] sm:$0xff] %vm77_vm0, %v1874_v45  ;;  %v571_v39 = vld [vmem:[#allocation2 + $0x140] sm:$0xff]  ;;  %664 = vrot.lane.b32.xlu0 %v644_v52, %s12020_s23 }
 0x16a   :  { %1899 = vst.msk [vmem:[#allocation4 + $0x38] sm:$0xff] %vm77_vm0, %v1875_v59  ;;  %14623 = vst [vmem:[#allocation38_spill] sm:$0xff] %v12724_v10  ;;  %v902_v13 = vld [vmem:[#allocation2 + $0x121] sm:$0xff]  ;;  %v750_v45 = vld [vmem:[#allocation4 + $0x98] sm:$0xff] }
 0x16b   :  { %14624 = vst [vmem:[#allocation39_spill] sm:$0xff] %v12726_v34  ;;  %595 = vst.msk [vmem:[#allocation4 + $0xa0] sm:$0xff] %vm77_vm0, %v571_v39  ;;  %v749_v21 = vld [vmem:[#allocation4 + $0x90] sm:$0xff]  ;;  %v12730_v62 = vld [vmem:[#allocation4 + $0x80] sm:$0xff] }
 0x16c   :  { %v759_v63 = vpack.c.bf16 %v749_v21, %v748_v49  ;;  %926 = vst.msk [vmem:[#allocation4 + $0x90] sm:$0xff] %vm77_vm0, %v902_v13  ;;  %v572_v59 = vld [vmem:[#allocation2 + $0x150] sm:$0xff]  ;;  %1252 = vst.msk [vmem:[#allocation4 + $0x80] sm:$0xff] %vm77_vm0, %v1228_v41  ;;  %v1554_v51 = vld [vmem:[#allocation2 + $0xe3] sm:$0xff]  ;;  %v12738_v10 = vpack.c.bf16 %v750_v45, %v749_v21 }
 0x16d   :  { %v1876_v5 = vld [vmem:[#allocation2 + $0x84] sm:$0xff]  ;;  %v1229_v34 = vld [vmem:[#allocation2 + $0x112] sm:$0xff]  ;;  %927 = vst.msk [vmem:[#allocation4 + $0x98] sm:$0xff] %vm77_vm0, %v903_v3  ;;  %596 = vst.msk [vmem:[#allocation4 + $0xa8] sm:$0xff] %vm77_vm0, %v572_v59 }
 0x16e   :  { %v12736_v52 = vld [vmem:[#allocation4 + $0x88] sm:$0xff]  ;;  %v1555_v39 = vld [vmem:[#allocation2 + $0xf3] sm:$0xff]  ;;  %14625 = vst [vmem:[#allocation40_spill] sm:$0xff] %v12738_v10  ;;  %780 = vrot.lane.b32.xlu1 %v759_v63, %s12020_s23 }
 0x16f   :  { %1253 = vst.msk [vmem:[#allocation4 + $0x88] sm:$0xff] %vm77_vm0, %v1229_v34  ;;  %v1404_v49 = vld [vmem:[#allocation4 + $0x78] sm:$0xff]  ;;  %v12742_v13 = vld [vmem:[#allocation4 + $0x70] sm:$0xff]  ;;  %v1619_v41 = vld [vmem:[#allocation4 + $0x40] sm:$0xff]  ;;  %v12746_v48 = vpack.c.bf16 %v12736_v52, %v12730_v62 }
 0x170   :  { %1578 = vst.msk [vmem:[#allocation4 + $0x70] sm:$0xff] %vm77_vm0, %v1554_v51  ;;  %1579 = vst.msk [vmem:[#allocation4 + $0x78] sm:$0xff] %vm77_vm0, %v1555_v39  ;;  %v12750_v3 = vpack.c.bf16 %v1619_v41, %v1618_v56  ;;  %v12753_v21 = vld [vmem:[#allocation4 + $0x48] sm:$0xff]  ;;  %v1877_v59 = vld [vmem:[#allocation2 + $0x94] sm:$0xff]  ;;  %v12756_v34 = vpack.c.bf16 %v1404_v49, %v12742_v13 }
 0x171   :  { %14626 = vst [vmem:[#allocation41_spill] sm:$0xff] %v12746_v48  ;;  %1900 = vst.msk [vmem:[#allocation4 + $0x40] sm:$0xff] %vm77_vm0, %v1876_v5  ;;  %v12760_v37 = vpack.c.bf16 %v12753_v21, %v1619_v41  ;;  %v1556_v48 = vld [vmem:[#allocation2 + $0x103] sm:$0xff]  ;;  %v1231_v51 = vld [vmem:[#allocation2 + $0x132] sm:$0xff] }
 0x172   :  { %14627 = vst [vmem:[#allocation42_spill] sm:$0xff] %v12753_v21  ;;  %14628 = vst [vmem:[#allocation43_spill] sm:$0xff] %v12756_v34  ;;  %v1230_v9 = vld [vmem:[#allocation2 + $0x122] sm:$0xff]  ;;  %666 = vrot.lane.b32.xlu1 %v12690_v20, %s12020_s23  ;;  %v1557_v20 = vld [vmem:[#allocation2 + $0x113] sm:$0xff] }
 0x173   :  { %1901 = vst.msk [vmem:[#allocation4 + $0x48] sm:$0xff] %vm77_vm0, %v1877_v59  ;;  %14629 = vst [vmem:[#allocation44_spill] sm:$0xff] %v12760_v37  ;;  %v751_v56 = vld [vmem:[#allocation4 + $0xa0] sm:$0xff]  ;;  %v12765_v10 = vld [vmem:[#allocation4 + $0x90] sm:$0xff] }
 0x174   :  { %v904_v39 = vld [vmem:[#allocation2 + $0x141] sm:$0xff]  ;;  %v760_v5 = vpack.c.bf16 %v751_v56, %v750_v45  ;;  %v905_v59 = vld [vmem:[#allocation2 + $0x151] sm:$0xff]  ;;  %1254 = vst.msk [vmem:[#allocation4 + $0x90] sm:$0xff] %vm77_vm0, %v1230_v9 }
 0x175   :  { %928 = vst.msk [vmem:[#allocation4 + $0xa0] sm:$0xff] %vm77_vm0, %v904_v39  ;;  %v1405_v6 = vld [vmem:[#allocation4 + $0x80] sm:$0xff]  ;;  %v728_v38 = vld [vmem:[#allocation4 + $0xa8] sm:$0xff]  ;;  %v12767_v27 = vld [vmem:[#allocation4 + $0x98] sm:$0xff] }
 0x176   :  { %v551_v34 = vld [vmem:[#allocation2] sm:$0xff]  ;;  %v12770_v41 = vpack.c.bf16 %v1405_v6, %v1404_v49  ;;  %1580 = vst.msk [vmem:[#allocation4 + $0x80] sm:$0xff] %vm77_vm0, %v1556_v48  ;;  %782 = vrot.lane.b32.xlu0 %v760_v5, %s12020_s23  ;;  %v761_v45 = vpack.c.bf16 %v12525_v40, %v728_v38  ;;  %929 = vst.msk [vmem:[#allocation4 + $0xa8] sm:$0xff] %vm77_vm0, %v905_v59  ;;  %v1406_v39 = vld [vmem:[#allocation4 + $0x88] sm:$0xff]  ;;  %v12778_v21 = vpack.c.bf16 %v728_v38, %v751_v56 }
 0x177   :  { %575 = vst.msk [vmem:[#allocation4] sm:$0xff] %vm77_vm0, %v551_v34  ;;  %1255 = vst.msk [vmem:[#allocation4 + $0x98] sm:$0xff] %vm77_vm0, %v1231_v51  ;;  %v1882_v37 = vld [vmem:[#allocation2 + $0xe4] sm:$0xff]  ;;  %v12782_v9 = vpack.c.bf16 %v12767_v27, %v12765_v10  ;;  %668 = vrot.lane.b32.xlu1 %v759_v63, %s12020_s23  ;;  %v12786_v48 = vld [vmem:[#allocation4 + $0x70] sm:$0xff]  ;;  %v12788_v40 = vpack.c.bf16 %v1406_v39, %v1405_v6 }
 0x178   :  { %14630 = vst [vmem:[#allocation45_spill] sm:$0xff] %v12778_v21  ;;  %1581 = vst.msk [vmem:[#allocation4 + $0x88] sm:$0xff] %vm77_vm0, %v1557_v20  ;;  %v1622_v49 = vld [vmem:[#allocation4 + $0x78] sm:$0xff]  ;;  %v11638_v38 = vld [vmem:[#allocation7 + $0x140] sm:$0xff]  }
 0x179   :  { %14631 = vst [vmem:[#allocation46_spill] sm:$0xff] %v12782_v9  ;;  %v1883_v34 = vld [vmem:[#allocation2 + $0xf4] sm:$0xff]  ;;  %14632 = vst [vmem:[#allocation47_spill] sm:$0xff] %v12788_v40  ;;  %v12793_v51 = vpack.c.bf16 %v1622_v49, %v12786_v48  ;;  %v1884_v56 = vld [vmem:[#allocation2 + $0x104] sm:$0xff]  ;;  %9730 = vmatprep.subr.bf16.mxu0 %v11638_v38 }
 0x17a   :  { %1906 = vst.msk [vmem:[#allocation4 + $0x70] sm:$0xff] %vm77_vm0, %v1882_v37  ;;  %1907 = vst.msk [vmem:[#allocation4 + $0x78] sm:$0xff] %vm77_vm0, %v1883_v34  ;;  %v1558_v59 = vld [vmem:[#allocation2 + $0x123] sm:$0xff]  ;;  %784 = vrot.lane.b32.xlu0 %v761_v45, %s12020_s23  ;;  %v1559_v20 = vld [vmem:[#allocation2 + $0x133] sm:$0xff]  ;;  %v754_v37 = vpack.c.bf16 %v12562_v15, %v12553_v4  ;;  %v972_v45 = vpack.c.bf16 %v12567_v25, %v12492_v16 }
 0x17b   :  { %14633 = vst [vmem:[#allocation48_spill] sm:$0xff] %v12793_v51  ;;  %v884_v63 = vld [vmem:[#allocation2 + $0x1] sm:$0xff]  ;;  %670 = vrot.lane.b32.xlu1 %v760_v5, %s12020_s23  ;;  %v1407_v34 = vld [vmem:[#allocation4 + $0x90] sm:$0xff] }
 0x17c   :  { %v12797_v9 = vld [vmem:[#allocation4 + $0xa0] sm:$0xff]  ;;  %v1233_v38 = vld [vmem:[#allocation2 + $0x152] sm:$0xff]  ;;  %v12808_v8 = vpack.c.bf16 %v1407_v34, %v1406_v39  ;;  %1582 = vst.msk [vmem:[#allocation4 + $0x90] sm:$0xff] %vm77_vm0, %v1558_v59  ;;  %v755_v59 = vpack.c.bf16 %v12584_v50, %v12570_v30 }
 0x17d   :  { %v1232_v6 = vld [vmem:[#allocation2 + $0x142] sm:$0xff]  ;;  %v1885_v4 = vld [vmem:[#allocation2 + $0x114] sm:$0xff] }
 0x17e   :  { %1256 = vst.msk [vmem:[#allocation4 + $0xa0] sm:$0xff] %vm77_vm0, %v1232_v6  ;;  %v1623_v40 = vld [vmem:[#allocation4 + $0x80] sm:$0xff]  ;;  %v12806_v21 = vld [vmem:[#allocation4 + $0xa8] sm:$0xff]  ;;  %v1408_v5 = vld [vmem:[#allocation4 + $0x98] sm:$0xff]  ;;  %770 = vrot.lane.b32.xlu0 %v754_v37, %s12020_s23 }
 0x17f   :  { %v12802_v51 = vld [vmem:[#allocation4] sm:$0xff]  ;;  %v12811_v28 = vpack.c.bf16 %v1623_v40, %v1622_v49  ;;  %1908 = vst.msk [vmem:[#allocation4 + $0x80] sm:$0xff] %vm77_vm0, %v1884_v56  ;;  %1257 = vst.msk [vmem:[#allocation4 + $0xa8] sm:$0xff] %vm77_vm0, %v1233_v38  ;;  %v1624_v15 = vld [vmem:[#allocation4 + $0x88] sm:$0xff]  ;;  %v12820_v25 = vpack.c.bf16 %v12806_v21, %v12797_v9  ;;  %v12822_v39 = vpack.c.bf16 %v1408_v5, %v1407_v34  ;;  %988 = vrot.lane.b32.xlu1 %v972_v45, %s12020_s23 }
 0x180   :  { %908 = vst.msk [vmem:[#allocation4] sm:$0xff] %vm77_vm0, %v884_v63  ;;  %1583 = vst.msk [vmem:[#allocation4 + $0x98] sm:$0xff] %vm77_vm0, %v1559_v20  ;;  %v12826_v49 = vpack.c.bf16 %v1624_v15, %v1623_v40  ;;  %v640_v56 = vpack.c.bf16 %v12548_v0, %v12489_v14  ;;  %v1212_v63 = vld [vmem:[#allocation2 + $0x2] sm:$0xff]  ;;  %v1887_v38 = vld [vmem:[#allocation2 + $0x134] sm:$0xff]  ;;  %v973_v45 = vpack.c.bf16 %v12589_v53, %v12572_v32 }
 0x181   :  { %1909 = vst.msk [vmem:[#allocation4 + $0x88] sm:$0xff] %vm77_vm0, %v1885_v4  ;;  %v1886_v20 = vld [vmem:[#allocation2 + $0x124] sm:$0xff]  ;;  %v1561_v50 = vld [vmem:[#allocation2 + $0x153] sm:$0xff] }
 0x182   :  { %14634 = vst [vmem:[#allocation49_spill] sm:$0xff] %v12826_v49  ;;  %656 = vrot.lane.b32.xlu0 %v640_v56, %s12020_s23  ;;  %v1560_v34 = vld [vmem:[#allocation2 + $0x143] sm:$0xff] }
 0x183   :  { %772 = vrot.lane.b32.xlu1 %v755_v59, %s12020_s23  ;;  %v1625_v0 = vld [vmem:[#allocation4 + $0x90] sm:$0xff] }
 0x184   :  { %v12843_v56 = vpack.c.bf16 %v1625_v0, %v1624_v15  ;;  %1910 = vst.msk [vmem:[#allocation4 + $0x90] sm:$0xff] %vm77_vm0, %v1886_v20  ;;  %v974_v15 = vpack.c.bf16 %v12620_v23, %v12603_v1  ;;  %v1888_v20 = vld [vmem:[#allocation2 + $0x144] sm:$0xff]  ;;  %v975_v1 = vpack.c.bf16 %v12661_v12, %v12631_v54  ;;  %v562_v23 = vld [vmem:[#allocation2 + $0xb0] sm:$0xff] }
 0x185   :  { %v1409_v6 = vld [vmem:[#allocation4 + $0xa0] sm:$0xff]  ;;  %586 = vst.msk [vmem:[#allocation4 + $0x58] sm:$0xff] %vm77_vm0, %v562_v23  ;;  %v895_v12 = vld [vmem:[#allocation2 + $0xb1] sm:$0xff] }
 0x186   :  { %v12836_v40 = vpack.c.bf16 %v1409_v6, %v1408_v5  ;;  %1584 = vst.msk [vmem:[#allocation4 + $0xa0] sm:$0xff] %vm77_vm0, %v1560_v34  ;;  %v12841_v30 = vld [vmem:[#allocation4 + $0xa8] sm:$0xff]  ;;  %990 = vrot.lane.b32.xlu0 %v973_v45, %s12020_s23  ;;  %v756_v5 = vpack.c.bf16 %v12615_v17, %v12591_v57  ;;  %v976_v17 = vpack.c.bf16 %v12699_v2, %v12512_v31 }
 0x187   :  { %v12839_v4 = vld [vmem:[#allocation4] sm:$0xff]  ;;  %v1626_v49 = vld [vmem:[#allocation4 + $0x98] sm:$0xff]  ;;  %1585 = vst.msk [vmem:[#allocation4 + $0xa8] sm:$0xff] %vm77_vm0, %v1561_v50  ;;  %v12851_v32 = vpack.c.bf16 %v12841_v30, %v1409_v6  ;;  %658 = vrot.lane.b32.xlu1 %v754_v37, %s12020_s23  ;;  %v757_v6 = vpack.c.bf16 %v12502_v24, %v12622_v43  ;;  %v977_v43 = vpack.c.bf16 %v12730_v62, %v12701_v60 }
 0x188   :  { %1236 = vst.msk [vmem:[#allocation4] sm:$0xff] %vm77_vm0, %v1212_v63  ;;  %1911 = vst.msk [vmem:[#allocation4 + $0x98] sm:$0xff] %vm77_vm0, %v1887_v38  ;;  %v12853_v53 = vpack.c.bf16 %v1626_v49, %v1625_v0  ;;  %v1889_v38 = vld [vmem:[#allocation2 + $0x154] sm:$0xff]  ;;  %v1224_v54 = vld [vmem:[#allocation2 + $0xc2] sm:$0xff]  ;;  %v978_v2 = vpack.c.bf16 %v12765_v10, %v12736_v52  ;;  %v979_v60 = vpack.c.bf16 %v12797_v9, %v12767_v27 }
 0x189   :  { %v1087_v62 = vpack.c.bf16 %v12509_v29, %v12663_v19  ;;  %v1300_v10 = vpack.c.bf16 %v12597_v61, %v12495_v18  ;;  %v1223_v19 = vld [vmem:[#allocation2 + $0xb2] sm:$0xff]  ;;  %v1415_v61 = vpack.c.bf16 %v12515_v33, %v12709_v11  ;;  %v1091_v9 = vpack.c.bf16 %v12531_v44, %v12806_v21 }
 0x18a   :  { %774 = vrot.lane.b32.xlu0 %v756_v5, %s12020_s23  ;;  %v574_v52 = vld [vmem:[#allocation2 + $0x170] sm:$0xff]  ;;  %v1628_v11 = vpack.c.bf16 %v12633_v55, %v12500_v22  ;;  %v1419_v55 = vpack.c.bf16 %v12534_v46, %v12841_v30  ;;  %v1632_v30 = vpack.c.bf16 %v12786_v48, %v12528_v42 }
 0x18b   :  { %992 = vrot.lane.b32.xlu1 %v974_v15, %s12020_s23  ;;  %598 = vst.msk [vmem:[#allocation4 + $0xb8] sm:$0xff] %vm77_vm0, %v574_v52  ;;  %v11631_v52 = vld [vmem:[#allocation7 + $0xd8] sm:$0xff]  }
 0x18d   :  { %v1627_v63 = vld [vmem:[#allocation4 + $0xa0] sm:$0xff] }
 0x18e   :  { %v12862_v34 = vpack.c.bf16 %v1627_v63, %v1626_v49  ;;  %1912 = vst.msk [vmem:[#allocation4 + $0xa0] sm:$0xff] %vm77_vm0, %v1888_v20  ;;  %v12867_v37 = vld [vmem:[#allocation4 + $0xa8] sm:$0xff]  ;;  %660 = vrot.lane.b32.xlu0 %v755_v59, %s12020_s23  ;;  %v12886_v49 = vld [vmem:[#allocation4 + $0x60] sm:$0xff]  ;;  %v12893_v59 = vld [vmem:[#allocation4 + $0x58] sm:$0xff] }
 0x18f   :  { %1913 = vst.msk [vmem:[#allocation4 + $0xa8] sm:$0xff] %vm77_vm0, %v1889_v38  ;;  %v12872_v57 = vpack.c.bf16 %v12867_v37, %v1627_v63  ;;  %776 = vrot.lane.b32.xlu1 %v757_v6, %s12020_s23  ;;  %1248 = vst.msk [vmem:[#allocation4 + $0x60] sm:$0xff] %vm77_vm0, %v1224_v54  ;;  %v12895_v0 = vld [vmem:[#allocation4] sm:$0xff]  ;;  %v14635_v63 = vld [vmem:[#allocation31_spill] sm:$0xff] }
 0x190   :  { %919 = vst.msk [vmem:[#allocation4 + $0x58] sm:$0xff] %vm77_vm0, %v895_v12  ;;  %v14637_v6 = vld [vmem:[#allocation17_spill] sm:$0xff]  ;;  %v11626_v38 = vld [vmem:[#allocation7 + $0x80] sm:$0xff]   ;;  %v14638_v54 = vld [vmem:[#allocation42_spill] sm:$0xff] }
 0x191   :  { %v14639_v12 = vld [vmem:[#allocation18_spill] sm:$0xff] }
 0x192   :  { %994 = vrot.lane.b32.xlu0 %v975_v1, %s12020_s23  ;;  %v12937_v50 = vld [vmem:[#allocation4 + $0xb8] sm:$0xff] }
 0x193   :  { %662 = vrot.lane.b32.xlu1 %v756_v5, %s12020_s23 }
 0x196   :  { %996 = vrot.lane.b32.xlu0 %v976_v17, %s12020_s23  ;;  %v12973_v5 = vld [vmem:[#allocation4 + $0x60] sm:$0xff]  ;;  %v11627_v17 = vld [vmem:[#allocation7 + $0xc8] sm:$0xff]  }
 0x197   :  { %1100 = vrot.lane.b32.xlu1 %v973_v45, %s12020_s23  ;;  %v1540_v45 = vld [vmem:[#allocation2 + $0x3] sm:$0xff]  ;;  %v12915_v27 = vld [vmem:[#allocation4 + $0x58] sm:$0xff] }
 0x198   :  { %1564 = vst.msk [vmem:[#allocation4] sm:$0xff] %vm77_vm0, %v1540_v45  ;;  %1247 = vst.msk [vmem:[#allocation4 + $0x58] sm:$0xff] %vm77_vm0, %v1223_v19  ;;  %v2053_v45 = vld [vmem:[#allocation4 + $0x20] sm:$0xff]  ;;  %v11630_v19 = vld [vmem:[#allocation7 + $0x90] sm:$0xff]  }
 0x19a   :  { %998 = vrot.lane.b32.xlu0 %v977_v43, %s12020_s23 }
 0x19b   :  { %1102 = vrot.lane.b32.xlu1 %v974_v15, %s12020_s23 }
 0x19e   :  { %1000 = vrot.lane.b32.xlu0 %v978_v2, %s12020_s23 }
 0x19f   :  { %1104 = vrot.lane.b32.xlu1 %v975_v1, %s12020_s23  ;;  %v12964_v21 = vld [vmem:[#allocation4] sm:$0xff] }
 0x1a2   :  { %1002 = vrot.lane.b32.xlu0 %v979_v60, %s12020_s23 }
 0x1a3   :  { %1106 = vrot.lane.b32.xlu1 %v1087_v62, %s12020_s23 }
 0x1a6   :  { %1428 = vrot.lane.b32.xlu0 %v12625_v47, %s12020_s23 }
 0x1a7   :  { %1108 = vrot.lane.b32.xlu1 %v977_v43, %s12020_s23 }
 0x1aa   :  { %1316 = vrot.lane.b32.xlu0 %v1300_v10, %s12020_s23  ;;  %v2052_v10 = vld [vmem:[#allocation4 + $0x18] sm:$0xff] }
 0x1ab   :  { %1430 = vrot.lane.b32.xlu1 %v12670_v35, %s12020_s23 }
 0x1ae   :  { %1110 = vrot.lane.b32.xlu0 %v978_v2, %s12020_s23  ;;  %v1743_v2 = vpack.c.bf16 %v14639_v12, %v14638_v54  ;;  %v13015_v54 = vld [vmem:[#allocation4 + $0x58] sm:$0xff] }
 0x1af   :  { %1318 = vrot.lane.b32.xlu1 %v12625_v47, %s12020_s23  ;;  %v907_v47 = vld [vmem:[#allocation2 + $0x171] sm:$0xff] }
 0x1b0   :  { %931 = vst.msk [vmem:[#allocation4 + $0xb8] sm:$0xff] %vm77_vm0, %v907_v47  ;;  %v1941_v47 = vld [vmem:[#allocation4 + $0x10] sm:$0xff] }
 0x1b2   :  { %1432 = vrot.lane.b32.xlu0 %v12707_v7, %s12020_s23 }
 0x1b3   :  { %1112 = vrot.lane.b32.xlu1 %v979_v60, %s12020_s23  ;;  %v14640_v60 = vld [vmem:[#allocation36_spill] sm:$0xff] }
 0x1b6   :  { %1320 = vrot.lane.b32.xlu0 %v12670_v35, %s12020_s23  ;;  %v1304_v35 = vpack.c.bf16 %v12742_v13, %v12519_v36  ;;  %v1235_v13 = vld [vmem:[#allocation2 + $0x172] sm:$0xff] }
 0x1b7   :  { %1434 = vrot.lane.b32.xlu1 %v1415_v61, %s12020_s23 }
 0x1ba   :  { %1114 = vrot.lane.b32.xlu0 %v1091_v9, %s12020_s23  ;;  %v1940_v9 = vld [vmem:[#allocation4 + $0x8] sm:$0xff] }
 0x1bb   :  { %1322 = vrot.lane.b32.xlu1 %v12707_v7, %s12020_s23  ;;  %v12958_v7 = vld [vmem:[#allocation4 + $0xb8] sm:$0xff] }
 0x1bc   :  { %1259 = vst.msk [vmem:[#allocation4 + $0xb8] sm:$0xff] %vm77_vm0, %v1235_v13  ;;  %v2054_v13 = vld [vmem:[#allocation4 + $0x28] sm:$0xff] }
 0x1be   :  { %1436 = vrot.lane.b32.xlu0 %v12770_v41, %s12020_s23 }
 0x1bf   :  { %1644 = vrot.lane.b32.xlu1 %v1628_v11, %s12020_s23 }
 0x1c2   :  { %1324 = vrot.lane.b32.xlu0 %v1304_v35, %s12020_s23  ;;  %v2055_v35 = vld [vmem:[#allocation4 + $0x30] sm:$0xff] }
 0x1c3   :  { %1438 = vrot.lane.b32.xlu1 %v12808_v8, %s12020_s23 }
 0x1c6   :  { %1646 = vrot.lane.b32.xlu0 %v12678_v26, %s12020_s23 }
 0x1c7   :  { %1326 = vrot.lane.b32.xlu1 %v12770_v41, %s12020_s23  ;;  %v1868_v41 = vld [vmem:[#allocation2 + $0x4] sm:$0xff] }
 0x1c8   :  { %1892 = vst.msk [vmem:[#allocation4] sm:$0xff] %vm77_vm0, %v1868_v41  ;;  %v1956_v41 = vpack.c.bf16 %v1941_v47, %v1940_v9  ;;  %v11637_v9 = vld [vmem:[#allocation7 + $0xf0] sm:$0xff]   ;;  %v2058_v47 = vld [vmem:[#allocation4 + $0x48] sm:$0xff] }
 0x1ca   :  { %1440 = vrot.lane.b32.xlu0 %v12836_v40, %s12020_s23 }
 0x1cb   :  { %1648 = vrot.lane.b32.xlu1 %v12719_v58, %s12020_s23 }
 0x1ce   :  { %1328 = vrot.lane.b32.xlu0 %v12808_v8, %s12020_s23  ;;  %v1552_v8 = vld [vmem:[#allocation2 + $0xc3] sm:$0xff] }
 0x1cf   :  { %1442 = vrot.lane.b32.xlu1 %v1419_v55, %s12020_s23  ;;  %1576 = vst.msk [vmem:[#allocation4 + $0x60] sm:$0xff] %vm77_vm0, %v1552_v8 }
 0x1d2   :  { %1650 = vrot.lane.b32.xlu0 %v12750_v3, %s12020_s23 }
 0x1d3   :  { %1330 = vrot.lane.b32.xlu1 %v12836_v40, %s12020_s23  ;;  %v14636_v40 = vld [vmem:[#allocation35_spill] sm:$0xff] }
 0x1d4   :  { %v619_v48 = vpack.c.bf16 %v14637_v6, %v14636_v40  ;;  %v2069_v40 = vpack.c.bf16 %v2055_v35, %v2054_v13  ;;  %v11633_v6 = vld [vmem:[#allocation7 + $0xe0] sm:$0xff]   ;;  %v948_v13 = vpack.c.bf16 %v12492_v16, %v12839_v4  ;;  %v11642_v16 = vld [vmem:[#allocation7 + $0x148] sm:$0xff]  }
 0x1d6   :  { %1652 = vrot.lane.b32.xlu0 %v1632_v30, %s12020_s23  ;;  %v11632_v30 = vld [vmem:[#allocation7 + $0x98] sm:$0xff]  }
 0x1d7   :  { %1756 = vrot.lane.b32.xlu1 %v12678_v26, %s12020_s23  ;;  %v779_v15 = vpop.permute.xlu0 %778  ;;  %v11628_v26 = vld [vmem:[#allocation7 + $0x88] sm:$0xff]  }
 0x1d8   :  { %v804_v20 = vsel %vm77_vm0, %v14635_v63, %v779_v15  ;;  %v14641_v15 = vld [vmem:[#allocation40_spill] sm:$0xff] }
 0x1d9   :  { %3347 = vmatprep.mubr.bf16.mxu1 %v804_v20 }
 0x1da   :  { %1654 = vrot.lane.b32.xlu0 %v12811_v28, %s12020_s23 }
 0x1db   :  { %1758 = vrot.lane.b32.xlu1 %v12719_v58, %s12020_s23  ;;  %v665_v1 = vpop.permute.xlu0 %664  ;;  %v11629_v58 = vld [vmem:[#allocation7 + $0xd0] sm:$0xff]  }
 0x1dc   :  { %v690_v23 = vsel %vm77_vm0, %v619_v48, %v665_v1 }
 0x1dd   :  { %3348 = vmatmul.mubr.bf16.vlgmr.msra.gmra.mrb[0].mxu1 %v690_v23  ;;  %v2057_v23 = vld [vmem:[#allocation4 + $0x40] sm:$0xff] }
 0x1de   :  { %1656 = vrot.lane.b32.xlu0 %v12843_v56, %s12020_s23  ;;  %9667 = vmatpush3.bf16.msra.mxu1 %v11626_v38  ;;  %v14642_v38 = vld [vmem:[#allocation45_spill] sm:$0xff] }
 0x1df   :  { %1760 = vrot.lane.b32.xlu1 %v12750_v3, %s12020_s23  ;;  %9668 = vmatprep.subr.bf16.mxu1 %v11627_v17  ;;  %v2068_v3 = vpack.c.bf16 %v2053_v45, %v2052_v10  ;;  %v11635_v17 = vld [vmem:[#allocation7 + $0xe8] sm:$0xff]   ;;  %v13018_v10 = vld [vmem:[#allocation4 + $0x60] sm:$0xff] }
 0x1e0   :  { %v781_v43 = vpop.permute.xlu1 %780 }
 0x1e1   :  { %v808_v62 = vsel %vm77_vm0, %v14640_v60, %v781_v43  ;;  %v2056_v43 = vld [vmem:[#allocation4 + $0x38] sm:$0xff] }
 0x1e2   :  { %1658 = vrot.lane.b32.xlu0 %v12862_v34, %s12020_s23  ;;  %3355 = vmatprep.mubr.bf16.mxu1 %v808_v62  ;;  %v2070_v45 = vpack.c.bf16 %v2057_v23, %v2056_v43  ;;  %v11636_v62 = vld [vmem:[#allocation7 + $0xa8] sm:$0xff]   ;;  %v2061_v23 = vld [vmem:[#allocation4 + $0x80] sm:$0xff] }
 0x1e3   :  { %1762 = vrot.lane.b32.xlu1 %v1743_v2, %s12020_s23  ;;  %9669 = vmatpush3.bf16.msra.mxu1 %v11628_v26  ;;  %v1551_v2 = vld [vmem:[#allocation2 + $0xb3] sm:$0xff]  ;;  %v1948_v43 = vld [vmem:[#allocation4 + $0x68] sm:$0xff] }
 0x1e4   :  { %v667_v61 = vpop.permute.xlu1 %666  ;;  %9670 = vmatprep.subr.bf16.mxu1 %v11629_v58  ;;  %1575 = vst.msk [vmem:[#allocation4 + $0x58] sm:$0xff] %vm77_vm0, %v1551_v2  ;;  %v1949_v2 = vld [vmem:[#allocation4 + $0x70] sm:$0xff] }
 0x1e5   :  { %v694_v11 = vsel %vm77_vm0, %v14635_v63, %v667_v61 }
 0x1e6   :  { %2084 = vrot.lane.b32.xlu0 %v2068_v3, %s12020_s23  ;;  %3356 = vmatmul.mubr.bf16.gmra.mrb[4].mxu1 %v694_v11  ;;  %v2059_v11 = vld [vmem:[#allocation4 + $0x50] sm:$0xff] }
 0x1e7   :  { %1764 = vrot.lane.b32.xlu1 %v12811_v28, %s12020_s23  ;;  %9671 = vmatpush3.bf16.msra.mxu1 %v11630_v19  ;;  %v11634_v28 = vld [vmem:[#allocation7 + $0xa0] sm:$0xff]  }
 0x1e8   :  { %v783_v55 = vpop.permute.xlu0 %782  ;;  %9672 = vmatprep.subr.bf16.mxu1 %v11631_v52  ;;  %v1880_v19 = vld [vmem:[#allocation2 + $0xc4] sm:$0xff] }
 0x1e9   :  { %v669_v8 = vpop.permute.xlu1 %668  ;;  %v812_v20 = vsel %vm77_vm0, %v14641_v15, %v783_v55  ;;  %v14643_v52 = vld [vmem:[#allocation21_spill] sm:$0xff]  ;;  %1904 = vst.msk [vmem:[#allocation4 + $0x60] sm:$0xff] %vm77_vm0, %v1880_v19  ;;  %v11639_v55 = vld [vmem:[#allocation7 + $0xb0] sm:$0xff]  }
 0x1ea   :  { %3363 = vmatprep.mubr.bf16.mxu1 %v812_v20  ;;  %1972 = vrot.lane.b32.xlu0 %v1956_v41, %s12020_s23  ;;  %v698_v26 = vsel %vm77_vm0, %v14640_v60, %v669_v8  ;;  %v14644_v20 = vld [vmem:[#allocation22_spill] sm:$0xff] }
 0x1eb   :  { %2086 = vrot.lane.b32.xlu1 %v2069_v40, %s12020_s23  ;;  %9673 = vmatpush3.bf16.msra.mxu1 %v11632_v30  ;;  %v11640_v30 = vld [vmem:[#allocation7 + $0x100] sm:$0xff]  }
 0x1ec   :  { %v785_v63 = vpop.permute.xlu0 %784  ;;  %9674 = vmatprep.subr.bf16.mxu1 %v11633_v6  ;;  %v11641_v6 = vld [vmem:[#allocation7 + $0xf8] sm:$0xff]  }
 0x1ed   :  { %v671_v48 = vpop.permute.xlu1 %670  ;;  %v816_v1 = vsel %vm77_vm0, %v14642_v38, %v785_v63 }
 0x1ee   :  { %1766 = vrot.lane.b32.xlu0 %v12843_v56, %s12020_s23  ;;  %3364 = vmatmul.mubr.bf16.gmra.mrb[8].mxu1 %v698_v26  ;;  %v702_v8 = vsel %vm77_vm0, %v14641_v15, %v671_v48  ;;  %v11643_v48 = vld [vmem:[#allocation7 + $0xb8] sm:$0xff]   ;;  %v11657_v26 = vld [vmem:[#allocation7 + $0x1c0] sm:$0xff]  }
 0x1ef   :  { %1974 = vrot.lane.b32.xlu1 %v2068_v3, %s12020_s23  ;;  %3371 = vmatprep.mubr.bf16.mxu1 %v816_v1  ;;  %v615_v3 = vpack.c.bf16 %v12489_v14, %v12802_v51  ;;  %v2071_v51 = vpack.c.bf16 %v2059_v11, %v2058_v47  ;;  %v11646_v11 = vld [vmem:[#allocation7 + $0x110] sm:$0xff]  }
 0x1f0   :  { %9675 = vmatpush3.bf16.msra.mxu1 %v11634_v28  ;;  %v771_v58 = vpop.permute.xlu0 %770  ;;  %v14645_v28 = vld [vmem:[#allocation20_spill] sm:$0xff] }
 0x1f1   :  { %v989_v61 = vpop.permute.xlu1 %988  ;;  %v788_v56 = vsel %vm77_vm0, %v14643_v52, %v771_v58  ;;  %9676 = vmatprep.subr.bf16.mxu1 %v11635_v17  ;;  %v1747_v1 = vpack.c.bf16 %v14645_v28, %v12867_v37  ;;  %v11644_v17 = vld [vmem:[#allocation7 + $0x108] sm:$0xff]   ;;  %v2060_v58 = vld [vmem:[#allocation4 + $0x78] sm:$0xff]  ;;  %v11645_v37 = vld [vmem:[#allocation7 + $0x150] sm:$0xff]  }
 0x1f2   :  { %3315 = vmatprep.mubr.bf16.mxu0 %v788_v56  ;;  %2088 = vrot.lane.b32.xlu0 %v2070_v45, %s12020_s23  ;;  %v1006_v4 = vsel %vm77_vm0, %v948_v13, %v989_v61  ;;  %v2072_v19 = vpack.c.bf16 %v2061_v23, %v2060_v58  ;;  %v1960_v56 = vpack.c.bf16 %v1949_v2, %v1948_v43  ;;  %v11658_v13 = vld [vmem:[#allocation7 + $0x180] sm:$0xff]   ;;  %v2067_v23 = vld [vmem:[#allocation4 + $0xb0] sm:$0xff]  ;;  %v14648_v43 = vld [vmem:[#allocation27_spill] sm:$0xff] }
 0x1f3   :  { %1768 = vrot.lane.b32.xlu1 %v12862_v34, %s12020_s23  ;;  %v11660_v58 = vld [vmem:[#allocation7 + $0x188] sm:$0xff]  }
 0x1f4   :  { %9677 = vmatpush3.bf16.msra.mxu1 %v11636_v62  ;;  %v657_v35 = vpop.permute.xlu0 %656 }
 0x1f5   :  { %v674_v41 = vsel %vm77_vm0, %v615_v3, %v657_v35  ;;  %v773_v14 = vpop.permute.xlu1 %772  ;;  %9678 = vmatprep.subr.bf16.mxu1 %v11637_v9  ;;  %v14646_v9 = vld [vmem:[#allocation24_spill] sm:$0xff]  ;;  %v2063_v35 = vld [vmem:[#allocation4 + $0x90] sm:$0xff] }
 0x1f6   :  { %1976 = vrot.lane.b32.xlu0 %v2069_v40, %s12020_s23  ;;  %3316 = vmatmul.mubr.bf16.vlgmr.msra.gmra.mrb[32].mxu0 %v674_v41  ;;  %v792_v34 = vsel %vm77_vm0, %v14644_v20, %v773_v14 }
 0x1f7   :  { %3372 = vmatmul.mubr.bf16.gmra.mrb[12].mxu1 %v702_v8  ;;  %2090 = vrot.lane.b32.xlu1 %v2071_v51, %s12020_s23  ;;  %v11648_v8 = vld [vmem:[#allocation7 + $0x118] sm:$0xff]  }
 0x1f8   :  { %3323 = vmatprep.mubr.bf16.mxu0 %v792_v34  ;;  %9679 = vmatpush3.bf16.msra.mxu1 %v11639_v55  ;;  %v991_v63 = vpop.permute.xlu0 %990  ;;  %v2062_v55 = vld [vmem:[#allocation4 + $0x88] sm:$0xff]  ;;  %v2065_v34 = vld [vmem:[#allocation4 + $0xa0] sm:$0xff] }
 0x1f9   :  { %3412 = vmatprep.mubr.bf16.mxu1 %v1006_v4  ;;  %9731 = vmatpush3.bf16.msra.mxu0 %v11640_v30  ;;  %v659_v40 = vpop.permute.xlu1 %658  ;;  %v2073_v51 = vpack.c.bf16 %v2063_v35, %v2062_v55  ;;  %v11659_v30 = vld [vmem:[#allocation7 + $0x1c8] sm:$0xff]   ;;  %v1563_v35 = vld [vmem:[#allocation2 + $0x173] sm:$0xff] }
 0x1fa   :  { %9680 = vmatprep.subr.bf16.mxu1 %v11641_v6  ;;  %1770 = vrot.lane.b32.xlu0 %v1747_v1, %s12020_s23  ;;  %v678_v3 = vsel %vm77_vm0, %v14643_v52, %v659_v40  ;;  %v14647_v52 = vld [vmem:[#allocation23_spill] sm:$0xff]  ;;  %v11649_v1 = vld [vmem:[#allocation7 + $0x160] sm:$0xff]  }
 0x1fb   :  { %1978 = vrot.lane.b32.xlu1 %v2070_v45, %s12020_s23  ;;  %9732 = vmatprep.subr.bf16.mxu0 %v11642_v16  ;;  %v11647_v45 = vld [vmem:[#allocation7 + $0x158] sm:$0xff]   ;;  %v1010_v41 = vsel %vm77_vm0, %v14647_v52, %v991_v63  ;;  %v11650_v40 = vld [vmem:[#allocation7 + $0x120] sm:$0xff]  }
 0x1fc   :  { %9681 = vmatpush3.bf16.msra.mxu1 %v11643_v48  ;;  %v775_v62 = vpop.permute.xlu0 %774  ;;  %v2064_v16 = vld [vmem:[#allocation4 + $0x98] sm:$0xff] }
 0x1fd   :  { %9733 = vmatpush3.bf16.msra.mxu0 %v11644_v17  ;;  %v993_v61 = vpop.permute.xlu1 %992  ;;  %v796_v47 = vsel %vm77_vm0, %v14646_v9, %v775_v62  ;;  %9794 = vmatprep.subr.bf16.mxu1 %v11657_v26  ;;  %v2074_v4 = vpack.c.bf16 %v2065_v34, %v2064_v16  ;;  %v2066_v17 = vld [vmem:[#allocation4 + $0xa8] sm:$0xff]  ;;  %v11664_v34 = vld [vmem:[#allocation7 + $0x198] sm:$0xff]   ;;  %v11665_v16 = vld [vmem:[#allocation7 + $0x1e0] sm:$0xff]  }
 0x1fe   :  { %2092 = vrot.lane.b32.xlu0 %v2072_v19, %s12020_s23  ;;  %3324 = vmatmul.mubr.bf16.gmra.mrb[36].mxu0 %v678_v3  ;;  %v11651_v26 = vld [vmem:[#allocation7 + $0x168] sm:$0xff]  }
 0x1ff   :  { %1980 = vrot.lane.b32.xlu1 %v1960_v56, %s12020_s23  ;;  %9562 = vmatmul.mubr.msk.bf16.vlgmr.msra.gmra.mrb[16].mxu1 %vm77_vm0, %v14644_v20  ;;  %v14649_v62 = vld [vmem:[#allocation25_spill] sm:$0xff] }
 0x200   :  { %9734 = vmatprep.subr.bf16.mxu0 %v11645_v37  ;;  %3331 = vmatprep.mubr.bf16.mxu0 %v796_v47  ;;  %v661_v14 = vpop.permute.xlu0 %660  ;;  %v11661_v37 = vld [vmem:[#allocation7 + $0x1d0] sm:$0xff]   ;;  %v11652_v3 = vld [vmem:[#allocation7 + $0x128] sm:$0xff]  }
 0x201   :  { %3420 = vmatprep.mubr.bf16.mxu1 %v1010_v41  ;;  %9735 = vmatpush3.bf16.msra.mxu0 %v11646_v11  ;;  %v777_v6 = vpop.permute.xlu1 %776  ;;  %v682_v48 = vsel %vm77_vm0, %v14644_v20, %v661_v14  ;;  %v1014_v20 = vsel %vm77_vm0, %v14649_v62, %v993_v61  ;;  %v11653_v47 = vld [vmem:[#allocation7 + $0x170] sm:$0xff]   ;;  %v13065_v11 = vld [vmem:[#allocation4 + $0xb8] sm:$0xff] }
 0x202   :  { %2094 = vrot.lane.b32.xlu0 %v2073_v51, %s12020_s23  ;;  %9736 = vmatprep.subr.bf16.mxu0 %v11647_v45  ;;  %v800_v2 = vsel %vm77_vm0, %v14648_v43, %v777_v6  ;;  %1587 = vst.msk [vmem:[#allocation4 + $0xb8] sm:$0xff] %vm77_vm0, %v1563_v35  ;;  %v11662_v61 = vld [vmem:[#allocation7 + $0x190] sm:$0xff]   ;;  %v11663_v41 = vld [vmem:[#allocation7 + $0x1d8] sm:$0xff]  }
 0x203   :  { %1982 = vrot.lane.b32.xlu1 %v2072_v19, %s12020_s23  ;;  %9795 = vmatpush3.bf16.msra.mxu1 %v11658_v13  ;;  %v2075_v19 = vpack.c.bf16 %v2067_v23, %v2066_v17  ;;  %v11654_v13 = vld [vmem:[#allocation7 + $0x130] sm:$0xff]   ;;  %v11655_v14 = vld [vmem:[#allocation7 + $0x178] sm:$0xff]   ;;  %v11666_v23 = vld [vmem:[#allocation7 + $0x1a0] sm:$0xff]  }
 0x204   :  { %9796 = vmatprep.subr.bf16.mxu1 %v11659_v30  ;;  %v995_v63 = vpop.permute.xlu0 %994  ;;  %v14650_v30 = vld [vmem:[#allocation28_spill] sm:$0xff] }
 0x205   :  { %9737 = vmatpush3.bf16.msra.mxu0 %v11648_v8  ;;  %v663_v56 = vpop.permute.xlu1 %662  ;;  %v1018_v8 = vsel %vm77_vm0, %v14650_v30, %v995_v63  ;;  %v952_v63 = vpack.c.bf16 %v12512_v31, %v12886_v49  ;;  %v11668_v31 = vld [vmem:[#allocation7 + $0x1a8] sm:$0xff]   ;;  %v11669_v49 = vld [vmem:[#allocation7 + $0x1f0] sm:$0xff]  }
 0x206   :  { %2096 = vrot.lane.b32.xlu0 %v2074_v4, %s12020_s23  ;;  %3332 = vmatmul.mubr.bf16.gmra.mrb[40].mxu0 %v682_v48  ;;  %v686_v55 = vsel %vm77_vm0, %v14646_v9, %v663_v56  ;;  %v1879_v48 = vld [vmem:[#allocation2 + $0xb4] sm:$0xff] }
 0x207   :  { %1984 = vrot.lane.b32.xlu1 %v2073_v51, %s12020_s23  ;;  %9563 = vmatmul.mubr.msk.bf16.gmra.mrb[20].mxu1 %vm77_vm0, %v14646_v9  ;;  %v11656_v9 = vld [vmem:[#allocation7 + $0x138] sm:$0xff]   ;;  %v11671_v56 = vld [vmem:[#allocation7 + $0x1b0] sm:$0xff]  }
 0x208   :  { %9738 = vmatprep.subr.bf16.mxu0 %v11649_v1  ;;  %3339 = vmatprep.mubr.bf16.mxu0 %v800_v2  ;;  %v997_v45 = vpop.permute.xlu0 %996  ;;  %v13077_v1 = vld [vmem:[#allocation4 + $0x58] sm:$0xff] }
 0x209   :  { %3428 = vmatprep.mubr.bf16.mxu1 %v1014_v20  ;;  %9739 = vmatpush3.bf16.msra.mxu0 %v11650_v40  ;;  %v1101_v51 = vpop.permute.xlu1 %1100  ;;  %v846_v40 = vpack.c.bf16 %v12893_v59, %v12502_v24  ;;  %1903 = vst.msk [vmem:[#allocation4 + $0x58] sm:$0xff] %vm77_vm0, %v1879_v48  ;;  %v1022_v24 = vsel %vm77_vm0, %v952_v63, %v997_v45  ;;  %v11674_v59 = vld [vmem:[#allocation7 + $0x248] sm:$0xff]  }
 0x20a   :  { %2098 = vrot.lane.b32.xlu0 %v2075_v19, %s12020_s23  ;;  %9740 = vmatprep.subr.bf16.mxu0 %v11651_v26  ;;  %v11667_v26 = vld [vmem:[#allocation7 + $0x1e8] sm:$0xff]   ;;  %v1118_v2 = vsel %vm77_vm0, %v14647_v52, %v1101_v51  ;;  %v11677_v52 = vld [vmem:[#allocation7 + $0x250] sm:$0xff]   ;;  %v11680_v51 = vld [vmem:[#allocation7 + $0x218] sm:$0xff]  }
 0x20b   :  { %1986 = vrot.lane.b32.xlu1 %v2074_v4, %s12020_s23  ;;  %9797 = vmatpush3.bf16.msra.mxu1 %v11660_v58  ;;  %v11670_v4 = vld [vmem:[#allocation7 + $0x240] sm:$0xff]   ;;  %v11676_v20 = vld [vmem:[#allocation7 + $0x208] sm:$0xff]  }
 0x20c   :  { %9798 = vmatprep.subr.bf16.mxu1 %v11661_v37  ;;  %v999_v6 = vpop.permute.xlu0 %998  ;;  %v14651_v45 = vld [vmem:[#allocation37_spill] sm:$0xff] }
 0x20d   :  { %9741 = vmatpush3.bf16.msra.mxu0 %v11652_v3  ;;  %v1103_v17 = vpop.permute.xlu1 %1102  ;;  %v11673_v3 = vld [vmem:[#allocation7 + $0x1f8] sm:$0xff]  }
 0x20e   :  { %3340 = vmatmul.mubr.bf16.gmra.mrb[44].mxu0 %v686_v55  ;;  %9742 = vmatprep.subr.bf16.mxu0 %v11653_v47  ;;  %v11678_v47 = vld [vmem:[#allocation7 + $0x210] sm:$0xff]   ;;  %v1122_v35 = vsel %vm77_vm0, %v14649_v62, %v1103_v17  ;;  %v11679_v55 = vld [vmem:[#allocation7 + $0x258] sm:$0xff]  }
 0x20f   :  { %9564 = vmatmul.mubr.msk.bf16.gmra.mrb[24].mxu1 %vm77_vm0, %v14648_v43  ;;  %9570 = vmatprep.mubr.msk.bf16.mxu0 %vm77_vm0, %v14649_v62  ;;  %v11672_v43 = vld [vmem:[#allocation7 + $0x200] sm:$0xff]  }
 0x210   :  { %3436 = vmatprep.mubr.bf16.mxu1 %v1018_v8  ;;  %9799 = vmatpush3.bf16.msra.mxu1 %v11662_v61  ;;  %v1001_v58 = vpop.permute.xlu0 %1000  ;;  %v1026_v61 = vsel %vm77_vm0, %v14651_v45, %v999_v6  ;;  %v11681_v62 = vld [vmem:[#allocation7 + $0x260] sm:$0xff]  }
 0x211   :  { %9743 = vmatpush3.bf16.msra.mxu0 %v11654_v13  ;;  %9800 = vmatprep.subr.bf16.mxu1 %v11663_v41  ;;  %v1105_v19 = vpop.permute.xlu1 %1104  ;;  %v14652_v41 = vld [vmem:[#allocation32_spill] sm:$0xff] }
 0x212   :  { %9744 = vmatprep.subr.bf16.mxu0 %v11655_v14  ;;  %v11675_v14 = vld [vmem:[#allocation7 + $0x1b8] sm:$0xff]   ;;  %v11682_v6 = vld [vmem:[#allocation7 + $0x220] sm:$0xff]  }
 0x214   :  { %9801 = vmatpush3.bf16.msra.mxu1 %v11664_v34  ;;  %v1003_v37 = vpop.permute.xlu0 %1002  ;;  %v1175_v34 = vpack.c.bf16 %v12915_v27, %v12509_v29  ;;  %v11684_v29 = vld [vmem:[#allocation7 + $0x228] sm:$0xff]   ;;  %v11685_v27 = vld [vmem:[#allocation7 + $0x270] sm:$0xff]  }
 0x215   :  { %9745 = vmatpush3.bf16.msra.mxu0 %v11656_v9  ;;  %9802 = vmatprep.subr.bf16.mxu1 %v11665_v16  ;;  %v1107_v13 = vpop.permute.xlu1 %1106  ;;  %v1126_v16 = vsel %vm77_vm0, %v14650_v30, %v1105_v19  ;;  %v14656_v19 = vld [vmem:[#allocation26_spill] sm:$0xff] }
 0x216   :  { %9858 = vmatprep.subr.bf16.mxu0 %v11670_v4  ;;  %v14653_v4 = vld [vmem:[#allocation41_spill] sm:$0xff] }
 0x217   :  { %9565 = vmatmul.mubr.msk.bf16.gmra.mrb[28].mxu1 %vm77_vm0, %v846_v40  ;;  %v1030_v48 = vsel %vm77_vm0, %v14653_v4, %v1001_v58  ;;  %v11683_v40 = vld [vmem:[#allocation7 + $0x268] sm:$0xff]   ;;  %v11688_v58 = vld [vmem:[#allocation7 + $0x238] sm:$0xff]  }
 0x218   :  { %3510 = vmatmul.mubr.bf16.vlgmr.msra.gmra.mrb[48].mxu0 %v1118_v2  ;;  %3444 = vmatprep.mubr.bf16.mxu1 %v1022_v24  ;;  %v1429_v8 = vpop.permute.xlu0 %1428  ;;  %v11687_v2 = vld [vmem:[#allocation7 + $0x278] sm:$0xff]  }
 0x219   :  { %9571 = vmatprep.mubr.msk.bf16.mxu0 %vm77_vm0, %v14650_v30  ;;  %9803 = vmatpush3.bf16.msra.mxu1 %v11666_v23  ;;  %v1109_v9 = vpop.permute.xlu1 %1108  ;;  %v1130_v30 = vsel %vm77_vm0, %v14652_v41, %v1107_v13 }
 0x21a   :  { %9804 = vmatprep.subr.bf16.mxu1 %v11667_v26  ;;  %9859 = vmatpush3.bf16.msra.mxu0 %v11672_v43  ;;  %v14654_v26 = vld [vmem:[#allocation46_spill] sm:$0xff] }
 0x21b   :  { %9860 = vmatprep.subr.bf16.mxu0 %v11674_v59  ;;  %v1034_v43 = vsel %vm77_vm0, %v14654_v26, %v1003_v37  ;;  %v14655_v59 = vld [vmem:[#allocation19_spill] sm:$0xff] }
 0x21c   :  { %v1317_v63 = vpop.permute.xlu0 %1316  ;;  %v13122_v37 = vld [vmem:[#allocation4 + $0xb8] sm:$0xff] }
 0x21d   :  { %9805 = vmatpush3.bf16.msra.mxu1 %v11668_v31  ;;  %v1431_v17 = vpop.permute.xlu1 %1430  ;;  %v850_v31 = vpack.c.bf16 %v12937_v50, %v14655_v59  ;;  %v1276_v50 = vpack.c.bf16 %v12495_v18, %v12895_v0  ;;  %v11692_v18 = vld [vmem:[#allocation7 + $0x288] sm:$0xff]   ;;  %v11693_v0 = vld [vmem:[#allocation7 + $0x2d0] sm:$0xff]   ;;  %v11704_v59 = vld [vmem:[#allocation7 + $0x300] sm:$0xff]  }
 0x21e   :  { %9806 = vmatprep.subr.bf16.mxu1 %v11669_v49  ;;  %9861 = vmatpush3.bf16.msra.mxu0 %v11676_v20  ;;  %v1134_v20 = vsel %vm77_vm0, %v14651_v45, %v1109_v9 }
 0x21f   :  { %9566 = vmatmul.mubr.msk.bf16.gmra.mrb[32].mxu1 %vm77_vm0, %v14640_v60  ;;  %9862 = vmatprep.subr.bf16.mxu0 %v11677_v52  ;;  %v11689_v60 = vld [vmem:[#allocation7 + $0x2c0] sm:$0xff]   ;;  %v1446_v52 = vsel %vm77_vm0, %v14656_v19, %v1429_v8  ;;  %v1334_v45 = vsel %vm77_vm0, %v1276_v50, %v1317_v63  ;;  %v1179_v8 = vpack.c.bf16 %v12958_v7, %v12531_v44  ;;  %v11696_v44 = vld [vmem:[#allocation7 + $0x298] sm:$0xff]  }
 0x220   :  { %3518 = vmatmul.mubr.bf16.gmra.mrb[52].mxu0 %v1122_v35  ;;  %3452 = vmatprep.mubr.bf16.mxu1 %v1026_v61  ;;  %v1111_v23 = vpop.permute.xlu0 %1110  ;;  %v11690_v35 = vld [vmem:[#allocation7 + $0x280] sm:$0xff]   ;;  %v11691_v61 = vld [vmem:[#allocation7 + $0x2c8] sm:$0xff]   ;;  %v1604_v63 = vpack.c.bf16 %v12500_v22, %v12964_v21  ;;  %v11707_v50 = vld [vmem:[#allocation7 + $0x2b8] sm:$0xff]  }
 0x221   :  { %9572 = vmatprep.mubr.msk.bf16.mxu0 %vm77_vm0, %v14652_v41  ;;  %9807 = vmatpush3.bf16.msra.mxu1 %v11671_v56  ;;  %v1319_v24 = vpop.permute.xlu1 %1318  ;;  %v1891_v56 = vld [vmem:[#allocation2 + $0x174] sm:$0xff]  ;;  %v1138_v13 = vsel %vm77_vm0, %v14653_v4, %v1111_v23  ;;  %v14657_v41 = vld [vmem:[#allocation29_spill] sm:$0xff]  ;;  %v11697_v7 = vld [vmem:[#allocation7 + $0x2e0] sm:$0xff]  }
 0x222   :  { %9808 = vmatprep.subr.bf16.mxu1 %v11673_v3  ;;  %9863 = vmatpush3.bf16.msra.mxu0 %v11678_v47  ;;  %1915 = vst.msk [vmem:[#allocation4 + $0xb8] sm:$0xff] %vm77_vm0, %v1891_v56  ;;  %v11700_v21 = vld [vmem:[#allocation7 + $0x2a8] sm:$0xff]  }
 0x223   :  { %9864 = vmatprep.subr.bf16.mxu0 %v11679_v55 }
 0x224   :  { %v1433_v49 = vpop.permute.xlu0 %1432 }
 0x225   :  { %9809 = vmatpush3.bf16.msra.mxu1 %v11675_v14  ;;  %v1113_v3 = vpop.permute.xlu1 %1112  ;;  %v1450_v14 = vsel %vm77_vm0, %v14657_v41, %v1431_v17 }
 0x226   :  { %9865 = vmatpush3.bf16.msra.mxu0 %v11680_v51  ;;  %9922 = vmatprep.subr.bf16.mxu1 %v11689_v60 }
 0x227   :  { %9567 = vmatmul.mubr.msk.bf16.gmra.mrb[36].mxu1 %vm77_vm0, %v14641_v15  ;;  %9866 = vmatprep.subr.bf16.mxu0 %v11681_v62  ;;  %v11686_v15 = vld [vmem:[#allocation7 + $0x230] sm:$0xff]  }
 0x228   :  { %3526 = vmatmul.mubr.bf16.gmra.mrb[56].mxu0 %v1126_v16  ;;  %3460 = vmatprep.mubr.bf16.mxu1 %v1030_v48  ;;  %v1321_v47 = vpop.permute.xlu0 %1320  ;;  %v11694_v62 = vld [vmem:[#allocation7 + $0x290] sm:$0xff]   ;;  %v1142_v16 = vsel %vm77_vm0, %v14654_v26, %v1113_v3 }
 0x229   :  { %9573 = vmatprep.mubr.msk.bf16.mxu0 %vm77_vm0, %v1175_v34  ;;  %v1435_v55 = vpop.permute.xlu1 %1434  ;;  %v1338_v34 = vsel %vm77_vm0, %v14656_v19, %v1319_v24  ;;  %v1342_v17 = vsel %vm77_vm0, %v14657_v41, %v1321_v47  ;;  %v11703_v24 = vld [vmem:[#allocation7 + $0x2b0] sm:$0xff]   ;;  %v11706_v19 = vld [vmem:[#allocation7 + $0x348] sm:$0xff]   ;;  %v1280_v47 = vpack.c.bf16 %v12519_v36, %v12973_v5  ;;  %v11711_v5 = vld [vmem:[#allocation7 + $0x358] sm:$0xff]  }
 0x22a   :  { %9867 = vmatpush3.bf16.msra.mxu0 %v11682_v6  ;;  %v11695_v6 = vld [vmem:[#allocation7 + $0x2d8] sm:$0xff]  }
 0x22b   :  { %9868 = vmatprep.subr.bf16.mxu0 %v11683_v40 }
 0x22c   :  { %v1115_v51 = vpop.permute.xlu0 %1114 }
 0x22d   :  { %v1323_v60 = vpop.permute.xlu1 %1322  ;;  %v1146_v23 = vsel %vm77_vm0, %v12820_v25, %v1115_v51  ;;  %v14662_v51 = vld [vmem:[#allocation47_spill] sm:$0xff] }
 0x22e   :  { %9869 = vmatpush3.bf16.msra.mxu0 %v11684_v29 }
 0x22f   :  { %9568 = vmatmul.mubr.msk.bf16.gmra.mrb[40].mxu1 %vm77_vm0, %v14642_v38  ;;  %9870 = vmatprep.subr.bf16.mxu0 %v11685_v27  ;;  %v11702_v38 = vld [vmem:[#allocation7 + $0x340] sm:$0xff]  }
 0x230   :  { %3534 = vmatmul.mubr.bf16.gmra.mrb[60].mxu0 %v1130_v30  ;;  %3468 = vmatprep.mubr.bf16.mxu1 %v1034_v43  ;;  %v1437_v9 = vpop.permute.xlu0 %1436  ;;  %v11698_v27 = vld [vmem:[#allocation7 + $0x2a0] sm:$0xff]   ;;  %v14659_v30 = vld [vmem:[#allocation38_spill] sm:$0xff] }
 0x231   :  { %9574 = vmatprep.mubr.msk.bf16.mxu0 %vm77_vm0, %v14653_v4  ;;  %v14658_v4 = vld [vmem:[#allocation33_spill] sm:$0xff]  ;;  %v1645_v40 = vpop.permute.xlu1 %1644 }
 0x232   :  { %9871 = vmatpush3.bf16.msra.mxu0 %v11686_v15  ;;  %v1454_v48 = vsel %vm77_vm0, %v14658_v4, %v1433_v49  ;;  %v11699_v15 = vld [vmem:[#allocation7 + $0x2e8] sm:$0xff]   ;;  %v1662_v43 = vsel %vm77_vm0, %v1604_v63, %v1645_v40  ;;  %v14660_v49 = vld [vmem:[#allocation43_spill] sm:$0xff]  ;;  %v11717_v40 = vld [vmem:[#allocation7 + $0x370] sm:$0xff]   ;;  %v1503_v63 = vpack.c.bf16 %v13015_v54, %v12515_v33 }
 0x233   :  { %9872 = vmatprep.subr.bf16.mxu0 %v11687_v2  ;;  %v11701_v2 = vld [vmem:[#allocation7 + $0x2f0] sm:$0xff]  }
 0x234   :  { %v1325_v29 = vpop.permute.xlu0 %1324 }
 0x235   :  { %v1439_v22 = vpop.permute.xlu1 %1438 }
 0x236   :  { %9873 = vmatpush3.bf16.msra.mxu0 %v11688_v58  ;;  %v1466_v36 = vsel %vm77_vm0, %v14662_v51, %v1439_v22  ;;  %v14665_v22 = vld [vmem:[#allocation48_spill] sm:$0xff] }
 0x237   :  { %9569 = vmatmul.mubr.msk.bf16.gmra.mrb[44].mxu1 %vm77_vm0, %v850_v31  ;;  %9986 = vmatprep.subr.bf16.mxu0 %v11702_v38  ;;  %v11705_v31 = vld [vmem:[#allocation7 + $0x2f8] sm:$0xff]  }
 0x238   :  { %3542 = vmatmul.mubr.bf16.gmra.mrb[64].mxu0 %v1134_v20  ;;  %3606 = vmatprep.mubr.bf16.mxu1 %v1446_v52  ;;  %v1647_v58 = vpop.permute.xlu0 %1646  ;;  %v1462_v20 = vsel %vm77_vm0, %v14660_v49, %v1437_v9  ;;  %v14661_v52 = vld [vmem:[#allocation30_spill] sm:$0xff] }
 0x239   :  { %9575 = vmatprep.mubr.msk.bf16.mxu0 %vm77_vm0, %v14654_v26  ;;  %v1458_v26 = vsel %vm77_vm0, %v14659_v30, %v1435_v55  ;;  %v1327_v38 = vpop.permute.xlu1 %1326  ;;  %v1666_v56 = vsel %vm77_vm0, %v14661_v52, %v1647_v58 }
 0x23c   :  { %v1441_v3 = vpop.permute.xlu0 %1440 }
 0x23d   :  { %v1649_v55 = vpop.permute.xlu1 %1648  ;;  %v1470_v9 = vsel %vm77_vm0, %v12822_v39, %v1441_v3  ;;  %v14667_v3 = vld [vmem:[#allocation44_spill] sm:$0xff] }
 0x23f   :  { %3607 = vmatmul.mubr.bf16.vlgmr.msra.gmra.mrb[48].mxu1 %v1334_v45  ;;  %v13164_v45 = vld [vmem:[#allocation7 + $0x380] sm:$0xff]  }
 0x240   :  { %3550 = vmatmul.mubr.bf16.gmra.mrb[68].mxu0 %v1138_v13  ;;  %3614 = vmatprep.mubr.bf16.mxu1 %v1450_v14  ;;  %v1350_v13 = vsel %vm77_vm0, %v1280_v47, %v1325_v29  ;;  %v1329_v14 = vpop.permute.xlu0 %1328  ;;  %v1608_v29 = vpack.c.bf16 %v12528_v42, %v13018_v10  ;;  %v11720_v42 = vld [vmem:[#allocation7 + $0x338] sm:$0xff]   ;;  %v11725_v47 = vld [vmem:[#allocation7 + $0x3a0] sm:$0xff]  }
 0x241   :  { %9576 = vmatprep.mubr.msk.bf16.mxu0 %vm77_vm0, %v12820_v25  ;;  %9923 = vmatpush3.bf16.msra.mxu1 %v11690_v35  ;;  %v1346_v25 = vsel %vm77_vm0, %v14658_v4, %v1323_v60  ;;  %v11708_v35 = vld [vmem:[#allocation7 + $0x308] sm:$0xff]   ;;  %v11712_v60 = vld [vmem:[#allocation7 + $0x318] sm:$0xff]  }
 0x242   :  { %9924 = vmatprep.subr.bf16.mxu1 %v11691_v61  ;;  %v11709_v61 = vld [vmem:[#allocation7 + $0x350] sm:$0xff]  }
 0x245   :  { %9925 = vmatpush3.bf16.msra.mxu1 %v11692_v18  ;;  %v14663_v18 = vld [vmem:[#allocation34_spill] sm:$0xff] }
 0x246   :  { %9926 = vmatprep.subr.bf16.mxu1 %v11693_v0  ;;  %v1670_v0 = vsel %vm77_vm0, %v14663_v18, %v1649_v55 }
 0x247   :  { %3615 = vmatmul.mubr.bf16.gmra.mrb[52].mxu1 %v1338_v34  ;;  %v1354_v34 = vsel %vm77_vm0, %v14660_v49, %v1327_v38  ;;  %v11723_v49 = vld [vmem:[#allocation7 + $0x390] sm:$0xff]  }
 0x248   :  { %3558 = vmatmul.mubr.bf16.gmra.mrb[72].mxu0 %v1142_v16  ;;  %3622 = vmatprep.mubr.bf16.mxu1 %v1454_v48  ;;  %v11715_v16 = vld [vmem:[#allocation7 + $0x368] sm:$0xff]  }
 0x249   :  { %9577 = vmatprep.mubr.msk.bf16.mxu0 %vm77_vm0, %v1179_v8  ;;  %9927 = vmatpush3.bf16.msra.mxu1 %v11694_v62  ;;  %v11713_v8 = vld [vmem:[#allocation7 + $0x360] sm:$0xff]   ;;  %v1651_v62 = vpop.permute.xlu0 %1650 }
 0x24a   :  { %9928 = vmatprep.subr.bf16.mxu1 %v11695_v6  ;;  %v11714_v6 = vld [vmem:[#allocation7 + $0x320] sm:$0xff]  }
 0x24d   :  { %9929 = vmatpush3.bf16.msra.mxu1 %v11696_v44  ;;  %v1443_v44 = vpop.permute.xlu1 %1442 }
 0x24e   :  { %9930 = vmatprep.subr.bf16.mxu1 %v11697_v7  ;;  %v11716_v7 = vld [vmem:[#allocation7 + $0x328] sm:$0xff]  }
 0x24f   :  { %3623 = vmatmul.mubr.bf16.gmra.mrb[56].mxu1 %v1342_v17  ;;  %v1358_v17 = vsel %vm77_vm0, %v14662_v51, %v1329_v14  ;;  %v11726_v14 = vld [vmem:[#allocation7 + $0x3a8] sm:$0xff]  }
 0x250   :  { %3566 = vmatmul.mubr.bf16.gmra.mrb[76].mxu0 %v1146_v23  ;;  %3630 = vmatprep.mubr.bf16.mxu1 %v1458_v26  ;;  %v11719_v26 = vld [vmem:[#allocation7 + $0x378] sm:$0xff]  }
 0x251   :  { %3703 = vmatprep.mubr.bf16.mxu0 %v1662_v43  ;;  %9931 = vmatpush3.bf16.msra.mxu1 %v11698_v27  ;;  %v1653_v27 = vpop.permute.xlu0 %1652  ;;  %v1331_v23 = vpop.permute.xlu1 %1330 }
 0x252   :  { %9932 = vmatprep.subr.bf16.mxu1 %v11699_v15  ;;  %v11718_v15 = vld [vmem:[#allocation7 + $0x330] sm:$0xff]   ;;  %v1678_v33 = vsel %vm77_vm0, %v1608_v29, %v1653_v27  ;;  %v1362_v43 = vsel %vm77_vm0, %v12822_v39, %v1331_v23 }
 0x255   :  { %9933 = vmatpush3.bf16.msra.mxu1 %v11700_v21  ;;  %v1757_v54 = vpop.permute.xlu1 %1756  ;;  %v1655_v10 = vpop.permute.xlu0 %1654 }
 0x256   :  { %9934 = vmatprep.subr.bf16.mxu1 %v11701_v2  ;;  %v1682_v21 = vsel %vm77_vm0, %v14665_v22, %v1655_v10 }
 0x257   :  { %3631 = vmatmul.mubr.bf16.gmra.mrb[60].mxu1 %v1346_v25  ;;  %v11722_v25 = vld [vmem:[#allocation7 + $0x388] sm:$0xff]  }
 0x258   :  { %9578 = vmatmul.mubr.msk.bf16.vlgmr.msra.gmra.mrb[80].mxu0 %vm77_vm0, %v14657_v41  ;;  %3638 = vmatprep.mubr.bf16.mxu1 %v1462_v20  ;;  %v11710_v41 = vld [vmem:[#allocation7 + $0x310] sm:$0xff]  }
 0x259   :  { %3711 = vmatprep.mubr.bf16.mxu0 %v1666_v56  ;;  %9935 = vmatpush3.bf16.msra.mxu1 %v11703_v24  ;;  %v1759_v2 = vpop.permute.xlu1 %1758  ;;  %v1657_v58 = vpop.permute.xlu0 %1656  ;;  %v1774_v24 = vsel %vm77_vm0, %v14661_v52, %v1757_v54  ;;  %v11724_v52 = vld [vmem:[#allocation7 + $0x398] sm:$0xff]  }
 0x25a   :  { %9987 = vmatpush3.bf16.msra.mxu0 %v11704_v59  ;;  %9936 = vmatprep.subr.bf16.mxu1 %v11705_v31  ;;  %v14666_v59 = vld [vmem:[#allocation49_spill] sm:$0xff] }
 0x25b   :  { %9988 = vmatprep.subr.bf16.mxu0 %v11706_v19  ;;  %v1686_v31 = vsel %vm77_vm0, %v14666_v59, %v1657_v58  ;;  %v1778_v19 = vsel %vm77_vm0, %v14663_v18, %v1759_v2  ;;  %v2036_v58 = vld [vmem:[#allocation4 + $0x70] sm:$0xff] }
 0x25d   :  { %9937 = vmatpush3.bf16.msra.mxu1 %v11707_v50  ;;  %v1761_v38 = vpop.permute.xlu1 %1760  ;;  %v1659_v20 = vpop.permute.xlu0 %1658 }
 0x25e   :  { %9989 = vmatpush3.bf16.msra.mxu0 %v11708_v35  ;;  %11002 = vmatprep.subr.bf16.mxu1 %v13164_v45  ;;  %v1690_v56 = vsel %vm77_vm0, %v12853_v53, %v1659_v20  ;;  %v2029_v35 = vld [vmem:[#allocation4 + $0x18] sm:$0xff] }
 0x25f   :  { %3639 = vmatmul.mubr.bf16.gmra.mrb[64].mxu1 %v1350_v13  ;;  %9990 = vmatprep.subr.bf16.mxu0 %v11709_v61  ;;  %v1831_v61 = vpack.c.bf16 %v13077_v1, %v14639_v12  ;;  %v11727_v12 = vld [vmem:[#allocation7 + $0x3b0] sm:$0xff]  }
 0x260   :  { %9579 = vmatmul.mubr.msk.bf16.gmra.mrb[84].mxu0 %vm77_vm0, %v14658_v4  ;;  %3646 = vmatprep.mubr.bf16.mxu1 %v1466_v36  ;;  %v14664_v4 = vld [vmem:[#allocation39_spill] sm:$0xff]  ;;  %v1916_v36 = vld [vmem:[#allocation4] sm:$0xff] }
 0x261   :  { %3719 = vmatprep.mubr.bf16.mxu0 %v1670_v0  ;;  %v1674_v48 = vsel %vm77_vm0, %v14664_v4, %v1651_v62  ;;  %v2085_v50 = vpop.permute.xlu0 %2084  ;;  %v1782_v13 = vsel %vm77_vm0, %v14664_v4, %v1761_v38  ;;  %v1924_v38 = vld [vmem:[#allocation4 + $0x60] sm:$0xff] }
 0x262   :  { %9991 = vmatpush3.bf16.msra.mxu0 %v11710_v41 }
 0x263   :  { %9992 = vmatprep.subr.bf16.mxu0 %v11711_v5  ;;  %v1917_v5 = vld [vmem:[#allocation4 + $0x8] sm:$0xff] }
 0x264   :  { %v1932_v1 = vpack.c.bf16 %v1917_v5, %v1916_v36 }
 0x266   :  { %9993 = vmatpush3.bf16.msra.mxu0 %v11712_v60  ;;  %v2030_v60 = vld [vmem:[#allocation4 + $0x20] sm:$0xff] }
 0x267   :  { %3647 = vmatmul.mubr.bf16.gmra.mrb[68].mxu1 %v1354_v34  ;;  %9994 = vmatprep.subr.bf16.mxu0 %v11713_v8  ;;  %v11728_v34 = vld [vmem:[#allocation7 + $0x3b8] sm:$0xff]  }
 0x268   :  { %9580 = vmatmul.mubr.msk.bf16.gmra.mrb[88].mxu0 %vm77_vm0, %v14659_v30  ;;  %3654 = vmatprep.mubr.bf16.mxu1 %v1470_v9  ;;  %v1474_v30 = vsel %vm77_vm0, %v12851_v32, %v1443_v44  ;;  %v2032_v44 = vld [vmem:[#allocation4 + $0x30] sm:$0xff] }
 0x269   :  { %3727 = vmatprep.mubr.bf16.mxu0 %v1674_v48  ;;  %v2033_v48 = vld [vmem:[#allocation4 + $0x38] sm:$0xff] }
 0x26a   :  { %9995 = vmatpush3.bf16.msra.mxu0 %v11714_v6 }
 0x26b   :  { %9996 = vmatprep.subr.bf16.mxu0 %v11715_v16 }
 0x26e   :  { %9997 = vmatpush3.bf16.msra.mxu0 %v11716_v7 }
 0x26f   :  { %3655 = vmatmul.mubr.bf16.gmra.mrb[72].mxu1 %v1358_v17  ;;  %9998 = vmatprep.subr.bf16.mxu0 %v11717_v40  ;;  %v13237_v40 = vpack.c.bf16 %v2033_v48, %v2032_v44 }
 0x270   :  { %9581 = vmatmul.mubr.msk.bf16.gmra.mrb[92].mxu0 %vm77_vm0, %v1503_v63  ;;  %3662 = vmatprep.mubr.bf16.mxu1 %v1474_v30  ;;  %v2034_v30 = vld [vmem:[#allocation4 + $0x40] sm:$0xff] }
 0x271   :  { %3735 = vmatprep.mubr.bf16.mxu0 %v1678_v33 }
 0x272   :  { %9999 = vmatpush3.bf16.msra.mxu0 %v11718_v15  ;;  %v2035_v15 = vld [vmem:[#allocation4 + $0x48] sm:$0xff] }
 0x273   :  { %10000 = vmatprep.subr.bf16.mxu0 %v11719_v26  ;;  %v2047_v33 = vpack.c.bf16 %v2035_v15, %v2034_v30 }
 0x276   :  { %10001 = vmatpush3.bf16.msra.mxu0 %v11720_v42 }
 0x277   :  { %3663 = vmatmul.mubr.bf16.gmra.mrb[76].mxu1 %v1362_v43  ;;  %v2037_v43 = vld [vmem:[#allocation4 + $0x78] sm:$0xff] }
 0x278   :  { %9582 = vmatmul.mubr.msk.bf16.gmra.mrb[96].mxu0 %vm77_vm0, %v14662_v51  ;;  %9586 = vmatprep.mubr.msk.bf16.mxu1 %vm77_vm0, %v14663_v18  ;;  %v1973_v51 = vpop.permute.xlu0 %1972  ;;  %v2031_v18 = vld [vmem:[#allocation4 + $0x28] sm:$0xff] }
 0x279   :  { %3743 = vmatprep.mubr.bf16.mxu0 %v1682_v21  ;;  %v13228_v62 = vpack.c.bf16 %v2031_v18, %v2030_v60  ;;  %v1990_v6 = vsel %vm77_vm0, %v1932_v1, %v1973_v51  ;;  %v1835_v21 = vpack.c.bf16 %v13122_v37, %v14645_v28  ;;  %v2147_v60 = vld [vmem:[#allocation4 + $0x58] sm:$0xff] }
 0x27c   :  { %v1767_v0 = vpop.permute.xlu0 %1766 }
 0x27d   :  { %v1794_v26 = vsel %vm77_vm0, %v14666_v59, %v1767_v0  ;;  %v2146_v0 = vld [vmem:[#allocation4 + $0x50] sm:$0xff] }
 0x27f   :  { %3801 = vmatmul.mubr.bf16.vlgmr.msra.gmra.mrb[80].mxu1 %v1774_v24 }
 0x280   :  { %9583 = vmatmul.mubr.msk.bf16.gmra.mrb[100].mxu0 %vm77_vm0, %v12822_v39  ;;  %9587 = vmatprep.mubr.msk.bf16.mxu1 %vm77_vm0, %v14664_v4  ;;  %v1763_v39 = vpop.permute.xlu1 %1762  ;;  %v2089_v4 = vpop.permute.xlu0 %2088 }
 0x281   :  { %3751 = vmatprep.mubr.bf16.mxu0 %v1686_v31  ;;  %11003 = vmatpush3.bf16.msra.mxu1 %v13164_v45  ;;  %v1507_v45 = vpack.c.bf16 %v13065_v11, %v12534_v46  ;;  %v1786_v8 = vsel %vm77_vm0, %v14667_v3, %v1763_v39  ;;  %v2110_v27 = vsel %vm77_vm0, %v13237_v40, %v2089_v4 }
 0x282   :  { %11004 = vmatprep.subr.bf16.mxu1 %v11722_v25 }
 0x284   :  { %v1765_v55 = vpop.permute.xlu1 %1764  ;;  %v1977_v17 = vpop.permute.xlu0 %1976 }
 0x285   :  { %11005 = vmatpush3.bf16.msra.mxu1 %v11722_v25  ;;  %v1790_v7 = vsel %vm77_vm0, %v14665_v22, %v1765_v55  ;;  %v1998_v54 = vsel %vm77_vm0, %v13228_v62, %v1977_v17  ;;  %v2048_v25 = vpack.c.bf16 %v2037_v43, %v2036_v58 }
 0x286   :  { %11006 = vmatprep.subr.bf16.mxu1 %v11723_v49 }
 0x287   :  { %3809 = vmatmul.mubr.bf16.gmra.mrb[84].mxu1 %v1778_v19  ;;  %v2039_v19 = vld [vmem:[#allocation4 + $0x88] sm:$0xff] }
 0x288   :  { %9584 = vmatmul.mubr.msk.bf16.gmra.mrb[104].mxu0 %vm77_vm0, %v12851_v32  ;;  %9588 = vmatprep.mubr.msk.bf16.mxu1 %vm77_vm0, %v14667_v3  ;;  %v2028_v32 = vld [vmem:[#allocation4 + $0x10] sm:$0xff]  ;;  %v2087_v11 = vpop.permute.xlu1 %2086  ;;  %v1771_v42 = vpop.permute.xlu0 %1770 }
 0x289   :  { %3759 = vmatprep.mubr.bf16.mxu0 %v1690_v56  ;;  %11007 = vmatpush3.bf16.msra.mxu1 %v11723_v49  ;;  %v2044_v41 = vpack.c.bf16 %v2029_v35, %v2028_v32  ;;  %v2106_v9 = vsel %vm77_vm0, %v13228_v62, %v2087_v11  ;;  %v1925_v49 = vld [vmem:[#allocation4 + $0x68] sm:$0xff]  ;;  %v1802_v35 = vsel %vm77_vm0, %v12872_v57, %v1771_v42 }
 0x28a   :  { %11008 = vmatprep.subr.bf16.mxu1 %v11724_v52  ;;  %v1936_v37 = vpack.c.bf16 %v1925_v49, %v1924_v38  ;;  %v13296_v49 = vld [vmem:[%s14557_s5] ss:$0 sm:$0xff] }
 0x28b   :  { %v2102_v46 = vsel %vm77_vm0, %v2044_v41, %v2085_v50  ;;  %v2038_v50 = vld [vmem:[#allocation4 + $0x80] sm:$0xff] }
 0x28c   :  { %v1975_v16 = vpop.permute.xlu1 %1974  ;;  %v2093_v2 = vpop.permute.xlu0 %2092 }
 0x28d   :  { %11009 = vmatpush3.bf16.msra.mxu1 %v11724_v52  ;;  %v1994_v29 = vsel %vm77_vm0, %v2044_v41, %v1975_v16  ;;  %v2118_v31 = vsel %vm77_vm0, %v2048_v25, %v2093_v2  ;;  %v2041_v41 = vld [vmem:[#allocation4 + $0x98] sm:$0xff] }
 0x28e   :  { %11010 = vmatprep.subr.bf16.mxu1 %v11725_v47 }
 0x28f   :  { %3817 = vmatmul.mubr.bf16.gmra.mrb[88].mxu1 %v1782_v13 }
 0x290   :  { %9585 = vmatmul.mubr.msk.bf16.gmra.mrb[108].mxu0 %vm77_vm0, %v1507_v45  ;;  %9589 = vmatprep.mubr.msk.bf16.mxu1 %vm77_vm0, %v1831_v61  ;;  %v1769_v63 = vpop.permute.xlu1 %1768  ;;  %v2095_v56 = vpop.permute.xlu0 %2094  ;;  %v2049_v45 = vpack.c.bf16 %v2039_v19, %v2038_v50 }
 0x291   :  { %3897 = vmatprep.mubr.bf16.mxu0 %v2102_v46  ;;  %11011 = vmatpush3.bf16.msra.mxu1 %v11725_v47  ;;  %v1798_v24 = vsel %vm77_vm0, %v12853_v53, %v1769_v63  ;;  %v2040_v46 = vld [vmem:[#allocation4 + $0x90] sm:$0xff] }
 0x292   :  { %11012 = vmatprep.subr.bf16.mxu1 %v11726_v14  ;;  %v2122_v55 = vsel %vm77_vm0, %v2049_v45, %v2095_v56  ;;  %v2050_v11 = vpack.c.bf16 %v2041_v41, %v2040_v46 }
 0x294   :  { %v2091_v23 = vpop.permute.xlu1 %2090  ;;  %v2097_v5 = vpop.permute.xlu0 %2096 }
 0x295   :  { %11013 = vmatpush3.bf16.msra.mxu1 %v11726_v14  ;;  %v2114_v10 = vsel %vm77_vm0, %v2047_v33, %v2091_v23  ;;  %v2126_v18 = vsel %vm77_vm0, %v2050_v11, %v2097_v5 }
 0x296   :  { %11014 = vmatprep.subr.bf16.mxu1 %v11727_v12 }
 0x297   :  { %3825 = vmatmul.mubr.bf16.gmra.mrb[92].mxu1 %v1786_v8 }
 0x298   :  { %3898 = vmatmul.mubr.bf16.vlgmr.msra.gmra.mrb[112].mxu0 %v1990_v6  ;;  %9590 = vmatprep.mubr.msk.bf16.mxu1 %vm77_vm0, %v14666_v59  ;;  %v1979_v22 = vpop.permute.xlu1 %1978  ;;  %v2159_v6 = vpack.c.bf16 %v2147_v60, %v2146_v0  ;;  %v2099_v48 = vpop.permute.xlu0 %2098 }
 0x299   :  { %3905 = vmatprep.mubr.bf16.mxu0 %v2106_v9  ;;  %11015 = vmatpush3.bf16.msra.mxu1 %v11727_v12  ;;  %v2002_v59 = vsel %vm77_vm0, %v13237_v40, %v1979_v22  ;;  %v2043_v9 = vld [vmem:[#allocation4 + $0xa8] sm:$0xff] }
 0x29a   :  { %11016 = vmatprep.subr.bf16.mxu1 %v11728_v34 }
 0x29c   :  { %v1981_v52 = vpop.permute.xlu1 %1980 }
 0x29d   :  { %11017 = vmatpush3.bf16.msra.mxu1 %v11728_v34  ;;  %v2006_v61 = vsel %vm77_vm0, %v1936_v37, %v1981_v52 }
 0x29f   :  { %3833 = vmatmul.mubr.bf16.gmra.mrb[96].mxu1 %v1790_v7  ;;  %v2042_v7 = vld [vmem:[#allocation4 + $0xa0] sm:$0xff] }
 0x2a0   :  { %3906 = vmatmul.mubr.bf16.gmra.mrb[116].mxu0 %v1994_v29  ;;  %9591 = vmatprep.mubr.msk.bf16.mxu1 %vm77_vm0, %v12853_v53  ;;  %v1983_v14 = vpop.permute.xlu1 %1982  ;;  %v2051_v63 = vpack.c.bf16 %v2043_v9, %v2042_v7 }
 0x2a1   :  { %3913 = vmatprep.mubr.bf16.mxu0 %v2110_v27  ;;  %v2010_v1 = vsel %vm77_vm0, %v2048_v25, %v1983_v14  ;;  %v2155_v25 = vld [vmem:[#allocation4 + $0xb8] sm:$0xff] }
 0x2a2   :  { %v2130_v27 = vsel %vm77_vm0, %v2051_v63, %v2099_v48 }
 0x2a7   :  { %3841 = vmatmul.mubr.bf16.gmra.mrb[100].mxu1 %v1794_v26 }
 0x2a8   :  { %3914 = vmatmul.mubr.bf16.gmra.mrb[120].mxu0 %v1998_v54  ;;  %9592 = vmatprep.mubr.msk.bf16.mxu1 %vm77_vm0, %v12872_v57 }
 0x2a9   :  { %3921 = vmatprep.mubr.bf16.mxu0 %v2114_v10 }
 0x2af   :  { %3849 = vmatmul.mubr.bf16.gmra.mrb[104].mxu1 %v1798_v24  ;;  %v2154_v24 = vld [vmem:[#allocation4 + $0xb0] sm:$0xff] }
 0x2b0   :  { %3922 = vmatmul.mubr.bf16.gmra.mrb[124].mxu0 %v2002_v59  ;;  %9593 = vmatprep.mubr.msk.bf16.mxu1 %vm77_vm0, %v1835_v21  ;;  %v9642_v20 = vpop.f32.mrb[0].mxu1  ;;  %v2163_v19 = vpack.c.bf16 %v2155_v25, %v2154_v24 }
 0x2b1   :  { %3929 = vmatprep.mubr.bf16.mxu0 %v2118_v31  ;;  %v9643_v28 = vpop.f32.mrb[1].mxu1 }
 0x2b2   :  { %v13259_v39 = vadd.f32 %v9643_v28, %v9642_v20  ;;  %v9645_v53 = vpop.f32.mrb[2].mxu1 }
 0x2b3   :  { %v9646_v3 = vpop.f32.mrb[3].mxu1 }
 0x2b4   :  { %v13261_v47 = vadd.f32 %v9646_v3, %v9645_v53 }
 0x2b7   :  { %3857 = vmatmul.mubr.bf16.gmra.mrb[108].mxu1 %v1802_v35 }
 0x2b8   :  { %3930 = vmatmul.mubr.bf16.gmra.mrb[128].mxu0 %v2006_v61  ;;  %11018 = vmatprep.mubr.msk.bf16.mxu1 %vm77_vm0, %v13228_v62  ;;  %v1985_v62 = vpop.permute.xlu1 %1984 }
 0x2b9   :  { %3937 = vmatprep.mubr.bf16.mxu0 %v2122_v55  ;;  %v9648_v32 = vpop.f32.mrb[4].mxu1  ;;  %v2014_v29 = vsel %vm77_vm0, %v2049_v45, %v1985_v62 }
 0x2ba   :  { %v9649_v13 = vpop.f32.mrb[5].mxu1 }
 0x2bb   :  { %v13269_v51 = vadd.f32 %v9649_v13, %v9648_v32  ;;  %v9651_v36 = vpop.f32.mrb[6].mxu1 }
 0x2bc   :  { %v9652_v57 = vpop.f32.mrb[7].mxu1  ;;  %v1987_v17 = vpop.permute.xlu1 %1986 }
 0x2bd   :  { %v13271_v12 = vadd.f32 %v9652_v57, %v9651_v36  ;;  %v2018_v58 = vsel %vm77_vm0, %v2050_v11, %v1987_v17 }
 0x2bf   :  { %11019 = vmatmul.mubr.msk.bf16.vlgmr.msra.gmra.mrb[112].mxu1 %vm77_vm0, %v13237_v40 }
 0x2c0   :  { %3938 = vmatmul.mubr.bf16.gmra.mrb[132].mxu0 %v2010_v1  ;;  %11022 = vmatprep.mubr.msk.bf16.mxu1 %vm77_vm0, %v2047_v33 }
 0x2c1   :  { %3945 = vmatprep.mubr.bf16.mxu0 %v2126_v18  ;;  %v9654_v8 = vpop.f32.mrb[8].mxu1 }
 0x2c2   :  { %v9655_v34 = vpop.f32.mrb[9].mxu1 }
 0x2c3   :  { %v13278_v16 = vadd.f32 %v9655_v34, %v9654_v8  ;;  %v9657_v4 = vpop.f32.mrb[10].mxu1 }
 0x2c4   :  { %v9658_v44 = vpop.f32.mrb[11].mxu1 }
 0x2c5   :  { %v13280_v40 = vadd.f32 %v9658_v44, %v9657_v4 }
 0x2c7   :  { %11023 = vmatmul.mubr.msk.bf16.gmra.mrb[116].mxu1 %vm77_vm0, %v2159_v6 }
 0x2c8   :  { %3946 = vmatmul.mubr.bf16.gmra.mrb[136].mxu0 %v2014_v29  ;;  %11026 = vmatprep.mubr.msk.bf16.mxu1 %vm77_vm0, %v2049_v45 }
 0x2c9   :  { %3953 = vmatprep.mubr.bf16.mxu0 %v2130_v27  ;;  %v9618_v15 = vpop.f32.mrb[32].mxu0 }
 0x2ca   :  { %v9660_v23 = vpop.f32.mrb[12].mxu1  ;;  %v9619_v30 = vpop.f32.mrb[33].mxu0 }
 0x2cb   :  { %v9620_v26 = vadd.f32 %v9619_v30, %v9618_v15  ;;  %v9661_v33 = vpop.f32.mrb[13].mxu1  ;;  %v9621_v42 = vpop.f32.mrb[34].mxu0 }
 0x2cc   :  { %v13286_v54 = vadd.f32 %v9661_v33, %v9660_v23  ;;  %v9663_v10 = vpop.f32.mrb[14].mxu1  ;;  %v9622_v43 = vpop.f32.mrb[35].mxu0 }
 0x2cd   :  { %v9623_v22 = vadd.f32 %v9622_v43, %v9621_v42  ;;  %v9664_v21 = vpop.f32.mrb[15].mxu1  ;;  %v3318_v52 = vadd.f32 %v9620_v26, %v13296_v49 }
 0x2ce   :  { %v13288_v2 = vadd.f32 %v9664_v21, %v9663_v10 }
 0x2cf   :  { %11027 = vmatmul.mubr.msk.bf16.gmra.mrb[120].mxu1 %vm77_vm0, %v2050_v11  ;;  %v3321_v45 = vadd.f32 %v9623_v22, %v13296_v49 }
 0x2d0   :  { %3954 = vmatmul.mubr.bf16.gmra.mrb[140].mxu0 %v2018_v58  ;;  %11030 = vmatprep.mubr.msk.bf16.mxu1 %vm77_vm0, %v2051_v63 }
 0x2d1   :  { %v9624_v59 = vpop.f32.mrb[36].mxu0 }
 0x2d2   :  { %v9682_v31 = vpop.f32.mrb[16].mxu1  ;;  %v9625_v38 = vpop.f32.mrb[37].mxu0 }
 0x2d3   :  { %v9626_v20 = vadd.f32 %v9625_v38, %v9624_v59  ;;  %v9683_v28 = vpop.f32.mrb[17].mxu1  ;;  %v9627_v37 = vpop.f32.mrb[38].mxu0 }
 0x2d4   :  { %v9684_v53 = vadd.f32 %v9683_v28, %v9682_v31  ;;  %v9685_v56 = vpop.f32.mrb[18].mxu1  ;;  %v9628_v3 = vpop.f32.mrb[39].mxu0 }
 0x2d5   :  { %v9629_v50 = vadd.f32 %v9628_v3, %v9627_v37  ;;  %v9686_v35 = vpop.f32.mrb[19].mxu1  ;;  %v3326_v46 = vadd.f32 %v9626_v20, %v13296_v49 }
 0x2d6   :  { %v3415_v61 = vadd.f32 %v9684_v53, %v3318_v52  ;;  %v9687_v55 = vadd.f32 %v9686_v35, %v9685_v56 }
 0x2d7   :  { %11031 = vmatmul.mubr.msk.bf16.gmra.mrb[124].mxu1 %vm77_vm0, %v2163_v19  ;;  %v3329_v8 = vadd.f32 %v9629_v50, %v13296_v49  ;;  %vm12027_vm0 = vmmov 0  }
 0x2d8   :  { %v3418_v32 = vadd.f32 %v9687_v55, %v3321_v45 }
 0x2d9   :  { %v9630_v13 = vpop.f32.mrb[40].mxu0 }
 0x2da   :  { %v9688_v41 = vpop.f32.mrb[20].mxu1  ;;  %v9631_v14 = vpop.f32.mrb[41].mxu0 }
 0x2db   :  { %v9632_v36 = vadd.f32 %v9631_v14, %v9630_v13  ;;  %v9689_v5 = vpop.f32.mrb[21].mxu1  ;;  %v9633_v57 = vpop.f32.mrb[42].mxu0  ;;  %v3350_v13 = vadd.f32 %v13259_v39, %v13296_v49 }
 0x2dc   :  { %v9690_v11 = vadd.f32 %v9689_v5, %v9688_v41  ;;  %v9691_v1 = vpop.f32.mrb[22].mxu1  ;;  %v9634_v18 = vpop.f32.mrb[43].mxu0 }
 0x2dd   :  { %v9635_v0 = vadd.f32 %v9634_v18, %v9633_v57  ;;  %v9692_v60 = vpop.f32.mrb[23].mxu1  ;;  %v3334_v29 = vadd.f32 %v9632_v36, %v13296_v49 }
 0x2de   :  { %v3423_v62 = vadd.f32 %v9690_v11, %v3326_v46  ;;  %v9693_v34 = vadd.f32 %v9692_v60, %v9691_v1 }
 0x2df   :  { %v3337_v26 = vadd.f32 %v9635_v0, %v13296_v49 }
 0x2e0   :  { %v3426_v6 = vadd.f32 %v9693_v34, %v3329_v8 }
 0x2e1   :  { %v9636_v9 = vpop.f32.mrb[44].mxu0 }
 0x2e2   :  { %v9694_v4 = vpop.f32.mrb[24].mxu1  ;;  %v9637_v48 = vpop.f32.mrb[45].mxu0 }
 0x2e3   :  { %v9638_v44 = vadd.f32 %v9637_v48, %v9636_v9  ;;  %v9695_v7 = vpop.f32.mrb[25].mxu1  ;;  %v9639_v63 = vpop.f32.mrb[46].mxu0 }
 0x2e4   :  { %v9696_v27 = vadd.f32 %v9695_v7, %v9694_v4  ;;  %v9697_v17 = vpop.f32.mrb[26].mxu1  ;;  %v9640_v15 = vpop.f32.mrb[47].mxu0  ;;  %v3358_v4 = vadd.f32 %v13269_v51, %v13296_v49 }
 0x2e5   :  { %v9641_v23 = vadd.f32 %v9640_v15, %v9639_v63  ;;  %v9698_v30 = vpop.f32.mrb[27].mxu1  ;;  %v3342_v58 = vadd.f32 %v9638_v44, %v13296_v49 }
 0x2e6   :  { %v3431_v33 = vadd.f32 %v9696_v27, %v3334_v29  ;;  %v9699_v42 = vadd.f32 %v9698_v30, %v9697_v17 }
 0x2e7   :  { %v3345_v28 = vadd.f32 %v9641_v23, %v13296_v49 }
 0x2e8   :  { %v3434_v10 = vadd.f32 %v9699_v42, %v3337_v26 }
 0x2ea   :  { %v9700_v43 = vpop.f32.mrb[28].mxu1 }
 0x2eb   :  { %v9746_v22 = vpop.f32.mrb[48].mxu0  ;;  %v9701_v21 = vpop.f32.mrb[29].mxu1 }
 0x2ec   :  { %v9702_v24 = vadd.f32 %v9701_v21, %v9700_v43  ;;  %v9747_v25 = vpop.f32.mrb[49].mxu0  ;;  %v9703_v59 = vpop.f32.mrb[30].mxu1 }
 0x2ed   :  { %v9748_v31 = vadd.f32 %v9747_v25, %v9746_v22  ;;  %v9749_v38 = vpop.f32.mrb[50].mxu0  ;;  %v9704_v20 = vpop.f32.mrb[31].mxu1  ;;  %v3366_v22 = vadd.f32 %v13278_v16, %v13296_v49 }
 0x2ee   :  { %v3439_v37 = vadd.f32 %v9702_v24, %v3342_v58  ;;  %v9705_v19 = vadd.f32 %v9704_v20, %v9703_v59  ;;  %v9750_v52 = vpop.f32.mrb[51].mxu0 }
 0x2ef   :  { %v13307_v53 = vadd.f32 %v9748_v31, %v3415_v61  ;;  %v9751_v56 = vadd.f32 %v9750_v52, %v9749_v38  ;;  %v3353_v61 = vadd.f32 %v13261_v47, %v13296_v49 }
 0x2f0   :  { %v3442_v3 = vadd.f32 %v9705_v19, %v3345_v28 }
 0x2f1   :  { %v13309_v50 = vadd.f32 %v9751_v56, %v3418_v32 }
 0x2f2   :  { %v9706_v35 = vpop.f32.mrb[32].mxu1 }
 0x2f3   :  { %v9752_v45 = vpop.f32.mrb[52].mxu0  ;;  %v9707_v55 = vpop.f32.mrb[33].mxu1 }
 0x2f4   :  { %v9708_v41 = vadd.f32 %v9707_v55, %v9706_v35  ;;  %v9753_v14 = vpop.f32.mrb[53].mxu0  ;;  %v9709_v36 = vpop.f32.mrb[34].mxu1 }
 0x2f5   :  { %v9754_v5 = vadd.f32 %v9753_v14, %v9752_v45  ;;  %v9755_v57 = vpop.f32.mrb[54].mxu0  ;;  %v9710_v46 = vpop.f32.mrb[35].mxu1  ;;  %v3374_v45 = vadd.f32 %v13286_v54, %v13296_v49 }
 0x2f6   :  { %v3447_v11 = vadd.f32 %v9708_v41, %v3350_v13  ;;  %v9711_v1 = vadd.f32 %v9710_v46, %v9709_v36  ;;  %v9756_v18 = vpop.f32.mrb[55].mxu0 }
 0x2f7   :  { %v13315_v32 = vadd.f32 %v9754_v5, %v3423_v62  ;;  %v9757_v0 = vadd.f32 %v9756_v18, %v9755_v57  ;;  %v3361_v62 = vadd.f32 %v13271_v12, %v13296_v49 }
 0x2f8   :  { %v3450_v60 = vadd.f32 %v9711_v1, %v3353_v61 }
 0x2f9   :  { %v13317_v8 = vadd.f32 %v9757_v0, %v3426_v6 }
 0x2fa   :  { %v9712_v34 = vpop.f32.mrb[36].mxu1 }
 0x2fb   :  { %v9758_v39 = vpop.f32.mrb[56].mxu0  ;;  %v9713_v9 = vpop.f32.mrb[37].mxu1 }
 0x2fc   :  { %v9714_v48 = vadd.f32 %v9713_v9, %v9712_v34  ;;  %v9759_v44 = vpop.f32.mrb[57].mxu0  ;;  %v9715_v7 = vpop.f32.mrb[38].mxu1 }
 0x2fd   :  { %v9760_v63 = vadd.f32 %v9759_v44, %v9758_v39  ;;  %v9761_v47 = vpop.f32.mrb[58].mxu0  ;;  %v9716_v29 = vpop.f32.mrb[39].mxu1 }
 0x2fe   :  { %v3455_v27 = vadd.f32 %v9714_v48, %v3358_v4  ;;  %v9717_v17 = vadd.f32 %v9716_v29, %v9715_v7  ;;  %v9762_v15 = vpop.f32.mrb[59].mxu0 }
 0x2ff   :  { %v13323_v6 = vadd.f32 %v9760_v63, %v3431_v33  ;;  %v9763_v23 = vadd.f32 %v9762_v15, %v9761_v47  ;;  %v3369_v33 = vadd.f32 %v13280_v40, %v13296_v49 }
 0x300   :  { %v3458_v30 = vadd.f32 %v9717_v17, %v3361_v62 }
 0x301   :  { %v13325_v26 = vadd.f32 %v9763_v23, %v3434_v10  ;;  %v12026_v23 = vmov 0.0|0.0  }
 0x302   :  { %v9718_v42 = vpop.f32.mrb[40].mxu1  ;;  %11378 = vmatprep.subr.bf16.mxu0 %v12026_v23  ;;  %11402 = vmatprep.subr.bf16.mxu1 %v12026_v23 }
 0x303   :  { %v9764_v51 = vpop.f32.mrb[60].mxu0  ;;  %v9719_v43 = vpop.f32.mrb[41].mxu1 }
 0x304   :  { %v9720_v21 = vadd.f32 %v9719_v43, %v9718_v42  ;;  %v9765_v58 = vpop.f32.mrb[61].mxu0  ;;  %v9721_v24 = vpop.f32.mrb[42].mxu1 }
 0x305   :  { %v9766_v25 = vadd.f32 %v9765_v58, %v9764_v51  ;;  %v9767_v12 = vpop.f32.mrb[62].mxu0  ;;  %v9722_v59 = vpop.f32.mrb[43].mxu1 }
 0x306   :  { %v3463_v31 = vadd.f32 %v9720_v21, %v3366_v22  ;;  %v9723_v38 = vadd.f32 %v9722_v59, %v9721_v24  ;;  %v9768_v20 = vpop.f32.mrb[63].mxu0 }
 0x307   :  { %v13331_v10 = vadd.f32 %v9766_v25, %v3439_v37  ;;  %v9769_v28 = vadd.f32 %v9768_v20, %v9767_v12  ;;  %v3377_v37 = vadd.f32 %v13288_v2, %v13296_v49 }
 0x308   :  { %v3466_v19 = vadd.f32 %v9723_v38, %v3369_v33 }
 0x309   :  { %v13333_v52 = vadd.f32 %v9769_v28, %v3442_v3 }
 0x30a   :  { %v9724_v56 = vpop.f32.mrb[44].mxu1 }
 0x30b   :  { %v9770_v16 = vpop.f32.mrb[64].mxu0  ;;  %v9725_v35 = vpop.f32.mrb[45].mxu1 }
 0x30c   :  { %v9726_v55 = vadd.f32 %v9725_v35, %v9724_v56  ;;  %v9771_v13 = vpop.f32.mrb[65].mxu0  ;;  %v9727_v41 = vpop.f32.mrb[46].mxu1 }
 0x30d   :  { %v9772_v14 = vadd.f32 %v9771_v13, %v9770_v16  ;;  %v9773_v40 = vpop.f32.mrb[66].mxu0  ;;  %v9728_v36 = vpop.f32.mrb[47].mxu1 }
 0x30e   :  { %v3471_v5 = vadd.f32 %v9726_v55, %v3374_v45  ;;  %v9729_v57 = vadd.f32 %v9728_v36, %v9727_v41  ;;  %v9774_v46 = vpop.f32.mrb[67].mxu0 }
 0x30f   :  { %v13339_v3 = vadd.f32 %v9772_v14, %v3447_v11  ;;  %v9775_v61 = vadd.f32 %v9774_v46, %v9773_v40 }
 0x310   :  { %v3474_v1 = vadd.f32 %v9729_v57, %v3377_v37 }
 0x311   :  { %v13341_v18 = vadd.f32 %v9775_v61, %v3450_v60 }
 0x312   :  { %v9810_v0 = vpop.f32.mrb[48].mxu1 }
 0x313   :  { %v9776_v54 = vpop.f32.mrb[68].mxu0  ;;  %v9811_v34 = vpop.f32.mrb[49].mxu1 }
 0x314   :  { %v9777_v39 = vpop.f32.mrb[69].mxu0  ;;  %v9812_v9 = vadd.f32 %v9811_v34, %v9810_v0  ;;  %v9813_v4 = vpop.f32.mrb[50].mxu1 }
 0x315   :  { %v9778_v48 = vadd.f32 %v9777_v39, %v9776_v54  ;;  %v9779_v44 = vpop.f32.mrb[70].mxu0  ;;  %v9814_v7 = vpop.f32.mrb[51].mxu1 }
 0x316   :  { %v3609_v2 = vadd.f32 %v9812_v9, %v13307_v53  ;;  %v9780_v49 = vpop.f32.mrb[71].mxu0  ;;  %v9815_v63 = vadd.f32 %v9814_v7, %v9813_v4 }
 0x317   :  { %v13344_v47 = vadd.f32 %v9778_v48, %v3455_v27  ;;  %v9781_v11 = vadd.f32 %v9780_v49, %v9779_v44 }
 0x318   :  { %v3612_v29 = vadd.f32 %v9815_v63, %v13309_v50 }
 0x319   :  { %v13347_v60 = vadd.f32 %v9781_v11, %v3458_v30 }
 0x31a   :  { %v9816_v62 = vpop.f32.mrb[52].mxu1 }
 0x31b   :  { %v9782_v17 = vpop.f32.mrb[72].mxu0  ;;  %v9817_v15 = vpop.f32.mrb[53].mxu1 }
 0x31c   :  { %v9783_v42 = vpop.f32.mrb[73].mxu0  ;;  %v9818_v51 = vadd.f32 %v9817_v15, %v9816_v62  ;;  %v9819_v53 = vpop.f32.mrb[54].mxu1 }
 0x31d   :  { %v9784_v43 = vadd.f32 %v9783_v42, %v9782_v17  ;;  %v9785_v22 = vpop.f32.mrb[74].mxu0  ;;  %v9820_v27 = vpop.f32.mrb[55].mxu1 }
 0x31e   :  { %v3617_v21 = vadd.f32 %v9818_v51, %v13315_v32  ;;  %v9786_v58 = vpop.f32.mrb[75].mxu0  ;;  %v9821_v50 = vadd.f32 %v9820_v27, %v9819_v53  ;;  %v13372_v53 = vld [vmem:[#allocation3] sm:$0xff] }
 0x31f   :  { %v13352_v30 = vadd.f32 %v9784_v43, %v3463_v31  ;;  %v9787_v24 = vadd.f32 %v9786_v58, %v9785_v22  ;;  %11066 = vmatprep.mubr.msk.f32.mxu0 %vm12027_vm0, %v13372_v53  ;;  %11101 = vmatprep.mubr.msk.f32.mxu1 %vm12027_vm0, %v13372_v53 }
 0x320   :  { %v3620_v25 = vadd.f32 %v9821_v50, %v13317_v8 }
 0x321   :  { %v13355_v12 = vadd.f32 %v9787_v24, %v3466_v19 }
 0x322   :  { %v9822_v59 = vpop.f32.mrb[56].mxu1 }
 0x323   :  { %v9788_v33 = vpop.f32.mrb[76].mxu0  ;;  %v9823_v38 = vpop.f32.mrb[57].mxu1 }
 0x324   :  { %v9789_v20 = vpop.f32.mrb[77].mxu0  ;;  %v9824_v28 = vadd.f32 %v9823_v38, %v9822_v59  ;;  %v9825_v56 = vpop.f32.mrb[58].mxu1 }
 0x325   :  { %v9790_v16 = vadd.f32 %v9789_v20, %v9788_v33  ;;  %v9791_v35 = vpop.f32.mrb[78].mxu0  ;;  %v9826_v45 = vpop.f32.mrb[59].mxu1 }
 0x326   :  { %v3625_v32 = vadd.f32 %v9824_v28, %v13323_v6  ;;  %v9792_v55 = vpop.f32.mrb[79].mxu0  ;;  %v9827_v13 = vadd.f32 %v9826_v45, %v9825_v56 }
 0x327   :  { %v13358_v31 = vadd.f32 %v9790_v16, %v3471_v5  ;;  %v9793_v41 = vadd.f32 %v9792_v55, %v9791_v35 }
 0x328   :  { %v3628_v8 = vadd.f32 %v9827_v13, %v13325_v26 }
 0x329   :  { %v13361_v19 = vadd.f32 %v9793_v41, %v3474_v1 }
 0x32a   :  { %v9828_v14 = vpop.f32.mrb[60].mxu1 }
 0x32b   :  { %v9874_v40 = vpop.f32.mrb[80].mxu0  ;;  %v9829_v36 = vpop.f32.mrb[61].mxu1 }
 0x32c   :  { %v9830_v37 = vadd.f32 %v9829_v36, %v9828_v14  ;;  %v9875_v57 = vpop.f32.mrb[81].mxu0  ;;  %v9831_v46 = vpop.f32.mrb[62].mxu1 }
 0x32d   :  { %v9876_v61 = vadd.f32 %v9875_v57, %v9874_v40  ;;  %v9877_v0 = vpop.f32.mrb[82].mxu0  ;;  %v9832_v54 = vpop.f32.mrb[63].mxu1 }
 0x32e   :  { %v3633_v6 = vadd.f32 %v9830_v37, %v13331_v10  ;;  %v9833_v34 = vadd.f32 %v9832_v54, %v9831_v46  ;;  %v9878_v39 = vpop.f32.mrb[83].mxu0 }
 0x32f   :  { %v13364_v5 = vadd.f32 %v9876_v61, %v3609_v2  ;;  %v9879_v9 = vadd.f32 %v9878_v39, %v9877_v0 }
 0x330   :  { %v3636_v26 = vadd.f32 %v9833_v34, %v13333_v52 }
 0x331   :  { %v13367_v1 = vadd.f32 %v9879_v9, %v3612_v29 }
 0x332   :  { %v9834_v4 = vpop.f32.mrb[64].mxu1 }
 0x333   :  { %v9880_v48 = vpop.f32.mrb[84].mxu0  ;;  %v9835_v44 = vpop.f32.mrb[65].mxu1 }
 0x334   :  { %v9836_v7 = vadd.f32 %v9835_v44, %v9834_v4  ;;  %v9881_v49 = vpop.f32.mrb[85].mxu0  ;;  %v9837_v63 = vpop.f32.mrb[66].mxu1 }
 0x335   :  { %v9882_v11 = vadd.f32 %v9881_v49, %v9880_v48  ;;  %v9883_v62 = vpop.f32.mrb[86].mxu0  ;;  %v9838_v17 = vpop.f32.mrb[67].mxu1 }
 0x336   :  { %v3641_v10 = vadd.f32 %v9836_v7, %v13339_v3  ;;  %v9839_v15 = vadd.f32 %v9838_v17, %v9837_v63  ;;  %v9884_v42 = vpop.f32.mrb[87].mxu0 }
 0x337   :  { %v13370_v2 = vadd.f32 %v9882_v11, %v3617_v21  ;;  %v9885_v51 = vadd.f32 %v9884_v42, %v9883_v62 }
 0x338   :  { %v3644_v52 = vadd.f32 %v9839_v15, %v13341_v18 }
 0x339   :  { %v13379_v29 = vadd.f32 %v9885_v51, %v3620_v25 }
 0x33a   :  { %v9840_v43 = vpop.f32.mrb[68].mxu1 }
 0x33b   :  { %v9886_v3 = vpop.f32.mrb[88].mxu0  ;;  %v9841_v22 = vpop.f32.mrb[69].mxu1 }
 0x33c   :  { %v9842_v27 = vadd.f32 %v9841_v22, %v9840_v43  ;;  %v9887_v21 = vpop.f32.mrb[89].mxu0  ;;  %v9843_v58 = vpop.f32.mrb[70].mxu1 }
 0x33d   :  { %v9888_v50 = vadd.f32 %v9887_v21, %v9886_v3  ;;  %v9889_v24 = vpop.f32.mrb[90].mxu0  ;;  %v9844_v59 = vpop.f32.mrb[71].mxu1 }
 0x33e   :  { %v3649_v33 = vadd.f32 %v9842_v27, %v13344_v47  ;;  %v9845_v38 = vadd.f32 %v9844_v59, %v9843_v58  ;;  %v9890_v20 = vpop.f32.mrb[91].mxu0 }
 0x33f   :  { %v9891_v28 = vadd.f32 %v9890_v20, %v9889_v24  ;;  %v13382_v56 = vadd.f32 %v9888_v50, %v3625_v32  ;;  %v4129_v50 = vld [vmem:[%s14555_s3] sm:$0xff]  ;;  %v4130_v24 = vld [vmem:[%s14555_s3 + $0x8] sm:$0xff] }
 0x340   :  { %v3652_v18 = vadd.f32 %v9845_v38, %v13347_v60 }
 0x341   :  { %v13385_v25 = vadd.f32 %v9891_v28, %v3628_v8 }
 0x342   :  { %v9846_v16 = vpop.f32.mrb[72].mxu1 }
 0x343   :  { %v9892_v35 = vpop.f32.mrb[92].mxu0  ;;  %v9847_v45 = vpop.f32.mrb[73].mxu1 }
 0x344   :  { %v9848_v55 = vadd.f32 %v9847_v45, %v9846_v16  ;;  %v9893_v13 = vpop.f32.mrb[93].mxu0  ;;  %v9849_v41 = vpop.f32.mrb[74].mxu1 }
 0x345   :  { %v9894_v14 = vadd.f32 %v9893_v13, %v9892_v35  ;;  %v9895_v40 = vpop.f32.mrb[94].mxu0  ;;  %v9850_v36 = vpop.f32.mrb[75].mxu1 }
 0x346   :  { %v9851_v37 = vadd.f32 %v9850_v36, %v9849_v41  ;;  %v9896_v47 = vpop.f32.mrb[95].mxu0  ;;  %v3657_v57 = vadd.f32 %v9848_v55, %v13352_v30  ;;  %v4133_v41 = vld [vmem:[%s14555_s3 + $0x20] sm:$0xff] }
 0x347   :  { %v9897_v46 = vadd.f32 %v9896_v47, %v9895_v40  ;;  %v13388_v32 = vadd.f32 %v9894_v14, %v3633_v6  ;;  %v4134_v14 = vld [vmem:[%s14555_s3 + $0x28] sm:$0xff] }
 0x348   :  { %v3660_v60 = vadd.f32 %v9851_v37, %v13355_v12 }
 0x349   :  { %v13391_v8 = vadd.f32 %v9897_v46, %v3636_v26 }
 0x34a   :  { %v9852_v61 = vpop.f32.mrb[76].mxu1 }
 0x34b   :  { %v9898_v0 = vpop.f32.mrb[96].mxu0  ;;  %v9853_v54 = vpop.f32.mrb[77].mxu1 }
 0x34c   :  { %v9854_v34 = vadd.f32 %v9853_v54, %v9852_v61  ;;  %v9899_v39 = vpop.f32.mrb[97].mxu0  ;;  %v9855_v9 = vpop.f32.mrb[78].mxu1 }
 0x34d   :  { %v9900_v4 = vadd.f32 %v9899_v39, %v9898_v0  ;;  %v9901_v48 = vpop.f32.mrb[98].mxu0  ;;  %v9856_v44 = vpop.f32.mrb[79].mxu1  ;;  %v13446_v0 = vpack.c.bf16 %v4134_v14, %v4133_v41 }
 0x34e   :  { %v9857_v7 = vadd.f32 %v9856_v44, %v9855_v9  ;;  %v9902_v49 = vpop.f32.mrb[99].mxu0  ;;  %v13394_v30 = vadd.f32 %v9854_v34, %v13358_v31  ;;  %v4135_v34 = vld [vmem:[%s14555_s3 + $0x30] sm:$0xff] }
 0x34f   :  { %v9903_v6 = vadd.f32 %v9902_v49, %v9901_v48  ;;  %v13396_v63 = vadd.f32 %v9900_v4, %v3641_v10 }
 0x350   :  { %v13399_v12 = vadd.f32 %v9857_v7, %v13361_v19 }
 0x351   :  { %v13401_v26 = vadd.f32 %v9903_v6, %v3644_v52  ;;  %v4137_v6 = vld [vmem:[%s14555_s3 + $0x40] sm:$0xff] }
 0x352   :  { %v9938_v11 = vpop.f32.mrb[80].mxu1 }
 0x353   :  { %v9904_v62 = vpop.f32.mrb[100].mxu0  ;;  %v9939_v17 = vpop.f32.mrb[81].mxu1 }
 0x354   :  { %v9905_v15 = vpop.f32.mrb[101].mxu0  ;;  %v9940_v42 = vadd.f32 %v9939_v17, %v9938_v11  ;;  %v9941_v51 = vpop.f32.mrb[82].mxu1  ;;  %v4138_v11 = vld [vmem:[%s14555_s3 + $0x48] sm:$0xff] }
 0x355   :  { %v9906_v43 = vadd.f32 %v9905_v15, %v9904_v62  ;;  %v9907_v3 = vpop.f32.mrb[102].mxu0  ;;  %v9942_v22 = vpop.f32.mrb[83].mxu1 }
 0x356   :  { %v9908_v27 = vpop.f32.mrb[103].mxu0  ;;  %v9943_v31 = vadd.f32 %v9942_v22, %v9941_v51  ;;  %v13404_v21 = vadd.f32 %v9940_v42, %v13364_v5  ;;  %v4131_v5 = vld [vmem:[%s14555_s3 + $0x10] sm:$0xff] }
 0x357   :  { %v9909_v10 = vadd.f32 %v9908_v27, %v9907_v3  ;;  %v13406_v58 = vadd.f32 %v9906_v43, %v3649_v33  ;;  %v13422_v33 = vpack.c.bf16 %v4130_v24, %v4129_v50  ;;  %v13477_v3 = vpack.c.bf16 %v4138_v11, %v4137_v6 }
 0x358   :  { %v13409_v19 = vadd.f32 %v9943_v31, %v13367_v1  ;;  %v4132_v1 = vld [vmem:[%s14555_s3 + $0x18] sm:$0xff] }
 0x359   :  { %v13411_v52 = vadd.f32 %v9909_v10, %v3652_v18  ;;  %11404 = vmatpush3.bf16.msra.mxu1 %v13422_v33  ;;  %v13428_v35 = vpack.c.bf16 %v4132_v1, %v4131_v5 }
 0x35a   :  { %v9944_v59 = vpop.f32.mrb[84].mxu1  ;;  %11405 = vmatprep.subr.bf16.mxu1 %v12026_v23 }
 0x35b   :  { %v9910_v38 = vpop.f32.mrb[104].mxu0  ;;  %v9945_v20 = vpop.f32.mrb[85].mxu1 }
 0x35c   :  { %v9911_v28 = vpop.f32.mrb[105].mxu0  ;;  %v9946_v18 = vadd.f32 %v9945_v20, %v9944_v59  ;;  %v9947_v16 = vpop.f32.mrb[86].mxu1  ;;  %v4142_v20 = vld [vmem:[%s14555_s3 + $0x68] sm:$0xff] }
 0x35d   :  { %v9912_v45 = vadd.f32 %v9911_v28, %v9910_v38  ;;  %v9913_v55 = vpop.f32.mrb[106].mxu0  ;;  %v9948_v13 = vpop.f32.mrb[87].mxu1  ;;  %11407 = vmatpush3.bf16.msra.mxu1 %v13428_v35  ;;  %v4141_v38 = vld [vmem:[%s14555_s3 + $0x60] sm:$0xff] }
 0x35e   :  { %v9914_v40 = vpop.f32.mrb[107].mxu0  ;;  %v9949_v36 = vadd.f32 %v9948_v13, %v9947_v16  ;;  %v13438_v37 = vadd.f32 %v9946_v18, %v13370_v2  ;;  %11408 = vmatprep.subr.bf16.mxu1 %v12026_v23  ;;  %v4136_v2 = vld [vmem:[%s14555_s3 + $0x38] sm:$0xff]  ;;  %v13505_v41 = vpack.c.bf16 %v4142_v20, %v4141_v38 }
 0x35f   :  { %v13440_v47 = vadd.f32 %v9912_v45, %v3657_v57  ;;  %v9915_v46 = vadd.f32 %v9914_v40, %v9913_v55 }
 0x360   :  { %v13443_v61 = vadd.f32 %v9949_v36, %v13379_v29 }
 0x361   :  { %v13448_v54 = vadd.f32 %v9915_v46, %v3660_v60  ;;  %11410 = vmatpush3.bf16.msra.mxu1 %v13446_v0  ;;  %v13458_v60 = vpack.c.bf16 %v4136_v2, %v4135_v34 }
 0x362   :  { %v9950_v57 = vpop.f32.mrb[88].mxu1  ;;  %11411 = vmatprep.subr.bf16.mxu1 %v12026_v23 }
 0x363   :  { %v9916_v39 = vpop.f32.mrb[108].mxu0  ;;  %v9951_v29 = vpop.f32.mrb[89].mxu1 }
 0x364   :  { %v9917_v9 = vpop.f32.mrb[109].mxu0  ;;  %v9952_v4 = vadd.f32 %v9951_v29, %v9950_v57  ;;  %v9953_v48 = vpop.f32.mrb[90].mxu1 }
 0x365   :  { %v9918_v44 = vadd.f32 %v9917_v9, %v9916_v39  ;;  %v9919_v7 = vpop.f32.mrb[110].mxu0  ;;  %v9954_v49 = vpop.f32.mrb[91].mxu1  ;;  %11413 = vmatpush3.bf16.msra.mxu1 %v13458_v60 }
 0x366   :  { %v13468_v62 = vadd.f32 %v9952_v4, %v13382_v56  ;;  %v9920_v17 = vpop.f32.mrb[111].mxu0  ;;  %v9955_v15 = vadd.f32 %v9954_v49, %v9953_v48  ;;  %11414 = vmatprep.subr.bf16.mxu1 %v12026_v23  ;;  %v4139_v56 = vld [vmem:[%s14555_s3 + $0x50] sm:$0xff] }
 0x367   :  { %v13471_v42 = vadd.f32 %v9918_v44, %v13394_v30  ;;  %v9921_v51 = vadd.f32 %v9920_v17, %v9919_v7  ;;  %v4140_v30 = vld [vmem:[%s14555_s3 + $0x58] sm:$0xff] }
 0x368   :  { %v13474_v43 = vadd.f32 %v9955_v15, %v13385_v25 }
 0x369   :  { %v13480_v22 = vadd.f32 %v9921_v51, %v13399_v12  ;;  %11416 = vmatpush3.bf16.msra.mxu1 %v13477_v3  ;;  %v13490_v12 = vpack.c.bf16 %v4140_v30, %v4139_v56 }
 0x36a   :  { %v9956_v27 = vpop.f32.mrb[92].mxu1  ;;  %11417 = vmatprep.subr.bf16.mxu1 %v12026_v23 }
 0x36b   :  { %v10002_v25 = vpop.f32.mrb[112].mxu0  ;;  %v9957_v31 = vpop.f32.mrb[93].mxu1 }
 0x36c   :  { %v9958_v10 = vadd.f32 %v9957_v31, %v9956_v27  ;;  %v10003_v50 = vpop.f32.mrb[113].mxu0  ;;  %v9959_v24 = vpop.f32.mrb[94].mxu1 }
 0x36d   :  { %v10004_v5 = vadd.f32 %v10003_v50, %v10002_v25  ;;  %v10005_v59 = vpop.f32.mrb[114].mxu0  ;;  %v9960_v1 = vpop.f32.mrb[95].mxu1  ;;  %11419 = vmatpush3.bf16.msra.mxu1 %v13490_v12 }
 0x36e   :  { %v3827_v28 = vadd.f32 %v9958_v10, %v13388_v32  ;;  %v9961_v18 = vadd.f32 %v9960_v1, %v9959_v24  ;;  %v10006_v16 = vpop.f32.mrb[115].mxu0  ;;  %11420 = vmatprep.subr.bf16.mxu1 %v12026_v23  ;;  %v4143_v32 = vld [vmem:[%s14555_s3 + $0x70] sm:$0xff] }
 0x36f   :  { %v10007_v45 = vadd.f32 %v10006_v16, %v10005_v59  ;;  %v13501_v55 = vadd.f32 %v10004_v5, %v13404_v21  ;;  %v4144_v21 = vld [vmem:[%s14555_s3 + $0x78] sm:$0xff] }
 0x370   :  { %v3830_v13 = vadd.f32 %v9961_v18, %v13391_v8 }
 0x371   :  { %v13508_v14 = vadd.f32 %v10007_v45, %v13409_v19  ;;  %11422 = vmatpush3.bf16.msra.mxu1 %v13505_v41  ;;  %v13518_v19 = vpack.c.bf16 %v4144_v21, %v4143_v32 }
 0x372   :  { %v9962_v40 = vpop.f32.mrb[96].mxu1  ;;  %11423 = vmatprep.subr.bf16.mxu1 %v12026_v23 }
 0x373   :  { %v10008_v36 = vpop.f32.mrb[116].mxu0  ;;  %v9963_v8 = vpop.f32.mrb[97].mxu1 }
 0x374   :  { %v9964_v46 = vadd.f32 %v9963_v8, %v9962_v40  ;;  %v10009_v34 = vpop.f32.mrb[117].mxu0  ;;  %v9965_v2 = vpop.f32.mrb[98].mxu1 }
 0x375   :  { %v10010_v57 = vadd.f32 %v10009_v34, %v10008_v36  ;;  %v10011_v39 = vpop.f32.mrb[118].mxu0  ;;  %v9966_v29 = vpop.f32.mrb[99].mxu1  ;;  %11425 = vmatpush3.bf16.msra.mxu1 %v13518_v19 }
 0x376   :  { %v3835_v9 = vadd.f32 %v9964_v46, %v13396_v63  ;;  %v9967_v4 = vadd.f32 %v9966_v29, %v9965_v2  ;;  %v10012_v48 = vpop.f32.mrb[119].mxu0  ;;  %11450 = vmatprep.subr.bf16.mxu1 %v12026_v23 }
 0x377   :  { %v10013_v44 = vadd.f32 %v10012_v48, %v10011_v39  ;;  %v3908_v7 = vadd.f32 %v10010_v57, %v13438_v37 }
 0x378   :  { %v3838_v49 = vadd.f32 %v9967_v4, %v13401_v26 }
 0x379   :  { %v3911_v6 = vadd.f32 %v10013_v44, %v13443_v61 }
 0x37a   :  { %v9968_v11 = vpop.f32.mrb[100].mxu1 }
 0x37b   :  { %v10014_v17 = vpop.f32.mrb[120].mxu0  ;;  %v9969_v15 = vpop.f32.mrb[101].mxu1 }
 0x37c   :  { %v9970_v51 = vadd.f32 %v9969_v15, %v9968_v11  ;;  %v10015_v56 = vpop.f32.mrb[121].mxu0  ;;  %v9971_v30 = vpop.f32.mrb[102].mxu1 }
 0x37d   :  { %v10016_v63 = vadd.f32 %v10015_v56, %v10014_v17  ;;  %v10017_v27 = vpop.f32.mrb[122].mxu0  ;;  %v9972_v25 = vpop.f32.mrb[103].mxu1 }
 0x37e   :  { %v3843_v31 = vadd.f32 %v9970_v51, %v13406_v58  ;;  %v9973_v37 = vadd.f32 %v9972_v25, %v9971_v30  ;;  %v10018_v10 = vpop.f32.mrb[123].mxu0 }
 0x37f   :  { %v10019_v26 = vadd.f32 %v10018_v10, %v10017_v27  ;;  %v3916_v50 = vadd.f32 %v10016_v63, %v13468_v62 }
 0x380   :  { %v3846_v61 = vadd.f32 %v9973_v37, %v13411_v52 }
 0x381   :  { %v13531_v24 = vadd.f32 %v10019_v26, %v13474_v43 }
 0x382   :  { %v9974_v5 = vpop.f32.mrb[104].mxu1 }
 0x383   :  { %v10020_v59 = vpop.f32.mrb[124].mxu0  ;;  %v9975_v1 = vpop.f32.mrb[105].mxu1 }
 0x384   :  { %v9976_v38 = vadd.f32 %v9975_v1, %v9974_v5  ;;  %v10021_v20 = vpop.f32.mrb[125].mxu0  ;;  %v9977_v18 = vpop.f32.mrb[106].mxu1 }
 0x385   :  { %v10022_v16 = vadd.f32 %v10021_v20, %v10020_v59  ;;  %v10023_v45 = vpop.f32.mrb[126].mxu0  ;;  %v9978_v32 = vpop.f32.mrb[107].mxu1 }
 0x386   :  { %v3851_v58 = vadd.f32 %v9976_v38, %v13440_v47  ;;  %v9979_v21 = vadd.f32 %v9978_v32, %v9977_v18  ;;  %v10024_v40 = vpop.f32.mrb[127].mxu0 }
 0x387   :  { %v10025_v36 = vadd.f32 %v10024_v40, %v10023_v45  ;;  %v3924_v62 = vadd.f32 %v10022_v16, %v3827_v28 }
 0x388   :  { %v3854_v52 = vadd.f32 %v9979_v21, %v13448_v54 }
 0x389   :  { %v3927_v8 = vadd.f32 %v10025_v36, %v3830_v13 }
 0x38a   :  { %v9980_v43 = vpop.f32.mrb[108].mxu1 }
 0x38b   :  { %v10026_v46 = vpop.f32.mrb[128].mxu0  ;;  %v9981_v34 = vpop.f32.mrb[109].mxu1 }
 0x38c   :  { %v9982_v2 = vadd.f32 %v9981_v34, %v9980_v43  ;;  %v10027_v57 = vpop.f32.mrb[129].mxu0  ;;  %v9983_v39 = vpop.f32.mrb[110].mxu1 }
 0x38d   :  { %v10028_v29 = vadd.f32 %v10027_v57, %v10026_v46  ;;  %v10029_v4 = vpop.f32.mrb[130].mxu0  ;;  %v9984_v48 = vpop.f32.mrb[111].mxu1 }
 0x38e   :  { %v13536_v44 = vadd.f32 %v9982_v2, %v13471_v42  ;;  %v9985_v47 = vadd.f32 %v9984_v48, %v9983_v39  ;;  %v10030_v11 = vpop.f32.mrb[131].mxu0 }
 0x38f   :  { %v10031_v17 = vadd.f32 %v10030_v11, %v10029_v4  ;;  %v3932_v15 = vadd.f32 %v10028_v29, %v3835_v9 }
 0x390   :  { %v3862_v28 = vadd.f32 %v9985_v47, %v13480_v22 }
 0x391   :  { %v3935_v54 = vadd.f32 %v10031_v17, %v3838_v49 }
 0x392   :  { %v11020_v13 = vpop.f32.mrb[112].mxu1 }
 0x393   :  { %v10032_v51 = vpop.f32.mrb[132].mxu0  ;;  %v13539_v56 = vadd.f32 %v11020_v13, %v3908_v7  ;;  %v3996_v30 = vpop.f32.mrb[113].mxu1 }
 0x394   :  { %v10033_v63 = vpop.f32.mrb[133].mxu0  ;;  %v13542_v27 = vadd.f32 %v3996_v30, %v13501_v55  ;;  %v11021_v25 = vpop.f32.mrb[114].mxu1 }
 0x395   :  { %v10034_v37 = vadd.f32 %v10033_v63, %v10032_v51  ;;  %v10035_v42 = vpop.f32.mrb[134].mxu0  ;;  %v13544_v10 = vadd.f32 %v11021_v25, %v3911_v6  ;;  %v3999_v26 = vpop.f32.mrb[115].mxu1 }
 0x396   :  { %v10036_v5 = vpop.f32.mrb[135].mxu0  ;;  %v13547_v9 = vadd.f32 %v3999_v26, %v13508_v14 }
 0x397   :  { %v10037_v22 = vadd.f32 %v10036_v5, %v10035_v42  ;;  %v3940_v49 = vadd.f32 %v10034_v37, %v3843_v31  ;;  %v11382_v6 = vpack.c.bf16 %v13544_v10, %v13539_v56 }
 0x398   :  { %v11379_v7 = vpack.c.bf16 %v13547_v9, %v13542_v27 }
 0x399   :  { %v3943_v59 = vadd.f32 %v10037_v22, %v3846_v61  ;;  %v4216_v22 = vmul.f32 %v13547_v9, %v13547_v9 }
 0x39a   :  { %v11024_v1 = vpop.f32.mrb[116].mxu1  ;;  %11380 = vmatpush3.bf16.msra.mxu0 %v11379_v7  ;;  %v4215_v7 = vmul.f32 %v13542_v27, %v13542_v27 }
 0x39b   :  { %v10038_v55 = vpop.f32.mrb[136].mxu0  ;;  %v13551_v38 = vadd.f32 %v11024_v1, %v3924_v62  ;;  %v4012_v20 = vpop.f32.mrb[117].mxu1  ;;  %11381 = vmatprep.subr.bf16.mxu0 %v12026_v23 }
 0x39c   :  { %v10039_v18 = vpop.f32.mrb[137].mxu0  ;;  %v13556_v14 = vadd.f32 %v4012_v20, %v3916_v50  ;;  %v11025_v16 = vpop.f32.mrb[118].mxu1  ;;  %v11427_v1 = vpack.c.bf16 %v4216_v22, %v4215_v7  ;;  %v4217_v20 = vmul.f32 %v13539_v56, %v13539_v56  ;;  %v11746_v22 = vld [vmem:[#allocation10 + $0xe0] sm:$0xff]  }
 0x39d   :  { %v10040_v31 = vadd.f32 %v10039_v18, %v10038_v55  ;;  %v10041_v45 = vpop.f32.mrb[138].mxu0  ;;  %v13558_v32 = vadd.f32 %v11025_v16, %v3927_v8  ;;  %v4015_v61 = vpop.f32.mrb[119].mxu1  ;;  %v12028_v55 = vmov 1.0   ;;  %v11748_v7 = vld [vmem:[#allocation10 + $0xa0] sm:$0xff]  }
 0x39e   :  { %v10042_v21 = vpop.f32.mrb[139].mxu0  ;;  %v13561_v40 = vadd.f32 %v4015_v61, %v13531_v24  ;;  %11383 = vmatpush3.bf16.msra.mxu0 %v11382_v6  ;;  %v4219_v16 = vmul.f32 %v13556_v14, %v13556_v14  ;;  %v4221_v61 = vmul.f32 %v13551_v38, %v13551_v38 }
 0x39f   :  { %v10043_v36 = vadd.f32 %v10042_v21, %v10041_v45  ;;  %11384 = vmatprep.subr.bf16.mxu0 %v12026_v23  ;;  %v3948_v62 = vadd.f32 %v10040_v31, %v3851_v58  ;;  %v11388_v24 = vpack.c.bf16 %v13558_v32, %v13551_v38  ;;  %v4222_v31 = vmul.f32 %v13558_v32, %v13558_v32 }
 0x3a0   :  { %v11385_v43 = vpack.c.bf16 %v13561_v40, %v13556_v14  ;;  %v4220_v18 = vmul.f32 %v13561_v40, %v13561_v40 }
 0x3a1   :  { %v3951_v50 = vadd.f32 %v10043_v36, %v3854_v52  ;;  %v11436_v21 = vpack.c.bf16 %v4222_v31, %v4221_v61  ;;  %v11755_v31 = vld [vmem:[#allocation10 + $0x30] sm:$0xff]   ;;  %v11757_v61 = vld [vmem:[#allocation10 + $0x78] sm:$0xff]  }
 0x3a2   :  { %v11028_v46 = vpop.f32.mrb[120].mxu1  ;;  %11386 = vmatpush3.bf16.msra.mxu0 %v11385_v43  ;;  %v11433_v45 = vpack.c.bf16 %v4220_v18, %v4219_v16  ;;  %v11753_v18 = vld [vmem:[#allocation10 + $0x70] sm:$0xff]  }
 0x3a3   :  { %v10044_v34 = vpop.f32.mrb[140].mxu0  ;;  %v13566_v2 = vadd.f32 %v11028_v46, %v3940_v49  ;;  %v4028_v8 = vpop.f32.mrb[121].mxu1  ;;  %11387 = vmatprep.subr.bf16.mxu0 %v12026_v23  ;;  %v11754_v16 = vld [vmem:[#allocation10 + $0xf0] sm:$0xff]  }
 0x3a4   :  { %v10045_v57 = vpop.f32.mrb[141].mxu0  ;;  %v13571_v39 = vadd.f32 %v4028_v8, %v3932_v15  ;;  %v11029_v29 = vpop.f32.mrb[122].mxu1 }
 0x3a5   :  { %v10046_v58 = vadd.f32 %v10045_v57, %v10044_v34  ;;  %v10047_v4 = vpop.f32.mrb[142].mxu0  ;;  %v13573_v48 = vadd.f32 %v11029_v29, %v3943_v59  ;;  %v4031_v52 = vpop.f32.mrb[123].mxu1  ;;  %v4218_v59 = vmul.f32 %v13544_v10, %v13544_v10  ;;  %v4225_v46 = vmul.f32 %v13566_v2, %v13566_v2 }
 0x3a6   :  { %v10048_v47 = vpop.f32.mrb[143].mxu0  ;;  %v13575_v11 = vadd.f32 %v4031_v52, %v3935_v54  ;;  %11389 = vmatpush3.bf16.msra.mxu0 %v11388_v24 }
 0x3a7   :  { %v10049_v17 = vadd.f32 %v10048_v47, %v10047_v4  ;;  %11390 = vmatprep.subr.bf16.mxu0 %v12026_v23  ;;  %v3956_v13 = vadd.f32 %v10046_v58, %v13536_v44  ;;  %v11394_v54 = vpack.c.bf16 %v13573_v48, %v13566_v2  ;;  %v11430_v6 = vpack.c.bf16 %v4218_v59, %v4217_v20  ;;  %v11749_v59 = vld [vmem:[#allocation10 + $0x68] sm:$0xff]  }
 0x3a8   :  { %v11391_v51 = vpack.c.bf16 %v13575_v11, %v13571_v39  ;;  %v4224_v36 = vmul.f32 %v13575_v11, %v13575_v11  ;;  %v4226_v43 = vmul.f32 %v13573_v48, %v13573_v48  ;;  %v11751_v20 = vld [vmem:[#allocation10 + $0x28] sm:$0xff]  }
 0x3a9   :  { %v3959_v15 = vadd.f32 %v10049_v17, %v3862_v28  ;;  %v11732_v17 = vld [vmem:[#allocation10 + $0x80] sm:$0xff]  }
 0x3aa   :  { %v11032_v30 = vpop.f32.mrb[124].mxu1  ;;  %11392 = vmatpush3.bf16.msra.mxu0 %v11391_v51  ;;  %v11442_v34 = vpack.c.bf16 %v4226_v43, %v4225_v46  ;;  %v11736_v51 = vld [vmem:[#allocation10 + $0x88] sm:$0xff]   ;;  %v11761_v43 = vld [vmem:[#allocation10 + $0x140] sm:$0xff]  }
 0x3ab   :  { %v13581_v63 = vadd.f32 %v11032_v30, %v3956_v13  ;;  %v4044_v25 = vpop.f32.mrb[125].mxu1  ;;  %11393 = vmatprep.subr.bf16.mxu0 %v12026_v23  ;;  %v11734_v13 = vld [vmem:[#allocation10 + $0xc8] sm:$0xff]   ;;  %v11740_v30 = vld [vmem:[#allocation10 + $0x90] sm:$0xff]  }
 0x3ac   :  { %v13586_v37 = vadd.f32 %v4044_v25, %v3948_v62  ;;  %v11033_v42 = vpop.f32.mrb[126].mxu1  ;;  %v4223_v62 = vmul.f32 %v13571_v39, %v13571_v39  ;;  %v11741_v25 = vld [vmem:[#allocation10 + $0x58] sm:$0xff]  }
 0x3ad   :  { %v13588_v26 = vadd.f32 %v11033_v42, %v3959_v15  ;;  %v4047_v44 = vpop.f32.mrb[127].mxu1  ;;  %v4229_v58 = vmul.f32 %v13581_v63, %v13581_v63  ;;  %v11738_v15 = vld [vmem:[#allocation10 + $0xd0] sm:$0xff]   ;;  %v11743_v42 = vld [vmem:[#allocation10 + $0x18] sm:$0xff]  }
 0x3ae   :  { %v13590_v5 = vadd.f32 %v4047_v44, %v3951_v50  ;;  %11395 = vmatpush3.bf16.msra.mxu0 %v11394_v54  ;;  %v11439_v50 = vpack.c.bf16 %v4224_v36, %v4223_v62  ;;  %v4227_v24 = vmul.f32 %v13586_v37, %v13586_v37  ;;  %v11742_v54 = vld [vmem:[#allocation10 + $0xd8] sm:$0xff]  }
 0x3af   :  { %11396 = vmatprep.subr.bf16.mxu0 %v12026_v23  ;;  %v11400_v49 = vpack.c.bf16 %v13588_v26, %v13581_v63  ;;  %v4230_v57 = vmul.f32 %v13588_v26, %v13588_v26  ;;  %v11744_v44 = vld [vmem:[#allocation10 + $0x98] sm:$0xff]  }
 0x3b0   :  { %v11397_v28 = vpack.c.bf16 %v13590_v5, %v13586_v37  ;;  %v4228_v8 = vmul.f32 %v13590_v5, %v13590_v5  ;;  %v11759_v36 = vld [vmem:[#allocation10 + $0x38] sm:$0xff]  }
 0x3b1   :  { %v11448_v4 = vpack.c.bf16 %v4230_v57, %v4229_v58  ;;  %v11760_v62 = vld [vmem:[#allocation10 + $0xb8] sm:$0xff]  }
 0x3b2   :  { %11398 = vmatpush3.bf16.msra.mxu0 %v11397_v28  ;;  %v11445_v29 = vpack.c.bf16 %v4228_v8, %v4227_v24  ;;  %v11745_v28 = vld [vmem:[#allocation10 + $0x60] sm:$0xff]  }
 0x3b3   :  { %11399 = vmatprep.subr.bf16.mxu0 %v12026_v23 }
 0x3b6   :  { %11401 = vmatpush3.bf16.msra.mxu0 %v11400_v49  ;;  %v11747_v49 = vld [vmem:[#allocation10 + $0x20] sm:$0xff]  }
 0x3b7   :  { %11426 = vmatprep.subr.bf16.mxu0 %v12026_v23 }
 0x3b9   :  { %11067 = vmatmul.mubr.f32.vlgmr.msra.gmra.mrb[144].mxu0 %v12028_v55 }
 0x3ba   :  { %11428 = vmatpush3.bf16.msra.mxu0 %v11427_v1  ;;  %11136 = vmatprep.mubr.msk.f32.mxu0 %vm12027_vm0, %v13372_v53  ;;  %v11750_v1 = vld [vmem:[#allocation10 + $0xe8] sm:$0xff]  }
 0x3bb   :  { %11429 = vmatprep.subr.bf16.mxu0 %v12026_v23 }
 0x3be   :  { %11431 = vmatpush3.bf16.msra.mxu0 %v11430_v6  ;;  %v11752_v6 = vld [vmem:[#allocation10 + $0xa8] sm:$0xff]  }
 0x3bf   :  { %11432 = vmatprep.subr.bf16.mxu0 %v12026_v23 }
 0x3c2   :  { %11434 = vmatpush3.bf16.msra.mxu0 %v11433_v45  ;;  %v11756_v45 = vld [vmem:[#allocation10 + $0xb0] sm:$0xff]  }
 0x3c3   :  { %11435 = vmatprep.subr.bf16.mxu0 %v12026_v23 }
 0x3c6   :  { %11437 = vmatpush3.bf16.msra.mxu0 %v11436_v21  ;;  %v11758_v21 = vld [vmem:[#allocation10 + $0xf8] sm:$0xff]  }
 0x3c7   :  { %11438 = vmatprep.subr.bf16.mxu0 %v12026_v23 }
 0x3ca   :  { %11440 = vmatpush3.bf16.msra.mxu0 %v11439_v50  ;;  %v11763_v50 = vld [vmem:[#allocation10 + $0x1c0] sm:$0xff]  }
 0x3cb   :  { %11441 = vmatprep.subr.bf16.mxu0 %v12026_v23 }
 0x3ce   :  { %11443 = vmatpush3.bf16.msra.mxu0 %v11442_v34 }
 0x3cf   :  { %11444 = vmatprep.subr.bf16.mxu0 %v12026_v23 }
 0x3d2   :  { %11446 = vmatpush3.bf16.msra.mxu0 %v11445_v29 }
 0x3d3   :  { %11447 = vmatprep.subr.bf16.mxu0 %v12026_v23 }
 0x3d6   :  { %11449 = vmatpush3.bf16.msra.mxu0 %v11448_v4 }
 0x3d9   :  { %11137 = vmatmul.mubr.f32.vlgmr.msra.gmra.mrb[146].mxu0 %v12028_v55 }
 0x48c   :  { %v4125_v52 = vpop.f32.mrb[144].mxu0 }
 0x48d   :  { %v11068_v47 = vpop.f32.mrb[145].mxu0  ;;  %11102 = vmatmul.mubr.f32.vlgmr.msra.gmra.mrb[128].mxu1 %v4125_v52 }
 0x48e   :  { %11452 = vmatpush3.bf16.msra.mxu1 %v13422_v33  ;;  %11171 = vmatprep.mubr.msk.f32.mxu1 %vm12027_vm0, %v13372_v53 }
 0x48f   :  { %11453 = vmatprep.subr.bf16.mxu1 %v12026_v23 }
 0x492   :  { %11455 = vmatpush3.bf16.msra.mxu1 %v13428_v35  ;;  %v11729_v35 = vld [vmem:[#allocation10 + $0x40] sm:$0xff]  }
 0x493   :  { %11456 = vmatprep.subr.bf16.mxu1 %v12026_v23  ;;  %10134 = vmatprep.subr.bf16.mxu0 %v11729_v35 }
 0x496   :  { %11458 = vmatpush3.bf16.msra.mxu1 %v13446_v0  ;;  %v11730_v0 = vld [vmem:[#allocation10 + $0xc0] sm:$0xff]  }
 0x497   :  { %11459 = vmatprep.subr.bf16.mxu1 %v12026_v23 }
 0x49a   :  { %11461 = vmatpush3.bf16.msra.mxu1 %v13458_v60  ;;  %v11731_v60 = vld [vmem:[#allocation10] sm:$0xff]  }
 0x49b   :  { %11462 = vmatprep.subr.bf16.mxu1 %v12026_v23  ;;  %10135 = vmatpush3.bf16.msra.mxu0 %v11731_v60 }
 0x49e   :  { %11464 = vmatpush3.bf16.msra.mxu1 %v13477_v3  ;;  %v11733_v3 = vld [vmem:[#allocation10 + $0x48] sm:$0xff]  }
 0x49f   :  { %11465 = vmatprep.subr.bf16.mxu1 %v12026_v23  ;;  %10136 = vmatprep.subr.bf16.mxu0 %v11733_v3 }
 0x4a2   :  { %11467 = vmatpush3.bf16.msra.mxu1 %v13490_v12  ;;  %v11735_v12 = vld [vmem:[#allocation10 + $0x8] sm:$0xff]  }
 0x4a3   :  { %11468 = vmatprep.subr.bf16.mxu1 %v12026_v23  ;;  %10137 = vmatpush3.bf16.msra.mxu0 %v11735_v12 }
 0x4a6   :  { %11470 = vmatpush3.bf16.msra.mxu1 %v13505_v41  ;;  %v11737_v41 = vld [vmem:[#allocation10 + $0x50] sm:$0xff]  }
 0x4a7   :  { %11471 = vmatprep.subr.bf16.mxu1 %v12026_v23  ;;  %10138 = vmatprep.subr.bf16.mxu0 %v11737_v41 }
 0x4aa   :  { %11473 = vmatpush3.bf16.msra.mxu1 %v13518_v19  ;;  %v11739_v19 = vld [vmem:[#allocation10 + $0x10] sm:$0xff]  }
 0x4ab   :  { %10198 = vmatprep.subr.bf16.mxu1 %v11730_v0  ;;  %10139 = vmatpush3.bf16.msra.mxu0 %v11739_v19  ;;  %v4380_v0 = vld [vmem:[%s14559_s7] sm:$0x1] }
 0x4ac   :  { %v4297_v53 = vpop.f32.mrb[146].mxu0  ;;  %10140 = vmatprep.subr.bf16.mxu0 %v11741_v25 }
 0x4ad   :  { %v11138_v33 = vpop.f32.mrb[147].mxu0  ;;  %11172 = vmatmul.mubr.f32.vlgmr.msra.gmra.mrb[130].mxu1 %v4297_v53  ;;  %v4376_v53 = vld [vmem:[%s14558_s6] sm:$0x1] }
 0x4ae   :  { %10199 = vmatpush3.bf16.msra.mxu1 %v11732_v17  ;;  %v14668_v17 = vld [vmem:[#allocation16_spill] sm:$0xff] }
 0x4af   :  { %10200 = vmatprep.subr.bf16.mxu1 %v11734_v13  ;;  %10141 = vmatpush3.bf16.msra.mxu0 %v11743_v42 }
 0x4b0   :  { %10142 = vmatprep.subr.bf16.mxu0 %v11745_v28 }
 0x4b2   :  { %10201 = vmatpush3.bf16.msra.mxu1 %v11736_v51 }
 0x4b3   :  { %10202 = vmatprep.subr.bf16.mxu1 %v11738_v15  ;;  %10143 = vmatpush3.bf16.msra.mxu0 %v11747_v49 }
 0x4b4   :  { %10144 = vmatprep.subr.bf16.mxu0 %v11749_v59 }
 0x4b6   :  { %10203 = vmatpush3.bf16.msra.mxu1 %v11740_v30 }
 0x4b7   :  { %10204 = vmatprep.subr.bf16.mxu1 %v11742_v54  ;;  %10145 = vmatpush3.bf16.msra.mxu0 %v11751_v20 }
 0x4b8   :  { %10146 = vmatprep.subr.bf16.mxu0 %v11753_v18 }
 0x4ba   :  { %10205 = vmatpush3.bf16.msra.mxu1 %v11744_v44 }
 0x4bb   :  { %10206 = vmatprep.subr.bf16.mxu1 %v11746_v22  ;;  %10147 = vmatpush3.bf16.msra.mxu0 %v11755_v31 }
 0x4bc   :  { %10148 = vmatprep.subr.bf16.mxu0 %v11757_v61 }
 0x4be   :  { %10207 = vmatpush3.bf16.msra.mxu1 %v11748_v7 }
 0x4bf   :  { %10208 = vmatprep.subr.bf16.mxu1 %v11750_v1  ;;  %10149 = vmatpush3.bf16.msra.mxu0 %v11759_v36 }
 0x4c0   :  { %10262 = vmatprep.subr.bf16.mxu0 %v11761_v43 }
 0x4c2   :  { %10209 = vmatpush3.bf16.msra.mxu1 %v11752_v6 }
 0x4c3   :  { %10210 = vmatprep.subr.bf16.mxu1 %v11754_v16 }
 0x4c6   :  { %10211 = vmatpush3.bf16.msra.mxu1 %v11756_v45 }
 0x4c7   :  { %10212 = vmatprep.subr.bf16.mxu1 %v11758_v21 }
 0x4ca   :  { %10213 = vmatpush3.bf16.msra.mxu1 %v11760_v62 }
 0x4cb   :  { %10326 = vmatprep.subr.bf16.mxu1 %v11763_v50 }
 0x560   :  { %v4211_v46 = vpop.f32.mrb[128].mxu1 }
 0x561   :  { %v11103_v34 = vpop.f32.mrb[129].mxu1  ;;  %v4371_v8 = vmul.f32 0.0009765625, %v4211_v46 }
 0x563   :  { %v4373_v57 = vmul.f32 %v4371_v8, %v4371_v8 }
 0x580   :  { %v4367_v24 = vpop.f32.mrb[130].mxu1 }
 0x581   :  { %v4372_v29 = vmul.f32 0.0009765625, %v4367_v24  ;;  %v11173_v58 = vpop.f32.mrb[131].mxu1 }
 0x583   :  { %v4374_v4 = vsub.f32 %v4372_v29, %v4373_v57 }
 0x585   :  { %v4375_v52 = vmax.f32 %v4374_v4, 0.0 }
 0x587   :  { %v4377_v47 = vadd.f32 1e-05, %v4375_v52 }
 0x589   :  { %11937 = vrsqrt.f32 %v4377_v47  ;;  %v13701_v47 = vld [vmem:[#allocation3] sm:$0xff] }
 0x593   :  { %v11938_v33 = vpop.eup %11937 }
 0x594   :  { %v4379_v35 = vmul.f32 %v11938_v33, %v4376_v53  ;;  %v13705_v53 = vpack.c.bf16 %v13701_v47, %v13701_v47 }
 0x596   :  { %v4381_v60 = vmul.f32 %v4379_v35, %v4371_v8  ;;  %v4387_v3 = vrot.slane %v4379_v35, %v14668_v17 }
 0x598   :  { %v4382_v13 = vsub.f32 %v4380_v0, %v4381_v60  ;;  %v4389_v12 = vmul.f32 %v4387_v3, %v13542_v27  ;;  %v4390_v51 = vmul.f32 %v4387_v3, %v13547_v9  ;;  %v4391_v41 = vmul.f32 %v4387_v3, %v13539_v56 }
 0x599   :  { %v4392_v15 = vmul.f32 %v4387_v3, %v13544_v10  ;;  %v4393_v19 = vmul.f32 %v4387_v3, %v13556_v14  ;;  %v4394_v30 = vmul.f32 %v4387_v3, %v13561_v40  ;;  %v4395_v25 = vmul.f32 %v4387_v3, %v13551_v38 }
 0x59a   :  { %v4409_v54 = vrot.slane %v4382_v13, %v14668_v17  ;;  %v4396_v42 = vmul.f32 %v4387_v3, %v13558_v32  ;;  %v4397_v44 = vmul.f32 %v4387_v3, %v13571_v39  ;;  %v4398_v27 = vmul.f32 %v4387_v3, %v13575_v11 }
 0x59b   :  { %v4399_v9 = vmul.f32 %v4387_v3, %v13566_v2  ;;  %v4400_v56 = vmul.f32 %v4387_v3, %v13573_v48  ;;  %v4401_v10 = vmul.f32 %v4387_v3, %v13586_v37  ;;  %v4402_v14 = vmul.f32 %v4387_v3, %v13590_v5 }
 0x59c   :  { %v4411_v28 = vadd.f32 %v4409_v54, %v4389_v12  ;;  %v4412_v40 = vadd.f32 %v4409_v54, %v4390_v51  ;;  %v4413_v22 = vadd.f32 %v4409_v54, %v4391_v41  ;;  %v4414_v38 = vadd.f32 %v4409_v54, %v4392_v15 }
 0x59d   :  { %v4415_v49 = vadd.f32 %v4409_v54, %v4393_v19  ;;  %v4416_v7 = vadd.f32 %v4409_v54, %v4394_v30  ;;  %v4417_v59 = vadd.f32 %v4409_v54, %v4395_v25  ;;  %v4418_v32 = vadd.f32 %v4409_v54, %v4396_v42 }
 0x59e   :  { %v13681_v1 = vmax.f32 %v4411_v28, 0.0  ;;  %v4428_v39 = vmax.f32 %v4412_v40, 0.0  ;;  %v4429_v11 = vmax.f32 %v4413_v22, 0.0  ;;  %v4430_v20 = vmax.f32 %v4414_v38, 0.0  ;;  %v11767_v28 = vld [vmem:[#allocation10 + $0x108] sm:$0xff]   ;;  %v11769_v22 = vld [vmem:[#allocation10 + $0x150] sm:$0xff]  }
 0x59f   :  { %v4431_v2 = vmax.f32 %v4415_v49, 0.0  ;;  %v4432_v6 = vmax.f32 %v4416_v7, 0.0  ;;  %v13683_v48 = vmax.f32 %v4417_v59, 0.0  ;;  %v4434_v37 = vmax.f32 %v4418_v32, 0.0  ;;  %v11768_v40 = vld [vmem:[#allocation10 + $0x188] sm:$0xff]   ;;  %v11770_v38 = vld [vmem:[#allocation10 + $0x1d0] sm:$0xff]  }
 0x5a0   :  { %4443 = vst [vmem:[#allocation3 + $0x22] sm:$0xff] %v13681_v1  ;;  %4444 = vst [vmem:[#allocation3 + $0x32] sm:$0xff] %v4428_v39  ;;  %v4419_v5 = vadd.f32 %v4409_v54, %v4397_v44  ;;  %v4420_v18 = vadd.f32 %v4409_v54, %v4398_v27  ;;  %v4421_v16 = vadd.f32 %v4409_v54, %v4399_v9  ;;  %v11762_v27 = vld [vmem:[#allocation10 + $0x100] sm:$0xff]   ;;  %v11771_v32 = vld [vmem:[#allocation10 + $0x110] sm:$0xff]  }
 0x5a1   :  { %4445 = vst [vmem:[#allocation3 + $0x42] sm:$0xff] %v4429_v11  ;;  %4446 = vst [vmem:[#allocation3 + $0x52] sm:$0xff] %v4430_v20  ;;  %v4422_v31 = vadd.f32 %v4409_v54, %v4400_v56  ;;  %v4423_v45 = vadd.f32 %v4409_v54, %v4401_v10  ;;  %v4403_v61 = vmul.f32 %v4387_v3, %v13581_v63  ;;  %v11764_v9 = vld [vmem:[#allocation10 + $0x180] sm:$0xff]   ;;  %v11765_v10 = vld [vmem:[#allocation10 + $0x148] sm:$0xff]  }
 0x5a2   :  { %4447 = vst [vmem:[#allocation3 + $0x62] sm:$0xff] %v4431_v2  ;;  %4448 = vst [vmem:[#allocation3 + $0x72] sm:$0xff] %v4432_v6  ;;  %v4424_v21 = vadd.f32 %v4409_v54, %v4402_v14  ;;  %v4404_v36 = vmul.f32 %v4387_v3, %v13588_v26  ;;  %v13689_v62 = vmax.f32 %v4419_v5, 0.0  ;;  %v4436_v43 = vmax.f32 %v4420_v18, 0.0  ;;  %v11766_v14 = vld [vmem:[#allocation10 + $0x1c8] sm:$0xff]   ;;  %v11777_v5 = vld [vmem:[#allocation10 + $0x160] sm:$0xff]  }
 0x5a3   :  { %4449 = vst [vmem:[#allocation3 + $0x82] sm:$0xff] %v13683_v48  ;;  %4450 = vst [vmem:[#allocation3 + $0x92] sm:$0xff] %v4434_v37  ;;  %v4437_v50 = vmax.f32 %v4421_v16, 0.0  ;;  %v4438_v46 = vmax.f32 %v4422_v31, 0.0  ;;  %v4439_v34 = vmax.f32 %v4423_v45, 0.0  ;;  %v4425_v8 = vadd.f32 %v4409_v54, %v4403_v61  ;;  %v11776_v37 = vld [vmem:[#allocation10 + $0x198] sm:$0xff]  }
 0x5a4   :  { %v4440_v24 = vmax.f32 %v4424_v21, 0.0  ;;  %v4426_v57 = vadd.f32 %v4409_v54, %v4404_v36  ;;  %4451 = vst [vmem:[#allocation3 + $0xe2] sm:$0xff] %v13689_v62  ;;  %4452 = vst [vmem:[#allocation3 + $0xf2] sm:$0xff] %v4436_v43  ;;  %v13692_v29 = vpack.c.bf16 %v4429_v11, %v4428_v39  ;;  %v13695_v63 = vpack.c.bf16 %v4428_v39, %v13681_v1  ;;  %v11772_v39 = vld [vmem:[#allocation10 + $0x190] sm:$0xff]   ;;  %v11778_v18 = vld [vmem:[#allocation10 + $0x1e0] sm:$0xff]  }
 0x5a5   :  { %4453 = vst [vmem:[#allocation3 + $0x102] sm:$0xff] %v4437_v50  ;;  %4454 = vst [vmem:[#allocation3 + $0x112] sm:$0xff] %v4438_v46  ;;  %v13697_v26 = vpack.c.bf16 %v4431_v2, %v4430_v20  ;;  %v4441_v58 = vmax.f32 %v4425_v8, 0.0  ;;  %v13699_v52 = vpack.c.bf16 %v4430_v20, %v4429_v11  ;;  %v13708_v33 = vpack.c.bf16 %v13683_v48, %v4432_v6  ;;  %v11773_v20 = vld [vmem:[#allocation10 + $0x158] sm:$0xff]   ;;  %v11779_v45 = vld [vmem:[#allocation10 + $0x120] sm:$0xff]  }
 0x5a6   :  { %4455 = vst [vmem:[#allocation3 + $0x122] sm:$0xff] %v4439_v34  ;;  %4456 = vst [vmem:[#allocation3 + $0x132] sm:$0xff] %v4440_v24  ;;  %v4442_v4 = vmax.f32 %v4426_v57, 0.0  ;;  %v13710_v35 = vpack.c.bf16 %v4432_v6, %v4431_v2  ;;  %v13712_v0 = vpack.c.bf16 %v4437_v50, %v4436_v43  ;;  %v13715_v12 = vpack.c.bf16 %v4436_v43, %v13689_v62  ;;  %v11774_v2 = vld [vmem:[#allocation10 + $0x1d8] sm:$0xff]   ;;  %v11780_v61 = vld [vmem:[#allocation10 + $0x1a0] sm:$0xff]  }
 0x5a7   :  { %v4461_v60 = vld [vmem:[#allocation3 + $0x20] sm:$0xff]  ;;  %v4462_v3 = vld [vmem:[#allocation3 + $0x30] sm:$0xff]  ;;  %4457 = vst [vmem:[#allocation3 + $0x142] sm:$0xff] %v4441_v58  ;;  %v13717_v51 = vpack.c.bf16 %v4439_v34, %v4438_v46  ;;  %v13719_v41 = vpack.c.bf16 %v4438_v46, %v4437_v50  ;;  %v13721_v15 = vpack.c.bf16 %v4441_v58, %v4440_v24  ;;  %v13724_v44 = vpack.c.bf16 %v4440_v24, %v4439_v34  ;;  %v11775_v6 = vld [vmem:[#allocation10 + $0x118] sm:$0xff]  }
 0x5a8   :  { %v4463_v13 = vld [vmem:[#allocation3 + $0x40] sm:$0xff]  ;;  %4458 = vst [vmem:[#allocation3 + $0x152] sm:$0xff] %v4442_v4  ;;  %v4556_v19 = vpack.c.bf16 %v4461_v60, %v13701_v47  ;;  %v4524_v30 = vpack.c.bf16 %v4462_v3, %v4461_v60  ;;  %v4464_v54 = vld [vmem:[#allocation3 + $0x50] sm:$0xff]  ;;  %v11781_v36 = vld [vmem:[#allocation10 + $0x168] sm:$0xff]  }
 0x5a9   :  { %v4557_v25 = vpack.c.bf16 %v4463_v13, %v4462_v3  ;;  %v4465_v42 = vld [vmem:[#allocation3 + $0x60] sm:$0xff]  ;;  %v4466_v49 = vld [vmem:[#allocation3 + $0x70] sm:$0xff]  ;;  %v13727_v59 = vpack.c.bf16 %v4464_v54, %v4463_v13  ;;  %v11782_v43 = vld [vmem:[#allocation10 + $0x1e8] sm:$0xff]  }
 0x5aa   :  { %7342 = vmatprep.mubr.bf16.mxu0 %v4556_v19  ;;  %v4558_v56 = vpack.c.bf16 %v4465_v42, %v4464_v54  ;;  %v4467_v7 = vld [vmem:[#allocation3 + $0x80] sm:$0xff]  ;;  %v4468_v16 = vld [vmem:[#allocation3 + $0x90] sm:$0xff]  ;;  %v13730_v31 = vpack.c.bf16 %v4466_v49, %v4465_v42  ;;  %v11783_v50 = vld [vmem:[#allocation10 + $0x128] sm:$0xff]  }
 0x5ab   :  { %7439 = vmatprep.mubr.bf16.mxu1 %v4557_v25  ;;  %7343 = vmatmul.mubr.bf16.vlgmr.msra.gmra.mrb[148].mxu0 %v13705_v53  ;;  %v4559_v11 = vpack.c.bf16 %v4467_v7, %v4466_v49  ;;  %v4625_v21 = vpack.c.bf16 %v13701_v47, %v4468_v16  ;;  %v11784_v46 = vld [vmem:[#allocation10 + $0x1a8] sm:$0xff]   ;;  %v11785_v34 = vld [vmem:[#allocation10 + $0x170] sm:$0xff]   ;;  %v4473_v24 = vld [vmem:[#allocation3 + $0xe0] sm:$0xff]  ;;  %v13735_v4 = vpack.c.bf16 %v4468_v16, %v4467_v7 }
 0x5ac   :  { %7440 = vmatmul.mubr.bf16.vlgmr.msra.gmra.mrb[132].mxu1 %v4524_v30  ;;  %7350 = vmatprep.mubr.bf16.mxu0 %v4557_v25  ;;  %v11786_v8 = vld [vmem:[#allocation10 + $0x1f0] sm:$0xff]   ;;  %v4475_v58 = vld [vmem:[#allocation3 + $0x100] sm:$0xff]  ;;  %v4560_v13 = vpack.c.bf16 %v4473_v24, %v13701_v47  ;;  %v11790_v25 = vld [vmem:[#allocation10 + $0x1f8] sm:$0xff]  }
 0x5ad   :  { %7447 = vmatprep.mubr.bf16.mxu1 %v4558_v56  ;;  %10263 = vmatpush3.bf16.msra.mxu0 %v11762_v27  ;;  %v4474_v57 = vld [vmem:[#allocation3 + $0xf0] sm:$0xff]  ;;  %v11791_v54 = vld [vmem:[#allocation10 + $0x138] sm:$0xff]   ;;  %v11793_v27 = vld [vmem:[#allocation10 + $0x240] sm:$0xff]  }
 0x5ae   :  { %10327 = vmatpush3.bf16.msra.mxu1 %v11764_v9  ;;  %10264 = vmatprep.subr.bf16.mxu0 %v11765_v10  ;;  %v11787_v60 = vld [vmem:[#allocation10 + $0x130] sm:$0xff]   ;;  %v4561_v19 = vpack.c.bf16 %v4475_v58, %v4474_v57  ;;  %v11792_v42 = vld [vmem:[#allocation10 + $0x1b8] sm:$0xff]   ;;  %v11795_v9 = vld [vmem:[#allocation10 + $0x2c0] sm:$0xff]  }
 0x5af   :  { %10328 = vmatprep.subr.bf16.mxu1 %v11766_v14  ;;  %v11788_v3 = vld [vmem:[#allocation10 + $0x1b0] sm:$0xff]   ;;  %v4477_v10 = vld [vmem:[#allocation3 + $0x120] sm:$0xff]  ;;  %v4528_v14 = vpack.c.bf16 %v4474_v57, %v4473_v24 }
 0x5b0   :  { %v4480_v7 = vld [vmem:[#allocation3 + $0x150] sm:$0xff]  ;;  %v4677_v57 = vld [vmem:[#allocation3 + $0x61] sm:$0xff] }
 0x5b1   :  { %10265 = vmatpush3.bf16.msra.mxu0 %v11767_v28  ;;  %v4676_v16 = vld [vmem:[#allocation3 + $0x51] sm:$0xff] }
 0x5b2   :  { %10329 = vmatpush3.bf16.msra.mxu1 %v11768_v40  ;;  %10266 = vmatprep.subr.bf16.mxu0 %v11769_v22  ;;  %v4478_v40 = vld [vmem:[#allocation3 + $0x130] sm:$0xff]  ;;  %v4479_v22 = vld [vmem:[#allocation3 + $0x140] sm:$0xff] }
 0x5b3   :  { %10330 = vmatprep.subr.bf16.mxu1 %v11770_v38  ;;  %7351 = vmatmul.mubr.bf16.gmra.mrb[152].mxu0 %v4524_v30  ;;  %v11789_v30 = vld [vmem:[#allocation10 + $0x178] sm:$0xff]   ;;  %v4563_v49 = vpack.c.bf16 %v4479_v22, %v4478_v40  ;;  %v11802_v24 = vld [vmem:[#allocation10 + $0x2d0] sm:$0xff]  }
 0x5b4   :  { %7448 = vmatmul.mubr.bf16.gmra.mrb[136].mxu1 %v13727_v59  ;;  %7358 = vmatprep.mubr.bf16.mxu0 %v4558_v56  ;;  %v4476_v56 = vld [vmem:[#allocation3 + $0x110] sm:$0xff] }
 0x5b5   :  { %7455 = vmatprep.mubr.bf16.mxu1 %v4559_v11  ;;  %10267 = vmatpush3.bf16.msra.mxu0 %v11771_v32  ;;  %v4562_v28 = vpack.c.bf16 %v4477_v10, %v4476_v56  ;;  %v13741_v38 = vpack.c.bf16 %v4476_v56, %v4475_v58  ;;  %v13744_v32 = vpack.c.bf16 %v4478_v40, %v4477_v10  ;;  %v4678_v58 = vld [vmem:[#allocation3 + $0x71] sm:$0xff]  ;;  %v11813_v40 = vld [vmem:[#allocation10 + $0x268] sm:$0xff]  }
 0x5b6   :  { %10331 = vmatpush3.bf16.msra.mxu1 %v11772_v39  ;;  %10268 = vmatprep.subr.bf16.mxu0 %v11773_v20  ;;  %v4629_v39 = vpack.c.bf16 %v13701_v47, %v4480_v7  ;;  %v4673_v20 = vld [vmem:[#allocation3 + $0x21] sm:$0xff]  ;;  %v13765_v56 = vld [vmem:[#allocation3 + $0x91] sm:$0xff]  ;;  %v13767_v10 = vpack.c.bf16 %v4677_v57, %v4676_v16 }
 0x5b7   :  { %10332 = vmatprep.subr.bf16.mxu1 %v11774_v2  ;;  %v4674_v2 = vld [vmem:[#allocation3 + $0x31] sm:$0xff]  ;;  %v4675_v47 = vld [vmem:[#allocation3 + $0x41] sm:$0xff] }
 0x5b9   :  { %10269 = vmatpush3.bf16.msra.mxu0 %v11775_v6  ;;  %v4672_v6 = vld [vmem:[#allocation3 + $0x11] sm:$0xff] }
 0x5ba   :  { %10333 = vmatpush3.bf16.msra.mxu1 %v11776_v37  ;;  %10270 = vmatprep.subr.bf16.mxu0 %v11777_v5  ;;  %v13749_v5 = vpack.c.bf16 %v4480_v7, %v4479_v22  ;;  %v11814_v22 = vld [vmem:[#allocation10 + $0x2e8] sm:$0xff]  }
 0x5bb   :  { %10334 = vmatprep.subr.bf16.mxu1 %v11778_v18  ;;  %7359 = vmatmul.mubr.bf16.gmra.mrb[156].mxu0 %v13727_v59  ;;  %v4736_v18 = vpack.c.bf16 %v4674_v2, %v4673_v20  ;;  %v11815_v7 = vld [vmem:[#allocation10 + $0x228] sm:$0xff]  }
 0x5bc   :  { %7456 = vmatmul.mubr.bf16.gmra.mrb[140].mxu1 %v13730_v31  ;;  %7366 = vmatprep.mubr.bf16.mxu0 %v4559_v11  ;;  %v4671_v11 = vld [vmem:[#allocation3 + $0x1] sm:$0xff] }
 0x5bd   :  { %7463 = vmatprep.mubr.bf16.mxu1 %v4625_v21  ;;  %10271 = vmatpush3.bf16.msra.mxu0 %v11779_v45  ;;  %v4735_v37 = vpack.c.bf16 %v4672_v6, %v4671_v11  ;;  %v4767_v45 = vpack.c.bf16 %v4673_v20, %v4672_v6  ;;  %v11796_v21 = vld [vmem:[#allocation10 + $0x280] sm:$0xff]   ;;  %v11817_v11 = vld [vmem:[#allocation10 + $0x270] sm:$0xff]  }
 0x5be   :  { %10335 = vmatpush3.bf16.msra.mxu1 %v11780_v61  ;;  %10272 = vmatprep.subr.bf16.mxu0 %v11781_v36  ;;  %v11794_v61 = vld [vmem:[#allocation10 + $0x200] sm:$0xff]   ;;  %v13753_v36 = vpack.c.bf16 %v4676_v16, %v4675_v47  ;;  %v11818_v20 = vld [vmem:[#allocation10 + $0x2f0] sm:$0xff]  }
 0x5bf   :  { %10336 = vmatprep.subr.bf16.mxu1 %v11782_v43  ;;  %v11797_v43 = vld [vmem:[#allocation10 + $0x248] sm:$0xff]   ;;  %v4686_v6 = vld [vmem:[#allocation3 + $0xf1] sm:$0xff] }
 0x5c0   :  { %v11820_v16 = vld [vmem:[#allocation10 + $0x2b0] sm:$0xff]  }
 0x5c1   :  { %10273 = vmatpush3.bf16.msra.mxu0 %v11783_v50  ;;  %v11798_v50 = vld [vmem:[#allocation10 + $0x2c8] sm:$0xff]  }
 0x5c2   :  { %10337 = vmatpush3.bf16.msra.mxu1 %v11784_v46  ;;  %10274 = vmatprep.subr.bf16.mxu0 %v11785_v34  ;;  %v11799_v46 = vld [vmem:[#allocation10 + $0x208] sm:$0xff]  }
 0x5c3   :  { %10338 = vmatprep.subr.bf16.mxu1 %v11786_v8  ;;  %7367 = vmatmul.mubr.bf16.gmra.mrb[160].mxu0 %v13730_v31  ;;  %v11800_v34 = vld [vmem:[#allocation10 + $0x288] sm:$0xff]   ;;  %v11801_v8 = vld [vmem:[#allocation10 + $0x250] sm:$0xff]  }
 0x5c4   :  { %7464 = vmatmul.mubr.bf16.gmra.mrb[144].mxu1 %v13735_v4  ;;  %7374 = vmatprep.mubr.bf16.mxu0 %v4560_v13  ;;  %v13759_v13 = vpack.c.bf16 %v4678_v58, %v4677_v57 }
 0x5c5   :  { %7471 = vmatprep.mubr.bf16.mxu1 %v4561_v19  ;;  %10275 = vmatpush3.bf16.msra.mxu0 %v11787_v60  ;;  %v13757_v60 = vpack.c.bf16 %v4675_v47, %v4674_v2  ;;  %v4685_v2 = vld [vmem:[#allocation3 + $0xe1] sm:$0xff]  ;;  %v11819_v47 = vld [vmem:[#allocation10 + $0x230] sm:$0xff]  }
 0x5c6   :  { %10339 = vmatpush3.bf16.msra.mxu1 %v11788_v3  ;;  %10276 = vmatprep.subr.bf16.mxu0 %v11789_v30  ;;  %v11803_v3 = vld [vmem:[#allocation10 + $0x210] sm:$0xff]   ;;  %v11806_v30 = vld [vmem:[#allocation10 + $0x2d8] sm:$0xff]  }
 0x5c7   :  { %10340 = vmatprep.subr.bf16.mxu1 %v11790_v25  ;;  %v11807_v25 = vld [vmem:[#allocation10 + $0x218] sm:$0xff]  }
 0x5c9   :  { %10277 = vmatpush3.bf16.msra.mxu0 %v11791_v54  ;;  %v11808_v54 = vld [vmem:[#allocation10 + $0x298] sm:$0xff]  }
 0x5ca   :  { %10341 = vmatpush3.bf16.msra.mxu1 %v11792_v42  ;;  %10390 = vmatprep.subr.bf16.mxu0 %v11793_v27  ;;  %v11809_v42 = vld [vmem:[#allocation10 + $0x260] sm:$0xff]  }
 0x5cb   :  { %10454 = vmatprep.subr.bf16.mxu1 %v11795_v9  ;;  %7375 = vmatmul.mubr.bf16.gmra.mrb[164].mxu0 %v13705_v53  ;;  %v11810_v27 = vld [vmem:[#allocation10 + $0x2e0] sm:$0xff]  }
 0x5cc   :  { %7472 = vmatmul.mubr.bf16.gmra.mrb[148].mxu1 %v4528_v14  ;;  %7382 = vmatprep.mubr.bf16.mxu0 %v4561_v19  ;;  %v11805_v19 = vld [vmem:[#allocation10 + $0x258] sm:$0xff]   ;;  %v4679_v9 = vld [vmem:[#allocation3 + $0x81] sm:$0xff] }
 0x5cd   :  { %7479 = vmatprep.mubr.bf16.mxu1 %v4562_v28 }
 0x5d3   :  { %7383 = vmatmul.mubr.bf16.gmra.mrb[168].mxu0 %v4528_v14  ;;  %v11812_v14 = vld [vmem:[#allocation10 + $0x2a0] sm:$0xff]  }
 0x5d4   :  { %7480 = vmatmul.mubr.bf16.gmra.mrb[152].mxu1 %v13741_v38  ;;  %7390 = vmatprep.mubr.bf16.mxu0 %v4562_v28  ;;  %v13770_v28 = vpack.c.bf16 %v13765_v56, %v4679_v9 }
 0x5d5   :  { %7487 = vmatprep.mubr.bf16.mxu1 %v4563_v49 }
 0x5db   :  { %7391 = vmatmul.mubr.bf16.gmra.mrb[172].mxu0 %v13741_v38 }
 0x5dc   :  { %7488 = vmatmul.mubr.bf16.gmra.mrb[156].mxu1 %v13744_v32  ;;  %7398 = vmatprep.mubr.bf16.mxu0 %v4563_v49  ;;  %v4683_v49 = vld [vmem:[#allocation3 + $0xc1] sm:$0xff] }
 0x5dd   :  { %7495 = vmatprep.mubr.bf16.mxu1 %v4629_v39  ;;  %v11816_v39 = vld [vmem:[#allocation10 + $0x2a8] sm:$0xff]  }
 0x5e3   :  { %7399 = vmatmul.mubr.bf16.gmra.mrb[176].mxu0 %v13744_v32 }
 0x5e4   :  { %7496 = vmatmul.mubr.bf16.gmra.mrb[160].mxu1 %v13749_v5  ;;  %7536 = vmatprep.mubr.bf16.mxu0 %v4735_v37  ;;  %v4684_v37 = vld [vmem:[#allocation3 + $0xd1] sm:$0xff] }
 0x5e5   :  { %7633 = vmatprep.mubr.bf16.mxu1 %v4736_v18  ;;  %v4771_v57 = vpack.c.bf16 %v4685_v2, %v4684_v37 }
 0x5eb   :  { %7537 = vmatmul.mubr.bf16.vlgmr.msra.gmra.mrb[180].mxu0 %v13727_v59  ;;  %v11804_v59 = vld [vmem:[#allocation10 + $0x290] sm:$0xff]  }
 0x5ec   :  { %7634 = vmatmul.mubr.bf16.vlgmr.msra.gmra.mrb[164].mxu1 %v4767_v45  ;;  %7544 = vmatprep.mubr.bf16.mxu0 %v4736_v18  ;;  %v4739_v18 = vpack.c.bf16 %v4684_v37, %v4683_v49  ;;  %v4740_v45 = vpack.c.bf16 %v4686_v6, %v4685_v2  ;;  %v11830_v49 = vld [vmem:[#allocation10 + $0x3c8] sm:$0xff]   ;;  %v11839_v2 = vld [vmem:[#allocation10 + $0x318] sm:$0xff]   ;;  %v11841_v37 = vld [vmem:[#allocation10 + $0x360] sm:$0xff]  }
 0x5ed   :  { %7641 = vmatprep.mubr.bf16.mxu1 %v13753_v36  ;;  %10391 = vmatpush3.bf16.msra.mxu0 %v11794_v61  ;;  %v11821_v61 = vld [vmem:[#allocation10 + $0x278] sm:$0xff]  }
 0x5ee   :  { %10455 = vmatpush3.bf16.msra.mxu1 %v11796_v21  ;;  %10392 = vmatprep.subr.bf16.mxu0 %v11797_v43  ;;  %v11822_v21 = vld [vmem:[#allocation10 + $0x2f8] sm:$0xff]  }
 0x5ef   :  { %10456 = vmatprep.subr.bf16.mxu1 %v11798_v50  ;;  %v11823_v43 = vld [vmem:[#allocation10 + $0x238] sm:$0xff]  }
 0x5f0   :  { %v11824_v50 = vld [vmem:[#allocation10 + $0x2b8] sm:$0xff]  }
 0x5f1   :  { %10393 = vmatpush3.bf16.msra.mxu0 %v11799_v46  ;;  %v11825_v46 = vld [vmem:[#allocation10 + $0x340] sm:$0xff]  }
 0x5f2   :  { %10457 = vmatpush3.bf16.msra.mxu1 %v11800_v34  ;;  %10394 = vmatprep.subr.bf16.mxu0 %v11801_v8  ;;  %v11827_v34 = vld [vmem:[#allocation10 + $0x3c0] sm:$0xff]  }
 0x5f3   :  { %10458 = vmatprep.subr.bf16.mxu1 %v11802_v24  ;;  %7545 = vmatmul.mubr.bf16.gmra.mrb[184].mxu0 %v13730_v31  ;;  %v11811_v31 = vld [vmem:[#allocation10 + $0x220] sm:$0xff]   ;;  %v4688_v24 = vld [vmem:[#allocation3 + $0x111] sm:$0xff] }
 0x5f4   :  { %7642 = vmatmul.mubr.bf16.gmra.mrb[168].mxu1 %v13757_v60  ;;  %7552 = vmatprep.mubr.bf16.mxu0 %v13753_v36  ;;  %v4687_v8 = vld [vmem:[#allocation3 + $0x101] sm:$0xff] }
 0x5f5   :  { %7649 = vmatprep.mubr.bf16.mxu1 %v13759_v13  ;;  %10395 = vmatpush3.bf16.msra.mxu0 %v11803_v3  ;;  %v4689_v3 = vld [vmem:[#allocation3 + $0x121] sm:$0xff] }
 0x5f6   :  { %10459 = vmatpush3.bf16.msra.mxu1 %v11804_v59  ;;  %10396 = vmatprep.subr.bf16.mxu0 %v11805_v19  ;;  %v4690_v59 = vld [vmem:[#allocation3 + $0x131] sm:$0xff]  ;;  %v13784_v19 = vpack.c.bf16 %v4687_v8, %v4686_v6 }
 0x5f7   :  { %10460 = vmatprep.subr.bf16.mxu1 %v11806_v30  ;;  %v13786_v30 = vpack.c.bf16 %v4690_v59, %v4689_v3  ;;  %v11840_v6 = vld [vmem:[#allocation10 + $0x398] sm:$0xff]  }
 0x5f9   :  { %10397 = vmatpush3.bf16.msra.mxu0 %v11807_v25  ;;  %v4691_v25 = vld [vmem:[#allocation3 + $0x141] sm:$0xff] }
 0x5fa   :  { %10461 = vmatpush3.bf16.msra.mxu1 %v11808_v54  ;;  %10398 = vmatprep.subr.bf16.mxu0 %v11809_v42  ;;  %v13794_v54 = vpack.c.bf16 %v4689_v3, %v4688_v24  ;;  %v11853_v3 = vld [vmem:[#allocation10 + $0x378] sm:$0xff]  }
 0x5fb   :  { %10462 = vmatprep.subr.bf16.mxu1 %v11810_v27  ;;  %7553 = vmatmul.mubr.bf16.gmra.mrb[188].mxu0 %v13735_v4  ;;  %v13776_v4 = vpack.c.bf16 %v4679_v9, %v4678_v58  ;;  %v13780_v58 = vpack.c.bf16 %v4688_v24, %v4687_v8  ;;  %v13803_v27 = vpack.c.bf16 %v4691_v25, %v4690_v59  ;;  %v11851_v24 = vld [vmem:[#allocation10 + $0x330] sm:$0xff]   ;;  %v11854_v59 = vld [vmem:[#allocation10 + $0x3f8] sm:$0xff]  }
 0x5fc   :  { %7650 = vmatmul.mubr.bf16.gmra.mrb[172].mxu1 %v13767_v10  ;;  %7560 = vmatprep.mubr.bf16.mxu0 %v13759_v13 }
 0x5fd   :  { %7657 = vmatprep.mubr.bf16.mxu1 %v13770_v28  ;;  %10399 = vmatpush3.bf16.msra.mxu0 %v11811_v31  ;;  %v4879_v31 = vld [vmem:[#allocation3 + $0x2] sm:$0xff] }
 0x5fe   :  { %10463 = vmatpush3.bf16.msra.mxu1 %v11812_v14  ;;  %10400 = vmatprep.subr.bf16.mxu0 %v11813_v40  ;;  %v11826_v14 = vld [vmem:[#allocation10 + $0x300] sm:$0xff]  }
 0x5ff   :  { %10464 = vmatprep.subr.bf16.mxu1 %v11814_v22  ;;  %v11828_v40 = vld [vmem:[#allocation10 + $0x380] sm:$0xff]   ;;  %v11829_v22 = vld [vmem:[#allocation10 + $0x348] sm:$0xff]  }
 0x601   :  { %10401 = vmatpush3.bf16.msra.mxu0 %v11815_v7  ;;  %v11834_v7 = vld [vmem:[#allocation10 + $0x3d0] sm:$0xff]  }
 0x602   :  { %10465 = vmatpush3.bf16.msra.mxu1 %v11816_v39  ;;  %10402 = vmatprep.subr.bf16.mxu0 %v11817_v11  ;;  %v11835_v39 = vld [vmem:[#allocation10 + $0x310] sm:$0xff]  }
 0x603   :  { %10466 = vmatprep.subr.bf16.mxu1 %v11818_v20  ;;  %7561 = vmatmul.mubr.bf16.gmra.mrb[192].mxu0 %v13705_v53  ;;  %v11836_v11 = vld [vmem:[#allocation10 + $0x390] sm:$0xff]   ;;  %v11838_v20 = vld [vmem:[#allocation10 + $0x3d8] sm:$0xff]  }
 0x604   :  { %7658 = vmatmul.mubr.bf16.gmra.mrb[176].mxu1 %v13776_v4  ;;  %7568 = vmatprep.mubr.bf16.mxu0 %v4739_v18  ;;  %v11842_v18 = vld [vmem:[#allocation10 + $0x3e0] sm:$0xff]  }
 0x605   :  { %7665 = vmatprep.mubr.bf16.mxu1 %v4740_v45  ;;  %10403 = vmatpush3.bf16.msra.mxu0 %v11819_v47  ;;  %v4681_v47 = vld [vmem:[#allocation3 + $0xa1] sm:$0xff] }
 0x606   :  { %10467 = vmatpush3.bf16.msra.mxu1 %v11820_v16  ;;  %10404 = vmatprep.subr.bf16.mxu0 %v11821_v61  ;;  %v11846_v61 = vld [vmem:[#allocation10 + $0x3e8] sm:$0xff]   ;;  %v4834_v8 = vpack.c.bf16 %v4681_v47, %v13765_v56  ;;  %v11855_v56 = vld [vmem:[#allocation10 + $0x338] sm:$0xff]  }
 0x607   :  { %10468 = vmatprep.subr.bf16.mxu1 %v11822_v21  ;;  %v11847_v21 = vld [vmem:[#allocation10 + $0x328] sm:$0xff]  }
 0x609   :  { %10405 = vmatpush3.bf16.msra.mxu0 %v11823_v43  ;;  %v11848_v43 = vld [vmem:[#allocation10 + $0x3a8] sm:$0xff]  }
 0x60a   :  { %10469 = vmatpush3.bf16.msra.mxu1 %v11824_v50  ;;  %10518 = vmatprep.subr.bf16.mxu0 %v11825_v46  ;;  %v11849_v50 = vld [vmem:[#allocation10 + $0x370] sm:$0xff]  }
 0x60b   :  { %10582 = vmatprep.subr.bf16.mxu1 %v11827_v34  ;;  %7569 = vmatmul.mubr.bf16.gmra.mrb[196].mxu0 %v13741_v38  ;;  %v13792_v38 = vld [vmem:[#allocation3 + $0x151] sm:$0xff] }
 0x60c   :  { %7666 = vmatmul.mubr.bf16.gmra.mrb[180].mxu1 %v4771_v57  ;;  %7576 = vmatprep.mubr.bf16.mxu0 %v4740_v45  ;;  %v13797_v42 = vpack.c.bf16 %v13792_v38, %v4691_v25  ;;  %v11844_v45 = vld [vmem:[#allocation10 + $0x3a0] sm:$0xff]   ;;  %v11850_v46 = vld [vmem:[#allocation10 + $0x3f0] sm:$0xff]  }
 0x60d   :  { %7673 = vmatprep.mubr.bf16.mxu1 %v13780_v58  ;;  %v4892_v34 = vld [vmem:[#allocation3 + $0xd2] sm:$0xff]  ;;  %v4891_v25 = vld [vmem:[#allocation3 + $0xc2] sm:$0xff] }
 0x60e   :  { %v4979_v57 = vpack.c.bf16 %v13689_v62, %v4892_v34  ;;  %v4947_v62 = vpack.c.bf16 %v4892_v34, %v4891_v25  ;;  %v5099_v34 = vld [vmem:[#allocation3 + $0xc3] sm:$0xff] }
 0x613   :  { %7577 = vmatmul.mubr.bf16.gmra.mrb[200].mxu0 %v13744_v32  ;;  %v4880_v32 = vld [vmem:[#allocation3 + $0x12] sm:$0xff] }
 0x614   :  { %7674 = vmatmul.mubr.bf16.gmra.mrb[184].mxu1 %v13784_v19  ;;  %7584 = vmatprep.mubr.bf16.mxu0 %v13780_v58  ;;  %v4975_v9 = vpack.c.bf16 %v13681_v1, %v4880_v32  ;;  %v11831_v1 = vld [vmem:[#allocation10 + $0x308] sm:$0xff]  }
 0x615   :  { %7681 = vmatprep.mubr.bf16.mxu1 %v13786_v30 }
 0x61b   :  { %7585 = vmatmul.mubr.bf16.gmra.mrb[204].mxu0 %v13749_v5  ;;  %v4943_v5 = vpack.c.bf16 %v4880_v32, %v4879_v31  ;;  %v11856_v32 = vld [vmem:[#allocation10 + $0x3b8] sm:$0xff]   ;;  %v11859_v31 = vld [vmem:[#allocation10 + $0x4c0] sm:$0xff]  }
 0x61c   :  { %7682 = vmatmul.mubr.bf16.gmra.mrb[188].mxu1 %v13794_v54  ;;  %7592 = vmatprep.mubr.bf16.mxu0 %v13786_v30 }
 0x61d   :  { %7689 = vmatprep.mubr.bf16.mxu1 %v13797_v42 }
 0x623   :  { %7593 = vmatmul.mubr.bf16.gmra.mrb[208].mxu0 %v13705_v53  ;;  %v11832_v53 = vld [vmem:[#allocation10 + $0x388] sm:$0xff]  }
 0x624   :  { %7690 = vmatmul.mubr.bf16.gmra.mrb[192].mxu1 %v13803_v27  ;;  %7730 = vmatprep.mubr.bf16.mxu0 %v13753_v36  ;;  %v11833_v36 = vld [vmem:[#allocation10 + $0x350] sm:$0xff]  }
 0x625   :  { %7827 = vmatprep.mubr.bf16.mxu1 %v4975_v9  ;;  %v11857_v9 = vld [vmem:[#allocation10 + $0x440] sm:$0xff]  }
 0x62b   :  { %7731 = vmatmul.mubr.bf16.vlgmr.msra.gmra.mrb[212].mxu0 %v13757_v60  ;;  %v11837_v60 = vld [vmem:[#allocation10 + $0x358] sm:$0xff]  }
 0x62c   :  { %7828 = vmatmul.mubr.bf16.vlgmr.msra.gmra.mrb[196].mxu1 %v4943_v5  ;;  %7738 = vmatprep.mubr.bf16.mxu0 %v13759_v13  ;;  %v4682_v13 = vld [vmem:[#allocation3 + $0xb1] sm:$0xff]  ;;  %v4693_v5 = vld [vmem:[#allocation3 + $0x161] sm:$0xff] }
 0x62d   :  { %7835 = vmatprep.mubr.bf16.mxu1 %v13692_v29  ;;  %10519 = vmatpush3.bf16.msra.mxu0 %v11826_v14  ;;  %v4866_v16 = vpack.c.bf16 %v4682_v13, %v4681_v47  ;;  %v11869_v13 = vld [vmem:[#allocation10 + $0x458] sm:$0xff]   ;;  %v11873_v47 = vld [vmem:[#allocation10 + $0x460] sm:$0xff]  }
 0x62e   :  { %10583 = vmatpush3.bf16.msra.mxu1 %v11828_v40  ;;  %10520 = vmatprep.subr.bf16.mxu0 %v11829_v22  ;;  %v4838_v40 = vpack.c.bf16 %v4693_v5, %v13792_v38  ;;  %v11858_v22 = vld [vmem:[#allocation10 + $0x400] sm:$0xff]   ;;  %v11864_v38 = vld [vmem:[#allocation10 + $0x488] sm:$0xff]  }
 0x62f   :  { %10584 = vmatprep.subr.bf16.mxu1 %v11830_v49  ;;  %v11860_v49 = vld [vmem:[#allocation10 + $0x480] sm:$0xff]  }
 0x631   :  { %10521 = vmatpush3.bf16.msra.mxu0 %v11831_v1 }
 0x632   :  { %10585 = vmatpush3.bf16.msra.mxu1 %v11832_v53  ;;  %10522 = vmatprep.subr.bf16.mxu0 %v11833_v36  ;;  %v11861_v53 = vld [vmem:[#allocation10 + $0x448] sm:$0xff]  }
 0x633   :  { %10586 = vmatprep.subr.bf16.mxu1 %v11834_v7  ;;  %7739 = vmatmul.mubr.bf16.gmra.mrb[216].mxu0 %v13767_v10  ;;  %v11843_v10 = vld [vmem:[#allocation10 + $0x320] sm:$0xff]   ;;  %v11862_v36 = vld [vmem:[#allocation10 + $0x4c8] sm:$0xff]   ;;  %v11865_v7 = vld [vmem:[#allocation10 + $0x450] sm:$0xff]  }
 0x634   :  { %7836 = vmatmul.mubr.bf16.gmra.mrb[200].mxu1 %v13695_v63  ;;  %7746 = vmatprep.mubr.bf16.mxu0 %v13770_v28  ;;  %v11845_v28 = vld [vmem:[#allocation10 + $0x368] sm:$0xff]  }
 0x635   :  { %7843 = vmatprep.mubr.bf16.mxu1 %v13697_v26  ;;  %10523 = vmatpush3.bf16.msra.mxu0 %v11835_v39  ;;  %v11866_v39 = vld [vmem:[#allocation10 + $0x4d0] sm:$0xff]  }
 0x636   :  { %10587 = vmatpush3.bf16.msra.mxu1 %v11836_v11  ;;  %10524 = vmatprep.subr.bf16.mxu0 %v11837_v60  ;;  %v13851_v11 = vld [vmem:[#allocation3 + $0x43] sm:$0xff]  ;;  %v13853_v60 = vld [vmem:[#allocation3 + $0x53] sm:$0xff] }
 0x637   :  { %10588 = vmatprep.subr.bf16.mxu1 %v11838_v20  ;;  %v11868_v20 = vld [vmem:[#allocation10 + $0x490] sm:$0xff]  }
 0x639   :  { %10525 = vmatpush3.bf16.msra.mxu0 %v11839_v2  ;;  %v11870_v2 = vld [vmem:[#allocation10 + $0x4d8] sm:$0xff]  }
 0x63a   :  { %10589 = vmatpush3.bf16.msra.mxu1 %v11840_v6  ;;  %10526 = vmatprep.subr.bf16.mxu0 %v11841_v37  ;;  %v11871_v6 = vld [vmem:[#allocation10 + $0x418] sm:$0xff]  }
 0x63b   :  { %10590 = vmatprep.subr.bf16.mxu1 %v11842_v18  ;;  %7747 = vmatmul.mubr.bf16.gmra.mrb[220].mxu0 %v13776_v4  ;;  %v11852_v4 = vld [vmem:[#allocation10 + $0x3b0] sm:$0xff]   ;;  %v11872_v37 = vld [vmem:[#allocation10 + $0x498] sm:$0xff]  }
 0x63c   :  { %7844 = vmatmul.mubr.bf16.gmra.mrb[204].mxu1 %v13699_v52  ;;  %7754 = vmatprep.mubr.bf16.mxu0 %v4866_v16  ;;  %v4888_v18 = vld [vmem:[#allocation3 + $0x92] sm:$0xff]  ;;  %v11874_v16 = vld [vmem:[#allocation10 + $0x4e0] sm:$0xff]  }
 0x63d   :  { %7851 = vmatprep.mubr.bf16.mxu1 %v13708_v33  ;;  %10527 = vmatpush3.bf16.msra.mxu0 %v11843_v10  ;;  %v4889_v10 = vld [vmem:[#allocation3 + $0xa2] sm:$0xff] }
 0x63e   :  { %10591 = vmatpush3.bf16.msra.mxu1 %v11844_v45  ;;  %10528 = vmatprep.subr.bf16.mxu0 %v11845_v28  ;;  %v13863_v45 = vld [vmem:[#allocation3 + $0x63] sm:$0xff]  ;;  %v13865_v28 = vld [vmem:[#allocation3 + $0x73] sm:$0xff] }
 0x63f   :  { %10592 = vmatprep.subr.bf16.mxu1 %v11846_v61  ;;  %v11876_v61 = vld [vmem:[#allocation10 + $0x4a0] sm:$0xff]  }
 0x641   :  { %10529 = vmatpush3.bf16.msra.mxu0 %v11847_v21  ;;  %v5042_v21 = vpack.c.bf16 %v4889_v10, %v4888_v18 }
 0x642   :  { %10593 = vmatpush3.bf16.msra.mxu1 %v11848_v43  ;;  %10530 = vmatprep.subr.bf16.mxu0 %v11849_v50  ;;  %v13870_v43 = vpack.c.bf16 %v13865_v28, %v13863_v45  ;;  %v11877_v50 = vld [vmem:[#allocation10 + $0x468] sm:$0xff]  }
 0x643   :  { %10594 = vmatprep.subr.bf16.mxu1 %v11850_v46  ;;  %7755 = vmatmul.mubr.bf16.gmra.mrb[224].mxu0 %v4834_v8  ;;  %v11878_v46 = vld [vmem:[#allocation10 + $0x4e8] sm:$0xff]  }
 0x644   :  { %7852 = vmatmul.mubr.bf16.gmra.mrb[208].mxu1 %v13710_v35  ;;  %7762 = vmatprep.mubr.bf16.mxu0 %v13780_v58  ;;  %v4694_v58 = vld [vmem:[#allocation3 + $0x171] sm:$0xff]  ;;  %v11879_v8 = vld [vmem:[#allocation10 + $0x428] sm:$0xff]  }
 0x645   :  { %7859 = vmatprep.mubr.bf16.mxu1 %v4979_v57  ;;  %10531 = vmatpush3.bf16.msra.mxu0 %v11851_v24  ;;  %v4870_v14 = vpack.c.bf16 %v4694_v58, %v4693_v5  ;;  %v11880_v24 = vld [vmem:[#allocation10 + $0x4a8] sm:$0xff]  }
 0x646   :  { %10595 = vmatpush3.bf16.msra.mxu1 %v11852_v4  ;;  %10532 = vmatprep.subr.bf16.mxu0 %v11853_v3  ;;  %v11881_v3 = vld [vmem:[#allocation10 + $0x470] sm:$0xff]  }
 0x647   :  { %10596 = vmatprep.subr.bf16.mxu1 %v11854_v59  ;;  %v11882_v59 = vld [vmem:[#allocation10 + $0x4f0] sm:$0xff]  }
 0x649   :  { %10533 = vmatpush3.bf16.msra.mxu0 %v11855_v56 }
 0x64a   :  { %10597 = vmatpush3.bf16.msra.mxu1 %v11856_v32  ;;  %10646 = vmatprep.subr.bf16.mxu0 %v11857_v9  ;;  %v13879_v9 = vld [vmem:[#allocation3 + $0xd3] sm:$0xff] }
 0x64b   :  { %10710 = vmatprep.subr.bf16.mxu1 %v11859_v31  ;;  %7763 = vmatmul.mubr.bf16.gmra.mrb[228].mxu0 %v13784_v19  ;;  %v5087_v19 = vld [vmem:[#allocation3 + $0x3] sm:$0xff] }
 0x64c   :  { %7860 = vmatmul.mubr.bf16.gmra.mrb[212].mxu1 %v4947_v62  ;;  %7770 = vmatprep.mubr.bf16.mxu0 %v13786_v30  ;;  %v13833_v30 = vld [vmem:[#allocation3 + $0x13] sm:$0xff] }
 0x64d   :  { %7867 = vmatprep.mubr.bf16.mxu1 %v13712_v0 }
 0x653   :  { %7771 = vmatmul.mubr.bf16.gmra.mrb[232].mxu0 %v13794_v54  ;;  %v5151_v54 = vpack.c.bf16 %v13833_v30, %v5087_v19 }
 0x654   :  { %7868 = vmatmul.mubr.bf16.gmra.mrb[216].mxu1 %v13715_v12  ;;  %7778 = vmatprep.mubr.bf16.mxu0 %v13797_v42  ;;  %v13839_v42 = vld [vmem:[#allocation3 + $0x23] sm:$0xff] }
 0x655   :  { %7875 = vmatprep.mubr.bf16.mxu1 %v13717_v51 }
 0x65b   :  { %7779 = vmatmul.mubr.bf16.gmra.mrb[236].mxu0 %v13803_v27  ;;  %v13841_v27 = vld [vmem:[#allocation3 + $0x33] sm:$0xff] }
 0x65c   :  { %7876 = vmatmul.mubr.bf16.gmra.mrb[220].mxu1 %v13719_v41  ;;  %7786 = vmatprep.mubr.bf16.mxu0 %v4870_v14  ;;  %v13845_v1 = vpack.c.bf16 %v13841_v27, %v13839_v42  ;;  %v5155_v14 = vpack.c.bf16 %v13879_v9, %v5099_v34 }
 0x65d   :  { %7883 = vmatprep.mubr.bf16.mxu1 %v13721_v15 }
 0x663   :  { %7787 = vmatmul.mubr.bf16.gmra.mrb[240].mxu0 %v4838_v40  ;;  %v11883_v40 = vld [vmem:[#allocation10 + $0x430] sm:$0xff]  }
 0x664   :  { %7884 = vmatmul.mubr.bf16.gmra.mrb[224].mxu1 %v13724_v44  ;;  %7924 = vmatprep.mubr.bf16.mxu0 %v13692_v29  ;;  %v11863_v29 = vld [vmem:[#allocation10 + $0x408] sm:$0xff]  }
 0x665   :  { %8021 = vmatprep.mubr.bf16.mxu1 %v5151_v54 }
 0x66b   :  { %7925 = vmatmul.mubr.bf16.vlgmr.msra.gmra.mrb[244].mxu0 %v13695_v63  ;;  %v11867_v63 = vld [vmem:[#allocation10 + $0x410] sm:$0xff]  }
 0x66c   :  { %8022 = vmatmul.mubr.bf16.vlgmr.msra.gmra.mrb[228].mxu1 %v13699_v52  ;;  %7932 = vmatprep.mubr.bf16.mxu0 %v13697_v26  ;;  %v13857_v26 = vpack.c.bf16 %v13853_v60, %v13851_v11 }
 0x66d   :  { %8029 = vmatprep.mubr.bf16.mxu1 %v13845_v1  ;;  %10647 = vmatpush3.bf16.msra.mxu0 %v11858_v22  ;;  %v11884_v22 = vld [vmem:[#allocation10 + $0x4b0] sm:$0xff]  }
 0x66e   :  { %10711 = vmatpush3.bf16.msra.mxu1 %v11860_v49  ;;  %10648 = vmatprep.subr.bf16.mxu0 %v11861_v53 }
 0x66f   :  { %10712 = vmatprep.subr.bf16.mxu1 %v11862_v36 }
 0x671   :  { %10649 = vmatpush3.bf16.msra.mxu0 %v11863_v29  ;;  %v11885_v29 = vld [vmem:[#allocation10 + $0x478] sm:$0xff]  }
 0x672   :  { %10713 = vmatpush3.bf16.msra.mxu1 %v11864_v38  ;;  %10650 = vmatprep.subr.bf16.mxu0 %v11865_v7  ;;  %v11886_v38 = vld [vmem:[#allocation10 + $0x4f8] sm:$0xff]  }
 0x673   :  { %10714 = vmatprep.subr.bf16.mxu1 %v11866_v39  ;;  %7933 = vmatmul.mubr.bf16.gmra.mrb[248].mxu0 %v13699_v52  ;;  %v5010_v52 = vpack.c.bf16 %v4888_v18, %v13683_v48  ;;  %v4890_v48 = vld [vmem:[#allocation3 + $0xb2] sm:$0xff] }
 0x674   :  { %8030 = vmatmul.mubr.bf16.gmra.mrb[232].mxu1 %v13710_v35  ;;  %7940 = vmatprep.mubr.bf16.mxu0 %v13708_v33  ;;  %v11875_v33 = vld [vmem:[#allocation10 + $0x420] sm:$0xff]   ;;  %v5074_v32 = vpack.c.bf16 %v4890_v48, %v4889_v10  ;;  %v13891_v18 = vld [vmem:[#allocation3 + $0xf3] sm:$0xff] }
 0x675   :  { %8037 = vmatprep.mubr.bf16.mxu1 %v13857_v26  ;;  %10651 = vmatpush3.bf16.msra.mxu0 %v11867_v63  ;;  %v13887_v63 = vld [vmem:[#allocation3 + $0xe3] sm:$0xff] }
 0x676   :  { %10715 = vmatpush3.bf16.msra.mxu1 %v11868_v20  ;;  %10652 = vmatprep.subr.bf16.mxu0 %v11869_v13  ;;  %v11887_v20 = vld [vmem:[#allocation10 + $0x438] sm:$0xff]   ;;  %v13895_v48 = vpack.c.bf16 %v13891_v18, %v13887_v63 }
 0x677   :  { %10716 = vmatprep.subr.bf16.mxu1 %v11870_v2  ;;  %v11888_v13 = vld [vmem:[#allocation10 + $0x4b8] sm:$0xff]  }
 0x679   :  { %10653 = vmatpush3.bf16.msra.mxu0 %v11871_v6 }
 0x67a   :  { %10717 = vmatpush3.bf16.msra.mxu1 %v11872_v37  ;;  %10654 = vmatprep.subr.bf16.mxu0 %v11873_v47  ;;  %v11889_v47 = vld [vmem:[#allocation10 + $0x540] sm:$0xff]  }
 0x67b   :  { %10718 = vmatprep.subr.bf16.mxu1 %v11874_v16  ;;  %7941 = vmatmul.mubr.bf16.gmra.mrb[252].mxu0 %v13710_v35  ;;  %v13877_v35 = vld [vmem:[%s14561_s9] ss:$0 sm:$0xff] }
 0x67c   :  { %8038 = vmatmul.mubr.bf16.gmra.mrb[236].mxu1 %v5010_v52  ;;  %7948 = vmatprep.mubr.bf16.mxu0 %v5042_v21  ;;  %v11891_v16 = vld [vmem:[#allocation10 + $0x5c0] sm:$0xff]  }
 0x67d   :  { %8045 = vmatprep.mubr.bf16.mxu1 %v13870_v43  ;;  %10655 = vmatpush3.bf16.msra.mxu0 %v11875_v33 }
 0x67e   :  { %10719 = vmatpush3.bf16.msra.mxu1 %v11876_v61  ;;  %v10150_v4 = vpop.f32.mrb[148].mxu0  ;;  %10656 = vmatprep.subr.bf16.mxu0 %v11877_v50 }
 0x67f   :  { %v10214_v57 = vpop.f32.mrb[132].mxu1  ;;  %10720 = vmatprep.subr.bf16.mxu1 %v11878_v46  ;;  %v10151_v25 = vpop.f32.mrb[149].mxu0 }
 0x680   :  { %v10215_v56 = vpop.f32.mrb[133].mxu1  ;;  %v10152_v31 = vadd.f32 %v10151_v25, %v10150_v4  ;;  %v10153_v58 = vpop.f32.mrb[150].mxu0 }
 0x681   :  { %v10216_v62 = vadd.f32 %v10215_v56, %v10214_v57  ;;  %v10217_v5 = vpop.f32.mrb[134].mxu1  ;;  %v10154_v19 = vpop.f32.mrb[151].mxu0  ;;  %10657 = vmatpush3.bf16.msra.mxu0 %v11879_v8 }
 0x682   :  { %v10218_v54 = vpop.f32.mrb[135].mxu1  ;;  %10721 = vmatpush3.bf16.msra.mxu1 %v11880_v24  ;;  %v7345_v49 = vadd.f32 %v10152_v31, %v13877_v35  ;;  %v10155_v53 = vadd.f32 %v10154_v19, %v10153_v58  ;;  %10658 = vmatprep.subr.bf16.mxu0 %v11881_v3  ;;  %v13907_v31 = vld [vmem:[#allocation3 + $0x103] sm:$0xff] }
 0x683   :  { %v10219_v36 = vadd.f32 %v10218_v54, %v10217_v5  ;;  %10722 = vmatprep.subr.bf16.mxu1 %v11882_v59  ;;  %7949 = vmatmul.mubr.bf16.gmra.mrb[0].mxu0 %v5010_v52 }
 0x684   :  { %8046 = vmatmul.mubr.bf16.gmra.mrb[240].mxu1 %v5074_v32  ;;  %v13883_v7 = vadd.f32 %v10216_v62, %v7345_v49  ;;  %v7348_v39 = vadd.f32 %v10155_v53, %v13877_v35  ;;  %7956 = vmatprep.mubr.bf16.mxu0 %v13712_v0  ;;  %v13909_v62 = vld [vmem:[#allocation3 + $0x113] sm:$0xff] }
 0x685   :  { %8053 = vmatprep.mubr.bf16.mxu1 %v5155_v14  ;;  %10659 = vmatpush3.bf16.msra.mxu0 %v11883_v40  ;;  %v13914_v49 = vpack.c.bf16 %v13909_v62, %v13907_v31 }
 0x686   :  { %10723 = vmatpush3.bf16.msra.mxu1 %v11884_v22  ;;  %v13889_v2 = vadd.f32 %v10219_v36, %v7348_v39  ;;  %v10156_v6 = vpop.f32.mrb[152].mxu0  ;;  %10660 = vmatprep.subr.bf16.mxu0 %v11885_v29 }
 0x687   :  { %v10220_v37 = vpop.f32.mrb[136].mxu1  ;;  %10724 = vmatprep.subr.bf16.mxu1 %v11886_v38  ;;  %v10157_v10 = vpop.f32.mrb[153].mxu0 }
 0x688   :  { %v10221_v52 = vpop.f32.mrb[137].mxu1  ;;  %v10158_v0 = vadd.f32 %v10157_v10, %v10156_v6  ;;  %v10159_v61 = vpop.f32.mrb[154].mxu0 }
 0x689   :  { %v10222_v33 = vadd.f32 %v10221_v52, %v10220_v37  ;;  %v10223_v21 = vpop.f32.mrb[138].mxu1  ;;  %v10160_v50 = vpop.f32.mrb[155].mxu0  ;;  %10661 = vmatpush3.bf16.msra.mxu0 %v11887_v20  ;;  %v4900_v20 = vld [vmem:[#allocation3 + $0x152] sm:$0xff] }
 0x68a   :  { %v10224_v46 = vpop.f32.mrb[139].mxu1  ;;  %10725 = vmatpush3.bf16.msra.mxu1 %v11888_v13  ;;  %v7353_v34 = vadd.f32 %v10158_v0, %v13877_v35  ;;  %v10161_v8 = vadd.f32 %v10160_v50, %v10159_v61  ;;  %10774 = vmatprep.subr.bf16.mxu0 %v11889_v47  ;;  %v4901_v13 = vld [vmem:[#allocation3 + $0x162] sm:$0xff] }
 0x68b   :  { %v10225_v24 = vadd.f32 %v10224_v46, %v10223_v21  ;;  %10838 = vmatprep.subr.bf16.mxu1 %v11891_v16  ;;  %7957 = vmatmul.mubr.bf16.gmra.mrb[4].mxu0 %v13715_v12  ;;  %v13925_v47 = vld [vmem:[#allocation3 + $0x123] sm:$0xff]  ;;  %v5046_v50 = vpack.c.bf16 %v4901_v13, %v4900_v20 }
 0x68c   :  { %8054 = vmatmul.mubr.bf16.gmra.mrb[244].mxu1 %v13719_v41  ;;  %v13900_v4 = vadd.f32 %v10222_v33, %v7353_v34  ;;  %v7356_v57 = vadd.f32 %v10161_v8, %v13877_v35  ;;  %7964 = vmatprep.mubr.bf16.mxu0 %v13717_v51  ;;  %v11944_v61 = vld [vmem:[#allocation3 + $0x142] sm:$0xff] }
 0x68d   :  { %8061 = vmatprep.mubr.bf16.mxu1 %v13895_v48  ;;  %v5014_v21 = vpack.c.bf16 %v4900_v20, %v11944_v61 }
 0x68e   :  { %v13905_v3 = vadd.f32 %v10225_v24, %v7356_v57  ;;  %v10162_v59 = vpop.f32.mrb[156].mxu0 }
 0x68f   :  { %v10226_v25 = vpop.f32.mrb[140].mxu1  ;;  %v10163_v56 = vpop.f32.mrb[157].mxu0 }
 0x690   :  { %v10227_v32 = vpop.f32.mrb[141].mxu1  ;;  %v10164_v12 = vadd.f32 %v10163_v56, %v10162_v59  ;;  %v10165_v5 = vpop.f32.mrb[158].mxu0 }
 0x691   :  { %v10228_v58 = vadd.f32 %v10227_v32, %v10226_v25  ;;  %v10229_v14 = vpop.f32.mrb[142].mxu1  ;;  %v10166_v19 = vpop.f32.mrb[159].mxu0  ;;  %v4902_v25 = vld [vmem:[#allocation3 + $0x172] sm:$0xff] }
 0x692   :  { %v10230_v54 = vpop.f32.mrb[143].mxu1  ;;  %v7361_v51 = vadd.f32 %v10164_v12, %v13877_v35  ;;  %v10167_v40 = vadd.f32 %v10166_v19, %v10165_v5 }
 0x693   :  { %v10231_v22 = vadd.f32 %v10230_v54, %v10229_v14  ;;  %7965 = vmatmul.mubr.bf16.gmra.mrb[8].mxu0 %v13719_v41  ;;  %v13927_v41 = vld [vmem:[#allocation3 + $0x133] sm:$0xff] }
 0x694   :  { %8062 = vmatmul.mubr.bf16.gmra.mrb[248].mxu1 %v13724_v44  ;;  %v13918_v53 = vadd.f32 %v10228_v58, %v7361_v51  ;;  %v7364_v36 = vadd.f32 %v10167_v40, %v13877_v35  ;;  %7972 = vmatprep.mubr.bf16.mxu0 %v13721_v15  ;;  %v13932_v24 = vpack.c.bf16 %v13927_v41, %v13925_v47 }
 0x695   :  { %8069 = vmatprep.mubr.bf16.mxu1 %v13914_v49  ;;  %v5078_v58 = vpack.c.bf16 %v4902_v25, %v4901_v13 }
 0x696   :  { %v13923_v29 = vadd.f32 %v10231_v22, %v7364_v36  ;;  %v10168_v38 = vpop.f32.mrb[160].mxu0 }
 0x697   :  { %v10232_v39 = vpop.f32.mrb[144].mxu1  ;;  %v10169_v6 = vpop.f32.mrb[161].mxu0 }
 0x698   :  { %v10233_v37 = vpop.f32.mrb[145].mxu1  ;;  %v10170_v16 = vadd.f32 %v10169_v6, %v10168_v38  ;;  %v10171_v52 = vpop.f32.mrb[162].mxu0 }
 0x699   :  { %v10234_v10 = vadd.f32 %v10233_v37, %v10232_v39  ;;  %v10235_v0 = vpop.f32.mrb[146].mxu1  ;;  %v10172_v33 = vpop.f32.mrb[163].mxu0 }
 0x69a   :  { %v10236_v15 = vpop.f32.mrb[147].mxu1  ;;  %v7369_v46 = vadd.f32 %v10170_v16, %v13877_v35  ;;  %v10173_v34 = vadd.f32 %v10172_v33, %v10171_v52 }
 0x69b   :  { %v10237_v8 = vadd.f32 %v10236_v15, %v10235_v0  ;;  %7973 = vmatmul.mubr.bf16.gmra.mrb[12].mxu0 %v13724_v44 }
 0x69c   :  { %8070 = vmatmul.mubr.bf16.gmra.mrb[252].mxu1 %v5014_v21  ;;  %v13935_v57 = vadd.f32 %v10234_v10, %v7369_v46  ;;  %v7372_v59 = vadd.f32 %v10173_v34, %v13877_v35  ;;  %7980 = vmatprep.mubr.bf16.mxu0 %v5046_v50  ;;  %v5184_v50 = vpack.c.bf16 %v13851_v11, %v13841_v27  ;;  %v11890_v34 = vld [vmem:[#allocation10 + $0x500] sm:$0xff]   ;;  %v11896_v27 = vld [vmem:[#allocation10 + $0x588] sm:$0xff]  }
 0x69d   :  { %8077 = vmatprep.mubr.bf16.mxu1 %v13932_v24 }
 0x69e   :  { %v13939_v56 = vadd.f32 %v10237_v8, %v7372_v59  ;;  %v10174_v32 = vpop.f32.mrb[164].mxu0  ;;  %v11892_v8 = vld [vmem:[#allocation10 + $0x580] sm:$0xff]  }
 0x69f   :  { %v10238_v12 = vpop.f32.mrb[148].mxu1  ;;  %v10175_v5 = vpop.f32.mrb[165].mxu0 }
 0x6a0   :  { %v10239_v14 = vpop.f32.mrb[149].mxu1  ;;  %v10176_v19 = vadd.f32 %v10175_v5, %v10174_v32  ;;  %v10177_v51 = vpop.f32.mrb[166].mxu0 }
 0x6a1   :  { %v10240_v54 = vadd.f32 %v10239_v14, %v10238_v12  ;;  %v10241_v44 = vpop.f32.mrb[150].mxu1  ;;  %v10178_v40 = vpop.f32.mrb[167].mxu0  ;;  %v11893_v12 = vld [vmem:[#allocation10 + $0x548] sm:$0xff]  }
 0x6a2   :  { %v10242_v22 = vpop.f32.mrb[151].mxu1  ;;  %v7377_v36 = vadd.f32 %v10176_v19, %v13877_v35  ;;  %v10179_v38 = vadd.f32 %v10178_v40, %v10177_v51  ;;  %v13961_v51 = vld [vmem:[#allocation3 + $0x93] sm:$0xff] }
 0x6a3   :  { %v10243_v39 = vadd.f32 %v10242_v22, %v10241_v44  ;;  %7981 = vmatmul.mubr.bf16.gmra.mrb[16].mxu0 %v5014_v21  ;;  %v5183_v21 = vpack.c.bf16 %v13839_v42, %v13833_v30  ;;  %v5095_v30 = vld [vmem:[#allocation3 + $0x83] sm:$0xff]  ;;  %v11897_v44 = vld [vmem:[#allocation10 + $0x550] sm:$0xff]  }
 0x6a4   :  { %8078 = vmatmul.mubr.bf16.gmra.mrb[0].mxu1 %v5078_v58  ;;  %v13942_v20 = vadd.f32 %v10240_v54, %v7377_v36  ;;  %v7380_v6 = vadd.f32 %v10179_v38, %v13877_v35  ;;  %8118 = vmatprep.mubr.bf16.mxu0 %v13845_v1  ;;  %v11894_v58 = vld [vmem:[#allocation10 + $0x5c8] sm:$0xff]   ;;  %v11898_v40 = vld [vmem:[#allocation10 + $0x5d0] sm:$0xff]  }
 0x6a5   :  { %8215 = vmatprep.mubr.bf16.mxu1 %v13857_v26  ;;  %v11895_v42 = vld [vmem:[#allocation10 + $0x508] sm:$0xff]  }
 0x6a6   :  { %v13947_v13 = vadd.f32 %v10243_v39, %v7380_v6  ;;  %v10180_v37 = vpop.f32.mrb[168].mxu0 }
 0x6a7   :  { %v10244_v16 = vpop.f32.mrb[152].mxu1  ;;  %v10181_v10 = vpop.f32.mrb[169].mxu0 }
 0x6a8   :  { %v10245_v52 = vpop.f32.mrb[153].mxu1  ;;  %v10182_v0 = vadd.f32 %v10181_v10, %v10180_v37  ;;  %v10183_v15 = vpop.f32.mrb[170].mxu0  ;;  %v5185_v37 = vpack.c.bf16 %v13863_v45, %v13853_v60  ;;  %v5098_v45 = vld [vmem:[#allocation3 + $0xb3] sm:$0xff] }
 0x6a9   :  { %v10246_v33 = vadd.f32 %v10245_v52, %v10244_v16  ;;  %v10247_v61 = vpop.f32.mrb[154].mxu1  ;;  %v10184_v46 = vpop.f32.mrb[171].mxu0  ;;  %v5218_v52 = vpack.c.bf16 %v13961_v51, %v5095_v30 }
 0x6aa   :  { %v10248_v1 = vpop.f32.mrb[155].mxu1  ;;  %v7385_v59 = vadd.f32 %v10182_v0, %v13877_v35  ;;  %v10185_v25 = vadd.f32 %v10184_v46, %v10183_v15  ;;  %v11899_v0 = vld [vmem:[#allocation10 + $0x510] sm:$0xff]   ;;  %v11901_v46 = vld [vmem:[#allocation10 + $0x558] sm:$0xff]  }
 0x6ab   :  { %v10249_v32 = vadd.f32 %v10248_v1, %v10247_v61  ;;  %8119 = vmatmul.mubr.bf16.vlgmr.msra.gmra.mrb[20].mxu0 %v5183_v21  ;;  %v11902_v1 = vld [vmem:[#allocation10 + $0x5d8] sm:$0xff]  }
 0x6ac   :  { %8216 = vmatmul.mubr.bf16.vlgmr.msra.gmra.mrb[4].mxu1 %v5184_v50  ;;  %v13954_v5 = vadd.f32 %v10246_v33, %v7385_v59  ;;  %v7388_v14 = vadd.f32 %v10185_v25, %v13877_v35  ;;  %8126 = vmatprep.mubr.bf16.mxu0 %v13857_v26  ;;  %v11900_v33 = vld [vmem:[#allocation10 + $0x590] sm:$0xff]   ;;  %v11904_v59 = vld [vmem:[#allocation10 + $0x598] sm:$0xff]  }
 0x6ad   :  { %8223 = vmatprep.mubr.bf16.mxu1 %v13870_v43  ;;  %10775 = vmatpush3.bf16.msra.mxu0 %v11890_v34 }
 0x6ae   :  { %10839 = vmatpush3.bf16.msra.mxu1 %v11892_v8  ;;  %v13959_v11 = vadd.f32 %v10249_v32, %v7388_v14  ;;  %v10186_v19 = vpop.f32.mrb[172].mxu0  ;;  %10776 = vmatprep.subr.bf16.mxu0 %v11893_v12  ;;  %v11903_v8 = vld [vmem:[#allocation10 + $0x518] sm:$0xff]  }
 0x6af   :  { %v10250_v54 = vpop.f32.mrb[156].mxu1  ;;  %10840 = vmatprep.subr.bf16.mxu1 %v11894_v58  ;;  %v10187_v22 = vpop.f32.mrb[173].mxu0  ;;  %v11906_v58 = vld [vmem:[#allocation10 + $0x5e0] sm:$0xff]  }
 0x6b0   :  { %v10251_v36 = vpop.f32.mrb[157].mxu1  ;;  %v10188_v26 = vadd.f32 %v10187_v22, %v10186_v19  ;;  %v10189_v39 = vpop.f32.mrb[174].mxu0  ;;  %v5186_v22 = vpack.c.bf16 %v5095_v30, %v13865_v28  ;;  %v11911_v30 = vld [vmem:[#allocation10 + $0x528] sm:$0xff]  }
 0x6b1   :  { %v10252_v38 = vadd.f32 %v10251_v36, %v10250_v54  ;;  %v10253_v6 = vpop.f32.mrb[158].mxu1  ;;  %v10190_v16 = vpop.f32.mrb[175].mxu0  ;;  %10777 = vmatpush3.bf16.msra.mxu0 %v11895_v42 }
 0x6b2   :  { %v10254_v10 = vpop.f32.mrb[159].mxu1  ;;  %10841 = vmatpush3.bf16.msra.mxu1 %v11896_v27  ;;  %v7393_v15 = vadd.f32 %v10188_v26, %v13877_v35  ;;  %v10191_v61 = vadd.f32 %v10190_v16, %v10189_v39  ;;  %10778 = vmatprep.subr.bf16.mxu0 %v11897_v44  ;;  %v5097_v27 = vld [vmem:[#allocation3 + $0xa3] sm:$0xff] }
 0x6b3   :  { %v10255_v21 = vadd.f32 %v10254_v10, %v10253_v6  ;;  %10842 = vmatprep.subr.bf16.mxu1 %v11898_v40  ;;  %8127 = vmatmul.mubr.bf16.gmra.mrb[24].mxu0 %v5184_v50  ;;  %v11905_v50 = vld [vmem:[#allocation10 + $0x560] sm:$0xff]   ;;  %v5282_v40 = vpack.c.bf16 %v5098_v45, %v5097_v27  ;;  %v11914_v45 = vld [vmem:[#allocation10 + $0x5f0] sm:$0xff]  }
 0x6b4   :  { %8224 = vmatmul.mubr.bf16.gmra.mrb[8].mxu1 %v5185_v37  ;;  %v13967_v34 = vadd.f32 %v10252_v38, %v7393_v15  ;;  %v7396_v60 = vadd.f32 %v10191_v61, %v13877_v35  ;;  %8134 = vmatprep.mubr.bf16.mxu0 %v13870_v43  ;;  %v11907_v38 = vld [vmem:[#allocation10 + $0x520] sm:$0xff]   ;;  %v11912_v61 = vld [vmem:[#allocation10 + $0x5a8] sm:$0xff]  }
 0x6b5   :  { %8231 = vmatprep.mubr.bf16.mxu1 %v5218_v52  ;;  %10779 = vmatpush3.bf16.msra.mxu0 %v11899_v0  ;;  %v11908_v39 = vld [vmem:[#allocation10 + $0x5a0] sm:$0xff]   ;;  %v11909_v0 = vld [vmem:[#allocation10 + $0x568] sm:$0xff]  }
 0x6b6   :  { %10843 = vmatpush3.bf16.msra.mxu1 %v11900_v33  ;;  %v13971_v25 = vadd.f32 %v10255_v21, %v7396_v60  ;;  %v10192_v32 = vpop.f32.mrb[176].mxu0  ;;  %10780 = vmatprep.subr.bf16.mxu0 %v11901_v46  ;;  %v11910_v33 = vld [vmem:[#allocation10 + $0x5e8] sm:$0xff]   ;;  %v11913_v60 = vld [vmem:[#allocation10 + $0x570] sm:$0xff]  }
 0x6b7   :  { %v10256_v12 = vpop.f32.mrb[160].mxu1  ;;  %10844 = vmatprep.subr.bf16.mxu1 %v11902_v1  ;;  %v10193_v14 = vpop.f32.mrb[177].mxu0 }
 0x6b8   :  { %v10257_v42 = vpop.f32.mrb[161].mxu1  ;;  %v10194_v19 = vadd.f32 %v10193_v14, %v10192_v32  ;;  %v10195_v43 = vpop.f32.mrb[178].mxu0  ;;  %v11915_v14 = vld [vmem:[#allocation10 + $0x530] sm:$0xff]  }
 0x6b9   :  { %v10258_v54 = vadd.f32 %v10257_v42, %v10256_v12  ;;  %v10259_v44 = vpop.f32.mrb[162].mxu1  ;;  %v10196_v36 = vpop.f32.mrb[179].mxu0  ;;  %10781 = vmatpush3.bf16.msra.mxu0 %v11903_v8  ;;  %v11916_v42 = vld [vmem:[#allocation10 + $0x5b0] sm:$0xff]  }
 0x6ba   :  { %v10260_v26 = vpop.f32.mrb[163].mxu1  ;;  %10845 = vmatpush3.bf16.msra.mxu1 %v11904_v59  ;;  %v7401_v6 = vadd.f32 %v10194_v19, %v13877_v35  ;;  %v10197_v16 = vadd.f32 %v10196_v36, %v10195_v43  ;;  %10782 = vmatprep.subr.bf16.mxu0 %v11905_v50 }
 0x6bb   :  { %v10261_v10 = vadd.f32 %v10260_v26, %v10259_v44  ;;  %10846 = vmatprep.subr.bf16.mxu1 %v11906_v58  ;;  %8135 = vmatmul.mubr.bf16.gmra.mrb[28].mxu0 %v5185_v37  ;;  %v5250_v58 = vpack.c.bf16 %v5097_v27, %v13961_v51  ;;  %v11917_v44 = vld [vmem:[#allocation10 + $0x578] sm:$0xff]  }
 0x6bc   :  { %8232 = vmatmul.mubr.bf16.gmra.mrb[12].mxu1 %v5186_v22  ;;  %v13975_v15 = vadd.f32 %v10258_v54, %v7401_v6  ;;  %v7404_v28 = vadd.f32 %v10197_v16, %v13877_v35  ;;  %8142 = vmatprep.mubr.bf16.mxu0 %v5218_v52  ;;  %v11919_v51 = vld [vmem:[#allocation10 + $0x538] sm:$0xff]  }
 0x6bd   :  { %8239 = vmatprep.mubr.bf16.mxu1 %v5282_v40  ;;  %10783 = vmatpush3.bf16.msra.mxu0 %v11907_v38  ;;  %v11918_v40 = vld [vmem:[#allocation10 + $0x5f8] sm:$0xff]  }
 0x6be   :  { %10847 = vmatpush3.bf16.msra.mxu1 %v11908_v39  ;;  %v13978_v21 = vadd.f32 %v10261_v10, %v7404_v28  ;;  %v10278_v46 = vpop.f32.mrb[180].mxu0  ;;  %10784 = vmatprep.subr.bf16.mxu0 %v11909_v0  ;;  %v5188_v28 = vpack.c.bf16 %v13907_v31, %v13891_v18 }
 0x6bf   :  { %v10342_v1 = vpop.f32.mrb[164].mxu1  ;;  %10848 = vmatprep.subr.bf16.mxu1 %v11910_v33  ;;  %v10279_v37 = vpop.f32.mrb[181].mxu0  ;;  %v5187_v33 = vpack.c.bf16 %v13887_v63, %v13879_v9 }
 0x6c0   :  { %v10343_v8 = vpop.f32.mrb[165].mxu1  ;;  %v10280_v59 = vadd.f32 %v10279_v37, %v10278_v46  ;;  %v10281_v12 = vpop.f32.mrb[182].mxu0 }
 0x6c1   :  { %v10344_v32 = vadd.f32 %v10343_v8, %v10342_v1  ;;  %v10345_v35 = vpop.f32.mrb[166].mxu1  ;;  %v10282_v52 = vpop.f32.mrb[183].mxu0  ;;  %10785 = vmatpush3.bf16.msra.mxu0 %v11911_v30  ;;  %v5107_v8 = vld [vmem:[#allocation3 + $0x143] sm:$0xff] }
 0x6c2   :  { %v10346_v50 = vpop.f32.mrb[167].mxu1  ;;  %10849 = vmatpush3.bf16.msra.mxu1 %v11912_v61  ;;  %v7539_v19 = vadd.f32 %v10280_v59, %v13883_v7  ;;  %v10283_v54 = vadd.f32 %v10282_v52, %v10281_v12  ;;  %10786 = vmatprep.subr.bf16.mxu0 %v11913_v60  ;;  %v11920_v7 = vld [vmem:[#allocation10 + $0x5b8] sm:$0xff]  }
 0x6c3   :  { %v10347_v43 = vadd.f32 %v10346_v50, %v10345_v35  ;;  %10850 = vmatprep.subr.bf16.mxu1 %v11914_v45  ;;  %8143 = vmatmul.mubr.bf16.gmra.mrb[32].mxu0 %v5186_v22  ;;  %v13989_v22 = vld [vmem:[#allocation10 + $0x600] sm:$0xff]   ;;  %v14005_v59 = vld [vmem:[#allocation3 + $0x153] sm:$0xff] }
 0x6c4   :  { %8240 = vmatmul.mubr.bf16.gmra.mrb[16].mxu1 %v5250_v58  ;;  %v13982_v36 = vadd.f32 %v10344_v32, %v7539_v19  ;;  %v7542_v26 = vadd.f32 %v10283_v54, %v13889_v2  ;;  %8150 = vmatprep.mubr.bf16.mxu0 %v13895_v48  ;;  %v5222_v19 = vpack.c.bf16 %v14005_v59, %v5107_v8 }
 0x6c5   :  { %8247 = vmatprep.mubr.bf16.mxu1 %v13914_v49  ;;  %10787 = vmatpush3.bf16.msra.mxu0 %v11915_v14 }
 0x6c6   :  { %10851 = vmatpush3.bf16.msra.mxu1 %v11916_v42  ;;  %v13987_v27 = vadd.f32 %v10347_v43, %v7542_v26  ;;  %v10284_v38 = vpop.f32.mrb[184].mxu0  ;;  %10788 = vmatprep.subr.bf16.mxu0 %v11917_v44  ;;  %v5110_v44 = vld [vmem:[#allocation3 + $0x173] sm:$0xff] }
 0x6c7   :  { %v10348_v39 = vpop.f32.mrb[168].mxu1  ;;  %10852 = vmatprep.subr.bf16.mxu1 %v11918_v40  ;;  %v10285_v6 = vpop.f32.mrb[185].mxu0 }
 0x6c8   :  { %v10349_v16 = vpop.f32.mrb[169].mxu1  ;;  %v10286_v10 = vadd.f32 %v10285_v6, %v10284_v38  ;;  %v10287_v0 = vpop.f32.mrb[186].mxu0 }
 0x6c9   :  { %v10350_v2 = vadd.f32 %v10349_v16, %v10348_v39  ;;  %v10351_v48 = vpop.f32.mrb[170].mxu1  ;;  %v10288_v30 = vpop.f32.mrb[187].mxu0  ;;  %10789 = vmatpush3.bf16.msra.mxu0 %v11919_v51  ;;  %v5109_v51 = vld [vmem:[#allocation3 + $0x163] sm:$0xff] }
 0x6ca   :  { %v10352_v61 = vpop.f32.mrb[171].mxu1  ;;  %10853 = vmatpush3.bf16.msra.mxu1 %v11920_v7  ;;  %v7547_v46 = vadd.f32 %v10286_v10, %v13900_v4  ;;  %v10289_v1 = vadd.f32 %v10288_v30, %v10287_v0  ;;  %11174 = vmatprep.subr.bf16.mxu0 %v13989_v22  ;;  %v5286_v16 = vpack.c.bf16 %v5110_v44, %v5109_v51 }
 0x6cb   :  { %v10353_v60 = vadd.f32 %v10352_v61, %v10351_v48  ;;  %11474 = vmatprep.subr.bf16.mxu1 %v12026_v23  ;;  %8151 = vmatmul.mubr.bf16.gmra.mrb[36].mxu0 %v5187_v33  ;;  %v5190_v10 = vpack.c.bf16 %v5107_v8, %v13927_v41  ;;  %v5297_v41 = vld [vmem:[#allocation3 + $0x24] sm:$0xff] }
 0x6cc   :  { %8248 = vmatmul.mubr.bf16.gmra.mrb[20].mxu1 %v5188_v28  ;;  %v13998_v45 = vadd.f32 %v10350_v2, %v7547_v46  ;;  %v7550_v9 = vadd.f32 %v10289_v1, %v13905_v3  ;;  %8158 = vmatprep.mubr.bf16.mxu0 %v13914_v49  ;;  %v5189_v3 = vpack.c.bf16 %v13925_v47, %v13909_v62  ;;  %v5296_v1 = vld [vmem:[#allocation3 + $0x14] sm:$0xff] }
 0x6cd   :  { %8255 = vmatprep.mubr.bf16.mxu1 %v13932_v24 }
 0x6ce   :  { %v14003_v63 = vadd.f32 %v10353_v60, %v7550_v9  ;;  %v10290_v18 = vpop.f32.mrb[188].mxu0 }
 0x6cf   :  { %v10354_v4 = vpop.f32.mrb[172].mxu1  ;;  %v10291_v31 = vpop.f32.mrb[189].mxu0 }
 0x6d0   :  { %v10355_v37 = vpop.f32.mrb[173].mxu1  ;;  %v10292_v32 = vadd.f32 %v10291_v31, %v10290_v18  ;;  %v10293_v35 = vpop.f32.mrb[190].mxu0  ;;  %v5298_v18 = vld [vmem:[#allocation3 + $0x34] sm:$0xff] }
 0x6d1   :  { %v10356_v12 = vadd.f32 %v10355_v37, %v10354_v4  ;;  %v10357_v52 = vpop.f32.mrb[174].mxu1  ;;  %v10294_v50 = vpop.f32.mrb[191].mxu0 }
 0x6d2   :  { %v10358_v49 = vpop.f32.mrb[175].mxu1  ;;  %v7555_v58 = vadd.f32 %v10292_v32, %v13918_v53  ;;  %v10295_v14 = vadd.f32 %v10294_v50, %v10293_v35  ;;  %v5391_v35 = vpack.c.bf16 %v5297_v41, %v5296_v1 }
 0x6d3   :  { %v10359_v42 = vadd.f32 %v10358_v49, %v10357_v52  ;;  %8159 = vmatmul.mubr.bf16.gmra.mrb[40].mxu0 %v5188_v28 }
 0x6d4   :  { %8256 = vmatmul.mubr.bf16.gmra.mrb[24].mxu1 %v5189_v3  ;;  %v14011_v54 = vadd.f32 %v10356_v12, %v7555_v58  ;;  %v7558_v43 = vadd.f32 %v10295_v14, %v13923_v29  ;;  %8166 = vmatprep.mubr.bf16.mxu0 %v13932_v24 }
 0x6d5   :  { %8263 = vmatprep.mubr.bf16.mxu1 %v5222_v19 }
 0x6d6   :  { %v14015_v40 = vadd.f32 %v10359_v42, %v7558_v43  ;;  %v10296_v62 = vpop.f32.mrb[192].mxu0  ;;  %v5295_v42 = vld [vmem:[#allocation3 + $0x4] sm:$0xff] }
 0x6d7   :  { %v10360_v47 = vpop.f32.mrb[176].mxu1  ;;  %v10297_v26 = vpop.f32.mrb[193].mxu0 }
 0x6d8   :  { %v10361_v53 = vpop.f32.mrb[177].mxu1  ;;  %v10298_v7 = vadd.f32 %v10297_v26, %v10296_v62  ;;  %v10299_v39 = vpop.f32.mrb[194].mxu0  ;;  %v14031_v26 = vld [vmem:[#allocation3 + $0x64] sm:$0xff] }
 0x6d9   :  { %v10362_v38 = vadd.f32 %v10361_v53, %v10360_v47  ;;  %v10363_v6 = vpop.f32.mrb[178].mxu1  ;;  %v10300_v2 = vpop.f32.mrb[195].mxu0 }
 0x6da   :  { %v10364_v29 = vpop.f32.mrb[179].mxu1  ;;  %v7563_v24 = vadd.f32 %v10298_v7, %v13935_v57  ;;  %v10301_v0 = vadd.f32 %v10300_v2, %v10299_v39  ;;  %v5299_v57 = vld [vmem:[#allocation3 + $0x44] sm:$0xff]  ;;  %v5360_v39 = vpack.c.bf16 %v5298_v18, %v5297_v41 }
 0x6db   :  { %v10365_v48 = vadd.f32 %v10364_v29, %v10363_v6  ;;  %8167 = vmatmul.mubr.bf16.gmra.mrb[44].mxu0 %v5189_v3  ;;  %v5392_v49 = vpack.c.bf16 %v5299_v57, %v5298_v18 }
 0x6dc   :  { %8264 = vmatmul.mubr.bf16.gmra.mrb[28].mxu1 %v5190_v10  ;;  %v14019_v33 = vadd.f32 %v10362_v38, %v7563_v24  ;;  %v7566_v28 = vadd.f32 %v10301_v0, %v13939_v56  ;;  %8174 = vmatprep.mubr.bf16.mxu0 %v5222_v19  ;;  %v5254_v56 = vpack.c.bf16 %v5109_v51, %v14005_v59  ;;  %v11922_v24 = vld [vmem:[#allocation10 + $0x608] sm:$0xff]  }
 0x6dd   :  { %8271 = vmatprep.mubr.bf16.mxu1 %v5286_v16  ;;  %v5359_v59 = vpack.c.bf16 %v5296_v1, %v5295_v42 }
 0x6de   :  { %v14022_v30 = vadd.f32 %v10365_v48, %v7566_v28  ;;  %v10302_v61 = vpop.f32.mrb[196].mxu0 }
 0x6df   :  { %v10366_v46 = vpop.f32.mrb[180].mxu1  ;;  %v10303_v60 = vpop.f32.mrb[197].mxu0 }
 0x6e0   :  { %v10367_v9 = vpop.f32.mrb[181].mxu1  ;;  %v10304_v4 = vadd.f32 %v10303_v60, %v10302_v61  ;;  %v10305_v37 = vpop.f32.mrb[198].mxu0  ;;  %v5302_v60 = vld [vmem:[#allocation3 + $0x74] sm:$0xff] }
 0x6e1   :  { %v10368_v31 = vadd.f32 %v10367_v9, %v10366_v46  ;;  %v10369_v8 = vpop.f32.mrb[182].mxu1  ;;  %v10306_v32 = vpop.f32.mrb[199].mxu0  ;;  %v14041_v9 = vld [vmem:[#allocation3 + $0x84] sm:$0xff] }
 0x6e2   :  { %v10370_v12 = vpop.f32.mrb[183].mxu1  ;;  %v7571_v52 = vadd.f32 %v10304_v4, %v13942_v20  ;;  %v10307_v3 = vadd.f32 %v10306_v32, %v10305_v37  ;;  %v5300_v20 = vld [vmem:[#allocation3 + $0x54] sm:$0xff] }
 0x6e3   :  { %v10371_v50 = vadd.f32 %v10370_v12, %v10369_v8  ;;  %8175 = vmatmul.mubr.bf16.gmra.mrb[48].mxu0 %v5190_v10  ;;  %v5393_v29 = vpack.c.bf16 %v14031_v26, %v5300_v20 }
 0x6e4   :  { %8272 = vmatmul.mubr.bf16.gmra.mrb[32].mxu1 %v5254_v56  ;;  %v14026_v58 = vadd.f32 %v10368_v31, %v7571_v52  ;;  %v7574_v14 = vadd.f32 %v10307_v3, %v13947_v13  ;;  %8312 = vmatprep.mubr.bf16.mxu0 %v5391_v35  ;;  %v5394_v35 = vpack.c.bf16 %v14041_v9, %v5302_v60  ;;  %v11924_v52 = vld [vmem:[#allocation10 + $0x618] sm:$0xff]  }
 0x6e5   :  { %8409 = vmatprep.mubr.bf16.mxu1 %v5392_v49 }
 0x6e6   :  { %v14029_v19 = vadd.f32 %v10371_v50, %v7574_v14  ;;  %v10308_v43 = vpop.f32.mrb[200].mxu0  ;;  %v11925_v14 = vld [vmem:[#allocation10 + $0x620] sm:$0xff]  }
 0x6e7   :  { %v10372_v44 = vpop.f32.mrb[184].mxu1  ;;  %v10309_v62 = vpop.f32.mrb[201].mxu0 }
 0x6e8   :  { %v10373_v47 = vpop.f32.mrb[185].mxu1  ;;  %v10310_v53 = vadd.f32 %v10309_v62, %v10308_v43  ;;  %v10311_v7 = vpop.f32.mrb[202].mxu0 }
 0x6e9   :  { %v10374_v51 = vadd.f32 %v10373_v47, %v10372_v44  ;;  %v10375_v38 = vpop.f32.mrb[186].mxu1  ;;  %v10312_v6 = vpop.f32.mrb[203].mxu0  ;;  %v5304_v44 = vld [vmem:[#allocation3 + $0x94] sm:$0xff] }
 0x6ea   :  { %v10376_v13 = vpop.f32.mrb[187].mxu1  ;;  %v7579_v16 = vadd.f32 %v10310_v53, %v13954_v5  ;;  %v10313_v10 = vadd.f32 %v10312_v6, %v10311_v7  ;;  %v11923_v5 = vld [vmem:[#allocation10 + $0x610] sm:$0xff]  }
 0x6eb   :  { %v10377_v2 = vadd.f32 %v10376_v13, %v10375_v38  ;;  %8313 = vmatmul.mubr.bf16.vlgmr.msra.gmra.mrb[52].mxu0 %v5359_v59  ;;  %v14053_v59 = vld [vmem:[#allocation3 + $0xa4] sm:$0xff] }
 0x6ec   :  { %8410 = vmatmul.mubr.bf16.vlgmr.msra.gmra.mrb[36].mxu1 %v5360_v39  ;;  %v14035_v0 = vadd.f32 %v10374_v51, %v7579_v16  ;;  %v7582_v48 = vadd.f32 %v10313_v10, %v13959_v11  ;;  %8320 = vmatprep.mubr.bf16.mxu0 %v5392_v49  ;;  %v14043_v11 = vpack.c.bf16 %v5300_v20, %v5299_v57  ;;  %v11926_v16 = vld [vmem:[#allocation10 + $0x628] sm:$0xff]  }
 0x6ed   :  { %8417 = vmatprep.mubr.bf16.mxu1 %v5393_v29  ;;  %11175 = vmatpush3.bf16.msra.mxu0 %v13989_v22  ;;  %v5458_v13 = vpack.c.bf16 %v14053_v59, %v5304_v44 }
 0x6ee   :  { %v14039_v28 = vadd.f32 %v10377_v2, %v7582_v48  ;;  %v10314_v61 = vpop.f32.mrb[204].mxu0  ;;  %11176 = vmatprep.subr.bf16.mxu0 %v11922_v24  ;;  %v5309_v48 = vld [vmem:[#allocation3 + $0xe4] sm:$0xff] }
 0x6ef   :  { %v10378_v46 = vpop.f32.mrb[188].mxu1  ;;  %v10315_v1 = vpop.f32.mrb[205].mxu0 }
 0x6f0   :  { %v10379_v41 = vpop.f32.mrb[189].mxu1  ;;  %v10316_v18 = vadd.f32 %v10315_v1, %v10314_v61  ;;  %v10317_v31 = vpop.f32.mrb[206].mxu0  ;;  %v11927_v61 = vld [vmem:[#allocation10 + $0x630] sm:$0xff]  }
 0x6f1   :  { %v10380_v4 = vadd.f32 %v10379_v41, %v10378_v46  ;;  %v10381_v37 = vpop.f32.mrb[190].mxu1  ;;  %v10318_v8 = vpop.f32.mrb[207].mxu0  ;;  %11177 = vmatpush3.bf16.msra.mxu0 %v11922_v24  ;;  %v5308_v24 = vld [vmem:[#allocation3 + $0xd4] sm:$0xff]  ;;  %v14067_v41 = vld [vmem:[#allocation3 + $0x104] sm:$0xff] }
 0x6f2   :  { %v10382_v32 = vpop.f32.mrb[191].mxu1  ;;  %v7587_v22 = vadd.f32 %v10316_v18, %v13967_v34  ;;  %v10319_v12 = vadd.f32 %v10318_v8, %v10317_v31  ;;  %11178 = vmatprep.subr.bf16.mxu0 %v11923_v5  ;;  %v5310_v1 = vld [vmem:[#allocation3 + $0xf4] sm:$0xff]  ;;  %v14070_v31 = vpack.c.bf16 %v5304_v44, %v14041_v9 }
 0x6f3   :  { %v10383_v56 = vadd.f32 %v10382_v32, %v10381_v37  ;;  %8321 = vmatmul.mubr.bf16.gmra.mrb[56].mxu0 %v5360_v39  ;;  %v5395_v32 = vpack.c.bf16 %v5309_v48, %v5308_v24 }
 0x6f4   :  { %8418 = vmatmul.mubr.bf16.gmra.mrb[40].mxu1 %v14043_v11  ;;  %v14048_v3 = vadd.f32 %v10380_v4, %v7587_v22  ;;  %v7590_v50 = vadd.f32 %v10319_v12, %v13971_v25  ;;  %8328 = vmatprep.mubr.bf16.mxu0 %v5393_v29  ;;  %v14056_v25 = vpack.c.bf16 %v5302_v60, %v14031_v26 }
 0x6f5   :  { %8425 = vmatprep.mubr.bf16.mxu1 %v5394_v35  ;;  %11179 = vmatpush3.bf16.msra.mxu0 %v11923_v5 }
 0x6f6   :  { %v14051_v57 = vadd.f32 %v10383_v56, %v7590_v50  ;;  %v10320_v49 = vpop.f32.mrb[208].mxu0  ;;  %11180 = vmatprep.subr.bf16.mxu0 %v11924_v52 }
 0x6f7   :  { %v10384_v34 = vpop.f32.mrb[192].mxu1  ;;  %v10321_v42 = vpop.f32.mrb[209].mxu0 }
 0x6f8   :  { %v10385_v43 = vpop.f32.mrb[193].mxu1  ;;  %v10322_v62 = vadd.f32 %v10321_v42, %v10320_v49  ;;  %v10323_v20 = vpop.f32.mrb[210].mxu0  ;;  %v5307_v49 = vld [vmem:[#allocation3 + $0xc4] sm:$0xff] }
 0x6f9   :  { %v10386_v47 = vadd.f32 %v10385_v43, %v10384_v34  ;;  %v10387_v53 = vpop.f32.mrb[194].mxu1  ;;  %v10324_v51 = vpop.f32.mrb[211].mxu0  ;;  %11181 = vmatpush3.bf16.msra.mxu0 %v11924_v52  ;;  %v11928_v52 = vld [vmem:[#allocation10 + $0x638] sm:$0xff]   ;;  %v5363_v42 = vpack.c.bf16 %v5308_v24, %v5307_v49 }
 0x6fa   :  { %v10388_v7 = vpop.f32.mrb[195].mxu1  ;;  %v7595_v38 = vadd.f32 %v10322_v62, %v13975_v15  ;;  %v10325_v39 = vadd.f32 %v10324_v51, %v10323_v20  ;;  %11182 = vmatprep.subr.bf16.mxu0 %v11925_v14  ;;  %v5312_v62 = vld [vmem:[#allocation3 + $0x114] sm:$0xff] }
 0x6fb   :  { %v10389_v6 = vadd.f32 %v10388_v7, %v10387_v53  ;;  %8329 = vmatmul.mubr.bf16.gmra.mrb[60].mxu0 %v14043_v11  ;;  %v5364_v7 = vpack.c.bf16 %v5310_v1, %v5309_v48 }
 0x6fc   :  { %8426 = vmatmul.mubr.bf16.gmra.mrb[44].mxu1 %v14056_v25  ;;  %v14062_v10 = vadd.f32 %v10386_v47, %v7595_v38  ;;  %v7598_v26 = vadd.f32 %v10325_v39, %v13978_v21  ;;  %8336 = vmatprep.mubr.bf16.mxu0 %v5394_v35  ;;  %v5396_v35 = vpack.c.bf16 %v14067_v41, %v5310_v1  ;;  %v5313_v47 = vld [vmem:[#allocation3 + $0x124] sm:$0xff] }
 0x6fd   :  { %8433 = vmatprep.mubr.bf16.mxu1 %v5458_v13  ;;  %11183 = vmatpush3.bf16.msra.mxu0 %v11925_v14  ;;  %v5315_v1 = vld [vmem:[#allocation3 + $0x144] sm:$0xff] }
 0x6fe   :  { %v14065_v2 = vadd.f32 %v10389_v6, %v7598_v26  ;;  %v10406_v15 = vpop.f32.mrb[212].mxu0  ;;  %11184 = vmatprep.subr.bf16.mxu0 %v11926_v16  ;;  %v5397_v26 = vpack.c.bf16 %v5313_v47, %v5312_v62 }
 0x6ff   :  { %v10470_v29 = vpop.f32.mrb[196].mxu1  ;;  %v10407_v46 = vpop.f32.mrb[213].mxu0 }
 0x700   :  { %v10471_v5 = vpop.f32.mrb[197].mxu1  ;;  %v10408_v60 = vadd.f32 %v10407_v46, %v10406_v15  ;;  %v10409_v18 = vpop.f32.mrb[214].mxu0 }
 0x701   :  { %v10472_v4 = vadd.f32 %v10471_v5, %v10470_v29  ;;  %v10473_v21 = vpop.f32.mrb[198].mxu1  ;;  %v10410_v37 = vpop.f32.mrb[215].mxu0  ;;  %11185 = vmatpush3.bf16.msra.mxu0 %v11926_v16 }
 0x702   :  { %v10474_v8 = vpop.f32.mrb[199].mxu1  ;;  %v7733_v22 = vadd.f32 %v10408_v60, %v13982_v36  ;;  %v10411_v12 = vadd.f32 %v10410_v37, %v10409_v18  ;;  %11186 = vmatprep.subr.bf16.mxu0 %v11927_v61  ;;  %v14089_v37 = vpack.c.bf16 %v5312_v62, %v14067_v41 }
 0x703   :  { %v10475_v56 = vadd.f32 %v10474_v8, %v10473_v21  ;;  %8337 = vmatmul.mubr.bf16.gmra.mrb[64].mxu0 %v14056_v25 }
 0x704   :  { %8434 = vmatmul.mubr.bf16.gmra.mrb[48].mxu1 %v14070_v31  ;;  %v7736_v50 = vadd.f32 %v10411_v12, %v13987_v27  ;;  %v14077_v9 = vadd.f32 %v10472_v4, %v7733_v22  ;;  %8344 = vmatprep.mubr.bf16.mxu0 %v5395_v32 }
 0x705   :  { %8441 = vmatprep.mubr.bf16.mxu1 %v5396_v35  ;;  %11187 = vmatpush3.bf16.msra.mxu0 %v11927_v61 }
 0x706   :  { %v14079_v34 = vadd.f32 %v10475_v56, %v7736_v50  ;;  %v10412_v36 = vpop.f32.mrb[216].mxu0  ;;  %11188 = vmatprep.subr.bf16.mxu0 %v11928_v52 }
 0x707   :  { %v10476_v14 = vpop.f32.mrb[200].mxu1  ;;  %v10413_v43 = vpop.f32.mrb[217].mxu0 }
 0x708   :  { %v10477_v44 = vpop.f32.mrb[201].mxu1  ;;  %v10414_v20 = vadd.f32 %v10413_v43, %v10412_v36  ;;  %v10415_v51 = vpop.f32.mrb[218].mxu0 }
 0x709   :  { %v10478_v53 = vadd.f32 %v10477_v44, %v10476_v14  ;;  %v10479_v27 = vpop.f32.mrb[202].mxu1  ;;  %v10416_v38 = vpop.f32.mrb[219].mxu0  ;;  %11189 = vmatpush3.bf16.msra.mxu0 %v11928_v52 }
 0x70a   :  { %v10480_v39 = vpop.f32.mrb[203].mxu1  ;;  %v7741_v6 = vadd.f32 %v10414_v20, %v13998_v45  ;;  %v10417_v13 = vadd.f32 %v10416_v38, %v10415_v51  ;;  %11498 = vmatprep.subr.bf16.mxu0 %v12026_v23  ;;  %v5314_v45 = vld [vmem:[#allocation3 + $0x134] sm:$0xff] }
 0x70b   :  { %v10481_v16 = vadd.f32 %v10480_v39, %v10479_v27  ;;  %8345 = vmatmul.mubr.bf16.gmra.mrb[68].mxu0 %v5363_v42  ;;  %v5398_v56 = vpack.c.bf16 %v5315_v1, %v5314_v45  ;;  %v5316_v42 = vld [vmem:[#allocation3 + $0x154] sm:$0xff] }
 0x70c   :  { %8442 = vmatmul.mubr.bf16.gmra.mrb[52].mxu1 %v5364_v7  ;;  %v14083_v15 = vadd.f32 %v10478_v53, %v7741_v6  ;;  %v7744_v29 = vadd.f32 %v10417_v13, %v14003_v63  ;;  %8352 = vmatprep.mubr.bf16.mxu0 %v5396_v35  ;;  %v14100_v53 = vpack.c.bf16 %v5314_v45, %v5313_v47 }
 0x70d   :  { %8449 = vmatprep.mubr.bf16.mxu1 %v5397_v26  ;;  %v14111_v45 = vpack.c.bf16 %v5316_v42, %v5315_v1 }
 0x70e   :  { %v14086_v24 = vadd.f32 %v10481_v16, %v7744_v29  ;;  %v10418_v48 = vpop.f32.mrb[220].mxu0 }
 0x70f   :  { %v10482_v61 = vpop.f32.mrb[204].mxu1  ;;  %v10419_v46 = vpop.f32.mrb[221].mxu0 }
 0x710   :  { %v10483_v5 = vpop.f32.mrb[205].mxu1  ;;  %v10420_v60 = vadd.f32 %v10419_v46, %v10418_v48  ;;  %v10421_v4 = vpop.f32.mrb[222].mxu0 }
 0x711   :  { %v10484_v18 = vadd.f32 %v10483_v5, %v10482_v61  ;;  %v10485_v21 = vpop.f32.mrb[206].mxu1  ;;  %v10422_v8 = vpop.f32.mrb[223].mxu0 }
 0x712   :  { %v10486_v32 = vpop.f32.mrb[207].mxu1  ;;  %v7749_v63 = vadd.f32 %v10420_v60, %v14011_v54  ;;  %v10423_v22 = vadd.f32 %v10422_v8, %v10421_v4  ;;  %v14098_v54 = vld [vmem:[#allocation3 + $0x164] sm:$0xff] }
 0x713   :  { %v10487_v12 = vadd.f32 %v10486_v32, %v10485_v21  ;;  %8353 = vmatmul.mubr.bf16.gmra.mrb[72].mxu0 %v5364_v7  ;;  %v5462_v39 = vpack.c.bf16 %v14098_v54, %v5316_v42 }
 0x714   :  { %8450 = vmatmul.mubr.bf16.gmra.mrb[56].mxu1 %v14089_v37  ;;  %v14093_v35 = vadd.f32 %v10484_v18, %v7749_v63  ;;  %v7752_v52 = vadd.f32 %v10423_v22, %v14015_v40  ;;  %8360 = vmatprep.mubr.bf16.mxu0 %v5397_v26  ;;  %v14120_v63 = vld [vmem:[#allocation3] sm:$0xff] }
 0x715   :  { %8457 = vmatprep.mubr.bf16.mxu1 %v5398_v56 }
 0x716   :  { %v14096_v50 = vadd.f32 %v10487_v12, %v7752_v52  ;;  %v10424_v41 = vpop.f32.mrb[224].mxu0 }
 0x717   :  { %v10488_v49 = vpop.f32.mrb[208].mxu1  ;;  %v10425_v36 = vpop.f32.mrb[225].mxu0 }
 0x718   :  { %v10489_v14 = vpop.f32.mrb[209].mxu1  ;;  %v10426_v43 = vadd.f32 %v10425_v36, %v10424_v41  ;;  %v10427_v62 = vpop.f32.mrb[226].mxu0 }
 0x719   :  { %v10490_v44 = vadd.f32 %v10489_v14, %v10488_v49  ;;  %v10491_v20 = vpop.f32.mrb[210].mxu1  ;;  %v10428_v51 = vpop.f32.mrb[227].mxu0 }
 0x71a   :  { %v10492_v27 = vpop.f32.mrb[211].mxu1  ;;  %v7757_v40 = vadd.f32 %v10426_v43, %v14019_v33  ;;  %v10429_v7 = vadd.f32 %v10428_v51, %v10427_v62 }
 0x71b   :  { %v10493_v38 = vadd.f32 %v10492_v27, %v10491_v20  ;;  %8361 = vmatmul.mubr.bf16.gmra.mrb[76].mxu0 %v14089_v37 }
 0x71c   :  { %8458 = vmatmul.mubr.bf16.gmra.mrb[60].mxu1 %v14100_v53  ;;  %v14106_v6 = vadd.f32 %v10490_v44, %v7757_v40  ;;  %v7760_v13 = vadd.f32 %v10429_v7, %v14022_v30  ;;  %8368 = vmatprep.mubr.bf16.mxu0 %v5398_v56  ;;  %v5306_v44 = vld [vmem:[#allocation3 + $0xb4] sm:$0xff] }
 0x71d   :  { %8465 = vmatprep.mubr.bf16.mxu1 %v5462_v39  ;;  %v5490_v7 = vpack.c.bf16 %v5306_v44, %v14053_v59 }
 0x71e   :  { %v14109_v47 = vadd.f32 %v10493_v38, %v7760_v13  ;;  %v10430_v16 = vpop.f32.mrb[228].mxu0 }
 0x71f   :  { %v10494_v26 = vpop.f32.mrb[212].mxu1  ;;  %v10431_v29 = vpop.f32.mrb[229].mxu0 }
 0x720   :  { %v10495_v33 = vpop.f32.mrb[213].mxu1  ;;  %v10432_v48 = vadd.f32 %v10431_v29, %v10430_v16  ;;  %v10433_v61 = vpop.f32.mrb[230].mxu0 }
 0x721   :  { %v10496_v46 = vadd.f32 %v10495_v33, %v10494_v26  ;;  %v10497_v5 = vpop.f32.mrb[214].mxu1  ;;  %v10434_v60 = vpop.f32.mrb[231].mxu0 }
 0x722   :  { %v10498_v18 = vpop.f32.mrb[215].mxu1  ;;  %v7765_v4 = vadd.f32 %v10432_v48, %v14026_v58  ;;  %v10435_v21 = vadd.f32 %v10434_v60, %v10433_v61 }
 0x723   :  { %v10499_v30 = vadd.f32 %v10498_v18, %v10497_v5  ;;  %8369 = vmatmul.mubr.bf16.gmra.mrb[80].mxu0 %v14100_v53 }
 0x724   :  { %8466 = vmatmul.mubr.bf16.gmra.mrb[64].mxu1 %v14111_v45  ;;  %v7768_v8 = vadd.f32 %v10435_v21, %v14029_v19  ;;  %v14117_v32 = vadd.f32 %v10496_v46, %v7765_v4  ;;  %11190 = vmatprep.mubr.bf16.mxu0 %v14043_v11 }
 0x725   :  { %11238 = vmatprep.mubr.msk.f32.mxu1 %vm12027_vm0, %v14120_v63 }
 0x726   :  { %v14124_v1 = vadd.f32 %v10499_v30, %v7768_v8  ;;  %v10436_v58 = vpop.f32.mrb[232].mxu0 }
 0x727   :  { %v10500_v22 = vpop.f32.mrb[216].mxu1  ;;  %v10437_v12 = vpop.f32.mrb[233].mxu0 }
 0x728   :  { %v10501_v56 = vpop.f32.mrb[217].mxu1  ;;  %v10438_v52 = vadd.f32 %v10437_v12, %v10436_v58  ;;  %v10439_v49 = vpop.f32.mrb[234].mxu0 }
 0x729   :  { %v10502_v41 = vadd.f32 %v10501_v56, %v10500_v22  ;;  %v10503_v36 = vpop.f32.mrb[218].mxu1  ;;  %v10440_v19 = vpop.f32.mrb[235].mxu0 }
 0x72a   :  { %v10504_v14 = vpop.f32.mrb[219].mxu1  ;;  %v7773_v42 = vadd.f32 %v10438_v52, %v14035_v0  ;;  %v10441_v11 = vadd.f32 %v10440_v19, %v10439_v49 }
 0x72b   :  { %v10505_v43 = vadd.f32 %v10504_v14, %v10503_v36  ;;  %11191 = vmatmul.mubr.bf16.vlgmr.msra.gmra.mrb[84].mxu0 %v14056_v25 }
 0x72c   :  { %v14128_v62 = vadd.f32 %v10502_v41, %v7773_v42  ;;  %v7776_v20 = vadd.f32 %v10441_v11, %v14039_v28  ;;  %11194 = vmatprep.mubr.bf16.mxu0 %v14070_v31 }
 0x72e   :  { %v14132_v51 = vadd.f32 %v10505_v43, %v7776_v20  ;;  %v10442_v27 = vpop.f32.mrb[236].mxu0 }
 0x72f   :  { %v10506_v40 = vpop.f32.mrb[220].mxu1  ;;  %v10443_v38 = vpop.f32.mrb[237].mxu0 }
 0x730   :  { %v10507_v39 = vpop.f32.mrb[221].mxu1  ;;  %v10444_v0 = vadd.f32 %v10443_v38, %v10442_v27  ;;  %v10445_v16 = vpop.f32.mrb[238].mxu0 }
 0x731   :  { %v10508_v13 = vadd.f32 %v10507_v39, %v10506_v40  ;;  %v10509_v26 = vpop.f32.mrb[222].mxu1  ;;  %v10446_v25 = vpop.f32.mrb[239].mxu0 }
 0x732   :  { %v10510_v29 = vpop.f32.mrb[223].mxu1  ;;  %v7781_v33 = vadd.f32 %v10444_v0, %v14048_v3  ;;  %v10447_v48 = vadd.f32 %v10446_v25, %v10445_v16 }
 0x733   :  { %v10511_v28 = vadd.f32 %v10510_v29, %v10509_v26  ;;  %11195 = vmatmul.mubr.bf16.gmra.mrb[88].mxu0 %v5490_v7 }
 0x734   :  { %v14136_v31 = vadd.f32 %v10508_v13, %v7781_v33  ;;  %v7784_v61 = vadd.f32 %v10447_v48, %v14051_v57  ;;  %11198 = vmatprep.mubr.bf16.mxu0 %v14089_v37  ;;  %v5318_v57 = vld [vmem:[#allocation3 + $0x174] sm:$0xff] }
 0x735   :  { %v5494_v19 = vpack.c.bf16 %v5318_v57, %v14098_v54 }
 0x736   :  { %v14140_v59 = vadd.f32 %v10511_v28, %v7784_v61  ;;  %v10448_v46 = vpop.f32.mrb[240].mxu0 }
 0x737   :  { %v10512_v5 = vpop.f32.mrb[224].mxu1  ;;  %v10449_v60 = vpop.f32.mrb[241].mxu0 }
 0x738   :  { %v10513_v18 = vpop.f32.mrb[225].mxu1  ;;  %v10450_v4 = vadd.f32 %v10449_v60, %v10448_v46  ;;  %v10451_v30 = vpop.f32.mrb[242].mxu0 }
 0x739   :  { %v10514_v21 = vadd.f32 %v10513_v18, %v10512_v5  ;;  %v10515_v8 = vpop.f32.mrb[226].mxu1  ;;  %v10452_v3 = vpop.f32.mrb[243].mxu0 }
 0x73a   :  { %v10516_v58 = vpop.f32.mrb[227].mxu1  ;;  %v7789_v22 = vadd.f32 %v10450_v4, %v14062_v10  ;;  %v10453_v12 = vadd.f32 %v10452_v3, %v10451_v30 }
 0x73b   :  { %v10517_v56 = vadd.f32 %v10516_v58, %v10515_v8  ;;  %11199 = vmatmul.mubr.bf16.gmra.mrb[92].mxu0 %v14100_v53 }
 0x73c   :  { %v14144_v37 = vadd.f32 %v10514_v21, %v7789_v22  ;;  %v7792_v52 = vadd.f32 %v10453_v12, %v14065_v2  ;;  %11202 = vmatprep.mubr.bf16.mxu0 %v14111_v45 }
 0x73e   :  { %v14148_v41 = vadd.f32 %v10517_v56, %v7792_v52  ;;  %v10534_v49 = vpop.f32.mrb[244].mxu0 }
 0x73f   :  { %v10598_v36 = vpop.f32.mrb[228].mxu1  ;;  %v10535_v14 = vpop.f32.mrb[245].mxu0 }
 0x740   :  { %v10599_v42 = vpop.f32.mrb[229].mxu1  ;;  %v10536_v10 = vadd.f32 %v10535_v14, %v10534_v49  ;;  %v10537_v43 = vpop.f32.mrb[246].mxu0 }
 0x741   :  { %v10600_v11 = vadd.f32 %v10599_v42, %v10598_v36  ;;  %v10601_v44 = vpop.f32.mrb[230].mxu1  ;;  %v10538_v53 = vpop.f32.mrb[247].mxu0 }
 0x742   :  { %v10602_v20 = vpop.f32.mrb[231].mxu1  ;;  %v7927_v27 = vadd.f32 %v10536_v10, %v14077_v9  ;;  %v10539_v40 = vadd.f32 %v10538_v53, %v10537_v43 }
 0x743   :  { %v10603_v2 = vadd.f32 %v10602_v20, %v10601_v44  ;;  %11203 = vmatmul.mubr.bf16.gmra.mrb[96].mxu0 %v5494_v19 }
 0x744   :  { %v14152_v45 = vadd.f32 %v10600_v11, %v7927_v27  ;;  %v7930_v7 = vadd.f32 %v10539_v40, %v14079_v34  ;;  %11273 = vmatprep.mubr.msk.f32.mxu0 %vm12027_vm0, %v14120_v63 }
 0x746   :  { %v14157_v54 = vadd.f32 %v10603_v2, %v7930_v7  ;;  %v10540_v38 = vpop.f32.mrb[248].mxu0 }
 0x747   :  { %v10604_v39 = vpop.f32.mrb[232].mxu1  ;;  %v10541_v0 = vpop.f32.mrb[249].mxu0 }
 0x748   :  { %v10605_v13 = vpop.f32.mrb[233].mxu1  ;;  %v10542_v16 = vadd.f32 %v10541_v0, %v10540_v38  ;;  %v10543_v25 = vpop.f32.mrb[250].mxu0 }
 0x749   :  { %v10606_v26 = vadd.f32 %v10605_v13, %v10604_v39  ;;  %v10607_v9 = vpop.f32.mrb[234].mxu1  ;;  %v10544_v29 = vpop.f32.mrb[251].mxu0 }
 0x74a   :  { %v10608_v33 = vpop.f32.mrb[235].mxu1  ;;  %v7935_v48 = vadd.f32 %v10542_v16, %v14083_v15  ;;  %v10545_v28 = vadd.f32 %v10544_v29, %v10543_v25 }
 0x74b   :  { %v10609_v61 = vadd.f32 %v10608_v33, %v10607_v9 }
 0x74c   :  { %v14160_v34 = vadd.f32 %v10606_v26, %v7935_v48  ;;  %v7938_v63 = vadd.f32 %v10545_v28, %v14086_v24 }
 0x74e   :  { %v14163_v46 = vadd.f32 %v10609_v61, %v7938_v63  ;;  %v10546_v5 = vpop.f32.mrb[252].mxu0 }
 0x74f   :  { %v10610_v60 = vpop.f32.mrb[236].mxu1  ;;  %v10547_v18 = vpop.f32.mrb[253].mxu0 }
 0x750   :  { %v10611_v4 = vpop.f32.mrb[237].mxu1  ;;  %v10548_v21 = vadd.f32 %v10547_v18, %v10546_v5  ;;  %v10549_v8 = vpop.f32.mrb[254].mxu0 }
 0x751   :  { %v10612_v30 = vadd.f32 %v10611_v4, %v10610_v60  ;;  %v10613_v3 = vpop.f32.mrb[238].mxu1  ;;  %v10550_v58 = vpop.f32.mrb[255].mxu0 }
 0x752   :  { %v10614_v22 = vpop.f32.mrb[239].mxu1  ;;  %v7943_v15 = vadd.f32 %v10548_v21, %v14093_v35  ;;  %v10551_v12 = vadd.f32 %v10550_v58, %v10549_v8 }
 0x753   :  { %v10615_v56 = vadd.f32 %v10614_v22, %v10613_v3 }
 0x754   :  { %v14166_v57 = vadd.f32 %v10612_v30, %v7943_v15  ;;  %v7946_v24 = vadd.f32 %v10551_v12, %v14096_v50 }
 0x756   :  { %v14169_v52 = vadd.f32 %v10615_v56, %v7946_v24  ;;  %v10552_v49 = vpop.f32.mrb[0].mxu0 }
 0x757   :  { %v10616_v36 = vpop.f32.mrb[240].mxu1  ;;  %v10553_v19 = vpop.f32.mrb[1].mxu0 }
 0x758   :  { %v10617_v14 = vpop.f32.mrb[241].mxu1  ;;  %v10554_v42 = vadd.f32 %v10553_v19, %v10552_v49  ;;  %v10555_v10 = vpop.f32.mrb[2].mxu0 }
 0x759   :  { %v10618_v11 = vadd.f32 %v10617_v14, %v10616_v36  ;;  %v10619_v43 = vpop.f32.mrb[242].mxu1  ;;  %v10556_v44 = vpop.f32.mrb[3].mxu0 }
 0x75a   :  { %v10620_v53 = vpop.f32.mrb[243].mxu1  ;;  %v7951_v35 = vadd.f32 %v10554_v42, %v14106_v6  ;;  %v10557_v20 = vadd.f32 %v10556_v44, %v10555_v10 }
 0x75b   :  { %v10621_v27 = vadd.f32 %v10620_v53, %v10619_v43 }
 0x75c   :  { %v7954_v40 = vadd.f32 %v10557_v20, %v14109_v47  ;;  %v14173_v2 = vadd.f32 %v10618_v11, %v7951_v35 }
 0x75e   :  { %v14175_v50 = vadd.f32 %v10621_v27, %v7954_v40  ;;  %v10558_v7 = vpop.f32.mrb[4].mxu0 }
 0x75f   :  { %v10622_v38 = vpop.f32.mrb[244].mxu1  ;;  %v10559_v39 = vpop.f32.mrb[5].mxu0 }
 0x760   :  { %v10623_v0 = vpop.f32.mrb[245].mxu1  ;;  %v10560_v13 = vadd.f32 %v10559_v39, %v10558_v7  ;;  %v10561_v26 = vpop.f32.mrb[6].mxu0 }
 0x761   :  { %v10624_v16 = vadd.f32 %v10623_v0, %v10622_v38  ;;  %v10625_v25 = vpop.f32.mrb[246].mxu1  ;;  %v10562_v9 = vpop.f32.mrb[7].mxu0 }
 0x762   :  { %v10626_v29 = vpop.f32.mrb[247].mxu1  ;;  %v7959_v6 = vadd.f32 %v10560_v13, %v14117_v32  ;;  %v10563_v33 = vadd.f32 %v10562_v9, %v10561_v26 }
 0x763   :  { %v10627_v48 = vadd.f32 %v10626_v29, %v10625_v25 }
 0x764   :  { %v14178_v28 = vadd.f32 %v10624_v16, %v7959_v6  ;;  %v7962_v47 = vadd.f32 %v10563_v33, %v14124_v1 }
 0x766   :  { %v14181_v61 = vadd.f32 %v10627_v48, %v7962_v47  ;;  %v10564_v63 = vpop.f32.mrb[8].mxu0 }
 0x767   :  { %v10628_v5 = vpop.f32.mrb[248].mxu1  ;;  %v10565_v60 = vpop.f32.mrb[9].mxu0 }
 0x768   :  { %v10629_v18 = vpop.f32.mrb[249].mxu1  ;;  %v10566_v4 = vadd.f32 %v10565_v60, %v10564_v63  ;;  %v10567_v30 = vpop.f32.mrb[10].mxu0 }
 0x769   :  { %v10630_v21 = vadd.f32 %v10629_v18, %v10628_v5  ;;  %v10631_v8 = vpop.f32.mrb[250].mxu1  ;;  %v10568_v3 = vpop.f32.mrb[11].mxu0 }
 0x76a   :  { %v10632_v58 = vpop.f32.mrb[251].mxu1  ;;  %v7967_v32 = vadd.f32 %v10566_v4, %v14128_v62  ;;  %v10569_v22 = vadd.f32 %v10568_v3, %v10567_v30 }
 0x76b   :  { %v10633_v15 = vadd.f32 %v10632_v58, %v10631_v8 }
 0x76c   :  { %v14184_v12 = vadd.f32 %v10630_v21, %v7967_v32  ;;  %v7970_v1 = vadd.f32 %v10569_v22, %v14132_v51 }
 0x76e   :  { %v14187_v56 = vadd.f32 %v10633_v15, %v7970_v1  ;;  %v10570_v24 = vpop.f32.mrb[12].mxu0 }
 0x76f   :  { %v10634_v49 = vpop.f32.mrb[252].mxu1  ;;  %v10571_v36 = vpop.f32.mrb[13].mxu0 }
 0x770   :  { %v10635_v19 = vpop.f32.mrb[253].mxu1  ;;  %v10572_v14 = vadd.f32 %v10571_v36, %v10570_v24  ;;  %v10573_v10 = vpop.f32.mrb[14].mxu0 }
 0x771   :  { %v10636_v42 = vadd.f32 %v10635_v19, %v10634_v49  ;;  %v10637_v11 = vpop.f32.mrb[254].mxu1  ;;  %v10574_v43 = vpop.f32.mrb[15].mxu0 }
 0x772   :  { %v10638_v44 = vpop.f32.mrb[255].mxu1  ;;  %v7975_v62 = vadd.f32 %v10572_v14, %v14136_v31  ;;  %v10575_v53 = vadd.f32 %v10574_v43, %v10573_v10 }
 0x773   :  { %v10639_v35 = vadd.f32 %v10638_v44, %v10637_v11 }
 0x774   :  { %v14190_v20 = vadd.f32 %v10636_v42, %v7975_v62  ;;  %v7978_v51 = vadd.f32 %v10575_v53, %v14140_v59 }
 0x776   :  { %v14193_v27 = vadd.f32 %v10639_v35, %v7978_v51  ;;  %v10576_v40 = vpop.f32.mrb[16].mxu0 }
 0x777   :  { %v10640_v7 = vpop.f32.mrb[0].mxu1  ;;  %v10577_v38 = vpop.f32.mrb[17].mxu0 }
 0x778   :  { %v10641_v39 = vpop.f32.mrb[1].mxu1  ;;  %v10578_v0 = vadd.f32 %v10577_v38, %v10576_v40  ;;  %v10579_v13 = vpop.f32.mrb[18].mxu0 }
 0x779   :  { %v10642_v16 = vadd.f32 %v10641_v39, %v10640_v7  ;;  %v10643_v26 = vpop.f32.mrb[2].mxu1  ;;  %v10580_v25 = vpop.f32.mrb[19].mxu0 }
 0x77a   :  { %v10644_v9 = vpop.f32.mrb[3].mxu1  ;;  %v7983_v31 = vadd.f32 %v10578_v0, %v14144_v37  ;;  %v10581_v29 = vadd.f32 %v10580_v25, %v10579_v13 }
 0x77b   :  { %v10645_v6 = vadd.f32 %v10644_v9, %v10643_v26 }
 0x77c   :  { %v7986_v33 = vadd.f32 %v10581_v29, %v14148_v41  ;;  %v14197_v48 = vadd.f32 %v10642_v16, %v7983_v31 }
 0x77e   :  { %v14199_v59 = vadd.f32 %v10645_v6, %v7986_v33  ;;  %v10662_v47 = vpop.f32.mrb[20].mxu0 }
 0x77f   :  { %v10726_v63 = vpop.f32.mrb[4].mxu1  ;;  %v10663_v5 = vpop.f32.mrb[21].mxu0 }
 0x780   :  { %v10727_v60 = vpop.f32.mrb[5].mxu1  ;;  %v10664_v18 = vadd.f32 %v10663_v5, %v10662_v47  ;;  %v10665_v21 = vpop.f32.mrb[22].mxu0 }
 0x781   :  { %v10728_v4 = vadd.f32 %v10727_v60, %v10726_v63  ;;  %v10729_v30 = vpop.f32.mrb[6].mxu1  ;;  %v10666_v8 = vpop.f32.mrb[23].mxu0 }
 0x782   :  { %v10730_v3 = vpop.f32.mrb[7].mxu1  ;;  %v8121_v37 = vadd.f32 %v10664_v18, %v14152_v45  ;;  %v10667_v58 = vadd.f32 %v10666_v8, %v10665_v21 }
 0x783   :  { %v10731_v32 = vadd.f32 %v10730_v3, %v10729_v30 }
 0x784   :  { %v14202_v22 = vadd.f32 %v10728_v4, %v8121_v37  ;;  %v8124_v41 = vadd.f32 %v10667_v58, %v14157_v54 }
 0x786   :  { %v14205_v15 = vadd.f32 %v10731_v32, %v8124_v41  ;;  %v10668_v1 = vpop.f32.mrb[24].mxu0 }
 0x787   :  { %v10732_v24 = vpop.f32.mrb[8].mxu1  ;;  %v10669_v49 = vpop.f32.mrb[25].mxu0 }
 0x788   :  { %v10733_v36 = vpop.f32.mrb[9].mxu1  ;;  %v10670_v19 = vadd.f32 %v10669_v49, %v10668_v1  ;;  %v10671_v42 = vpop.f32.mrb[26].mxu0 }
 0x789   :  { %v10734_v14 = vadd.f32 %v10733_v36, %v10732_v24  ;;  %v10735_v10 = vpop.f32.mrb[10].mxu1  ;;  %v10672_v11 = vpop.f32.mrb[27].mxu0 }
 0x78a   :  { %v10736_v43 = vpop.f32.mrb[11].mxu1  ;;  %v8129_v45 = vadd.f32 %v10670_v19, %v14160_v34  ;;  %v10673_v44 = vadd.f32 %v10672_v11, %v10671_v42 }
 0x78b   :  { %v10737_v62 = vadd.f32 %v10736_v43, %v10735_v10 }
 0x78c   :  { %v14208_v53 = vadd.f32 %v10734_v14, %v8129_v45  ;;  %v8132_v54 = vadd.f32 %v10673_v44, %v14163_v46 }
 0x78e   :  { %v14211_v35 = vadd.f32 %v10737_v62, %v8132_v54  ;;  %v10674_v51 = vpop.f32.mrb[28].mxu0 }
 0x78f   :  { %v10738_v40 = vpop.f32.mrb[12].mxu1  ;;  %v10675_v7 = vpop.f32.mrb[29].mxu0 }
 0x790   :  { %v10739_v38 = vpop.f32.mrb[13].mxu1  ;;  %v10676_v39 = vadd.f32 %v10675_v7, %v10674_v51  ;;  %v10677_v13 = vpop.f32.mrb[30].mxu0 }
 0x791   :  { %v10740_v0 = vadd.f32 %v10739_v38, %v10738_v40  ;;  %v10741_v16 = vpop.f32.mrb[14].mxu1  ;;  %v10678_v26 = vpop.f32.mrb[31].mxu0 }
 0x792   :  { %v10742_v25 = vpop.f32.mrb[15].mxu1  ;;  %v8137_v34 = vadd.f32 %v10676_v39, %v14166_v57  ;;  %v10679_v9 = vadd.f32 %v10678_v26, %v10677_v13 }
 0x793   :  { %v10743_v31 = vadd.f32 %v10742_v25, %v10741_v16 }
 0x794   :  { %v14214_v29 = vadd.f32 %v10740_v0, %v8137_v34  ;;  %v8140_v46 = vadd.f32 %v10679_v9, %v14169_v52 }
 0x796   :  { %v14217_v6 = vadd.f32 %v10743_v31, %v8140_v46  ;;  %v10680_v33 = vpop.f32.mrb[32].mxu0 }
 0x797   :  { %v10744_v47 = vpop.f32.mrb[16].mxu1  ;;  %v10681_v63 = vpop.f32.mrb[33].mxu0 }
 0x798   :  { %v10745_v5 = vpop.f32.mrb[17].mxu1  ;;  %v10682_v60 = vadd.f32 %v10681_v63, %v10680_v33  ;;  %v10683_v4 = vpop.f32.mrb[34].mxu0 }
 0x799   :  { %v10746_v18 = vadd.f32 %v10745_v5, %v10744_v47  ;;  %v10747_v21 = vpop.f32.mrb[18].mxu1  ;;  %v10684_v30 = vpop.f32.mrb[35].mxu0 }
 0x79a   :  { %v10748_v8 = vpop.f32.mrb[19].mxu1  ;;  %v8145_v57 = vadd.f32 %v10682_v60, %v14173_v2  ;;  %v10685_v3 = vadd.f32 %v10684_v30, %v10683_v4 }
 0x79b   :  { %v10749_v37 = vadd.f32 %v10748_v8, %v10747_v21 }
 0x79c   :  { %v14220_v58 = vadd.f32 %v10746_v18, %v8145_v57  ;;  %v8148_v52 = vadd.f32 %v10685_v3, %v14175_v50 }
 0x79e   :  { %v14223_v32 = vadd.f32 %v10749_v37, %v8148_v52  ;;  %v10686_v41 = vpop.f32.mrb[36].mxu0 }
 0x79f   :  { %v10750_v1 = vpop.f32.mrb[20].mxu1  ;;  %v10687_v24 = vpop.f32.mrb[37].mxu0 }
 0x7a0   :  { %v10751_v49 = vpop.f32.mrb[21].mxu1  ;;  %v10688_v36 = vadd.f32 %v10687_v24, %v10686_v41  ;;  %v10689_v14 = vpop.f32.mrb[38].mxu0 }
 0x7a1   :  { %v10752_v19 = vadd.f32 %v10751_v49, %v10750_v1  ;;  %v10753_v42 = vpop.f32.mrb[22].mxu1  ;;  %v10690_v10 = vpop.f32.mrb[39].mxu0 }
 0x7a2   :  { %v10754_v11 = vpop.f32.mrb[23].mxu1  ;;  %v8153_v2 = vadd.f32 %v10688_v36, %v14178_v28  ;;  %v10691_v43 = vadd.f32 %v10690_v10, %v10689_v14 }
 0x7a3   :  { %v10755_v45 = vadd.f32 %v10754_v11, %v10753_v42 }
 0x7a4   :  { %v14226_v44 = vadd.f32 %v10752_v19, %v8153_v2  ;;  %v8156_v50 = vadd.f32 %v10691_v43, %v14181_v61 }
 0x7a6   :  { %v14229_v62 = vadd.f32 %v10755_v45, %v8156_v50  ;;  %v10692_v54 = vpop.f32.mrb[40].mxu0 }
 0x7a7   :  { %v10756_v51 = vpop.f32.mrb[24].mxu1  ;;  %v10693_v40 = vpop.f32.mrb[41].mxu0 }
 0x7a8   :  { %v10757_v7 = vpop.f32.mrb[25].mxu1  ;;  %v10694_v38 = vadd.f32 %v10693_v40, %v10692_v54  ;;  %v10695_v0 = vpop.f32.mrb[42].mxu0 }
 0x7a9   :  { %v10758_v39 = vadd.f32 %v10757_v7, %v10756_v51  ;;  %v10759_v13 = vpop.f32.mrb[26].mxu1  ;;  %v10696_v16 = vpop.f32.mrb[43].mxu0 }
 0x7aa   :  { %v10760_v26 = vpop.f32.mrb[27].mxu1  ;;  %v8161_v28 = vadd.f32 %v10694_v38, %v14184_v12  ;;  %v10697_v25 = vadd.f32 %v10696_v16, %v10695_v0 }
 0x7ab   :  { %v10761_v34 = vadd.f32 %v10760_v26, %v10759_v13 }
 0x7ac   :  { %v14232_v9 = vadd.f32 %v10758_v39, %v8161_v28  ;;  %v8164_v61 = vadd.f32 %v10697_v25, %v14187_v56 }
 0x7ae   :  { %v14235_v31 = vadd.f32 %v10761_v34, %v8164_v61  ;;  %v10698_v46 = vpop.f32.mrb[44].mxu0  ;;  %v8642_v61 = vld [vmem:[%s14555_s3 + $0x8] sm:$0xff] }
 0x7af   :  { %v10762_v33 = vpop.f32.mrb[28].mxu1  ;;  %v10699_v47 = vpop.f32.mrb[45].mxu0 }
 0x7b0   :  { %v10763_v63 = vpop.f32.mrb[29].mxu1  ;;  %v10700_v5 = vadd.f32 %v10699_v47, %v10698_v46  ;;  %v10701_v18 = vpop.f32.mrb[46].mxu0  ;;  %v8643_v46 = vld [vmem:[%s14555_s3 + $0x10] sm:$0xff] }
 0x7b1   :  { %v10764_v60 = vadd.f32 %v10763_v63, %v10762_v33  ;;  %v10765_v4 = vpop.f32.mrb[30].mxu1  ;;  %v10702_v21 = vpop.f32.mrb[47].mxu0 }
 0x7b2   :  { %v10766_v30 = vpop.f32.mrb[31].mxu1  ;;  %v8169_v12 = vadd.f32 %v10700_v5, %v14190_v20  ;;  %v10703_v8 = vadd.f32 %v10702_v21, %v10701_v18 }
 0x7b3   :  { %v10767_v57 = vadd.f32 %v10766_v30, %v10765_v4 }
 0x7b4   :  { %v14238_v3 = vadd.f32 %v10764_v60, %v8169_v12  ;;  %v8172_v56 = vadd.f32 %v10703_v8, %v14193_v27 }
 0x7b6   :  { %v14241_v37 = vadd.f32 %v10767_v57, %v8172_v56  ;;  %v10704_v52 = vpop.f32.mrb[48].mxu0  ;;  %v8645_v56 = vld [vmem:[%s14555_s3 + $0x20] sm:$0xff] }
 0x7b7   :  { %v10768_v41 = vpop.f32.mrb[32].mxu1  ;;  %v10705_v1 = vpop.f32.mrb[49].mxu0 }
 0x7b8   :  { %v10769_v24 = vpop.f32.mrb[33].mxu1  ;;  %v10706_v49 = vadd.f32 %v10705_v1, %v10704_v52  ;;  %v10707_v19 = vpop.f32.mrb[50].mxu0  ;;  %v8646_v52 = vld [vmem:[%s14555_s3 + $0x28] sm:$0xff] }
 0x7b9   :  { %v10770_v36 = vadd.f32 %v10769_v24, %v10768_v41  ;;  %v10771_v14 = vpop.f32.mrb[34].mxu1  ;;  %v10708_v42 = vpop.f32.mrb[51].mxu0 }
 0x7ba   :  { %v10772_v10 = vpop.f32.mrb[35].mxu1  ;;  %v8177_v20 = vadd.f32 %v10706_v49, %v14197_v48  ;;  %v10709_v11 = vadd.f32 %v10708_v42, %v10707_v19  ;;  %v14284_v19 = vpack.c.bf16 %v8646_v52, %v8645_v56 }
 0x7bb   :  { %v10773_v2 = vadd.f32 %v10772_v10, %v10771_v14  ;;  %v8647_v14 = vld [vmem:[%s14555_s3 + $0x30] sm:$0xff] }
 0x7bc   :  { %v14244_v43 = vadd.f32 %v10770_v36, %v8177_v20  ;;  %v8180_v27 = vadd.f32 %v10709_v11, %v14199_v59  ;;  %v8641_v59 = vld [vmem:[%s14555_s3] sm:$0xff] }
 0x7bd   :  { %v14264_v63 = vpack.c.bf16 %v8642_v61, %v8641_v59 }
 0x7be   :  { %v14247_v45 = vadd.f32 %v10773_v2, %v8180_v27  ;;  %v10790_v50 = vpop.f32.mrb[52].mxu0 }
 0x7bf   :  { %v10854_v54 = vpop.f32.mrb[36].mxu1  ;;  %v10791_v51 = vpop.f32.mrb[53].mxu0  ;;  %11500 = vmatpush3.bf16.msra.mxu0 %v14264_v63 }
 0x7c0   :  { %v10855_v40 = vpop.f32.mrb[37].mxu1  ;;  %v10792_v7 = vadd.f32 %v10791_v51, %v10790_v50  ;;  %v10793_v39 = vpop.f32.mrb[54].mxu0  ;;  %11501 = vmatprep.subr.bf16.mxu0 %v12026_v23 }
 0x7c1   :  { %v10856_v38 = vadd.f32 %v10855_v40, %v10854_v54  ;;  %v10857_v0 = vpop.f32.mrb[38].mxu1  ;;  %v10794_v13 = vpop.f32.mrb[55].mxu0 }
 0x7c2   :  { %v10858_v16 = vpop.f32.mrb[39].mxu1  ;;  %v8315_v48 = vadd.f32 %v10792_v7, %v14202_v22  ;;  %v10795_v26 = vadd.f32 %v10794_v13, %v10793_v39  ;;  %v8650_v39 = vld [vmem:[%s14555_s3 + $0x48] sm:$0xff] }
 0x7c3   :  { %v10859_v28 = vadd.f32 %v10858_v16, %v10857_v0 }
 0x7c4   :  { %v8318_v25 = vadd.f32 %v10795_v26, %v14205_v15  ;;  %v14251_v34 = vadd.f32 %v10856_v38, %v8315_v48  ;;  %v8644_v15 = vld [vmem:[%s14555_s3 + $0x18] sm:$0xff]  ;;  %v8649_v38 = vld [vmem:[%s14555_s3 + $0x40] sm:$0xff] }
 0x7c5   :  { %v14270_v12 = vpack.c.bf16 %v8644_v15, %v8643_v46 }
 0x7c6   :  { %v10796_v33 = vpop.f32.mrb[56].mxu0  ;;  %v14262_v47 = vadd.f32 %v10859_v28, %v8318_v25  ;;  %v14310_v28 = vpack.c.bf16 %v8650_v39, %v8649_v38  ;;  %v8651_v25 = vld [vmem:[%s14555_s3 + $0x50] sm:$0xff] }
 0x7c7   :  { %v10860_v22 = vpop.f32.mrb[40].mxu1  ;;  %v10797_v5 = vpop.f32.mrb[57].mxu0  ;;  %11503 = vmatpush3.bf16.msra.mxu0 %v14270_v12 }
 0x7c8   :  { %v10861_v60 = vpop.f32.mrb[41].mxu1  ;;  %v10798_v18 = vadd.f32 %v10797_v5, %v10796_v33  ;;  %v10799_v21 = vpop.f32.mrb[58].mxu0  ;;  %11504 = vmatprep.subr.bf16.mxu0 %v12026_v23 }
 0x7c9   :  { %v10862_v4 = vadd.f32 %v10861_v60, %v10860_v22  ;;  %v10863_v30 = vpop.f32.mrb[42].mxu1  ;;  %v10800_v8 = vpop.f32.mrb[59].mxu0 }
 0x7ca   :  { %v10864_v57 = vpop.f32.mrb[43].mxu1  ;;  %v8323_v41 = vadd.f32 %v10798_v18, %v14208_v53  ;;  %v10801_v1 = vadd.f32 %v10800_v8, %v10799_v21  ;;  %v8648_v53 = vld [vmem:[%s14555_s3 + $0x38] sm:$0xff]  ;;  %v8654_v8 = vld [vmem:[%s14555_s3 + $0x68] sm:$0xff] }
 0x7cb   :  { %v10865_v24 = vadd.f32 %v10864_v57, %v10863_v30  ;;  %11506 = vmatpush3.bf16.msra.mxu0 %v14284_v19  ;;  %v14296_v51 = vpack.c.bf16 %v8648_v53, %v8647_v14  ;;  %v8653_v30 = vld [vmem:[%s14555_s3 + $0x60] sm:$0xff] }
 0x7cc   :  { %v8326_v49 = vadd.f32 %v10801_v1, %v14211_v35  ;;  %v14281_v36 = vadd.f32 %v10862_v4, %v8323_v41  ;;  %11507 = vmatprep.subr.bf16.mxu0 %v12026_v23 }
 0x7ce   :  { %v10802_v42 = vpop.f32.mrb[60].mxu0  ;;  %v14293_v20 = vadd.f32 %v10865_v24, %v8326_v49  ;;  %v14336_v24 = vpack.c.bf16 %v8654_v8, %v8653_v30  ;;  %v8655_v49 = vld [vmem:[%s14555_s3 + $0x70] sm:$0xff] }
 0x7cf   :  { %v10866_v10 = vpop.f32.mrb[44].mxu1  ;;  %v10803_v35 = vpop.f32.mrb[61].mxu0  ;;  %11509 = vmatpush3.bf16.msra.mxu0 %v14296_v51 }
 0x7d0   :  { %v10867_v11 = vpop.f32.mrb[45].mxu1  ;;  %v10804_v2 = vadd.f32 %v10803_v35, %v10802_v42  ;;  %v10805_v50 = vpop.f32.mrb[62].mxu0  ;;  %11510 = vmatprep.subr.bf16.mxu0 %v12026_v23 }
 0x7d1   :  { %v10868_v27 = vadd.f32 %v10867_v11, %v10866_v10  ;;  %v10869_v54 = vpop.f32.mrb[46].mxu1  ;;  %v10806_v40 = vpop.f32.mrb[63].mxu0 }
 0x7d2   :  { %v10870_v7 = vpop.f32.mrb[47].mxu1  ;;  %v8331_v0 = vadd.f32 %v10804_v2, %v14214_v29  ;;  %v10807_v13 = vadd.f32 %v10806_v40, %v10805_v50  ;;  %v8652_v29 = vld [vmem:[%s14555_s3 + $0x58] sm:$0xff] }
 0x7d3   :  { %v10871_v16 = vadd.f32 %v10870_v7, %v10869_v54  ;;  %11512 = vmatpush3.bf16.msra.mxu0 %v14310_v28  ;;  %v14322_v18 = vpack.c.bf16 %v8652_v29, %v8651_v25 }
 0x7d4   :  { %v8334_v48 = vadd.f32 %v10807_v13, %v14217_v6  ;;  %v14307_v26 = vadd.f32 %v10868_v27, %v8331_v0  ;;  %11513 = vmatprep.subr.bf16.mxu0 %v12026_v23 }
 0x7d6   :  { %v10808_v59 = vpop.f32.mrb[64].mxu0  ;;  %v14319_v46 = vadd.f32 %v10871_v16, %v8334_v48 }
 0x7d7   :  { %v10872_v61 = vpop.f32.mrb[48].mxu1  ;;  %v10809_v6 = vpop.f32.mrb[65].mxu0  ;;  %11515 = vmatpush3.bf16.msra.mxu0 %v14322_v18 }
 0x7d8   :  { %v10873_v33 = vpop.f32.mrb[49].mxu1  ;;  %v10810_v22 = vadd.f32 %v10809_v6, %v10808_v59  ;;  %v10811_v5 = vpop.f32.mrb[66].mxu0  ;;  %11516 = vmatprep.subr.bf16.mxu0 %v12026_v23 }
 0x7d9   :  { %v10874_v15 = vadd.f32 %v10873_v33, %v10872_v61  ;;  %v10875_v60 = vpop.f32.mrb[50].mxu1  ;;  %v10812_v4 = vpop.f32.mrb[67].mxu0 }
 0x7da   :  { %v10876_v21 = vpop.f32.mrb[51].mxu1  ;;  %v8339_v57 = vadd.f32 %v10810_v22, %v14220_v58  ;;  %v10813_v56 = vadd.f32 %v10812_v4, %v10811_v5  ;;  %v8656_v58 = vld [vmem:[%s14555_s3 + $0x78] sm:$0xff] }
 0x7db   :  { %v10877_v52 = vadd.f32 %v10876_v21, %v10875_v60  ;;  %11518 = vmatpush3.bf16.msra.mxu0 %v14336_v24  ;;  %v14348_v50 = vpack.c.bf16 %v8656_v58, %v8655_v49 }
 0x7dc   :  { %v8342_v41 = vadd.f32 %v10813_v56, %v14223_v32  ;;  %v14333_v1 = vadd.f32 %v10874_v15, %v8339_v57  ;;  %11519 = vmatprep.subr.bf16.mxu0 %v12026_v23 }
 0x7de   :  { %v10814_v14 = vpop.f32.mrb[68].mxu0  ;;  %v14345_v42 = vadd.f32 %v10877_v52, %v8342_v41 }
 0x7df   :  { %v10878_v53 = vpop.f32.mrb[52].mxu1  ;;  %v10815_v32 = vpop.f32.mrb[69].mxu0  ;;  %11521 = vmatpush3.bf16.msra.mxu0 %v14348_v50 }
 0x7e0   :  { %v10879_v10 = vpop.f32.mrb[53].mxu1  ;;  %v10816_v35 = vadd.f32 %v10815_v32, %v10814_v14  ;;  %v10817_v2 = vpop.f32.mrb[70].mxu0  ;;  %11546 = vmatprep.subr.bf16.mxu0 %v12026_v23 }
 0x7e1   :  { %v10880_v11 = vadd.f32 %v10879_v10, %v10878_v53  ;;  %v10881_v27 = vpop.f32.mrb[54].mxu1  ;;  %v10818_v54 = vpop.f32.mrb[71].mxu0 }
 0x7e2   :  { %v10882_v40 = vpop.f32.mrb[55].mxu1  ;;  %v8347_v7 = vadd.f32 %v10816_v35, %v14226_v44  ;;  %v10819_v38 = vadd.f32 %v10818_v54, %v10817_v2 }
 0x7e3   :  { %v10883_v39 = vadd.f32 %v10882_v40, %v10881_v27 }
 0x7e4   :  { %v8350_v0 = vadd.f32 %v10819_v38, %v14229_v62  ;;  %v14353_v13 = vadd.f32 %v10880_v11, %v8347_v7 }
 0x7e6   :  { %v10820_v16 = vpop.f32.mrb[72].mxu0  ;;  %v14357_v25 = vadd.f32 %v10883_v39, %v8350_v0 }
 0x7e7   :  { %v10884_v48 = vpop.f32.mrb[56].mxu1  ;;  %v10821_v29 = vpop.f32.mrb[73].mxu0 }
 0x7e8   :  { %v10885_v59 = vpop.f32.mrb[57].mxu1  ;;  %v10822_v61 = vadd.f32 %v10821_v29, %v10820_v16  ;;  %v10823_v33 = vpop.f32.mrb[74].mxu0 }
 0x7e9   :  { %v10886_v6 = vadd.f32 %v10885_v59, %v10884_v48  ;;  %v10887_v44 = vpop.f32.mrb[58].mxu1  ;;  %v10824_v22 = vpop.f32.mrb[75].mxu0 }
 0x7ea   :  { %v10888_v15 = vpop.f32.mrb[59].mxu1  ;;  %v8355_v62 = vadd.f32 %v10822_v61, %v14232_v9  ;;  %v10825_v5 = vadd.f32 %v10824_v22, %v10823_v33 }
 0x7eb   :  { %v10889_v60 = vadd.f32 %v10888_v15, %v10887_v44 }
 0x7ec   :  { %v8358_v4 = vadd.f32 %v10825_v5, %v14235_v31  ;;  %v8452_v21 = vadd.f32 %v10886_v6, %v8355_v62 }
 0x7ee   :  { %v10826_v30 = vpop.f32.mrb[76].mxu0  ;;  %v8455_v57 = vadd.f32 %v10889_v60, %v8358_v4 }
 0x7ef   :  { %v10890_v8 = vpop.f32.mrb[60].mxu1  ;;  %v10827_v56 = vpop.f32.mrb[77].mxu0 }
 0x7f0   :  { %v10891_v52 = vpop.f32.mrb[61].mxu1  ;;  %v10828_v41 = vadd.f32 %v10827_v56, %v10826_v30  ;;  %v10829_v58 = vpop.f32.mrb[78].mxu0 }
 0x7f1   :  { %v10892_v49 = vadd.f32 %v10891_v52, %v10890_v8  ;;  %v10893_v14 = vpop.f32.mrb[62].mxu1  ;;  %v10830_v53 = vpop.f32.mrb[79].mxu0 }
 0x7f2   :  { %v10894_v32 = vpop.f32.mrb[63].mxu1  ;;  %v8363_v10 = vadd.f32 %v10828_v41, %v14238_v3  ;;  %v10831_v35 = vadd.f32 %v10830_v53, %v10829_v58 }
 0x7f3   :  { %v10895_v9 = vadd.f32 %v10894_v32, %v10893_v14 }
 0x7f4   :  { %v8366_v11 = vadd.f32 %v10831_v35, %v14241_v37  ;;  %v8460_v2 = vadd.f32 %v10892_v49, %v8363_v10 }
 0x7f6   :  { %v10832_v31 = vpop.f32.mrb[80].mxu0  ;;  %v8463_v54 = vadd.f32 %v10895_v9, %v8366_v11 }
 0x7f7   :  { %v10896_v27 = vpop.f32.mrb[64].mxu1  ;;  %v10833_v40 = vpop.f32.mrb[81].mxu0 }
 0x7f8   :  { %v10897_v7 = vpop.f32.mrb[65].mxu1  ;;  %v10834_v38 = vadd.f32 %v10833_v40, %v10832_v31  ;;  %v10835_v0 = vpop.f32.mrb[82].mxu0 }
 0x7f9   :  { %v10898_v39 = vadd.f32 %v10897_v7, %v10896_v27  ;;  %v10899_v16 = vpop.f32.mrb[66].mxu1  ;;  %v10836_v48 = vpop.f32.mrb[83].mxu0 }
 0x7fa   :  { %v10900_v29 = vpop.f32.mrb[67].mxu1  ;;  %v8371_v59 = vadd.f32 %v10834_v38, %v14244_v43  ;;  %v10837_v61 = vadd.f32 %v10836_v48, %v10835_v0  ;;  %v11946_v48 = vld [vmem:[#allocation3] sm:$0xff] }
 0x7fb   :  { %v10901_v3 = vadd.f32 %v10900_v29, %v10899_v16 }
 0x7fc   :  { %v8374_v6 = vadd.f32 %v10837_v61, %v14247_v45  ;;  %v8468_v33 = vadd.f32 %v10898_v39, %v8371_v59 }
 0x7fe   :  { %v11192_v37 = vpop.f32.mrb[84].mxu0  ;;  %v8471_v44 = vadd.f32 %v10901_v3, %v8374_v6 }
 0x7ff   :  { %v14366_v22 = vadd.f32 %v11192_v37, %v14281_v36  ;;  %v8508_v15 = vpop.f32.mrb[85].mxu0 }
 0x800   :  { %v14369_v62 = vadd.f32 %v8508_v15, %v14251_v34  ;;  %v11193_v5 = vpop.f32.mrb[86].mxu0 }
 0x801   :  { %v14372_v60 = vadd.f32 %v11193_v5, %v14293_v20  ;;  %v8511_v4 = vpop.f32.mrb[87].mxu0  ;;  %v8729_v16 = vmul.f32 %v14366_v22, %v14366_v22 }
 0x802   :  { %v14375_v43 = vadd.f32 %v8511_v4, %v14262_v47  ;;  %v8727_v39 = vmul.f32 %v14369_v62, %v14369_v62 }
 0x803   :  { %v11478_v34 = vpack.c.bf16 %v14372_v60, %v14366_v22 }
 0x804   :  { %v11475_v45 = vpack.c.bf16 %v14375_v43, %v14369_v62  ;;  %v8728_v38 = vmul.f32 %v14375_v43, %v14375_v43 }
 0x806   :  { %v11196_v30 = vpop.f32.mrb[88].mxu0  ;;  %11476 = vmatpush3.bf16.msra.mxu1 %v11475_v45  ;;  %v11523_v0 = vpack.c.bf16 %v8728_v38, %v8727_v39 }
 0x807   :  { %v14380_v36 = vadd.f32 %v11196_v30, %v14333_v1  ;;  %v8524_v8 = vpop.f32.mrb[89].mxu0  ;;  %11477 = vmatprep.subr.bf16.mxu1 %v12026_v23 }
 0x808   :  { %v14386_v20 = vadd.f32 %v8524_v8, %v14307_v26  ;;  %v11197_v56 = vpop.f32.mrb[90].mxu0 }
 0x809   :  { %v14389_v47 = vadd.f32 %v11197_v56, %v14345_v42  ;;  %v8527_v52 = vpop.f32.mrb[91].mxu0 }
 0x80a   :  { %v14392_v41 = vadd.f32 %v8527_v52, %v14319_v46  ;;  %11479 = vmatpush3.bf16.msra.mxu1 %v11478_v34  ;;  %v8731_v61 = vmul.f32 %v14386_v20, %v14386_v20 }
 0x80b   :  { %11480 = vmatprep.subr.bf16.mxu1 %v12026_v23  ;;  %v11484_v42 = vpack.c.bf16 %v14389_v47, %v14380_v36  ;;  %v8734_v3 = vmul.f32 %v14389_v47, %v14389_v47 }
 0x80c   :  { %v11481_v1 = vpack.c.bf16 %v14392_v41, %v14386_v20  ;;  %v8732_v59 = vmul.f32 %v14392_v41, %v14392_v41 }
 0x80e   :  { %v11200_v49 = vpop.f32.mrb[92].mxu0  ;;  %11482 = vmatpush3.bf16.msra.mxu1 %v11481_v1  ;;  %v11529_v6 = vpack.c.bf16 %v8732_v59, %v8731_v61 }
 0x80f   :  { %v14397_v58 = vadd.f32 %v11200_v49, %v8452_v21  ;;  %v8540_v26 = vpop.f32.mrb[93].mxu0  ;;  %11483 = vmatprep.subr.bf16.mxu1 %v12026_v23 }
 0x810   :  { %v14403_v14 = vadd.f32 %v8540_v26, %v14353_v13  ;;  %v11201_v46 = vpop.f32.mrb[94].mxu0 }
 0x811   :  { %v14405_v53 = vadd.f32 %v11201_v46, %v8455_v57  ;;  %v8543_v32 = vpop.f32.mrb[95].mxu0  ;;  %v8737_v45 = vmul.f32 %v14397_v58, %v14397_v58 }
 0x812   :  { %v14408_v10 = vadd.f32 %v8543_v32, %v14357_v25  ;;  %11485 = vmatpush3.bf16.msra.mxu1 %v11484_v42  ;;  %v8735_v15 = vmul.f32 %v14403_v14, %v14403_v14 }
 0x813   :  { %11486 = vmatprep.subr.bf16.mxu1 %v12026_v23  ;;  %v11490_v13 = vpack.c.bf16 %v14405_v53, %v14397_v58  ;;  %v8738_v5 = vmul.f32 %v14405_v53, %v14405_v53 }
 0x814   :  { %v11487_v21 = vpack.c.bf16 %v14408_v10, %v14403_v14 }
 0x815   :  { %v11538_v30 = vpack.c.bf16 %v8738_v5, %v8737_v45 }
 0x816   :  { %v11204_v35 = vpop.f32.mrb[96].mxu0  ;;  %11488 = vmatpush3.bf16.msra.mxu1 %v11487_v21 }
 0x817   :  { %v14413_v9 = vadd.f32 %v11204_v35, %v8468_v33  ;;  %v8556_v11 = vpop.f32.mrb[97].mxu0  ;;  %11489 = vmatprep.subr.bf16.mxu1 %v12026_v23  ;;  %v8733_v33 = vmul.f32 %v14380_v36, %v14380_v36 }
 0x818   :  { %v14418_v57 = vadd.f32 %v8556_v11, %v8460_v2  ;;  %v11205_v25 = vpop.f32.mrb[98].mxu0 }
 0x819   :  { %v14420_v31 = vadd.f32 %v11205_v25, %v8471_v44  ;;  %v8559_v27 = vpop.f32.mrb[99].mxu0  ;;  %v11532_v37 = vpack.c.bf16 %v8734_v3, %v8733_v33  ;;  %v8736_v44 = vmul.f32 %v14408_v10, %v14408_v10  ;;  %v8741_v1 = vmul.f32 %v14413_v9, %v14413_v9 }
 0x81a   :  { %v14422_v40 = vadd.f32 %v8559_v27, %v8463_v54  ;;  %11491 = vmatpush3.bf16.msra.mxu1 %v11490_v13  ;;  %v8730_v54 = vmul.f32 %v14372_v60, %v14372_v60  ;;  %v8739_v34 = vmul.f32 %v14418_v57, %v14418_v57 }
 0x81b   :  { %11492 = vmatprep.subr.bf16.mxu1 %v12026_v23  ;;  %v11496_v2 = vpack.c.bf16 %v14420_v31, %v14413_v9  ;;  %v11535_v4 = vpack.c.bf16 %v8736_v44, %v8735_v15  ;;  %v8742_v56 = vmul.f32 %v14420_v31, %v14420_v31 }
 0x81c   :  { %v11493_v7 = vpack.c.bf16 %v14422_v40, %v14418_v57  ;;  %v11526_v29 = vpack.c.bf16 %v8730_v54, %v8729_v16  ;;  %v8740_v8 = vmul.f32 %v14422_v40, %v14422_v40 }
 0x81d   :  { %v11544_v49 = vpack.c.bf16 %v8742_v56, %v8741_v1 }
 0x81e   :  { %11494 = vmatpush3.bf16.msra.mxu1 %v11493_v7  ;;  %v11541_v52 = vpack.c.bf16 %v8740_v8, %v8739_v34 }
 0x81f   :  { %11495 = vmatprep.subr.bf16.mxu1 %v12026_v23 }
 0x822   :  { %11497 = vmatpush3.bf16.msra.mxu1 %v11496_v2  ;;  %v8888_v2 = vld [vmem:[%s14562_s10] sm:$0x1] }
 0x823   :  { %11522 = vmatprep.subr.bf16.mxu1 %v12026_v23 }
 0x825   :  { %11239 = vmatmul.mubr.f32.vlgmr.msra.gmra.mrb[68].mxu1 %v12028_v55 }
 0x826   :  { %11524 = vmatpush3.bf16.msra.mxu1 %v11523_v0  ;;  %11308 = vmatprep.mubr.msk.f32.mxu1 %vm12027_vm0, %v11946_v48  ;;  %v8892_v0 = vld [vmem:[%s14563_s11] sm:$0x1] }
 0x827   :  { %11525 = vmatprep.subr.bf16.mxu1 %v12026_v23 }
 0x82a   :  { %11527 = vmatpush3.bf16.msra.mxu1 %v11526_v29 }
 0x82b   :  { %11528 = vmatprep.subr.bf16.mxu1 %v12026_v23 }
 0x82e   :  { %11530 = vmatpush3.bf16.msra.mxu1 %v11529_v6 }
 0x82f   :  { %11531 = vmatprep.subr.bf16.mxu1 %v12026_v23 }
 0x832   :  { %11533 = vmatpush3.bf16.msra.mxu1 %v11532_v37 }
 0x833   :  { %11534 = vmatprep.subr.bf16.mxu1 %v12026_v23 }
 0x836   :  { %11536 = vmatpush3.bf16.msra.mxu1 %v11535_v4 }
 0x837   :  { %11537 = vmatprep.subr.bf16.mxu1 %v12026_v23 }
 0x83a   :  { %11539 = vmatpush3.bf16.msra.mxu1 %v11538_v30 }
 0x83b   :  { %11540 = vmatprep.subr.bf16.mxu1 %v12026_v23 }
 0x83e   :  { %11542 = vmatpush3.bf16.msra.mxu1 %v11541_v52 }
 0x83f   :  { %11543 = vmatprep.subr.bf16.mxu1 %v12026_v23 }
 0x842   :  { %11545 = vmatpush3.bf16.msra.mxu1 %v11544_v49 }
 0x845   :  { %11309 = vmatmul.mubr.f32.vlgmr.msra.gmra.mrb[70].mxu1 %v12028_v55 }
 0x8f8   :  { %v8637_v26 = vpop.f32.mrb[68].mxu1 }
 0x8f9   :  { %11274 = vmatmul.mubr.f32.vlgmr.msra.gmra.mrb[100].mxu0 %v8637_v26  ;;  %v11240_v42 = vpop.f32.mrb[69].mxu1 }
 0x8fa   :  { %11548 = vmatpush3.bf16.msra.mxu0 %v14264_v63  ;;  %11343 = vmatprep.mubr.msk.f32.mxu0 %vm12027_vm0, %v11946_v48 }
 0x8fb   :  { %11549 = vmatprep.subr.bf16.mxu0 %v12026_v23 }
 0x8fe   :  { %11551 = vmatpush3.bf16.msra.mxu0 %v14270_v12  ;;  %v11929_v12 = vld [vmem:[%s14564_s12] sm:$0xff]  }
 0x8ff   :  { %11552 = vmatprep.subr.bf16.mxu0 %v12026_v23  ;;  %11346 = vmatprep.subr.bf16.mxu1 %v11929_v12 }
 0x900   :  { %11347 = vmatpush3.bf16.msra.mxu1 %v11929_v12 }
 0x902   :  { %11554 = vmatpush3.bf16.msra.mxu0 %v14284_v19  ;;  %v11930_v19 = vld [vmem:[%s14564_s12 + $0x8] sm:$0xff]  }
 0x903   :  { %11555 = vmatprep.subr.bf16.mxu0 %v12026_v23  ;;  %11348 = vmatprep.subr.bf16.mxu1 %v11930_v19 }
 0x904   :  { %11349 = vmatpush3.bf16.msra.mxu1 %v11930_v19 }
 0x906   :  { %11557 = vmatpush3.bf16.msra.mxu0 %v14296_v51  ;;  %v11932_v51 = vld [vmem:[%s14564_s12 + $0x18] sm:$0xff]  }
 0x907   :  { %11558 = vmatprep.subr.bf16.mxu0 %v12026_v23 }
 0x90a   :  { %11560 = vmatpush3.bf16.msra.mxu0 %v14310_v28  ;;  %v11933_v28 = vld [vmem:[%s14564_s12 + $0x20] sm:$0xff]  }
 0x90b   :  { %11561 = vmatprep.subr.bf16.mxu0 %v12026_v23 }
 0x90e   :  { %11563 = vmatpush3.bf16.msra.mxu0 %v14322_v18  ;;  %v11934_v18 = vld [vmem:[%s14564_s12 + $0x28] sm:$0xff]  }
 0x90f   :  { %11564 = vmatprep.subr.bf16.mxu0 %v12026_v23 }
 0x912   :  { %11566 = vmatpush3.bf16.msra.mxu0 %v14336_v24  ;;  %v11935_v24 = vld [vmem:[%s14564_s12 + $0x30] sm:$0xff]  }
 0x913   :  { %11567 = vmatprep.subr.bf16.mxu0 %v12026_v23  ;;  %v11931_v23 = vld [vmem:[%s14564_s12 + $0x10] sm:$0xff]  }
 0x914   :  { %11350 = vmatprep.subr.bf16.mxu1 %v11931_v23 }
 0x915   :  { %11351 = vmatpush3.bf16.msra.mxu1 %v11931_v23 }
 0x916   :  { %11569 = vmatpush3.bf16.msra.mxu0 %v14348_v50  ;;  %11352 = vmatprep.subr.bf16.mxu1 %v11932_v51  ;;  %v11936_v50 = vld [vmem:[%s14564_s12 + $0x38] sm:$0xff]  }
 0x918   :  { %v8809_v55 = vpop.f32.mrb[70].mxu1 }
 0x919   :  { %11344 = vmatmul.mubr.f32.vlgmr.msra.gmra.mrb[102].mxu0 %v8809_v55  ;;  %v11310_v63 = vpop.f32.mrb[71].mxu1  ;;  %11353 = vmatpush3.bf16.msra.mxu1 %v11932_v51 }
 0x91a   :  { %11354 = vmatprep.subr.bf16.mxu1 %v11933_v28 }
 0x91d   :  { %11355 = vmatpush3.bf16.msra.mxu1 %v11933_v28 }
 0x91e   :  { %11356 = vmatprep.subr.bf16.mxu1 %v11934_v18 }
 0x921   :  { %11357 = vmatpush3.bf16.msra.mxu1 %v11934_v18 }
 0x922   :  { %11358 = vmatprep.subr.bf16.mxu1 %v11935_v24 }
 0x925   :  { %11359 = vmatpush3.bf16.msra.mxu1 %v11935_v24 }
 0x926   :  { %11360 = vmatprep.subr.bf16.mxu1 %v11936_v50 }
 0x929   :  { %11361 = vmatpush3.bf16.msra.mxu1 %v11936_v50 }
 0x9cc   :  { %v8723_v46 = vpop.f32.mrb[100].mxu0 }
 0x9cd   :  { %v11275_v32 = vpop.f32.mrb[101].mxu0  ;;  %v8883_v21 = vmul.f32 0.0009765625, %v8723_v46 }
 0x9cf   :  { %v8885_v11 = vmul.f32 %v8883_v21, %v8883_v21 }
 0x9ec   :  { %v8879_v35 = vpop.f32.mrb[102].mxu0 }
 0x9ed   :  { %v8884_v13 = vmul.f32 0.0009765625, %v8879_v35  ;;  %v11345_v25 = vpop.f32.mrb[103].mxu0 }
 0x9ef   :  { %v8886_v27 = vsub.f32 %v8884_v13, %v8885_v11 }
 0x9f1   :  { %v8887_v7 = vmax.f32 %v8886_v27, 0.0 }
 0x9f3   :  { %v8889_v38 = vadd.f32 1e-05, %v8887_v7 }
 0x9f5   :  { %11939 = vrsqrt.f32 %v8889_v38 }
 0x9ff   :  { %v11940_v39 = vpop.eup %11939 }
 0xa00   :  { %v8891_v54 = vmul.f32 %v11940_v39, %v8888_v2 }
 0xa02   :  { %v8893_v16 = vmul.f32 %v8891_v54, %v8883_v21  ;;  %v8899_v48 = vrot.slane %v8891_v54, %v14668_v17 }
 0xa04   :  { %v8894_v29 = vsub.f32 %v8892_v0, %v8893_v16  ;;  %v8901_v59 = vmul.f32 %v8899_v48, %v14369_v62  ;;  %v8902_v61 = vmul.f32 %v8899_v48, %v14375_v43  ;;  %v8903_v3 = vmul.f32 %v8899_v48, %v14366_v22 }
 0xa05   :  { %v8904_v6 = vmul.f32 %v8899_v48, %v14372_v60  ;;  %v8905_v33 = vmul.f32 %v8899_v48, %v14386_v20  ;;  %v8906_v37 = vmul.f32 %v8899_v48, %v14392_v41  ;;  %v8907_v44 = vmul.f32 %v8899_v48, %v14380_v36 }
 0xa06   :  { %v8921_v15 = vrot.slane %v8894_v29, %v14668_v17  ;;  %v8908_v5 = vmul.f32 %v8899_v48, %v14389_v47  ;;  %v8909_v4 = vmul.f32 %v8899_v48, %v14403_v14  ;;  %v8910_v62 = vmul.f32 %v8899_v48, %v14408_v10 }
 0xa07   :  { %v8911_v43 = vmul.f32 %v8899_v48, %v14397_v58  ;;  %v8912_v22 = vmul.f32 %v8899_v48, %v14405_v53  ;;  %v8913_v60 = vmul.f32 %v8899_v48, %v14418_v57  ;;  %v8914_v20 = vmul.f32 %v8899_v48, %v14422_v40 }
 0xa08   :  { %v8923_v45 = vadd.f32 %v8921_v15, %v8901_v59  ;;  %v8924_v41 = vadd.f32 %v8921_v15, %v8902_v61  ;;  %v8925_v30 = vadd.f32 %v8921_v15, %v8903_v3  ;;  %v8926_v36 = vadd.f32 %v8921_v15, %v8904_v6 }
 0xa09   :  { %v8927_v8 = vadd.f32 %v8921_v15, %v8905_v33  ;;  %v8928_v17 = vadd.f32 %v8921_v15, %v8906_v37  ;;  %v8929_v34 = vadd.f32 %v8921_v15, %v8907_v44  ;;  %v8930_v47 = vadd.f32 %v8921_v15, %v8908_v5 }
 0xa0a   :  { %v8939_v56 = vmax.f32 %v8923_v45, 0.0  ;;  %v8940_v14 = vmax.f32 %v8924_v41, 0.0  ;;  %v8941_v52 = vmax.f32 %v8925_v30, 0.0  ;;  %v8942_v10 = vmax.f32 %v8926_v36, 0.0 }
 0xa0b   :  { %v8943_v1 = vmax.f32 %v8927_v8, 0.0  ;;  %v8944_v58 = vmax.f32 %v8928_v17, 0.0  ;;  %v8945_v49 = vmax.f32 %v8929_v34, 0.0  ;;  %v8946_v53 = vmax.f32 %v8930_v47, 0.0 }
 0xa0c   :  { %v8955_v26 = vpack.c.bf16 %v8940_v14, %v8939_v56  ;;  %v8956_v57 = vpack.c.bf16 %v8942_v10, %v8941_v52  ;;  %v8931_v42 = vadd.f32 %v8921_v15, %v8909_v4  ;;  %v8932_v40 = vadd.f32 %v8921_v15, %v8910_v62 }
 0xa0d   :  { %v8957_v55 = vpack.c.bf16 %v8944_v58, %v8943_v1  ;;  %v8958_v63 = vpack.c.bf16 %v8946_v53, %v8945_v49  ;;  %v8933_v12 = vadd.f32 %v8921_v15, %v8911_v43  ;;  %v8934_v19 = vadd.f32 %v8921_v15, %v8912_v22 }
 0xa0e   :  { %11362 = vmatprep.mubr.bf16.mxu1 %v8955_v26  ;;  %v8947_v23 = vmax.f32 %v8931_v42, 0.0  ;;  %v8948_v51 = vmax.f32 %v8932_v40, 0.0  ;;  %v8935_v28 = vadd.f32 %v8921_v15, %v8913_v60  ;;  %v8936_v18 = vadd.f32 %v8921_v15, %v8914_v20 }
 0xa0f   :  { %11363 = vmatmul.mubr.bf16.vlgmr.msra.gmra.mrb[72].mxu1 %v8956_v57  ;;  %v8949_v24 = vmax.f32 %v8933_v12, 0.0  ;;  %v8950_v50 = vmax.f32 %v8934_v19, 0.0  ;;  %v8915_v46 = vmul.f32 %v8899_v48, %v14413_v9  ;;  %v8916_v32 = vmul.f32 %v8899_v48, %v14420_v31  ;;  %v9553_v9 = vld [vmem:[%s14565_s13] ss:$0 sm:$0xff]  ;;  %s12029_s13 = smov [#allocation12]  }
 0xa10   :  { %11366 = vmatprep.mubr.bf16.mxu1 %v8957_v55  ;;  %v8959_v21 = vpack.c.bf16 %v8948_v51, %v8947_v23  ;;  %v8951_v35 = vmax.f32 %v8935_v28, 0.0  ;;  %v8952_v11 = vmax.f32 %v8936_v18, 0.0  ;;  %s9152_s9 = sshll.u32 %s12029_s13, 4  ;;  %s9153_s9 = int_to_ptr.vmem [resolvable:$true] %s9152_s9 }
 0xa11   :  { %v8960_v13 = vpack.c.bf16 %v8950_v50, %v8949_v24  ;;  %v8937_v25 = vadd.f32 %v8921_v15, %v8915_v46  ;;  %v8938_v27 = vadd.f32 %v8921_v15, %v8916_v32  ;;  %s11991_s29 = scalar_lea.vmem %s9153_s9, 2048  ;;  %p11996_p3 = scmp.lt.s32.totalorder %s9153_s9, %s9153_s9 }
 0xa12   :  { %v8961_v7 = vpack.c.bf16 %v8952_v11, %v8951_v35  ;;  %p11992_p2 = scmp.ne.s32.totalorder %s9153_s9, %s11991_s29  ;;  %p11997_p4 = scmp.lt.s32.totalorder %s11991_s29, %s11991_s29 }
 0xa13   :  { %v8953_v38 = vmax.f32 %v8937_v25, 0.0  ;;  %v8954_v2 = vmax.f32 %v8938_v27, 0.0 }
 0xa14   :  { %p11998_p5 = por %p11997_p4, %p11996_p3 }
 0xa15   :  { %v8962_v39 = vpack.c.bf16 %v8954_v2, %v8953_v38 }
 0xa16   :  { %p11999_p6 = pnand %p11998_p5, %p11992_p2 }
 0xa17   :  { %11367 = vmatmul.mubr.bf16.gmra.mrb[76].mxu1 %v8958_v63 }
 0xa18   :  { %11370 = vmatprep.mubr.bf16.mxu1 %v8959_v21 }
 0xa1f   :  { %11371 = vmatmul.mubr.bf16.gmra.mrb[80].mxu1 %v8960_v13 }
 0xa20   :  { %11374 = vmatprep.mubr.bf16.mxu1 %v8961_v7 }
 0xa27   :  { %11375 = vmatmul.mubr.bf16.gmra.mrb[84].mxu1 %v8962_v39 }
 0xae2   :  { %v11364_v31 = vpop.f32.mrb[72].mxu1 }
 0xae3   :  { %v9077_v54 = vadd.f32 %v11364_v31, %v9553_v9  ;;  %v9068_v0 = vpop.f32.mrb[73].mxu1 }
 0xae4   :  { %v9069_v16 = vadd.f32 %v9553_v9, %v9068_v0  ;;  %v11365_v48 = vpop.f32.mrb[74].mxu1 }
 0xae5   :  { %9133 = vst [vmem:[#allocation12 + $0x10] sm:$0xff] %v9077_v54  ;;  %v9080_v29 = vadd.f32 %v11365_v48, %v9553_v9  ;;  %v9071_v59 = vpop.f32.mrb[75].mxu1 }
 0xae6   :  { %9131 = vst [vmem:[#allocation12] sm:$0xff] %v9069_v16  ;;  %v9072_v61 = vadd.f32 %v9553_v9, %v9071_v59 }
 0xae7   :  { %9134 = vst [vmem:[#allocation12 + $0x18] sm:$0xff] %v9080_v29 }
 0xae8   :  { %9132 = vst [vmem:[#allocation12 + $0x8] sm:$0xff] %v9072_v61 }
 0xaea   :  { %v11368_v3 = vpop.f32.mrb[76].mxu1 }
 0xaeb   :  { %v9093_v6 = vadd.f32 %v11368_v3, %v9553_v9  ;;  %v9084_v33 = vpop.f32.mrb[77].mxu1 }
 0xaec   :  { %v9085_v37 = vadd.f32 %v9553_v9, %v9084_v33  ;;  %v11369_v44 = vpop.f32.mrb[78].mxu1 }
 0xaed   :  { %9137 = vst [vmem:[#allocation12 + $0x30] sm:$0xff] %v9093_v6  ;;  %v9096_v15 = vadd.f32 %v11369_v44, %v9553_v9  ;;  %v9087_v5 = vpop.f32.mrb[79].mxu1 }
 0xaee   :  { %9135 = vst [vmem:[#allocation12 + $0x20] sm:$0xff] %v9085_v37  ;;  %v9088_v4 = vadd.f32 %v9553_v9, %v9087_v5 }
 0xaef   :  { %9138 = vst [vmem:[#allocation12 + $0x38] sm:$0xff] %v9096_v15 }
 0xaf0   :  { %9136 = vst [vmem:[#allocation12 + $0x28] sm:$0xff] %v9088_v4 }
 0xaf2   :  { %v11372_v62 = vpop.f32.mrb[80].mxu1 }
 0xaf3   :  { %v9109_v43 = vadd.f32 %v11372_v62, %v9553_v9  ;;  %v9100_v22 = vpop.f32.mrb[81].mxu1 }
 0xaf4   :  { %v9101_v60 = vadd.f32 %v9553_v9, %v9100_v22  ;;  %v11373_v20 = vpop.f32.mrb[82].mxu1 }
 0xaf5   :  { %9141 = vst [vmem:[#allocation12 + $0x50] sm:$0xff] %v9109_v43  ;;  %v9112_v45 = vadd.f32 %v11373_v20, %v9553_v9  ;;  %v9103_v41 = vpop.f32.mrb[83].mxu1 }
 0xaf6   :  { %9139 = vst [vmem:[#allocation12 + $0x40] sm:$0xff] %v9101_v60  ;;  %v9104_v30 = vadd.f32 %v9553_v9, %v9103_v41 }
 0xaf7   :  { %9142 = vst [vmem:[#allocation12 + $0x58] sm:$0xff] %v9112_v45 }
 0xaf8   :  { %9140 = vst [vmem:[#allocation12 + $0x48] sm:$0xff] %v9104_v30 }
 0xafa   :  { %v11376_v36 = vpop.f32.mrb[84].mxu1 }
 0xafb   :  { %v9125_v8 = vadd.f32 %v11376_v36, %v9553_v9  ;;  %v9116_v17 = vpop.f32.mrb[85].mxu1 }
 0xafc   :  { %v9117_v34 = vadd.f32 %v9553_v9, %v9116_v17  ;;  %v11377_v47 = vpop.f32.mrb[86].mxu1 }
 0xafd   :  { %9145 = vst [vmem:[#allocation12 + $0x70] sm:$0xff] %v9125_v8  ;;  %v9128_v56 = vadd.f32 %v11377_v47, %v9553_v9  ;;  %v9119_v14 = vpop.f32.mrb[87].mxu1 }
 0xafe   :  { %9143 = vst [vmem:[#allocation12 + $0x60] sm:$0xff] %v9117_v34  ;;  %v9120_v52 = vadd.f32 %v9553_v9, %v9119_v14 }
 0xaff   :  { %9146 = vst [vmem:[#allocation12 + $0x78] sm:$0xff] %v9128_v56 }
 0xb00   :  { %9144 = vst [vmem:[#allocation12 + $0x68] sm:$0xff] %v9120_v52 }
 0xb01   :  { %12002 = shalt.err (!%p11999_p6)
}
 0xb02   :  { %s12003_s17 = scalar_lea.hbm %s14566_s14, 2048 }
 0xb03   :  { %p12004_p7 = scmp.ne.s32.totalorder %s14566_s14, %s12003_s17  ;;  %p12007_p8 = scmp.lt.u32.totalorder %s12003_s17, %s14566_s14 }
 0xb05   :  { %p12009_p9 = pnand %p12007_p8, %p12004_p7 }
 0xb07   :  { %12012 = shalt.err (!%p12009_p9)
}
 0xb08   :  { %s12030_s23 = smov 128   ;;  %s12031_s5 = smov 8  }
 0xb09   :  { %9158 = dma.vmem_to_hbm [thread:$0]  %s9153_s9, 2048, %s14566_s14, [#allocation9], %s12030_s23, %s12030_s23, %s12031_s5  }
 0xb0a   :  { %12017 = dma.done.wait [#allocation9], 2048  }
 0xb0b   :  { %12018 = vsyncadd [#allocation9], 4294965248 }
 0xb0c   :  { %9162 = vsyncpa [#allocation8], 1 }
 0xb0d   :  { %9163 = vsyncpa [#allocation11], 1 }
 0xb0e   :  { %9164 = vsyncpa [#allocation9], 1 }

</bundles_post_ra>
